<compile_context>
chip_gen: v7x
topology: tpu7x:2x2x1
jax: 0.10.0
libtpu: 0.0.40
codegen_flags: <defaults>
</compile_context>

<pallas_src>
import math
from functools import partial

import jax
import jax.numpy as jnp
from jax.experimental import pallas as pl
from jax.experimental.pallas import tpu as pltpu


def _round_up(v, m):
    return ((v + m - 1) // m) * m


# ----------------------------------------------------------------------------
# Pallas kernels
# ----------------------------------------------------------------------------
def _matmul_bias_act_kernel(x_ref, w_ref, b_ref, o_ref, *, apply_relu):
    """One (tm, K) x (K, N) tile: y = x @ w + b (+ ReLU), f32 accumulate."""
    acc = jnp.dot(x_ref[...], w_ref[...], preferred_element_type=jnp.float32)
    acc = acc + b_ref[...]                       # (1, N) broadcast over rows
    if apply_relu:
        acc = jnp.maximum(acc, 0.0)
    o_ref[...] = acc.astype(o_ref.dtype)


def fused_matmul(x, w, b, *, relu, tm=512, out_dtype=jnp.float32):
    """y = x @ w + b (optionally ReLU).  x:(M,K), w:(K,N), b:(1,N).

    No padding or slicing: the weight/bias blocks span the full K / N dims
    (block dims equal array dims), and M is tiled with a cdiv grid (OOB rows
    of the last block are masked on store)."""
    M, K = x.shape
    Kw, N = w.shape
    assert K == Kw and b.shape == (1, N)
    tm = min(tm, _round_up(M, 8))
    return pl.pallas_call(
        partial(_matmul_bias_act_kernel, apply_relu=relu),
        out_shape=jax.ShapeDtypeStruct((M, N), out_dtype),
        grid=(pl.cdiv(M, tm),),
        in_specs=[
            pl.BlockSpec((tm, K), lambda i: (i, 0)),
            pl.BlockSpec((K, N), lambda i: (0, 0)),    # weight resident
            pl.BlockSpec((1, N), lambda i: (0, 0)),    # bias resident
        ],
        out_specs=pl.BlockSpec((tm, N), lambda i: (i, 0)),
        compiler_params=pltpu.CompilerParams(
            dimension_semantics=("parallel",)),
    )(x, w, b)


def _tail_kernel(se_ref, pf_ref, avgp_ref, w1_ref, b1_ref, w2_ref, b2_ref,
                 wvs_ref, wvp_ref, bv_ref, o_ref):
    """Fused tail: product MLP, per-set means, value head.
    Tiny tensors; everything resident in VMEM; one dispatch."""
    # stock summary: mean over the num_stocks axis
    stock_summary = jnp.mean(se_ref[...], axis=1)                  # (B, 128)

    # product encoder fc1: K=3 is too small for the MXU -> VPU broadcast form
    pf = pf_ref[...]                                               # (B*P, 3)
    w1 = w1_ref[...]                                               # (3, 64)
    h = (pf[:, 0:1] * w1[0:1, :] + pf[:, 1:2] * w1[1:2, :]
         + pf[:, 2:3] * w1[2:3, :] + b1_ref[...])
    h = jnp.maximum(h, 0.0)                                        # (B*P, 64)
    e = jnp.dot(h, w2_ref[...], preferred_element_type=jnp.float32)
    e = jnp.maximum(e + b2_ref[...], 0.0)                          # (B*P, 32)
    # mean over products == block-diagonal averaging matmul
    prod_summary = jnp.dot(avgp_ref[...], e,
                           preferred_element_type=jnp.float32)     # (B, 32)

    # value head on concat([stock, prod]) == split dot -> lane reductions
    v = (jnp.sum(stock_summary * wvs_ref[...], axis=-1, keepdims=True)
         + jnp.sum(prod_summary * wvp_ref[...], axis=-1, keepdims=True)
         + bv_ref[...])
    o_ref[...] = v


def tail_value_head(stock_embeds, prod_feats_2d, avg_p, params):
    B = stock_embeds.shape[0]
    return pl.pallas_call(
        _tail_kernel,
        out_shape=jax.ShapeDtypeStruct((B, 1), jnp.float32),
    )(stock_embeds, prod_feats_2d, avg_p,
      params["p1_w"], params["p1_b"], params["p2_w"], params["p2_b"],
      params["vh_ws"], params["vh_wp"], params["vh_b"])


# ----------------------------------------------------------------------------
# Conv2d(+ReLU): NHWC im2col gather (no transposes) + Pallas fused matmul
# ----------------------------------------------------------------------------
def _im2col_nhwc(x, k, s):
    """x: (N, H, W, C) -> patches (N*OH*OW, k*k*C), K ordered (kh, kw, c)."""
    N, H, W, C = x.shape
    OH = (H - k) // s + 1
    OW = (W - k) // s + 1
    cols = [x[:, kh:kh + s * (OH - 1) + 1:s, kw:kw + s * (OW - 1) + 1:s, :]
            for kh in range(k) for kw in range(k)]        # each (N, OH, OW, C)
    p = jnp.stack(cols, axis=3)                           # (N, OH, OW, k*k, C)
    return p.reshape(N * OH * OW, k * k * C), OH, OW


def conv2d_relu(x, w_mat, b_row, *, k, s, tm=512):
    """x: NHWC bf16, w_mat: (k*k*Cin, Cout) bf16, b_row: (1, Cout) f32."""
    N = x.shape[0]
    patches, OH, OW = _im2col_nhwc(x, k, s)
    y = fused_matmul(patches, w_mat, b_row, relu=True, tm=tm,
                     out_dtype=jnp.bfloat16)
    return y.reshape(N, OH, OW, -1)                       # stays NHWC


# ----------------------------------------------------------------------------
# Deterministic parameter init (PyTorch-default-style uniform, fixed seed).
# Weights are stored pre-transposed / pre-reshaped for the kernels.
# ----------------------------------------------------------------------------
def _uniform(key, shape, bound):
    return jax.random.uniform(key, shape, jnp.float32, -bound, bound)


def _init_conv(key, cout, cin, k):
    kw_, kb_ = jax.random.split(key)
    fan_in = cin * k * k
    bound = 1.0 / math.sqrt(fan_in)
    w = _uniform(kw_, (cout, cin, k, k), bound)           # PyTorch layout
    # pre-reshape once to the ((kh, kw, cin), cout) matmul layout, bf16
    w_mat = jnp.transpose(w, (2, 3, 1, 0)).reshape(k * k * cin, cout)
    b = _uniform(kb_, (1, cout), bound)
    return w_mat.astype(jnp.bfloat16), b


def _init_linear(key, fan_in, fan_out, dtype=jnp.float32):
    kw_, kb_ = jax.random.split(key)
    bound = 1.0 / math.sqrt(fan_in)
    w = _uniform(kw_, (fan_in, fan_out), bound).astype(dtype)   # stored (K, N)
    b = _uniform(kb_, (1, fan_out), bound)
    return w, b


def init_critic_params(key):
    ks = jax.random.split(key, 7)
    c1w, c1b = _init_conv(ks[0], 32, 1, 8)
    c2w, c2b = _init_conv(ks[1], 64, 32, 4)
    c3w, c3b = _init_conv(ks[2], 64, 64, 3)
    # NOTE: stock_fc weight corresponds to NHWC-flattened (H, W, C) conv
    # features; to port PyTorch (C, H, W)-flattened weights, permute columns.
    fcw, fcb = _init_linear(ks[3], 64 * 9 * 9, 128, jnp.bfloat16)
    p1w, p1b = _init_linear(ks[4], 3, 64)
    p2w, p2b = _init_linear(ks[5], 64, 32)
    vw, vb = _init_linear(ks[6], 160, 1)                  # (160, 1), (1, 1)
    return {
        "conv1_w": c1w, "conv1_b": c1b,
        "conv2_w": c2w, "conv2_b": c2b,
        "conv3_w": c3w, "conv3_b": c3b,
        "fc_w": fcw, "fc_b": fcb,
        "p1_w": p1w, "p1_b": p1b,
        "p2_w": p2w, "p2_b": p2b,
        "vh_ws": vw[:128, 0].reshape(1, 128),             # value head, split
        "vh_wp": vw[128:, 0].reshape(1, 32),
        "vh_b": vb,
    }


# ----------------------------------------------------------------------------
# CriticNetwork forward
# ----------------------------------------------------------------------------
@partial(jax.jit, static_argnames=("num_stocks", "num_products"))
def critic_forward(params, stock_images, product_features,
                   num_stocks, num_products):
    B = stock_images.shape[0]
    H, W = stock_images.shape[2], stock_images.shape[3]
    BN = B * num_stocks

    # ---- stock encoder (CNN, NHWC, bf16 activations) ----
    x = stock_images.reshape(BN, H, W, 1).astype(jnp.bfloat16)
    x = conv2d_relu(x, params["conv1_w"], params["conv1_b"], k=8, s=4)  # (BN,24,24,32)
    x = conv2d_relu(x, params["conv2_w"], params["conv2_b"], k=4, s=2)  # (BN,11,11,64)
    x = conv2d_relu(x, params["conv3_w"], params["conv3_b"], k=3, s=1)  # (BN, 9, 9,64)
    x = x.reshape(BN, -1)                                               # (BN, 5184)
    stock_embeds = fused_matmul(x, params["fc_w"], params["fc_b"],
                                relu=True, tm=256,       # v7x-friendly tile
                                out_dtype=jnp.float32)                  # (BN, 128)
    stock_embeds = stock_embeds.reshape(B, num_stocks, 128)

    # ---- fused tail: product MLP + per-set means + value head ----
    pf2 = product_features.reshape(B * num_products, 3).astype(jnp.float32)
    avg_p = jnp.kron(jnp.eye(B, dtype=jnp.float32),
                     jnp.full((1, num_products), 1.0 / num_products,
                              jnp.float32))                             # (B, B*P)
    value = tail_value_head(stock_embeds, pf2, avg_p, params)           # (B, 1)
    return value[:, 0]                                                  # (B,)


# ----------------------------------------------------------------------------
if __name__ == "__main__":
    B = 2
    NUM_STOCKS = 3      # small instead of 100 (module is parameterized)
    NUM_PRODUCTS = 4    # small instead of 20
    # 100x100 spatial is hard-wired by the module's view() and fc(64*9*9).

    key = jax.random.PRNGKey(0)
    k_params, k_stock, k_prod = jax.random.split(key, 3)

    params = init_critic_params(k_params)
    stock_images = jax.random.normal(
        k_stock, (B, NUM_STOCKS, 100, 100), jnp.float32)
    product_features = jax.random.normal(
        k_prod, (B, NUM_PRODUCTS, 3), jnp.float32)

    value = critic_forward(params, stock_images, product_features,
                           num_stocks=NUM_STOCKS, num_products=NUM_PRODUCTS)
    value = jax.block_until_ready(value)
    assert value.shape == (B,) and value.dtype == jnp.float32
    print("KERNEL_OK")
</pallas_src>

<mosaic_0001>
module attributes {stable_mosaic.version = 11 : i64} {
  func.func @_matmul_bias_act_kernel(%arg0: i32, %arg1: memref<512x64xbf16, #tpu.memory_space<vmem>>, %arg2: memref<64x32xbf16, #tpu.memory_space<vmem>>, %arg3: memref<1x32xf32, #tpu.memory_space<vmem>>, %arg4: memref<512x32xbf16, #tpu.memory_space<vmem>>) attributes {dimension_semantics = [#tpu.dimension_semantics<parallel>], iteration_bounds = array<i64: 7>, scalar_prefetch = 0 : i64, scratch_operands = 0 : i64, tpu.core_type = #tpu.core_type<tc>, window_params = [{transform_indices = @transform_0, window_bounds = array<i64: 512, 64>}, {pipeline_mode = #tpu.pipeline_mode<synchronous>, transform_indices = @transform_1, window_bounds = array<i64: 64, 32>}, {pipeline_mode = #tpu.pipeline_mode<synchronous>, transform_indices = @transform_2, window_bounds = array<i64: 1, 32>}, {transform_indices = @transform_3, window_bounds = array<i64: 512, 32>}]} {
    %c0 = arith.constant 0 : index
    %c0_0 = arith.constant 0 : index
    %0 = vector.load %arg1[%c0, %c0_0] : memref<512x64xbf16, #tpu.memory_space<vmem>>, vector<512x64xbf16>
    %c0_1 = arith.constant 0 : index
    %c0_2 = arith.constant 0 : index
    %1 = vector.load %arg2[%c0_1, %c0_2] : memref<64x32xbf16, #tpu.memory_space<vmem>>, vector<64x32xbf16>
    %cst = arith.constant dense<0.000000e+00> : vector<512x32xf32>
    %2 = tpu.matmul %0, %1, %cst {dimension_numbers = #tpu.dot_dimension_numbers<[1], [0], [0], [1], [0, 0, 1, 1], [], []>} : vector<512x64xbf16>, vector<64x32xbf16>, vector<512x32xf32> -> vector<512x32xf32>
    %c0_3 = arith.constant 0 : index
    %c0_4 = arith.constant 0 : index
    %3 = vector.load %arg3[%c0_3, %c0_4] : memref<1x32xf32, #tpu.memory_space<vmem>>, vector<1x32xf32>
    %4 = vector.broadcast %3 : vector<1x32xf32> to vector<512x32xf32>
    %5 = arith.addf %2, %4 : vector<512x32xf32>
    %cst_5 = arith.constant 0.000000e+00 : f32
    %6 = vector.broadcast %cst_5 : f32 to vector<512x32xf32>
    %7 = arith.maximumf %5, %6 : vector<512x32xf32>
    %8 = arith.truncf %7 : vector<512x32xf32> to vector<512x32xbf16>
    %c0_6 = arith.constant 0 : index
    %c0_7 = arith.constant 0 : index
    %9 = vector.load %arg4[%c0_6, %c0_7] : memref<512x32xbf16, #tpu.memory_space<vmem>>, vector<512x32xbf16>
    tpu.vector_store %arg4[%c0_6, %c0_7], %8 {strides = array<i32>} : memref<512x32xbf16, #tpu.memory_space<vmem>>, vector<512x32xbf16>,
    return
  }
  func.func @transform_0(%arg0: i32) -> (i32, i32) {
    %c0_i32 = arith.constant 0 : i32
    %c0_i32_0 = arith.constant 0 : i32
    return %arg0, %c0_i32 : i32, i32
  }
  func.func @transform_1(%arg0: i32) -> (i32, i32) {
    %c0_i32 = arith.constant 0 : i32
    %c0_i32_0 = arith.constant 0 : i32
    %c0_i32_1 = arith.constant 0 : i32
    return %c0_i32, %c0_i32_0 : i32, i32
  }
  func.func @transform_2(%arg0: i32) -> (i32, i32) {
    %c0_i32 = arith.constant 0 : i32
    %c0_i32_0 = arith.constant 0 : i32
    %c0_i32_1 = arith.constant 0 : i32
    return %c0_i32, %c0_i32_0 : i32, i32
  }
  func.func @transform_3(%arg0: i32) -> (i32, i32) {
    %c0_i32 = arith.constant 0 : i32
    %c0_i32_0 = arith.constant 0 : i32
    return %arg0, %c0_i32 : i32, i32
  }
}

module attributes {stable_mosaic.version = 11 : i64} {
  func.func @_matmul_bias_act_kernel(%arg0: i32, %arg1: memref<512x512xbf16, #tpu.memory_space<vmem>>, %arg2: memref<512x64xbf16, #tpu.memory_space<vmem>>, %arg3: memref<1x64xf32, #tpu.memory_space<vmem>>, %arg4: memref<512x64xbf16, #tpu.memory_space<vmem>>) attributes {dimension_semantics = [#tpu.dimension_semantics<parallel>], iteration_bounds = array<i64: 2>, scalar_prefetch = 0 : i64, scratch_operands = 0 : i64, tpu.core_type = #tpu.core_type<tc>, window_params = [{transform_indices = @transform_0, window_bounds = array<i64: 512, 512>}, {pipeline_mode = #tpu.pipeline_mode<synchronous>, transform_indices = @transform_1, window_bounds = array<i64: 512, 64>}, {pipeline_mode = #tpu.pipeline_mode<synchronous>, transform_indices = @transform_2, window_bounds = array<i64: 1, 64>}, {transform_indices = @transform_3, window_bounds = array<i64: 512, 64>}]} {
    %c0 = arith.constant 0 : index
    %c0_0 = arith.constant 0 : index
    %0 = vector.load %arg1[%c0, %c0_0] : memref<512x512xbf16, #tpu.memory_space<vmem>>, vector<512x512xbf16>
    %c0_1 = arith.constant 0 : index
    %c0_2 = arith.constant 0 : index
    %1 = vector.load %arg2[%c0_1, %c0_2] : memref<512x64xbf16, #tpu.memory_space<vmem>>, vector<512x64xbf16>
    %cst = arith.constant dense<0.000000e+00> : vector<512x64xf32>
    %2 = tpu.matmul %0, %1, %cst {dimension_numbers = #tpu.dot_dimension_numbers<[1], [0], [0], [1], [0, 0, 1, 1], [], []>} : vector<512x512xbf16>, vector<512x64xbf16>, vector<512x64xf32> -> vector<512x64xf32>
    %c0_3 = arith.constant 0 : index
    %c0_4 = arith.constant 0 : index
    %3 = vector.load %arg3[%c0_3, %c0_4] : memref<1x64xf32, #tpu.memory_space<vmem>>, vector<1x64xf32>
    %4 = vector.broadcast %3 : vector<1x64xf32> to vector<512x64xf32>
    %5 = arith.addf %2, %4 : vector<512x64xf32>
    %cst_5 = arith.constant 0.000000e+00 : f32
    %6 = vector.broadcast %cst_5 : f32 to vector<512x64xf32>
    %7 = arith.maximumf %5, %6 : vector<512x64xf32>
    %8 = arith.truncf %7 : vector<512x64xf32> to vector<512x64xbf16>
    %c0_6 = arith.constant 0 : index
    %c0_7 = arith.constant 0 : index
    %9 = vector.load %arg4[%c0_6, %c0_7] : memref<512x64xbf16, #tpu.memory_space<vmem>>, vector<512x64xbf16>
    tpu.vector_store %arg4[%c0_6, %c0_7], %8 {strides = array<i32>} : memref<512x64xbf16, #tpu.memory_space<vmem>>, vector<512x64xbf16>,
    return
  }
  func.func @transform_0(%arg0: i32) -> (i32, i32) {
    %c0_i32 = arith.constant 0 : i32
    %c0_i32_0 = arith.constant 0 : i32
    return %arg0, %c0_i32 : i32, i32
  }
  func.func @transform_1(%arg0: i32) -> (i32, i32) {
    %c0_i32 = arith.constant 0 : i32
    %c0_i32_0 = arith.constant 0 : i32
    %c0_i32_1 = arith.constant 0 : i32
    return %c0_i32, %c0_i32_0 : i32, i32
  }
  func.func @transform_2(%arg0: i32) -> (i32, i32) {
    %c0_i32 = arith.constant 0 : i32
    %c0_i32_0 = arith.constant 0 : i32
    %c0_i32_1 = arith.constant 0 : i32
    return %c0_i32, %c0_i32_0 : i32, i32
  }
  func.func @transform_3(%arg0: i32) -> (i32, i32) {
    %c0_i32 = arith.constant 0 : i32
    %c0_i32_0 = arith.constant 0 : i32
    return %arg0, %c0_i32 : i32, i32
  }
}

module attributes {stable_mosaic.version = 11 : i64} {
  func.func @_matmul_bias_act_kernel(%arg0: i32, %arg1: memref<488x576xbf16, #tpu.memory_space<vmem>>, %arg2: memref<576x64xbf16, #tpu.memory_space<vmem>>, %arg3: memref<1x64xf32, #tpu.memory_space<vmem>>, %arg4: memref<488x64xbf16, #tpu.memory_space<vmem>>) attributes {dimension_semantics = [#tpu.dimension_semantics<parallel>], iteration_bounds = array<i64: 1>, scalar_prefetch = 0 : i64, scratch_operands = 0 : i64, tpu.core_type = #tpu.core_type<tc>, window_params = [{transform_indices = @transform_0, window_bounds = array<i64: 488, 576>}, {pipeline_mode = #tpu.pipeline_mode<synchronous>, transform_indices = @transform_1, window_bounds = array<i64: 576, 64>}, {pipeline_mode = #tpu.pipeline_mode<synchronous>, transform_indices = @transform_2, window_bounds = array<i64: 1, 64>}, {transform_indices = @transform_3, window_bounds = array<i64: 488, 64>}]} {
    %c0 = arith.constant 0 : index
    %c0_0 = arith.constant 0 : index
    %0 = vector.load %arg1[%c0, %c0_0] : memref<488x576xbf16, #tpu.memory_space<vmem>>, vector<488x576xbf16>
    %c0_1 = arith.constant 0 : index
    %c0_2 = arith.constant 0 : index
    %1 = vector.load %arg2[%c0_1, %c0_2] : memref<576x64xbf16, #tpu.memory_space<vmem>>, vector<576x64xbf16>
    %cst = arith.constant dense<0.000000e+00> : vector<488x64xf32>
    %2 = tpu.matmul %0, %1, %cst {dimension_numbers = #tpu.dot_dimension_numbers<[1], [0], [0], [1], [0, 0, 1, 1], [], []>} : vector<488x576xbf16>, vector<576x64xbf16>, vector<488x64xf32> -> vector<488x64xf32>
    %c0_3 = arith.constant 0 : index
    %c0_4 = arith.constant 0 : index
    %3 = vector.load %arg3[%c0_3, %c0_4] : memref<1x64xf32, #tpu.memory_space<vmem>>, vector<1x64xf32>
    %4 = vector.broadcast %3 : vector<1x64xf32> to vector<488x64xf32>
    %5 = arith.addf %2, %4 : vector<488x64xf32>
    %cst_5 = arith.constant 0.000000e+00 : f32
    %6 = vector.broadcast %cst_5 : f32 to vector<488x64xf32>
    %7 = arith.maximumf %5, %6 : vector<488x64xf32>
    %8 = arith.truncf %7 : vector<488x64xf32> to vector<488x64xbf16>
    %c0_6 = arith.constant 0 : index
    %c0_7 = arith.constant 0 : index
    %9 = vector.load %arg4[%c0_6, %c0_7] : memref<488x64xbf16, #tpu.memory_space<vmem>>, vector<488x64xbf16>
    tpu.vector_store %arg4[%c0_6, %c0_7], %8 {strides = array<i32>} : memref<488x64xbf16, #tpu.memory_space<vmem>>, vector<488x64xbf16>,
    return
  }
  func.func @transform_0(%arg0: i32) -> (i32, i32) {
    %c0_i32 = arith.constant 0 : i32
    %c0_i32_0 = arith.constant 0 : i32
    return %arg0, %c0_i32 : i32, i32
  }
  func.func @transform_1(%arg0: i32) -> (i32, i32) {
    %c0_i32 = arith.constant 0 : i32
    %c0_i32_0 = arith.constant 0 : i32
    %c0_i32_1 = arith.constant 0 : i32
    return %c0_i32, %c0_i32_0 : i32, i32
  }
  func.func @transform_2(%arg0: i32) -> (i32, i32) {
    %c0_i32 = arith.constant 0 : i32
    %c0_i32_0 = arith.constant 0 : i32
    %c0_i32_1 = arith.constant 0 : i32
    return %c0_i32, %c0_i32_0 : i32, i32
  }
  func.func @transform_3(%arg0: i32) -> (i32, i32) {
    %c0_i32 = arith.constant 0 : i32
    %c0_i32_0 = arith.constant 0 : i32
    return %arg0, %c0_i32 : i32, i32
  }
}

module attributes {stable_mosaic.version = 11 : i64} {
  func.func @_matmul_bias_act_kernel(%arg0: i32, %arg1: memref<8x5184xbf16, #tpu.memory_space<vmem>>, %arg2: memref<5184x128xbf16, #tpu.memory_space<vmem>>, %arg3: memref<1x128xf32, #tpu.memory_space<vmem>>, %arg4: memref<8x128xf32, #tpu.memory_space<vmem>>) attributes {dimension_semantics = [#tpu.dimension_semantics<parallel>], iteration_bounds = array<i64: 1>, scalar_prefetch = 0 : i64, scratch_operands = 0 : i64, tpu.core_type = #tpu.core_type<tc>, window_params = [{transform_indices = @transform_0, window_bounds = array<i64: 8, 5184>}, {pipeline_mode = #tpu.pipeline_mode<synchronous>, transform_indices = @transform_1, window_bounds = array<i64: 5184, 128>}, {pipeline_mode = #tpu.pipeline_mode<synchronous>, transform_indices = @transform_2, window_bounds = array<i64: 1, 128>}, {transform_indices = @transform_3, window_bounds = array<i64: 8, 128>}]} {
    %c0 = arith.constant 0 : index
    %c0_0 = arith.constant 0 : index
    %0 = vector.load %arg1[%c0, %c0_0] : memref<8x5184xbf16, #tpu.memory_space<vmem>>, vector<8x5184xbf16>
    %c0_1 = arith.constant 0 : index
    %c0_2 = arith.constant 0 : index
    %1 = vector.load %arg2[%c0_1, %c0_2] : memref<5184x128xbf16, #tpu.memory_space<vmem>>, vector<5184x128xbf16>
    %cst = arith.constant dense<0.000000e+00> : vector<8x128xf32>
    %2 = tpu.matmul %0, %1, %cst {dimension_numbers = #tpu.dot_dimension_numbers<[1], [0], [0], [1], [0, 0, 1, 1], [], []>} : vector<8x5184xbf16>, vector<5184x128xbf16>, vector<8x128xf32> -> vector<8x128xf32>
    %c0_3 = arith.constant 0 : index
    %c0_4 = arith.constant 0 : index
    %3 = vector.load %arg3[%c0_3, %c0_4] : memref<1x128xf32, #tpu.memory_space<vmem>>, vector<1x128xf32>
    %4 = vector.broadcast %3 : vector<1x128xf32> to vector<8x128xf32>
    %5 = arith.addf %2, %4 : vector<8x128xf32>
    %cst_5 = arith.constant 0.000000e+00 : f32
    %6 = vector.broadcast %cst_5 : f32 to vector<8x128xf32>
    %7 = arith.maximumf %5, %6 : vector<8x128xf32>
    %c0_6 = arith.constant 0 : index
    %c0_7 = arith.constant 0 : index
    %8 = vector.load %arg4[%c0_6, %c0_7] : memref<8x128xf32, #tpu.memory_space<vmem>>, vector<8x128xf32>
    tpu.vector_store %arg4[%c0_6, %c0_7], %7 {strides = array<i32>} : memref<8x128xf32, #tpu.memory_space<vmem>>, vector<8x128xf32>,
    return
  }
  func.func @transform_0(%arg0: i32) -> (i32, i32) {
    %c0_i32 = arith.constant 0 : i32
    %c0_i32_0 = arith.constant 0 : i32
    return %arg0, %c0_i32 : i32, i32
  }
  func.func @transform_1(%arg0: i32) -> (i32, i32) {
    %c0_i32 = arith.constant 0 : i32
    %c0_i32_0 = arith.constant 0 : i32
    %c0_i32_1 = arith.constant 0 : i32
    return %c0_i32, %c0_i32_0 : i32, i32
  }
  func.func @transform_2(%arg0: i32) -> (i32, i32) {
    %c0_i32 = arith.constant 0 : i32
    %c0_i32_0 = arith.constant 0 : i32
    %c0_i32_1 = arith.constant 0 : i32
    return %c0_i32, %c0_i32_0 : i32, i32
  }
  func.func @transform_3(%arg0: i32) -> (i32, i32) {
    %c0_i32 = arith.constant 0 : i32
    %c0_i32_0 = arith.constant 0 : i32
    return %arg0, %c0_i32 : i32, i32
  }
}

module attributes {stable_mosaic.version = 11 : i64} {
  func.func @_tail_kernel(%arg0: memref<2x3x128xf32, #tpu.memory_space<vmem>>, %arg1: memref<8x3xf32, #tpu.memory_space<vmem>>, %arg2: memref<2x8xf32, #tpu.memory_space<vmem>>, %arg3: memref<3x64xf32, #tpu.memory_space<vmem>>, %arg4: memref<1x64xf32, #tpu.memory_space<vmem>>, %arg5: memref<64x32xf32, #tpu.memory_space<vmem>>, %arg6: memref<1x32xf32, #tpu.memory_space<vmem>>, %arg7: memref<1x128xf32, #tpu.memory_space<vmem>>, %arg8: memref<1x32xf32, #tpu.memory_space<vmem>>, %arg9: memref<1x1xf32, #tpu.memory_space<vmem>>, %arg10: memref<2x1xf32, #tpu.memory_space<vmem>>) attributes {dimension_semantics = [], scalar_prefetch = 0 : i64, scratch_operands = 0 : i64, tpu.core_type = #tpu.core_type<tc>} {
    %c0 = arith.constant 0 : index
    %c0_0 = arith.constant 0 : index
    %c0_1 = arith.constant 0 : index
    %0 = vector.load %arg0[%c0, %c0_0, %c0_1] : memref<2x3x128xf32, #tpu.memory_space<vmem>>, vector<2x3x128xf32>
    %cst = arith.constant dense<0.000000e+00> : vector<2x128xf32>
    %1 = vector.multi_reduction <add>, %0, %cst [1] : vector<2x3x128xf32> to vector<2x128xf32>
    %cst_2 = arith.constant 3.000000e+00 : f32
    %2 = vector.broadcast %cst_2 : f32 to vector<2x128xf32>
    %3 = arith.divf %1, %2 : vector<2x128xf32>
    %c0_3 = arith.constant 0 : index
    %c0_4 = arith.constant 0 : index
    %4 = vector.load %arg1[%c0_3, %c0_4] : memref<8x3xf32, #tpu.memory_space<vmem>>, vector<8x3xf32>
    %c0_5 = arith.constant 0 : index
    %c0_6 = arith.constant 0 : index
    %5 = vector.load %arg3[%c0_5, %c0_6] : memref<3x64xf32, #tpu.memory_space<vmem>>, vector<3x64xf32>
    %6 = vector.extract_strided_slice %4 {offsets = [0, 0], sizes = [8, 1], strides = [1, 1]} : vector<8x3xf32> to vector<8x1xf32>
    %7 = vector.extract_strided_slice %5 {offsets = [0, 0], sizes = [1, 64], strides = [1, 1]} : vector<3x64xf32> to vector<1x64xf32>
    %8 = vector.broadcast %6 : vector<8x1xf32> to vector<8x64xf32>
    %9 = vector.broadcast %7 : vector<1x64xf32> to vector<8x64xf32>
    %10 = arith.mulf %8, %9 : vector<8x64xf32>
    %11 = vector.extract_strided_slice %4 {offsets = [0, 1], sizes = [8, 1], strides = [1, 1]} : vector<8x3xf32> to vector<8x1xf32>
    %12 = vector.extract_strided_slice %5 {offsets = [1, 0], sizes = [1, 64], strides = [1, 1]} : vector<3x64xf32> to vector<1x64xf32>
    %13 = vector.broadcast %11 : vector<8x1xf32> to vector<8x64xf32>
    %14 = vector.broadcast %12 : vector<1x64xf32> to vector<8x64xf32>
    %15 = arith.mulf %13, %14 : vector<8x64xf32>
    %16 = arith.addf %10, %15 : vector<8x64xf32>
    %17 = vector.extract_strided_slice %4 {offsets = [0, 2], sizes = [8, 1], strides = [1, 1]} : vector<8x3xf32> to vector<8x1xf32>
    %18 = vector.extract_strided_slice %5 {offsets = [2, 0], sizes = [1, 64], strides = [1, 1]} : vector<3x64xf32> to vector<1x64xf32>
    %19 = vector.broadcast %17 : vector<8x1xf32> to vector<8x64xf32>
    %20 = vector.broadcast %18 : vector<1x64xf32> to vector<8x64xf32>
    %21 = arith.mulf %19, %20 : vector<8x64xf32>
    %22 = arith.addf %16, %21 : vector<8x64xf32>
    %c0_7 = arith.constant 0 : index
    %c0_8 = arith.constant 0 : index
    %23 = vector.load %arg4[%c0_7, %c0_8] : memref<1x64xf32, #tpu.memory_space<vmem>>, vector<1x64xf32>
    %24 = vector.broadcast %23 : vector<1x64xf32> to vector<8x64xf32>
    %25 = arith.addf %22, %24 : vector<8x64xf32>
    %cst_9 = arith.constant 0.000000e+00 : f32
    %26 = vector.broadcast %cst_9 : f32 to vector<8x64xf32>
    %27 = arith.maximumf %25, %26 : vector<8x64xf32>
    %c0_10 = arith.constant 0 : index
    %c0_11 = arith.constant 0 : index
    %28 = vector.load %arg5[%c0_10, %c0_11] : memref<64x32xf32, #tpu.memory_space<vmem>>, vector<64x32xf32>
    %cst_12 = arith.constant dense<0.000000e+00> : vector<8x32xf32>
    %29 = tpu.matmul %27, %28, %cst_12 {dimension_numbers = #tpu.dot_dimension_numbers<[1], [0], [0], [1], [0, 0, 1, 1], [], []>} : vector<8x64xf32>, vector<64x32xf32>, vector<8x32xf32> -> vector<8x32xf32>
    %c0_13 = arith.constant 0 : index
    %c0_14 = arith.constant 0 : index
    %30 = vector.load %arg6[%c0_13, %c0_14] : memref<1x32xf32, #tpu.memory_space<vmem>>, vector<1x32xf32>
    %31 = vector.broadcast %30 : vector<1x32xf32> to vector<8x32xf32>
    %32 = arith.addf %29, %31 : vector<8x32xf32>
    %cst_15 = arith.constant 0.000000e+00 : f32
    %33 = vector.broadcast %cst_15 : f32 to vector<8x32xf32>
    %34 = arith.maximumf %32, %33 : vector<8x32xf32>
    %c0_16 = arith.constant 0 : index
    %c0_17 = arith.constant 0 : index
    %35 = vector.load %arg2[%c0_16, %c0_17] : memref<2x8xf32, #tpu.memory_space<vmem>>, vector<2x8xf32>
    %cst_18 = arith.constant dense<0.000000e+00> : vector<2x32xf32>
    %36 = tpu.matmul %35, %34, %cst_18 {dimension_numbers = #tpu.dot_dimension_numbers<[1], [0], [0], [1], [0, 0, 1, 1], [], []>} : vector<2x8xf32>, vector<8x32xf32>, vector<2x32xf32> -> vector<2x32xf32>
    %c0_19 = arith.constant 0 : index
    %c0_20 = arith.constant 0 : index
    %37 = vector.load %arg7[%c0_19, %c0_20] : memref<1x128xf32, #tpu.memory_space<vmem>>, vector<1x128xf32>
    %38 = vector.broadcast %37 : vector<1x128xf32> to vector<2x128xf32>
    %39 = arith.mulf %3, %38 : vector<2x128xf32>
    %cst_21 = arith.constant dense<0.000000e+00> : vector<2xf32>
    %40 = vector.multi_reduction <add>, %39, %cst_21 [1] : vector<2x128xf32> to vector<2xf32>
    %41 = vector.shape_cast %40 : vector<2xf32> to vector<2x1xf32>
    %c0_22 = arith.constant 0 : index
    %c0_23 = arith.constant 0 : index
    %42 = vector.load %arg8[%c0_22, %c0_23] : memref<1x32xf32, #tpu.memory_space<vmem>>, vector<1x32xf32>
    %43 = vector.broadcast %42 : vector<1x32xf32> to vector<2x32xf32>
    %44 = arith.mulf %36, %43 : vector<2x32xf32>
    %cst_24 = arith.constant dense<0.000000e+00> : vector<2xf32>
    %45 = vector.multi_reduction <add>, %44, %cst_24 [1] : vector<2x32xf32> to vector<2xf32>
    %46 = vector.shape_cast %45 : vector<2xf32> to vector<2x1xf32>
    %47 = arith.addf %41, %46 : vector<2x1xf32>
    %c0_25 = arith.constant 0 : index
    %c0_26 = arith.constant 0 : index
    %48 = vector.load %arg9[%c0_25, %c0_26] : memref<1x1xf32, #tpu.memory_space<vmem>>, vector<1x1xf32>
    %49 = vector.broadcast %48 : vector<1x1xf32> to vector<2x1xf32>
    %50 = arith.addf %47, %49 : vector<2x1xf32>
    %c0_27 = arith.constant 0 : index
    %c0_28 = arith.constant 0 : index
    %51 = vector.load %arg10[%c0_27, %c0_28] : memref<2x1xf32, #tpu.memory_space<vmem>>, vector<2x1xf32>
    tpu.vector_store %arg10[%c0_27, %c0_28], %50 {strides = array<i32>} : memref<2x1xf32, #tpu.memory_space<vmem>>, vector<2x1xf32>,
    return
  }
}

</mosaic_0001>

<bundles_post_ra>
// kernel: critic_forward.5
= control target key start
LH: loop header
LB: loop body
LE: loop exit
PB: predicated region body
PF: predicated region fallthrough
CT: control target
= control target key end

     0   :  { %8 = vsyncpa [#allocation3], 0  ;;  %s2923_s0 = inlined_call_operand.hbm [shape: bf16[3456,64], index: 0, kind: input, shape index: {}]   ;;  %s2924_s1 = inlined_call_operand.vmem [shape: bf16[64,32], index: 1, kind: input, shape index: {}]   ;;  %s2925_s2 = inlined_call_operand.vmem [shape: f32[1,32], index: 2, kind: input, shape index: {}]   ;;  %s2926_s3 = inlined_call_operand.vmem [shape: bf16[3456,32], index: 3, kind: output, shape index: {}]  }
   0x1   :  { %10 = vsyncpa [#allocation3 + $0x1], 0  ;;  %s2346_s12 = smov 0   ;;  %s2348_s13 = smov 0  }
   0x2   :  { %s2350_s14 = smov 0   ;;  %s2352_s15 = smov 0  }
   0x3 LB: > { %s2365_s16 = sadd.s32 4294967295, %s2289_s15   ;;  %s2368_s17 = sadd.s32 1, %s2289_s15   ;;  %s2289_s15 = sphi %s2352_s15, %s2935_s15   ;;  %s2285_s14 = sphi %s2350_s14, %s2934_s14   ;;  %s2281_s13 = sphi %s2348_s13, %s2933_s13   ;;  %s2277_s12 = sphi %s2346_s12, %s2932_s12  }
   0x4   : > { %s20_s18 = ssub.s32 %s2289_s15, %s2368_s17  ;;  %s23_s19 = sadd.s32 1, %s2285_s14 }
   0x5   : > { %p21_p0 = scmp.eq.s32.totalorder %s20_s18, 0  ;;  %p30_p1 = scmp.ne.s32.totalorder %s2285_s14, %s2281_s13 }
   0x6   : > { %p31_p2 = scmp.eq.s32.totalorder %s2289_s15, 0  ;;  %p36_p3 = scmp.ne.s32.totalorder %s2281_s13, %s2277_s12 }
   0x7   : > { %s2378_s20 = scalar_select %p21_p0, %s2285_s14, %s23_s19  }
   0x8   : > { %p32_p4 = por %p31_p2, %p30_p1  ;;  %p37_p5 = scmp.eq.s32.totalorder %s2365_s16, 0 }
   0x9   : > { %p102_p6 = scmp.eq.s32.totalorder %s2365_s16, 6  ;;  %p1715_p9 = scmp.ge.s32.totalorder %s2289_s15, 7 }
   0xa   : > { %p2382_p7 = por %p37_p5, %p36_p3 }
   0xb   : > { %p2386_p8 = por %p102_p6, %p30_p1  ;;  %130 = sbr.rel (%p1715_p9) target bundleno = 53 (0x35), region = 24 }
  0x12   : > { %133 = sbr.rel (!%p32_p4) target bundleno = 53 (0x35), region = 28  ;;  %s134_s23 = sand.u32 (%p32_p4), 1, %s2285_s14  }
  0x13   : > { %s1717_s24 = sshll.u32 (%p32_p4), %s2289_s15, 6  ;;  %s1716_s25 = sshll.u32 (%p32_p4), %s134_s23, 8 }
  0x14   : > { %s140_s26 = ssub.s32 (%p32_p4), 432, %s1717_s24  ;;  %s2396_s29 = scalar_lea.sflag (%p32_p4), [#allocation3], %s134_s23 }
  0x15   : > { %p141_p10 = scmp.lt.s32.totalorder (%p32_p4), %s140_s26, 64  ;;  %s138_s30 = scalar_lea.vmem (%p32_p4), [#allocation2], %s1716_s25 }
  0x19   : > { %s2937_s26 = smov (!%p141_p10, %s140_s26), 64 }
  0x1a   : > { %s2393_s27 = sshll.u32 %s2937_s26, 6 }
  0x1b   : > { %s145_s28 = ssub.s32 4096, %s2393_s27 }
  0x1c   : > { %146 = vsyncadd %s2396_s29, %s145_s28  ;;  %p1719_p11 = scmp.ne.s32.totalorder %s2393_s27, 0  ;;  %s1876_s4 = sshll.u32 %s2289_s15, 12 }
  0x1d   : > { %s2404_s7 = scalar_lea.hbm %s2923_s0, %s1876_s4  ;;  %s151_s8 = sshll.u32 %s138_s30, 4  ;;  %s2406_s8 = int_to_ptr.vmem [resolvable:$true] %s151_s8 }
  0x1e   : > { %s2195_s9 = scalar_lea.hbm %s2404_s7, %s2393_s27  ;;  %s2199_s12 = scalar_lea.hbm %s2923_s0, 27648 }
  0x1f   : > { %p2196_p12 = scmp.ne.s32.totalorder %s2404_s7, %s2195_s9  ;;  %p2200_p1 = scmp.lt.u32.totalorder %s2404_s7, %s2923_s0 }
  0x20   : > { %p2201_p2 = scmp.lt.u32.totalorder %s2199_s12, %s2195_s9  ;;  %p2203_p4 = scmp.lt.u32.totalorder %s2195_s9, %s2404_s7 }
  0x21   : > { %p2197_p13 = pnand %p2196_p12, %p1719_p11 }
  0x22   : > { %p2202_p3 = por %p2201_p2, %p2200_p1 }
  0x23   : > { %p2198_p0 = pneg %p2197_p13 }
  0x24   : > { %p2204_p5 = por %p2203_p4, %p2202_p3 }
  0x26   : > { %p2205_p6 = pnand %p2204_p5, %p2198_p0 }
  0x28   : > { %2208 = shalt.err (!%p2205_p6)
}
  0x29   : > { %s2209_s23 = scalar_lea.vmem %s2406_s8, %s2393_s27  ;;  %s2323_s24 = smov [#allocation2]  }
  0x2a   : > { %p2210_p9 = scmp.ne.s32.totalorder %s2406_s8, %s2209_s23  ;;  %s2213_s25 = sshll.u32 %s2323_s24, 4  ;;  %s2214_s25 = int_to_ptr.vmem [resolvable:$false] %s2213_s25 }
  0x2b   : > { %s2215_s26 = scalar_lea.vmem %s2214_s25, 8192  ;;  %p2216_p13 = scmp.lt.s32.totalorder %s2406_s8, %s2214_s25 }
  0x2c   : > { %p2211_p10 = pnand %p2210_p9, %p1719_p11  ;;  %p2217_p1 = scmp.lt.s32.totalorder %s2215_s26, %s2209_s23 }
  0x2e   : > { %p2212_p12 = pneg %p2211_p10  ;;  %p2218_p2 = por %p2217_p1, %p2216_p13 }
  0x30   : > { %p2219_p3 = pnand %p2218_p2, %p2212_p12 }
  0x32   : > { %2222 = shalt.err (!%p2219_p3)
}
  0x33   : > { %s2324_s28 = smov 64   ;;  %s2325_s30 = smov 4  }
  0x34   : > { %157 = dma.hbm_to_vmem [thread:$0]  (%p1719_p11), %s2404_s7, %s2393_s27, %s2406_s8, %s2396_s29, %s2324_s28, %s2324_s28, %s2325_s30  }
  0x35 PF: > { %p1723_p0 = scmp.ge.s32.totalorder %s2289_s15, 1  ;;  %p159_p4 = scmp.lt.s32.totalorder %s2289_s15, 8 }
  0x37   : > { %p160_p5 = pnand %p1723_p0, %p159_p4 }
  0x38   : > { %s165_s4 = sand.u32 (!%p160_p5), 1, %s2281_s13  }
  0x39   : > { %163 = sbr.rel (%p160_p5) target bundleno = 451 (0x1c3), region = 32  ;;  %s2436_s5 = sshll.u32 (!%p160_p5), %s165_s4, 8 }
  0x3a   : > { %s166_s6 = scalar_lea.sflag (!%p160_p5), [#allocation3], %s165_s4  ;;  %s2439_s9 = scalar_lea.vmem (!%p160_p5), [#allocation2], %s2436_s5 }
  0x40   : > { %2272 = dma.done.wait (%p2382_p7), %s166_s6, 4096  }
  0x41   : > { %2274 = vsyncadd (%p2382_p7), %s166_s6, 4294963200  ;;  %v2159_v0 = vld [vmem:[%s2924_s1] sm:$0xff]   ;;  %v2160_v1 = vld [vmem:[%s2924_s1 + $0x8] sm:$0xff]   ;;  %vm465_vm0 = vcmask 523264   ;;  %vm1171_vm1 = vcmask 257024   ;;  %s2535_s19 = scalar_lea.vmem [#allocation4], %s2436_s5  }
  0x42   : > { %1980 = vmatprep.subr.bf16.mxu0 %v2159_v0  ;;  %2052 = vmatprep.subr.bf16.mxu1 %v2159_v0  ;;  %v2161_v2 = vld [vmem:[%s2924_s1 + $0x10] sm:$0xff]   ;;  %v2163_v3 = vld [vmem:[%s2439_s9] sm:$0xff]   ;;  %v2165_v6 = vld [vmem:[%s2439_s9 + $0x8] sm:$0xff]   ;;  %s1860_s23 = sshll.u32 (%p2386_p8), %s2365_s16, 6  ;;  %s1941_s24 = sshll.u32 (%p2386_p8), %s2365_s16, 8 }
  0x43   : > { %1981 = vmatpush3.bf16.msra.mxu0 %v2159_v0  ;;  %2056 = vmatpush3.bf16.msra.mxu1 %v2159_v0  ;;  %v2164_v4 = vld [vmem:[%s2439_s9 + $0x80] sm:$0xff]   ;;  %v2166_v7 = vld [vmem:[%s2439_s9 + $0x88] sm:$0xff]   ;;  %v2167_v8 = vld [vmem:[%s2439_s9 + $0x10] sm:$0xff]   ;;  %s1244_s25 = ssub.s32 (%p2386_p8), 432, %s1860_s23  ;;  %s2728_s30 = scalar_lea.vmem (%p2386_p8), %s2926_s3, %s1941_s24  }
  0x44   : > { %1982 = vmatprep.subr.bf16.mxu0 %v2160_v1  ;;  %2053 = vmatprep.subr.bf16.mxu1 %v2160_v1  ;;  %v2162_v5 = vld [vmem:[%s2924_s1 + $0x18] sm:$0xff]   ;;  %v2168_v9 = vld [vmem:[%s2439_s9 + $0x90] sm:$0xff]   ;;  %v2169_v10 = vld [vmem:[%s2439_s9 + $0x18] sm:$0xff]   ;;  %p1245_p7 = scmp.lt.s32.totalorder (%p2386_p8), %s1244_s25, 64 }
  0x45   : > { %1988 = vmatprep.mubr.msk.bf16.mxu0 %vm465_vm0, %v2163_v3  ;;  %2020 = vmatprep.mubr.msk.bf16.mxu1 %vm465_vm0, %v2164_v4  ;;  %v2170_v11 = vld [vmem:[%s2439_s9 + $0x98] sm:$0xff]   ;;  %v2171_v12 = vld [vmem:[%s2439_s9 + $0x20] sm:$0xff]   ;;  %v2173_v14 = vld [vmem:[%s2439_s9 + $0x28] sm:$0xff]  }
  0x46   : > { %v2172_v13 = vld [vmem:[%s2439_s9 + $0xa0] sm:$0xff]   ;;  %v2174_v15 = vld [vmem:[%s2439_s9 + $0xa8] sm:$0xff]   ;;  %v2175_v16 = vld [vmem:[%s2439_s9 + $0x30] sm:$0xff]  }
  0x47   : > { %1983 = vmatpush3.bf16.msra.mxu0 %v2160_v1  ;;  %2057 = vmatpush3.bf16.msra.mxu1 %v2160_v1  ;;  %v2176_v17 = vld [vmem:[%s2439_s9 + $0xb0] sm:$0xff]   ;;  %v2177_v18 = vld [vmem:[%s2439_s9 + $0x38] sm:$0xff]   ;;  %v2179_v20 = vld [vmem:[%s2439_s9 + $0x40] sm:$0xff]  }
  0x48   : > { %1984 = vmatprep.subr.bf16.mxu0 %v2161_v2  ;;  %2054 = vmatprep.subr.bf16.mxu1 %v2161_v2  ;;  %v2178_v19 = vld [vmem:[%s2439_s9 + $0xb8] sm:$0xff]   ;;  %v2180_v21 = vld [vmem:[%s2439_s9 + $0xc0] sm:$0xff]   ;;  %v2181_v22 = vld [vmem:[%s2439_s9 + $0x48] sm:$0xff]  }
  0x49   : > { %v2182_v23 = vld [vmem:[%s2439_s9 + $0xc8] sm:$0xff]   ;;  %v2183_v24 = vld [vmem:[%s2439_s9 + $0x50] sm:$0xff]   ;;  %v2185_v26 = vld [vmem:[%s2439_s9 + $0x58] sm:$0xff]  }
  0x4a   : > { %v2184_v25 = vld [vmem:[%s2439_s9 + $0xd0] sm:$0xff]   ;;  %v2186_v27 = vld [vmem:[%s2439_s9 + $0xd8] sm:$0xff]   ;;  %v2187_v28 = vld [vmem:[%s2439_s9 + $0x60] sm:$0xff]  }
  0x4b   : > { %1985 = vmatpush3.bf16.msra.mxu0 %v2161_v2  ;;  %2058 = vmatpush3.bf16.msra.mxu1 %v2161_v2  ;;  %v2188_v29 = vld [vmem:[%s2439_s9 + $0xe0] sm:$0xff]   ;;  %v2189_v30 = vld [vmem:[%s2439_s9 + $0x68] sm:$0xff]   ;;  %v2191_v32 = vld [vmem:[%s2439_s9 + $0x70] sm:$0xff]  }
  0x4c   : > { %1986 = vmatprep.subr.bf16.mxu0 %v2162_v5  ;;  %2055 = vmatprep.subr.bf16.mxu1 %v2162_v5  ;;  %v2190_v31 = vld [vmem:[%s2439_s9 + $0xe8] sm:$0xff]   ;;  %v2192_v33 = vld [vmem:[%s2439_s9 + $0xf0] sm:$0xff]   ;;  %v2193_v34 = vld [vmem:[%s2439_s9 + $0x78] sm:$0xff]  }
  0x4d   : > { %v2194_v35 = vld [vmem:[%s2439_s9 + $0xf8] sm:$0xff]   ;;  %v2524_v36 = vld [vmem:[%s2925_s2] ss:$0 sm:$0xff] }
  0x4f   : > { %1987 = vmatpush3.bf16.msra.mxu0 %v2162_v5  ;;  %2059 = vmatpush3.bf16.msra.mxu1 %v2162_v5 }
  0x52   : > { %1989 = vmatmul.mubr.msk.bf16.vlgmr.msra.gmra.mrb[0].mxu0 %vm465_vm0, %v2165_v6  ;;  %2021 = vmatmul.mubr.msk.bf16.vlgmr.msra.gmra.mrb[0].mxu1 %vm465_vm0, %v2166_v7 }
  0x53   : > { %1992 = vmatprep.mubr.msk.bf16.mxu0 %vm465_vm0, %v2167_v8  ;;  %2024 = vmatprep.mubr.msk.bf16.mxu1 %vm465_vm0, %v2168_v9 }
  0x5a   : > { %1993 = vmatmul.mubr.msk.bf16.gmra.mrb[4].mxu0 %vm465_vm0, %v2169_v10  ;;  %2025 = vmatmul.mubr.msk.bf16.gmra.mrb[4].mxu1 %vm465_vm0, %v2170_v11 }
  0x5b   : > { %1996 = vmatprep.mubr.msk.bf16.mxu0 %vm465_vm0, %v2171_v12  ;;  %2028 = vmatprep.mubr.msk.bf16.mxu1 %vm465_vm0, %v2172_v13 }
  0x62   : > { %1997 = vmatmul.mubr.msk.bf16.gmra.mrb[8].mxu0 %vm465_vm0, %v2173_v14  ;;  %2029 = vmatmul.mubr.msk.bf16.gmra.mrb[8].mxu1 %vm465_vm0, %v2174_v15 }
  0x63   : > { %2000 = vmatprep.mubr.msk.bf16.mxu0 %vm465_vm0, %v2175_v16  ;;  %2032 = vmatprep.mubr.msk.bf16.mxu1 %vm465_vm0, %v2176_v17 }
  0x6a   : > { %2001 = vmatmul.mubr.msk.bf16.gmra.mrb[12].mxu0 %vm465_vm0, %v2177_v18  ;;  %2033 = vmatmul.mubr.msk.bf16.gmra.mrb[12].mxu1 %vm465_vm0, %v2178_v19 }
  0x6b   : > { %2004 = vmatprep.mubr.msk.bf16.mxu0 %vm465_vm0, %v2179_v20  ;;  %2036 = vmatprep.mubr.msk.bf16.mxu1 %vm465_vm0, %v2180_v21 }
  0x72   : > { %2005 = vmatmul.mubr.msk.bf16.gmra.mrb[16].mxu0 %vm465_vm0, %v2181_v22  ;;  %2037 = vmatmul.mubr.msk.bf16.gmra.mrb[16].mxu1 %vm465_vm0, %v2182_v23 }
  0x73   : > { %2008 = vmatprep.mubr.msk.bf16.mxu0 %vm465_vm0, %v2183_v24  ;;  %2040 = vmatprep.mubr.msk.bf16.mxu1 %vm465_vm0, %v2184_v25 }
  0x7a   : > { %2009 = vmatmul.mubr.msk.bf16.gmra.mrb[20].mxu0 %vm465_vm0, %v2185_v26  ;;  %2041 = vmatmul.mubr.msk.bf16.gmra.mrb[20].mxu1 %vm465_vm0, %v2186_v27 }
  0x7b   : > { %2012 = vmatprep.mubr.msk.bf16.mxu0 %vm465_vm0, %v2187_v28  ;;  %2044 = vmatprep.mubr.msk.bf16.mxu1 %vm465_vm0, %v2188_v29 }
  0x82   : > { %2013 = vmatmul.mubr.msk.bf16.gmra.mrb[24].mxu0 %vm465_vm0, %v2189_v30  ;;  %2045 = vmatmul.mubr.msk.bf16.gmra.mrb[24].mxu1 %vm465_vm0, %v2190_v31 }
  0x83   : > { %2016 = vmatprep.mubr.msk.bf16.mxu0 %vm465_vm0, %v2191_v32  ;;  %2048 = vmatprep.mubr.msk.bf16.mxu1 %vm465_vm0, %v2192_v33 }
  0x8a   : > { %2017 = vmatmul.mubr.msk.bf16.gmra.mrb[28].mxu0 %vm465_vm0, %v2193_v34  ;;  %2049 = vmatmul.mubr.msk.bf16.gmra.mrb[28].mxu1 %vm465_vm0, %v2194_v35 }
 0x125   : > { %v1990_v37 = vpop.f32.mrb[0].mxu0  ;;  %v2022_v38 = vpop.f32.mrb[0].mxu1 }
 0x126   : > { %v605_v39 = vadd.f32 %v1990_v37, %v2524_v36  ;;  %v733_v40 = vadd.f32 %v2022_v38, %v2524_v36  ;;  %v596_v41 = vpop.f32.mrb[1].mxu0  ;;  %v724_v42 = vpop.f32.mrb[1].mxu1 }
 0x127   : > { %v597_v43 = vadd.f32 %v2524_v36, %v596_v41  ;;  %v725_v44 = vadd.f32 %v2524_v36, %v724_v42  ;;  %v1991_v45 = vpop.f32.mrb[2].mxu0  ;;  %v2023_v46 = vpop.f32.mrb[2].mxu1 }
 0x128   : > { %v853_v47 = vmax.f32 %v605_v39, 0.0  ;;  %v885_v48 = vmax.f32 %v733_v40, 0.0  ;;  %v608_v49 = vadd.f32 %v1991_v45, %v2524_v36  ;;  %v736_v50 = vadd.f32 %v2023_v46, %v2524_v36  ;;  %v599_v51 = vpop.f32.mrb[3].mxu0  ;;  %v727_v52 = vpop.f32.mrb[3].mxu1 }
 0x129   : > { %v851_v53 = vmax.f32 %v597_v43, 0.0  ;;  %v883_v54 = vmax.f32 %v725_v44, 0.0  ;;  %v600_v55 = vadd.f32 %v2524_v36, %v599_v51  ;;  %v728_v56 = vadd.f32 %v2524_v36, %v727_v52 }
 0x12a   : > { %v1879_v57 = vpack.c.bf16 %v853_v47, %v853_v47  ;;  %v1911_v58 = vpack.c.bf16 %v885_v48, %v885_v48  ;;  %v854_v59 = vmax.f32 %v608_v49, 0.0  ;;  %v886_v60 = vmax.f32 %v736_v50, 0.0 }
 0x12b   : > { %v1877_v61 = vpack.c.bf16 %v851_v53, %v851_v53  ;;  %v1909_v62 = vpack.c.bf16 %v883_v54, %v883_v54  ;;  %v852_v63 = vmax.f32 %v600_v55, 0.0  ;;  %v884_v0 = vmax.f32 %v728_v56, 0.0 }
 0x12c   : > { %1174 = vst.msk [vmem:[%s2535_s19 + $0x8] sm:$0xf] %vm1171_vm1, %v1879_v57  ;;  %1206 = vst.msk [vmem:[%s2535_s19 + $0x88] sm:$0xf] %vm1171_vm1, %v1911_v58  ;;  %v1880_v1 = vpack.c.bf16 %v854_v59, %v854_v59  ;;  %v1912_v2 = vpack.c.bf16 %v886_v60, %v886_v60 }
 0x12d   : > { %1172 = vst.msk [vmem:[%s2535_s19] sm:$0xf] %vm1171_vm1, %v1877_v61  ;;  %1204 = vst.msk [vmem:[%s2535_s19 + $0x80] sm:$0xf] %vm1171_vm1, %v1909_v62  ;;  %v1878_v3 = vpack.c.bf16 %v852_v63, %v852_v63  ;;  %v1910_v4 = vpack.c.bf16 %v884_v0, %v884_v0  ;;  %v1994_v5 = vpop.f32.mrb[4].mxu0  ;;  %v2026_v6 = vpop.f32.mrb[4].mxu1 }
 0x12e   : > { %1175 = vst.msk [vmem:[%s2535_s19 + $0xc] sm:$0xf] %vm1171_vm1, %v1880_v1  ;;  %1207 = vst.msk [vmem:[%s2535_s19 + $0x8c] sm:$0xf] %vm1171_vm1, %v1912_v2  ;;  %v621_v7 = vadd.f32 %v1994_v5, %v2524_v36  ;;  %v749_v8 = vadd.f32 %v2026_v6, %v2524_v36  ;;  %v612_v9 = vpop.f32.mrb[5].mxu0  ;;  %v740_v10 = vpop.f32.mrb[5].mxu1 }
 0x12f   : > { %1173 = vst.msk [vmem:[%s2535_s19 + $0x4] sm:$0xf] %vm1171_vm1, %v1878_v3  ;;  %1205 = vst.msk [vmem:[%s2535_s19 + $0x84] sm:$0xf] %vm1171_vm1, %v1910_v4  ;;  %v613_v11 = vadd.f32 %v2524_v36, %v612_v9  ;;  %v741_v12 = vadd.f32 %v2524_v36, %v740_v10  ;;  %v1995_v13 = vpop.f32.mrb[6].mxu0  ;;  %v2027_v14 = vpop.f32.mrb[6].mxu1 }
 0x130   : > { %v857_v15 = vmax.f32 %v621_v7, 0.0  ;;  %v889_v16 = vmax.f32 %v749_v8, 0.0  ;;  %v624_v17 = vadd.f32 %v1995_v13, %v2524_v36  ;;  %v752_v18 = vadd.f32 %v2027_v14, %v2524_v36  ;;  %v615_v19 = vpop.f32.mrb[7].mxu0  ;;  %v743_v20 = vpop.f32.mrb[7].mxu1 }
 0x131   : > { %v855_v21 = vmax.f32 %v613_v11, 0.0  ;;  %v887_v22 = vmax.f32 %v741_v12, 0.0  ;;  %v616_v23 = vadd.f32 %v2524_v36, %v615_v19  ;;  %v744_v24 = vadd.f32 %v2524_v36, %v743_v20 }
 0x132   : > { %v1883_v25 = vpack.c.bf16 %v857_v15, %v857_v15  ;;  %v1915_v26 = vpack.c.bf16 %v889_v16, %v889_v16  ;;  %v858_v27 = vmax.f32 %v624_v17, 0.0  ;;  %v890_v28 = vmax.f32 %v752_v18, 0.0 }
 0x133   : > { %v1881_v29 = vpack.c.bf16 %v855_v21, %v855_v21  ;;  %v1913_v30 = vpack.c.bf16 %v887_v22, %v887_v22  ;;  %v856_v31 = vmax.f32 %v616_v23, 0.0  ;;  %v888_v32 = vmax.f32 %v744_v24, 0.0 }
 0x134   : > { %1178 = vst.msk [vmem:[%s2535_s19 + $0x18] sm:$0xf] %vm1171_vm1, %v1883_v25  ;;  %1210 = vst.msk [vmem:[%s2535_s19 + $0x98] sm:$0xf] %vm1171_vm1, %v1915_v26  ;;  %v1884_v33 = vpack.c.bf16 %v858_v27, %v858_v27  ;;  %v1916_v34 = vpack.c.bf16 %v890_v28, %v890_v28 }
 0x135   : > { %1176 = vst.msk [vmem:[%s2535_s19 + $0x10] sm:$0xf] %vm1171_vm1, %v1881_v29  ;;  %1208 = vst.msk [vmem:[%s2535_s19 + $0x90] sm:$0xf] %vm1171_vm1, %v1913_v30  ;;  %v1882_v35 = vpack.c.bf16 %v856_v31, %v856_v31  ;;  %v1914_v37 = vpack.c.bf16 %v888_v32, %v888_v32  ;;  %v1998_v38 = vpop.f32.mrb[8].mxu0  ;;  %v2030_v39 = vpop.f32.mrb[8].mxu1 }
 0x136   : > { %1179 = vst.msk [vmem:[%s2535_s19 + $0x1c] sm:$0xf] %vm1171_vm1, %v1884_v33  ;;  %1211 = vst.msk [vmem:[%s2535_s19 + $0x9c] sm:$0xf] %vm1171_vm1, %v1916_v34  ;;  %v637_v40 = vadd.f32 %v1998_v38, %v2524_v36  ;;  %v765_v41 = vadd.f32 %v2030_v39, %v2524_v36  ;;  %v628_v42 = vpop.f32.mrb[9].mxu0  ;;  %v756_v43 = vpop.f32.mrb[9].mxu1 }
 0x137   : > { %1177 = vst.msk [vmem:[%s2535_s19 + $0x14] sm:$0xf] %vm1171_vm1, %v1882_v35  ;;  %1209 = vst.msk [vmem:[%s2535_s19 + $0x94] sm:$0xf] %vm1171_vm1, %v1914_v37  ;;  %v629_v44 = vadd.f32 %v2524_v36, %v628_v42  ;;  %v757_v45 = vadd.f32 %v2524_v36, %v756_v43  ;;  %v1999_v46 = vpop.f32.mrb[10].mxu0  ;;  %v2031_v47 = vpop.f32.mrb[10].mxu1 }
 0x138   : > { %v861_v48 = vmax.f32 %v637_v40, 0.0  ;;  %v893_v49 = vmax.f32 %v765_v41, 0.0  ;;  %v640_v50 = vadd.f32 %v1999_v46, %v2524_v36  ;;  %v768_v51 = vadd.f32 %v2031_v47, %v2524_v36  ;;  %v631_v52 = vpop.f32.mrb[11].mxu0  ;;  %v759_v53 = vpop.f32.mrb[11].mxu1 }
 0x139   : > { %v859_v54 = vmax.f32 %v629_v44, 0.0  ;;  %v891_v55 = vmax.f32 %v757_v45, 0.0  ;;  %v632_v56 = vadd.f32 %v2524_v36, %v631_v52  ;;  %v760_v57 = vadd.f32 %v2524_v36, %v759_v53 }
 0x13a   : > { %v1887_v58 = vpack.c.bf16 %v861_v48, %v861_v48  ;;  %v1919_v59 = vpack.c.bf16 %v893_v49, %v893_v49  ;;  %v862_v60 = vmax.f32 %v640_v50, 0.0  ;;  %v894_v61 = vmax.f32 %v768_v51, 0.0 }
 0x13b   : > { %v1885_v62 = vpack.c.bf16 %v859_v54, %v859_v54  ;;  %v1917_v63 = vpack.c.bf16 %v891_v55, %v891_v55  ;;  %v860_v0 = vmax.f32 %v632_v56, 0.0  ;;  %v892_v1 = vmax.f32 %v760_v57, 0.0 }
 0x13c   : > { %1182 = vst.msk [vmem:[%s2535_s19 + $0x28] sm:$0xf] %vm1171_vm1, %v1887_v58  ;;  %1214 = vst.msk [vmem:[%s2535_s19 + $0xa8] sm:$0xf] %vm1171_vm1, %v1919_v59  ;;  %v1888_v2 = vpack.c.bf16 %v862_v60, %v862_v60  ;;  %v1920_v3 = vpack.c.bf16 %v894_v61, %v894_v61 }
 0x13d   : > { %1180 = vst.msk [vmem:[%s2535_s19 + $0x20] sm:$0xf] %vm1171_vm1, %v1885_v62  ;;  %1212 = vst.msk [vmem:[%s2535_s19 + $0xa0] sm:$0xf] %vm1171_vm1, %v1917_v63  ;;  %v1886_v4 = vpack.c.bf16 %v860_v0, %v860_v0  ;;  %v1918_v5 = vpack.c.bf16 %v892_v1, %v892_v1  ;;  %v2002_v6 = vpop.f32.mrb[12].mxu0  ;;  %v2034_v7 = vpop.f32.mrb[12].mxu1 }
 0x13e   : > { %1183 = vst.msk [vmem:[%s2535_s19 + $0x2c] sm:$0xf] %vm1171_vm1, %v1888_v2  ;;  %1215 = vst.msk [vmem:[%s2535_s19 + $0xac] sm:$0xf] %vm1171_vm1, %v1920_v3  ;;  %v653_v8 = vadd.f32 %v2002_v6, %v2524_v36  ;;  %v781_v9 = vadd.f32 %v2034_v7, %v2524_v36  ;;  %v644_v10 = vpop.f32.mrb[13].mxu0  ;;  %v772_v11 = vpop.f32.mrb[13].mxu1 }
 0x13f   : > { %1181 = vst.msk [vmem:[%s2535_s19 + $0x24] sm:$0xf] %vm1171_vm1, %v1886_v4  ;;  %1213 = vst.msk [vmem:[%s2535_s19 + $0xa4] sm:$0xf] %vm1171_vm1, %v1918_v5  ;;  %v645_v12 = vadd.f32 %v2524_v36, %v644_v10  ;;  %v773_v13 = vadd.f32 %v2524_v36, %v772_v11  ;;  %v2003_v14 = vpop.f32.mrb[14].mxu0  ;;  %v2035_v15 = vpop.f32.mrb[14].mxu1 }
 0x140   : > { %v865_v16 = vmax.f32 %v653_v8, 0.0  ;;  %v897_v17 = vmax.f32 %v781_v9, 0.0  ;;  %v656_v18 = vadd.f32 %v2003_v14, %v2524_v36  ;;  %v784_v19 = vadd.f32 %v2035_v15, %v2524_v36  ;;  %v647_v20 = vpop.f32.mrb[15].mxu0  ;;  %v775_v21 = vpop.f32.mrb[15].mxu1 }
 0x141   : > { %v863_v22 = vmax.f32 %v645_v12, 0.0  ;;  %v895_v23 = vmax.f32 %v773_v13, 0.0  ;;  %v648_v24 = vadd.f32 %v2524_v36, %v647_v20  ;;  %v776_v25 = vadd.f32 %v2524_v36, %v775_v21 }
 0x142   : > { %v1891_v26 = vpack.c.bf16 %v865_v16, %v865_v16  ;;  %v1923_v27 = vpack.c.bf16 %v897_v17, %v897_v17  ;;  %v866_v28 = vmax.f32 %v656_v18, 0.0  ;;  %v898_v29 = vmax.f32 %v784_v19, 0.0 }
 0x143   : > { %v1889_v30 = vpack.c.bf16 %v863_v22, %v863_v22  ;;  %v1921_v31 = vpack.c.bf16 %v895_v23, %v895_v23  ;;  %v864_v32 = vmax.f32 %v648_v24, 0.0  ;;  %v896_v33 = vmax.f32 %v776_v25, 0.0 }
 0x144   : > { %1186 = vst.msk [vmem:[%s2535_s19 + $0x38] sm:$0xf] %vm1171_vm1, %v1891_v26  ;;  %1218 = vst.msk [vmem:[%s2535_s19 + $0xb8] sm:$0xf] %vm1171_vm1, %v1923_v27  ;;  %v1892_v34 = vpack.c.bf16 %v866_v28, %v866_v28  ;;  %v1924_v35 = vpack.c.bf16 %v898_v29, %v898_v29 }
 0x145   : > { %1184 = vst.msk [vmem:[%s2535_s19 + $0x30] sm:$0xf] %vm1171_vm1, %v1889_v30  ;;  %1216 = vst.msk [vmem:[%s2535_s19 + $0xb0] sm:$0xf] %vm1171_vm1, %v1921_v31  ;;  %v1890_v37 = vpack.c.bf16 %v864_v32, %v864_v32  ;;  %v1922_v38 = vpack.c.bf16 %v896_v33, %v896_v33  ;;  %v2006_v39 = vpop.f32.mrb[16].mxu0  ;;  %v2038_v40 = vpop.f32.mrb[16].mxu1 }
 0x146   : > { %1187 = vst.msk [vmem:[%s2535_s19 + $0x3c] sm:$0xf] %vm1171_vm1, %v1892_v34  ;;  %1219 = vst.msk [vmem:[%s2535_s19 + $0xbc] sm:$0xf] %vm1171_vm1, %v1924_v35  ;;  %v669_v41 = vadd.f32 %v2006_v39, %v2524_v36  ;;  %v797_v42 = vadd.f32 %v2038_v40, %v2524_v36  ;;  %v660_v43 = vpop.f32.mrb[17].mxu0  ;;  %v788_v44 = vpop.f32.mrb[17].mxu1 }
 0x147   : > { %1185 = vst.msk [vmem:[%s2535_s19 + $0x34] sm:$0xf] %vm1171_vm1, %v1890_v37  ;;  %1217 = vst.msk [vmem:[%s2535_s19 + $0xb4] sm:$0xf] %vm1171_vm1, %v1922_v38  ;;  %v661_v45 = vadd.f32 %v2524_v36, %v660_v43  ;;  %v789_v46 = vadd.f32 %v2524_v36, %v788_v44  ;;  %v2007_v47 = vpop.f32.mrb[18].mxu0  ;;  %v2039_v48 = vpop.f32.mrb[18].mxu1 }
 0x148   : > { %v869_v49 = vmax.f32 %v669_v41, 0.0  ;;  %v901_v50 = vmax.f32 %v797_v42, 0.0  ;;  %v672_v51 = vadd.f32 %v2007_v47, %v2524_v36  ;;  %v800_v52 = vadd.f32 %v2039_v48, %v2524_v36  ;;  %v663_v53 = vpop.f32.mrb[19].mxu0  ;;  %v791_v54 = vpop.f32.mrb[19].mxu1 }
 0x149   : > { %v867_v55 = vmax.f32 %v661_v45, 0.0  ;;  %v899_v56 = vmax.f32 %v789_v46, 0.0  ;;  %v664_v57 = vadd.f32 %v2524_v36, %v663_v53  ;;  %v792_v58 = vadd.f32 %v2524_v36, %v791_v54 }
 0x14a   : > { %v1895_v59 = vpack.c.bf16 %v869_v49, %v869_v49  ;;  %v1927_v60 = vpack.c.bf16 %v901_v50, %v901_v50  ;;  %v870_v61 = vmax.f32 %v672_v51, 0.0  ;;  %v902_v62 = vmax.f32 %v800_v52, 0.0 }
 0x14b   : > { %v1893_v63 = vpack.c.bf16 %v867_v55, %v867_v55  ;;  %v1925_v0 = vpack.c.bf16 %v899_v56, %v899_v56  ;;  %v868_v1 = vmax.f32 %v664_v57, 0.0  ;;  %v900_v2 = vmax.f32 %v792_v58, 0.0 }
 0x14c   : > { %1190 = vst.msk [vmem:[%s2535_s19 + $0x48] sm:$0xf] %vm1171_vm1, %v1895_v59  ;;  %1222 = vst.msk [vmem:[%s2535_s19 + $0xc8] sm:$0xf] %vm1171_vm1, %v1927_v60  ;;  %v1896_v3 = vpack.c.bf16 %v870_v61, %v870_v61  ;;  %v1928_v4 = vpack.c.bf16 %v902_v62, %v902_v62 }
 0x14d   : > { %1188 = vst.msk [vmem:[%s2535_s19 + $0x40] sm:$0xf] %vm1171_vm1, %v1893_v63  ;;  %1220 = vst.msk [vmem:[%s2535_s19 + $0xc0] sm:$0xf] %vm1171_vm1, %v1925_v0  ;;  %v1894_v5 = vpack.c.bf16 %v868_v1, %v868_v1  ;;  %v1926_v6 = vpack.c.bf16 %v900_v2, %v900_v2  ;;  %v2010_v7 = vpop.f32.mrb[20].mxu0  ;;  %v2042_v8 = vpop.f32.mrb[20].mxu1 }
 0x14e   : > { %1191 = vst.msk [vmem:[%s2535_s19 + $0x4c] sm:$0xf] %vm1171_vm1, %v1896_v3  ;;  %1223 = vst.msk [vmem:[%s2535_s19 + $0xcc] sm:$0xf] %vm1171_vm1, %v1928_v4  ;;  %v685_v9 = vadd.f32 %v2010_v7, %v2524_v36  ;;  %v813_v10 = vadd.f32 %v2042_v8, %v2524_v36  ;;  %v676_v11 = vpop.f32.mrb[21].mxu0  ;;  %v804_v12 = vpop.f32.mrb[21].mxu1 }
 0x14f   : > { %1189 = vst.msk [vmem:[%s2535_s19 + $0x44] sm:$0xf] %vm1171_vm1, %v1894_v5  ;;  %1221 = vst.msk [vmem:[%s2535_s19 + $0xc4] sm:$0xf] %vm1171_vm1, %v1926_v6  ;;  %v677_v13 = vadd.f32 %v2524_v36, %v676_v11  ;;  %v805_v14 = vadd.f32 %v2524_v36, %v804_v12  ;;  %v2011_v15 = vpop.f32.mrb[22].mxu0  ;;  %v2043_v16 = vpop.f32.mrb[22].mxu1 }
 0x150   : > { %v873_v17 = vmax.f32 %v685_v9, 0.0  ;;  %v905_v18 = vmax.f32 %v813_v10, 0.0  ;;  %v688_v19 = vadd.f32 %v2011_v15, %v2524_v36  ;;  %v816_v20 = vadd.f32 %v2043_v16, %v2524_v36  ;;  %v679_v21 = vpop.f32.mrb[23].mxu0  ;;  %v807_v22 = vpop.f32.mrb[23].mxu1 }
 0x151   : > { %v871_v23 = vmax.f32 %v677_v13, 0.0  ;;  %v903_v24 = vmax.f32 %v805_v14, 0.0  ;;  %v680_v25 = vadd.f32 %v2524_v36, %v679_v21  ;;  %v808_v26 = vadd.f32 %v2524_v36, %v807_v22 }
 0x152   : > { %v1899_v27 = vpack.c.bf16 %v873_v17, %v873_v17  ;;  %v1931_v28 = vpack.c.bf16 %v905_v18, %v905_v18  ;;  %v874_v29 = vmax.f32 %v688_v19, 0.0  ;;  %v906_v30 = vmax.f32 %v816_v20, 0.0 }
 0x153   : > { %v1897_v31 = vpack.c.bf16 %v871_v23, %v871_v23  ;;  %v1929_v32 = vpack.c.bf16 %v903_v24, %v903_v24  ;;  %v872_v33 = vmax.f32 %v680_v25, 0.0  ;;  %v904_v34 = vmax.f32 %v808_v26, 0.0 }
 0x154   : > { %1194 = vst.msk [vmem:[%s2535_s19 + $0x58] sm:$0xf] %vm1171_vm1, %v1899_v27  ;;  %1226 = vst.msk [vmem:[%s2535_s19 + $0xd8] sm:$0xf] %vm1171_vm1, %v1931_v28  ;;  %v1900_v35 = vpack.c.bf16 %v874_v29, %v874_v29  ;;  %v1932_v37 = vpack.c.bf16 %v906_v30, %v906_v30 }
 0x155   : > { %1192 = vst.msk [vmem:[%s2535_s19 + $0x50] sm:$0xf] %vm1171_vm1, %v1897_v31  ;;  %1224 = vst.msk [vmem:[%s2535_s19 + $0xd0] sm:$0xf] %vm1171_vm1, %v1929_v32  ;;  %v1898_v38 = vpack.c.bf16 %v872_v33, %v872_v33  ;;  %v1930_v39 = vpack.c.bf16 %v904_v34, %v904_v34  ;;  %v2014_v40 = vpop.f32.mrb[24].mxu0  ;;  %v2046_v41 = vpop.f32.mrb[24].mxu1 }
 0x156   : > { %1195 = vst.msk [vmem:[%s2535_s19 + $0x5c] sm:$0xf] %vm1171_vm1, %v1900_v35  ;;  %1227 = vst.msk [vmem:[%s2535_s19 + $0xdc] sm:$0xf] %vm1171_vm1, %v1932_v37  ;;  %v701_v42 = vadd.f32 %v2014_v40, %v2524_v36  ;;  %v829_v43 = vadd.f32 %v2046_v41, %v2524_v36  ;;  %v692_v44 = vpop.f32.mrb[25].mxu0  ;;  %v820_v45 = vpop.f32.mrb[25].mxu1 }
 0x157   : > { %1193 = vst.msk [vmem:[%s2535_s19 + $0x54] sm:$0xf] %vm1171_vm1, %v1898_v38  ;;  %1225 = vst.msk [vmem:[%s2535_s19 + $0xd4] sm:$0xf] %vm1171_vm1, %v1930_v39  ;;  %v693_v46 = vadd.f32 %v2524_v36, %v692_v44  ;;  %v821_v47 = vadd.f32 %v2524_v36, %v820_v45  ;;  %v2015_v48 = vpop.f32.mrb[26].mxu0  ;;  %v2047_v49 = vpop.f32.mrb[26].mxu1 }
 0x158   : > { %v877_v50 = vmax.f32 %v701_v42, 0.0  ;;  %v909_v51 = vmax.f32 %v829_v43, 0.0  ;;  %v704_v52 = vadd.f32 %v2015_v48, %v2524_v36  ;;  %v832_v53 = vadd.f32 %v2047_v49, %v2524_v36  ;;  %v695_v54 = vpop.f32.mrb[27].mxu0  ;;  %v823_v55 = vpop.f32.mrb[27].mxu1 }
 0x159   : > { %v875_v56 = vmax.f32 %v693_v46, 0.0  ;;  %v907_v57 = vmax.f32 %v821_v47, 0.0  ;;  %v696_v58 = vadd.f32 %v2524_v36, %v695_v54  ;;  %v824_v59 = vadd.f32 %v2524_v36, %v823_v55 }
 0x15a   : > { %v1903_v60 = vpack.c.bf16 %v877_v50, %v877_v50  ;;  %v1935_v61 = vpack.c.bf16 %v909_v51, %v909_v51  ;;  %v878_v62 = vmax.f32 %v704_v52, 0.0  ;;  %v910_v63 = vmax.f32 %v832_v53, 0.0 }
 0x15b   : > { %v1901_v0 = vpack.c.bf16 %v875_v56, %v875_v56  ;;  %v1933_v1 = vpack.c.bf16 %v907_v57, %v907_v57  ;;  %v876_v2 = vmax.f32 %v696_v58, 0.0  ;;  %v908_v3 = vmax.f32 %v824_v59, 0.0 }
 0x15c   : > { %1198 = vst.msk [vmem:[%s2535_s19 + $0x68] sm:$0xf] %vm1171_vm1, %v1903_v60  ;;  %1230 = vst.msk [vmem:[%s2535_s19 + $0xe8] sm:$0xf] %vm1171_vm1, %v1935_v61  ;;  %v1904_v4 = vpack.c.bf16 %v878_v62, %v878_v62  ;;  %v1936_v5 = vpack.c.bf16 %v910_v63, %v910_v63 }
 0x15d   : > { %1196 = vst.msk [vmem:[%s2535_s19 + $0x60] sm:$0xf] %vm1171_vm1, %v1901_v0  ;;  %1228 = vst.msk [vmem:[%s2535_s19 + $0xe0] sm:$0xf] %vm1171_vm1, %v1933_v1  ;;  %v1902_v6 = vpack.c.bf16 %v876_v2, %v876_v2  ;;  %v1934_v7 = vpack.c.bf16 %v908_v3, %v908_v3  ;;  %v2018_v8 = vpop.f32.mrb[28].mxu0  ;;  %v2050_v9 = vpop.f32.mrb[28].mxu1 }
 0x15e   : > { %1199 = vst.msk [vmem:[%s2535_s19 + $0x6c] sm:$0xf] %vm1171_vm1, %v1904_v4  ;;  %1231 = vst.msk [vmem:[%s2535_s19 + $0xec] sm:$0xf] %vm1171_vm1, %v1936_v5  ;;  %v717_v10 = vadd.f32 %v2018_v8, %v2524_v36  ;;  %v845_v11 = vadd.f32 %v2050_v9, %v2524_v36  ;;  %v708_v12 = vpop.f32.mrb[29].mxu0  ;;  %v836_v13 = vpop.f32.mrb[29].mxu1 }
 0x15f   : > { %1197 = vst.msk [vmem:[%s2535_s19 + $0x64] sm:$0xf] %vm1171_vm1, %v1902_v6  ;;  %1229 = vst.msk [vmem:[%s2535_s19 + $0xe4] sm:$0xf] %vm1171_vm1, %v1934_v7  ;;  %v709_v14 = vadd.f32 %v2524_v36, %v708_v12  ;;  %v837_v15 = vadd.f32 %v2524_v36, %v836_v13  ;;  %v2019_v16 = vpop.f32.mrb[30].mxu0  ;;  %v2051_v17 = vpop.f32.mrb[30].mxu1 }
 0x160   : > { %v881_v18 = vmax.f32 %v717_v10, 0.0  ;;  %v913_v19 = vmax.f32 %v845_v11, 0.0  ;;  %v720_v20 = vadd.f32 %v2019_v16, %v2524_v36  ;;  %v848_v21 = vadd.f32 %v2051_v17, %v2524_v36  ;;  %v711_v22 = vpop.f32.mrb[31].mxu0  ;;  %v839_v23 = vpop.f32.mrb[31].mxu1 }
 0x161   : > { %v879_v24 = vmax.f32 %v709_v14, 0.0  ;;  %v911_v25 = vmax.f32 %v837_v15, 0.0  ;;  %v712_v26 = vadd.f32 %v2524_v36, %v711_v22  ;;  %v840_v27 = vadd.f32 %v2524_v36, %v839_v23  ;;  %1242 = sbr.rel (!%p2386_p8) target bundleno = 451 (0x1c3), region = 40 }
 0x162   : > { %v1907_v28 = vpack.c.bf16 %v881_v18, %v881_v18  ;;  %v1939_v29 = vpack.c.bf16 %v913_v19, %v913_v19  ;;  %v882_v30 = vmax.f32 %v720_v20, 0.0  ;;  %v914_v31 = vmax.f32 %v848_v21, 0.0 }
 0x163   : > { %v1905_v32 = vpack.c.bf16 %v879_v24, %v879_v24  ;;  %v1937_v33 = vpack.c.bf16 %v911_v25, %v911_v25  ;;  %v880_v34 = vmax.f32 %v712_v26, 0.0  ;;  %v912_v35 = vmax.f32 %v840_v27, 0.0 }
 0x164   : > { %1202 = vst.msk [vmem:[%s2535_s19 + $0x78] sm:$0xf] %vm1171_vm1, %v1907_v28  ;;  %1234 = vst.msk [vmem:[%s2535_s19 + $0xf8] sm:$0xf] %vm1171_vm1, %v1939_v29  ;;  %v1908_v37 = vpack.c.bf16 %v882_v30, %v882_v30  ;;  %v1940_v38 = vpack.c.bf16 %v914_v31, %v914_v31 }
 0x165   : > { %1200 = vst.msk [vmem:[%s2535_s19 + $0x70] sm:$0xf] %vm1171_vm1, %v1905_v32  ;;  %1232 = vst.msk [vmem:[%s2535_s19 + $0xf0] sm:$0xf] %vm1171_vm1, %v1937_v33  ;;  %v1906_v36 = vpack.c.bf16 %v880_v34, %v880_v34  ;;  %v1938_v39 = vpack.c.bf16 %v912_v35, %v912_v35 }
 0x166   : > { %1203 = vst.msk [vmem:[%s2535_s19 + $0x7c] sm:$0xf] %vm1171_vm1, %v1908_v37  ;;  %1235 = vst.msk [vmem:[%s2535_s19 + $0xfc] sm:$0xf] %vm1171_vm1, %v1940_v38 }
 0x167   : > { %1201 = vst.msk [vmem:[%s2535_s19 + $0x74] sm:$0xf] %vm1171_vm1, %v1906_v36  ;;  %1233 = vst.msk [vmem:[%s2535_s19 + $0xf4] sm:$0xf] %vm1171_vm1, %v1938_v39 }
 0x168   : > { %s2939_s25 = smov (!%p1245_p7, %s1244_s25), 64 }
 0x169   : > { %s1861_s4 = sshll.u32 %s2939_s25, 6 }
 0x16a   : > { %p1864_p11 = scmp.eq.s32.totalorder %s1861_s4, 0 }
 0x16b   : > { %s2734_s22 = sshrl.u32 (!%p1864_p11), %s2939_s25, 6 }
 0x16c   : > { %1253 = sbr.rel (%p1864_p11) target bundleno = 451 (0x1c3), region = 44  ;;  %p1865_p8 = scmp.le.s32.totalorder (!%p1864_p11), %s2734_s22, 0 }
 0x173   : > { %1666 = sbr.rel (%p1865_p8) target bundleno = 430 (0x1ae), region = 122  ;;  %s2929_s16 = smov (!%p1865_p8), %s2728_s30 }
 0x174   : > { %s2930_s5 = smov (!%p1865_p8), %s2535_s19  ;;  %s2743_s6 = smov (!%p1865_p8), 0  }
 0x175   : > { %s2745_s9 = smov (!%p1865_p8), 0  }
 0x17a LB: >> { %v1269_v40 = vld [vmem:[%s2297_s5] sm:$0xf]  ;;  %v1271_v41 = vld [vmem:[%s2297_s5 + $0x4] sm:$0xf]  ;;  %v1273_v42 = vld [vmem:[%s2297_s5 + $0x8] sm:$0xf]  ;;  %s2305_s9 = sphi %s2745_s9, %s1263_s9   ;;  %s2301_s6 = sphi %s2743_s6, %s2931_s6   ;;  %s2297_s5 = sphi %s2930_s5, %s1402_s5   ;;  %s2293_s16 = sphi %s2929_s16, %s1403_s16  }
 0x17b   : >> { %1270 = vst [vmem:[%s2293_s16] sm:$0xf] %v1269_v40  ;;  %1272 = vst [vmem:[%s2293_s16 + $0x4] sm:$0xf] %v1271_v41  ;;  %v1275_v43 = vld [vmem:[%s2297_s5 + $0xc] sm:$0xf]  ;;  %s1397_s27 = sadd.s32 1, %s2301_s6 }
 0x17c   : >> { %1274 = vst [vmem:[%s2293_s16 + $0x8] sm:$0xf] %v1273_v42  ;;  %v1277_v44 = vld [vmem:[%s2297_s5 + $0x10] sm:$0xf]  ;;  %v1279_v45 = vld [vmem:[%s2297_s5 + $0x14] sm:$0xf]  ;;  %p1398_p6 = scmp.ge.s32.totalorder %s1397_s27, %s2734_s22 }
 0x17d   : >> { %1276 = vst [vmem:[%s2293_s16 + $0xc] sm:$0xf] %v1275_v43  ;;  %1278 = vst [vmem:[%s2293_s16 + $0x10] sm:$0xf] %v1277_v44  ;;  %v1281_v46 = vld [vmem:[%s2297_s5 + $0x18] sm:$0xf] }
 0x17e   : >> { %1280 = vst [vmem:[%s2293_s16 + $0x14] sm:$0xf] %v1279_v45  ;;  %v1283_v47 = vld [vmem:[%s2297_s5 + $0x1c] sm:$0xf]  ;;  %v1285_v48 = vld [vmem:[%s2297_s5 + $0x20] sm:$0xf] }
 0x17f   : >> { %1282 = vst [vmem:[%s2293_s16 + $0x18] sm:$0xf] %v1281_v46  ;;  %1284 = vst [vmem:[%s2293_s16 + $0x1c] sm:$0xf] %v1283_v47  ;;  %v1287_v49 = vld [vmem:[%s2297_s5 + $0x24] sm:$0xf] }
 0x180   : >> { %1286 = vst [vmem:[%s2293_s16 + $0x20] sm:$0xf] %v1285_v48  ;;  %v1289_v50 = vld [vmem:[%s2297_s5 + $0x28] sm:$0xf]  ;;  %v1291_v51 = vld [vmem:[%s2297_s5 + $0x2c] sm:$0xf] }
 0x181   : >> { %1288 = vst [vmem:[%s2293_s16 + $0x24] sm:$0xf] %v1287_v49  ;;  %1290 = vst [vmem:[%s2293_s16 + $0x28] sm:$0xf] %v1289_v50  ;;  %v1293_v52 = vld [vmem:[%s2297_s5 + $0x30] sm:$0xf] }
 0x182   : >> { %1292 = vst [vmem:[%s2293_s16 + $0x2c] sm:$0xf] %v1291_v51  ;;  %v1295_v53 = vld [vmem:[%s2297_s5 + $0x34] sm:$0xf]  ;;  %v1297_v54 = vld [vmem:[%s2297_s5 + $0x38] sm:$0xf] }
 0x183   : >> { %1294 = vst [vmem:[%s2293_s16 + $0x30] sm:$0xf] %v1293_v52  ;;  %1296 = vst [vmem:[%s2293_s16 + $0x34] sm:$0xf] %v1295_v53  ;;  %v1299_v55 = vld [vmem:[%s2297_s5 + $0x3c] sm:$0xf] }
 0x184   : >> { %1298 = vst [vmem:[%s2293_s16 + $0x38] sm:$0xf] %v1297_v54  ;;  %v1301_v56 = vld [vmem:[%s2297_s5 + $0x40] sm:$0xf]  ;;  %v1303_v57 = vld [vmem:[%s2297_s5 + $0x44] sm:$0xf] }
 0x185   : >> { %1300 = vst [vmem:[%s2293_s16 + $0x3c] sm:$0xf] %v1299_v55  ;;  %1302 = vst [vmem:[%s2293_s16 + $0x40] sm:$0xf] %v1301_v56  ;;  %v1305_v58 = vld [vmem:[%s2297_s5 + $0x48] sm:$0xf] }
 0x186   : >> { %1304 = vst [vmem:[%s2293_s16 + $0x44] sm:$0xf] %v1303_v57  ;;  %v1307_v59 = vld [vmem:[%s2297_s5 + $0x4c] sm:$0xf]  ;;  %v1309_v60 = vld [vmem:[%s2297_s5 + $0x50] sm:$0xf] }
 0x187   : >> { %1306 = vst [vmem:[%s2293_s16 + $0x48] sm:$0xf] %v1305_v58  ;;  %1308 = vst [vmem:[%s2293_s16 + $0x4c] sm:$0xf] %v1307_v59  ;;  %v1311_v61 = vld [vmem:[%s2297_s5 + $0x54] sm:$0xf] }
 0x188   : >> { %1310 = vst [vmem:[%s2293_s16 + $0x50] sm:$0xf] %v1309_v60  ;;  %v1313_v62 = vld [vmem:[%s2297_s5 + $0x58] sm:$0xf]  ;;  %v1315_v63 = vld [vmem:[%s2297_s5 + $0x5c] sm:$0xf] }
 0x189   : >> { %1312 = vst [vmem:[%s2293_s16 + $0x54] sm:$0xf] %v1311_v61  ;;  %1314 = vst [vmem:[%s2293_s16 + $0x58] sm:$0xf] %v1313_v62  ;;  %v1317_v0 = vld [vmem:[%s2297_s5 + $0x60] sm:$0xf] }
 0x18a   : >> { %1316 = vst [vmem:[%s2293_s16 + $0x5c] sm:$0xf] %v1315_v63  ;;  %v1319_v1 = vld [vmem:[%s2297_s5 + $0x64] sm:$0xf]  ;;  %v1321_v2 = vld [vmem:[%s2297_s5 + $0x68] sm:$0xf] }
 0x18b   : >> { %1318 = vst [vmem:[%s2293_s16 + $0x60] sm:$0xf] %v1317_v0  ;;  %1320 = vst [vmem:[%s2293_s16 + $0x64] sm:$0xf] %v1319_v1  ;;  %v1323_v3 = vld [vmem:[%s2297_s5 + $0x6c] sm:$0xf] }
 0x18c   : >> { %1322 = vst [vmem:[%s2293_s16 + $0x68] sm:$0xf] %v1321_v2  ;;  %v1325_v4 = vld [vmem:[%s2297_s5 + $0x70] sm:$0xf]  ;;  %v1327_v5 = vld [vmem:[%s2297_s5 + $0x74] sm:$0xf] }
 0x18d   : >> { %1324 = vst [vmem:[%s2293_s16 + $0x6c] sm:$0xf] %v1323_v3  ;;  %1326 = vst [vmem:[%s2293_s16 + $0x70] sm:$0xf] %v1325_v4  ;;  %v1329_v6 = vld [vmem:[%s2297_s5 + $0x78] sm:$0xf] }
 0x18e   : >> { %1328 = vst [vmem:[%s2293_s16 + $0x74] sm:$0xf] %v1327_v5  ;;  %v1331_v7 = vld [vmem:[%s2297_s5 + $0x7c] sm:$0xf]  ;;  %v1333_v8 = vld [vmem:[%s2297_s5 + $0x80] sm:$0xf] }
 0x18f   : >> { %1330 = vst [vmem:[%s2293_s16 + $0x78] sm:$0xf] %v1329_v6  ;;  %1332 = vst [vmem:[%s2293_s16 + $0x7c] sm:$0xf] %v1331_v7  ;;  %v1335_v9 = vld [vmem:[%s2297_s5 + $0x84] sm:$0xf] }
 0x190   : >> { %1334 = vst [vmem:[%s2293_s16 + $0x80] sm:$0xf] %v1333_v8  ;;  %v1337_v10 = vld [vmem:[%s2297_s5 + $0x88] sm:$0xf]  ;;  %v1339_v11 = vld [vmem:[%s2297_s5 + $0x8c] sm:$0xf] }
 0x191   : >> { %1336 = vst [vmem:[%s2293_s16 + $0x84] sm:$0xf] %v1335_v9  ;;  %1338 = vst [vmem:[%s2293_s16 + $0x88] sm:$0xf] %v1337_v10  ;;  %v1341_v12 = vld [vmem:[%s2297_s5 + $0x90] sm:$0xf] }
 0x192   : >> { %1340 = vst [vmem:[%s2293_s16 + $0x8c] sm:$0xf] %v1339_v11  ;;  %v1343_v13 = vld [vmem:[%s2297_s5 + $0x94] sm:$0xf]  ;;  %v1345_v14 = vld [vmem:[%s2297_s5 + $0x98] sm:$0xf] }
 0x193   : >> { %1342 = vst [vmem:[%s2293_s16 + $0x90] sm:$0xf] %v1341_v12  ;;  %1344 = vst [vmem:[%s2293_s16 + $0x94] sm:$0xf] %v1343_v13  ;;  %v1347_v15 = vld [vmem:[%s2297_s5 + $0x9c] sm:$0xf] }
 0x194   : >> { %1346 = vst [vmem:[%s2293_s16 + $0x98] sm:$0xf] %v1345_v14  ;;  %v1349_v16 = vld [vmem:[%s2297_s5 + $0xa0] sm:$0xf]  ;;  %v1351_v17 = vld [vmem:[%s2297_s5 + $0xa4] sm:$0xf] }
 0x195   : >> { %1348 = vst [vmem:[%s2293_s16 + $0x9c] sm:$0xf] %v1347_v15  ;;  %1350 = vst [vmem:[%s2293_s16 + $0xa0] sm:$0xf] %v1349_v16  ;;  %v1353_v18 = vld [vmem:[%s2297_s5 + $0xa8] sm:$0xf] }
 0x196   : >> { %1352 = vst [vmem:[%s2293_s16 + $0xa4] sm:$0xf] %v1351_v17  ;;  %v1355_v19 = vld [vmem:[%s2297_s5 + $0xac] sm:$0xf]  ;;  %v1357_v20 = vld [vmem:[%s2297_s5 + $0xb0] sm:$0xf] }
 0x197   : >> { %1354 = vst [vmem:[%s2293_s16 + $0xa8] sm:$0xf] %v1353_v18  ;;  %1356 = vst [vmem:[%s2293_s16 + $0xac] sm:$0xf] %v1355_v19  ;;  %v1359_v21 = vld [vmem:[%s2297_s5 + $0xb4] sm:$0xf] }
 0x198   : >> { %1358 = vst [vmem:[%s2293_s16 + $0xb0] sm:$0xf] %v1357_v20  ;;  %v1361_v22 = vld [vmem:[%s2297_s5 + $0xb8] sm:$0xf]  ;;  %v1363_v23 = vld [vmem:[%s2297_s5 + $0xbc] sm:$0xf] }
 0x199   : >> { %1360 = vst [vmem:[%s2293_s16 + $0xb4] sm:$0xf] %v1359_v21  ;;  %1362 = vst [vmem:[%s2293_s16 + $0xb8] sm:$0xf] %v1361_v22  ;;  %v1365_v24 = vld [vmem:[%s2297_s5 + $0xc0] sm:$0xf] }
 0x19a   : >> { %1364 = vst [vmem:[%s2293_s16 + $0xbc] sm:$0xf] %v1363_v23  ;;  %v1367_v25 = vld [vmem:[%s2297_s5 + $0xc4] sm:$0xf]  ;;  %v1369_v26 = vld [vmem:[%s2297_s5 + $0xc8] sm:$0xf] }
 0x19b   : >> { %1366 = vst [vmem:[%s2293_s16 + $0xc0] sm:$0xf] %v1365_v24  ;;  %1368 = vst [vmem:[%s2293_s16 + $0xc4] sm:$0xf] %v1367_v25  ;;  %v1371_v27 = vld [vmem:[%s2297_s5 + $0xcc] sm:$0xf] }
 0x19c   : >> { %1370 = vst [vmem:[%s2293_s16 + $0xc8] sm:$0xf] %v1369_v26  ;;  %v1373_v28 = vld [vmem:[%s2297_s5 + $0xd0] sm:$0xf]  ;;  %v1375_v29 = vld [vmem:[%s2297_s5 + $0xd4] sm:$0xf] }
 0x19d   : >> { %1372 = vst [vmem:[%s2293_s16 + $0xcc] sm:$0xf] %v1371_v27  ;;  %1374 = vst [vmem:[%s2293_s16 + $0xd0] sm:$0xf] %v1373_v28  ;;  %v1377_v30 = vld [vmem:[%s2297_s5 + $0xd8] sm:$0xf] }
 0x19e   : >> { %1376 = vst [vmem:[%s2293_s16 + $0xd4] sm:$0xf] %v1375_v29  ;;  %v1379_v31 = vld [vmem:[%s2297_s5 + $0xdc] sm:$0xf]  ;;  %v1381_v32 = vld [vmem:[%s2297_s5 + $0xe0] sm:$0xf] }
 0x19f   : >> { %1378 = vst [vmem:[%s2293_s16 + $0xd8] sm:$0xf] %v1377_v30  ;;  %1380 = vst [vmem:[%s2293_s16 + $0xdc] sm:$0xf] %v1379_v31  ;;  %v1383_v33 = vld [vmem:[%s2297_s5 + $0xe4] sm:$0xf] }
 0x1a0   : >> { %1382 = vst [vmem:[%s2293_s16 + $0xe0] sm:$0xf] %v1381_v32  ;;  %v1385_v34 = vld [vmem:[%s2297_s5 + $0xe8] sm:$0xf]  ;;  %v1387_v35 = vld [vmem:[%s2297_s5 + $0xec] sm:$0xf] }
 0x1a1   : >> { %1384 = vst [vmem:[%s2293_s16 + $0xe4] sm:$0xf] %v1383_v33  ;;  %1386 = vst [vmem:[%s2293_s16 + $0xe8] sm:$0xf] %v1385_v34  ;;  %v1389_v37 = vld [vmem:[%s2297_s5 + $0xf0] sm:$0xf] }
 0x1a2   : >> { %1388 = vst [vmem:[%s2293_s16 + $0xec] sm:$0xf] %v1387_v35  ;;  %v1391_v38 = vld [vmem:[%s2297_s5 + $0xf4] sm:$0xf]  ;;  %v1393_v36 = vld [vmem:[%s2297_s5 + $0xf8] sm:$0xf] }
 0x1a3   : >> { %1390 = vst [vmem:[%s2293_s16 + $0xf0] sm:$0xf] %v1389_v37  ;;  %1392 = vst [vmem:[%s2293_s16 + $0xf4] sm:$0xf] %v1391_v38  ;;  %v1395_v39 = vld [vmem:[%s2297_s5 + $0xfc] sm:$0xf] }
 0x1a4   : >> { %1394 = vst [vmem:[%s2293_s16 + $0xf8] sm:$0xf] %v1393_v36  ;;  %1396 = vst [vmem:[%s2293_s16 + $0xfc] sm:$0xf] %v1395_v39  ;;  %s2941_s27 = smov (%p1398_p6, %s1397_s27), 0  ;;  %s1263_s9 = sadd.s32 1, %s2305_s9  }
 0x1a5   : >> { %s1866_s29 = sshll.u32 %s2941_s27, 8  ;;  %p1262_p9 = scmp.ge.s32.totalorder %s1263_s9, %s2734_s22 }
 0x1a6   : >> { %s1402_s5 = scalar_lea.vmem %s2535_s19, %s1866_s29 [#allocation4]   ;;  %s1403_s16 = scalar_lea.vmem %s2728_s30, %s1866_s29  }
 0x1a7   : >> { %s2931_s6 = smov %s2941_s27  ;;  %1265 = sbr.rel (!%p1262_p9) target bundleno = 378 (0x17a), region = 128 }
 0x1ae PF: > { %s2902_s15 = sand.u32 63, %s2939_s25   ;;  %s1942_s7 = sshll.u32 %s2734_s22, 8 }
 0x1af   : > { %s1408_s8 = scalar_lea.vmem %s2535_s19, %s1942_s7 [#allocation4]   ;;  %s1410_s10 = scalar_lea.vmem %s2728_s30, %s1942_s7  }
 0x1b0   : > { %p1871_p10 = scmp.le.s32.totalorder %s2902_s15, 0 }
 0x1b1   : > { %s2307_s21 = smov (!%p1871_p10), %s1410_s10   ;;  %s2311_s11 = smov (!%p1871_p10), %s1408_s8  }
 0x1b2   : > { %1680 = sbr.rel (%p1871_p10) target bundleno = 451 (0x1c3), region = 133  ;;  %s2315_s12 = smov (!%p1871_p10), 0  }
 0x1b3   : > { %s2319_s18 = smov (!%p1871_p10), 0  }
 0x1b9 LB: >> { %v1420_v40 = vld [vmem:[%s2313_s11] sm:$0xf]  ;;  %s1422_s23 = sadd.s32 1, %s2317_s12  ;;  %s1414_s18 = sadd.s32 1, %s2321_s18   ;;  %s2321_s18 = sphi %s2319_s18, %s1414_s18   ;;  %s2317_s12 = sphi %s2315_s12, %s2316_s12   ;;  %s2313_s11 = sphi %s2311_s11, %s1427_s11   ;;  %s2309_s21 = sphi %s2307_s21, %s1428_s21  }
 0x1ba   : >> { %1421 = vst [vmem:[%s2309_s21] sm:$0xf] %v1420_v40  ;;  %p1423_p12 = scmp.ge.s32.totalorder %s1422_s23, %s2902_s15  ;;  %p1413_p13 = scmp.ge.s32.totalorder %s1414_s18, %s2902_s15 }
 0x1bc   : >> { %s2943_s23 = smov (%p1423_p12, %s1422_s23), 0  ;;  %1416 = sbr.rel (!%p1413_p13) target bundleno = 441 (0x1b9), region = 139 }
 0x1bd   : >> { %s1872_s19 = sshll.u32 %s2943_s23, 2  ;;  %s2316_s12 = smov %s2943_s23  }
 0x1be   : >> { %s1427_s11 = scalar_lea.vmem %s1408_s8, %s1872_s19 [#allocation4]   ;;  %s1428_s21 = scalar_lea.vmem %s1410_s10, %s1872_s19  }
 0x1c3 PF: > { %p13_p1 = scmp.ge.s32.totalorder %s2368_s17, 9   ;;  %s2932_s12 = smov %s2281_s13 }
 0x1c4   : > { %s2933_s13 = smov %s2285_s14  ;;  %s2934_s14 = smov %s2378_s20 }
 0x1c5   : > { %s2935_s15 = smov %s2368_s17  ;;  %15 = sbr.rel (!%p13_p1) target bundleno = 3 (0x3), region = 150 }
 0x1cc   :  { %1615 = vsyncpa [#allocation3], 1 }
 0x1cd   :  { %1617 = vsyncpa [#allocation3 + $0x1], 1 }

// kernel: critic_forward.6
= control target key start
LH: loop header
LB: loop body
LE: loop exit
PB: predicated region body
PF: predicated region fallthrough
CT: control target
= control target key end

     0   :  { %s3530_s12 = smov 0   ;;  %s3532_s13 = smov 0   ;;  %s4229_s0 = inlined_call_operand.vmem [shape: bf16[726,512], index: 0, kind: input, shape index: {}]   ;;  %s4230_s1 = inlined_call_operand.vmem [shape: bf16[512,64], index: 1, kind: input, shape index: {}]   ;;  %s4231_s2 = inlined_call_operand.vmem [shape: f32[1,64], index: 2, kind: input, shape index: {}]   ;;  %s4232_s3 = inlined_call_operand.vmem [shape: bf16[726,64], index: 3, kind: output, shape index: {}]  }
   0x1   :  { %s3534_s14 = smov 0  }
   0x2 LB: > { %s3543_s15 = sadd.s32 4294967295, %s3475_s14   ;;  %s3545_s16 = sadd.s32 1, %s3475_s14   ;;  %s3475_s14 = sphi %s3534_s14, %s4239_s14   ;;  %s3471_s13 = sphi %s3532_s13, %s4238_s13   ;;  %s3467_s12 = sphi %s3530_s12, %s4237_s12  }
   0x3   : > { %s85_s17 = ssub.s32 %s3475_s14, %s3545_s16  ;;  %s88_s18 = sadd.s32 1, %s3471_s13 }
   0x4   : > { %p86_p0 = scmp.eq.s32.totalorder %s85_s17, 0  ;;  %p98_p1 = scmp.ne.s32.totalorder %s3471_s13, %s3467_s12 }
   0x5   : > { %p99_p2 = scmp.eq.s32.totalorder %s3543_s15, 1  ;;  %p2664_p3 = scmp.ge.s32.totalorder %s3475_s14, 1 }
   0x6   : > { %s3553_s19 = scalar_select %p86_p0, %s3471_s13, %s88_s18  }
   0x7   : > { %p3555_p4 = por %p99_p2, %p98_p1  ;;  %p149_p5 = scmp.lt.s32.totalorder %s3475_s14, 3 }
   0x9   : > { %p150_p6 = pnand %p2664_p3, %p149_p5 }
   0xa   : > { %v3196_v0 = vld [vmem:[%s4230_s1] sm:$0xff] (!%p150_p6)   ;;  %v3509_v1 = vmov (!%p150_p6), 0   ;;  %v3198_v3 = vld [vmem:[%s4230_s1 + $0x8] sm:$0xff] (!%p150_p6)   ;;  %v3200_v5 = vld [vmem:[%s4230_s1 + $0x10] sm:$0xff] (!%p150_p6)   ;;  %s3600_s18 = sshll.u32 (!%p150_p6), %s3543_s15, 6  ;;  %s175_s6 = sand.u32 (!%p150_p6), 1, %s3467_s12  }
   0xb   : > { %153 = sbr.rel (%p150_p6) target bundleno = 637 (0x27d), region = 32  ;;  %1232 = vmatprep.subr.bf16.mxu1 (!%p150_p6), %v3509_v1  ;;  %1521 = vmatprep.subr.bf16.mxu0 (!%p150_p6), %v3509_v1  ;;  %v3197_v2 = vld [vmem:[%s4230_s1 + $0x80] sm:$0xff] (!%p150_p6)   ;;  %v3199_v4 = vld [vmem:[%s4230_s1 + $0x88] sm:$0xff] (!%p150_p6)   ;;  %v3201_v6 = vld [vmem:[%s4230_s1 + $0x90] sm:$0xff] (!%p150_p6)   ;;  %p184_p7 = scmp.lt.s32.totalorder (!%p150_p6), %s3600_s18, 90  ;;  %vm2130_vm0 = vcmask (!%p150_p6), 519168  }
   0xc   : > { %1233 = vmatpush1.bf16.msra.mxu1 (!%p150_p6), %v3196_v0  ;;  %1522 = vmatpush1.bf16.msra.mxu0 (!%p150_p6), %v3197_v2  ;;  %v3202_v7 = vld [vmem:[%s4230_s1 + $0x18] sm:$0xff] (!%p150_p6)   ;;  %v3204_v9 = vld [vmem:[%s4230_s1 + $0x20] sm:$0xff] (!%p150_p6)   ;;  %v3206_v11 = vld [vmem:[%s4230_s1 + $0x28] sm:$0xff] (!%p150_p6)  }
   0xd   : > { %1234 = vmatprep.subr.bf16.mxu1 (!%p150_p6), %v3509_v1  ;;  %1523 = vmatprep.subr.bf16.mxu0 (!%p150_p6), %v3509_v1  ;;  %v3203_v8 = vld [vmem:[%s4230_s1 + $0x98] sm:$0xff] (!%p150_p6)   ;;  %v3205_v10 = vld [vmem:[%s4230_s1 + $0xa0] sm:$0xff] (!%p150_p6)   ;;  %v3207_v12 = vld [vmem:[%s4230_s1 + $0xa8] sm:$0xff] (!%p150_p6)  }
   0xe   : > { %v3208_v13 = vld [vmem:[%s4230_s1 + $0x30] sm:$0xff] (!%p150_p6)   ;;  %v3210_v15 = vld [vmem:[%s4230_s1 + $0x38] sm:$0xff] (!%p150_p6)   ;;  %v3212_v17 = vld [vmem:[%s4230_s1 + $0x40] sm:$0xff] (!%p150_p6)  }
   0xf   : > { %v3209_v14 = vld [vmem:[%s4230_s1 + $0xb0] sm:$0xff] (!%p150_p6)   ;;  %v3211_v16 = vld [vmem:[%s4230_s1 + $0xb8] sm:$0xff] (!%p150_p6)   ;;  %v3213_v18 = vld [vmem:[%s4230_s1 + $0xc0] sm:$0xff] (!%p150_p6)  }
  0x10   : > { %1235 = vmatpush1.bf16.msra.mxu1 (!%p150_p6), %v3198_v3  ;;  %1524 = vmatpush1.bf16.msra.mxu0 (!%p150_p6), %v3199_v4  ;;  %v3214_v20 = vld [vmem:[%s4230_s1 + $0x48] sm:$0xff] (!%p150_p6)   ;;  %v3216_v23 = vld [vmem:[%s4230_s1 + $0x50] sm:$0xff] (!%p150_p6)   ;;  %v3218_v25 = vld [vmem:[%s4230_s1 + $0x58] sm:$0xff] (!%p150_p6)  }
  0x11   : > { %1236 = vmatprep.subr.bf16.mxu1 (!%p150_p6), %v3509_v1  ;;  %1525 = vmatprep.subr.bf16.mxu0 (!%p150_p6), %v3509_v1  ;;  %v3215_v22 = vld [vmem:[%s4230_s1 + $0xc8] sm:$0xff] (!%p150_p6)   ;;  %v3217_v24 = vld [vmem:[%s4230_s1 + $0xd0] sm:$0xff] (!%p150_p6)   ;;  %v3219_v26 = vld [vmem:[%s4230_s1 + $0xd8] sm:$0xff] (!%p150_p6)  }
  0x12   : > { %s185_s29 = scalar_select %p184_p7, %s3600_s18, 90  ;;  %v3220_v27 = vld [vmem:[%s4230_s1 + $0x60] sm:$0xff]   ;;  %v3222_v29 = vld [vmem:[%s4230_s1 + $0x68] sm:$0xff]   ;;  %v3224_v31 = vld [vmem:[%s4230_s1 + $0x70] sm:$0xff]  }
  0x13   : > { %v3221_v28 = vld [vmem:[%s4230_s1 + $0xe0] sm:$0xff]   ;;  %v3223_v30 = vld [vmem:[%s4230_s1 + $0xe8] sm:$0xff]   ;;  %v3225_v32 = vld [vmem:[%s4230_s1 + $0xf0] sm:$0xff]   ;;  %s2203_s9 = ssub.s32 (%p3555_p4), 91, %s3600_s18  ;;  %s2976_s10 = sshll.u32 (%p3555_p4), %s3543_s15, 8 }
  0x14   : > { %1237 = vmatpush1.bf16.msra.mxu1 %v3200_v5  ;;  %1526 = vmatpush1.bf16.msra.mxu0 %v3201_v6  ;;  %s2911_s7 = sshll.u32 %s185_s29, 4  ;;  %v3226_v33 = vld [vmem:[%s4230_s1 + $0x78] sm:$0xff]   ;;  %p2204_p8 = scmp.lt.s32.totalorder (%p3555_p4), %s2203_s9, 64 }
  0x15   : > { %1238 = vmatprep.subr.bf16.mxu1 %v3509_v1  ;;  %1527 = vmatprep.subr.bf16.mxu0 %v3509_v1  ;;  %s3634_s14 = scalar_lea.vmem %s4229_s0, %s2911_s7  ;;  %v3227_v34 = vld [vmem:[%s4230_s1 + $0xf8] sm:$0xff]   ;;  %s2665_s7 = sshll.u32 %s175_s6, 8 }
  0x16   : > { %v3230_v19 = vld [vmem:[%s3634_s14 + $0x4] ss:$16 sps:$4 sm:$0xff]   ;;  %v3233_v21 = vld [vmem:[%s3634_s14 + $0xc] ss:$16 sps:$4 sm:$0xff]   ;;  %v3228_v35 = vld [vmem:[%s3634_s14] ss:$16 sps:$4 sm:$0xff]   ;;  %s4037_s21 = scalar_lea.vmem (%p3555_p4), %s4232_s3, %s2976_s10  }
  0x17   : > { %1264 = vmatprep.mubr.bf16.mxu1 %v3230_v19  ;;  %1553 = vmatprep.mubr.bf16.mxu0 %v3233_v21  ;;  %v3231_v36 = vld [vmem:[%s3634_s14 + $0x8] ss:$16 sps:$4 sm:$0xff]   ;;  %v3234_v37 = vld [vmem:[%s3634_s14 + $0x24] ss:$16 sps:$4 sm:$0xff]   ;;  %v3236_v38 = vld [vmem:[%s3634_s14 + $0x2c] ss:$16 sps:$4 sm:$0xff]  }
  0x18   : > { %1239 = vmatpush1.bf16.msra.mxu1 %v3202_v7  ;;  %1528 = vmatpush1.bf16.msra.mxu0 %v3203_v8  ;;  %v3238_v39 = vld [vmem:[%s3634_s14 + $0x20] ss:$16 sps:$4 sm:$0xff]   ;;  %v3239_v40 = vld [vmem:[%s3634_s14 + $0x28] ss:$16 sps:$4 sm:$0xff]   ;;  %v3240_v41 = vld [vmem:[%s3634_s14 + $0x44] ss:$16 sps:$4 sm:$0xff]  }
  0x19   : > { %1240 = vmatprep.subr.bf16.mxu1 %v3509_v1  ;;  %1529 = vmatprep.subr.bf16.mxu0 %v3509_v1  ;;  %v3242_v42 = vld [vmem:[%s3634_s14 + $0x4c] ss:$16 sps:$4 sm:$0xff]   ;;  %v3244_v43 = vld [vmem:[%s3634_s14 + $0x40] ss:$16 sps:$4 sm:$0xff]   ;;  %v3245_v44 = vld [vmem:[%s3634_s14 + $0x48] ss:$16 sps:$4 sm:$0xff]  }
  0x1a   : > { %v3246_v45 = vld [vmem:[%s3634_s14 + $0x64] ss:$16 sps:$4 sm:$0xff]   ;;  %v3248_v46 = vld [vmem:[%s3634_s14 + $0x6c] ss:$16 sps:$4 sm:$0xff]   ;;  %v3250_v47 = vld [vmem:[%s3634_s14 + $0x60] ss:$16 sps:$4 sm:$0xff]  }
  0x1b   : > { %v3251_v48 = vld [vmem:[%s3634_s14 + $0x68] ss:$16 sps:$4 sm:$0xff]   ;;  %v3252_v49 = vld [vmem:[%s3634_s14 + $0x84] ss:$16 sps:$4 sm:$0xff]   ;;  %v3254_v50 = vld [vmem:[%s3634_s14 + $0x8c] ss:$16 sps:$4 sm:$0xff]  }
  0x1c   : > { %1241 = vmatpush1.bf16.msra.mxu1 %v3204_v9  ;;  %1530 = vmatpush1.bf16.msra.mxu0 %v3205_v10  ;;  %v3256_v51 = vld [vmem:[%s3634_s14 + $0x80] ss:$16 sps:$4 sm:$0xff]   ;;  %v3257_v52 = vld [vmem:[%s3634_s14 + $0x88] ss:$16 sps:$4 sm:$0xff]   ;;  %v3258_v53 = vld [vmem:[%s3634_s14 + $0xa4] ss:$16 sps:$4 sm:$0xff]  }
  0x1d   : > { %1242 = vmatprep.subr.bf16.mxu1 %v3509_v1  ;;  %1531 = vmatprep.subr.bf16.mxu0 %v3509_v1  ;;  %v3260_v54 = vld [vmem:[%s3634_s14 + $0xac] ss:$16 sps:$4 sm:$0xff]   ;;  %v3262_v55 = vld [vmem:[%s3634_s14 + $0xa0] ss:$16 sps:$4 sm:$0xff]   ;;  %v3263_v56 = vld [vmem:[%s3634_s14 + $0xa8] ss:$16 sps:$4 sm:$0xff]  }
  0x1e   : > { %v3264_v57 = vld [vmem:[%s3634_s14 + $0xc4] ss:$16 sps:$4 sm:$0xff]   ;;  %v3266_v58 = vld [vmem:[%s3634_s14 + $0xcc] ss:$16 sps:$4 sm:$0xff]   ;;  %v3268_v59 = vld [vmem:[%s3634_s14 + $0xc0] ss:$16 sps:$4 sm:$0xff]  }
  0x1f   : > { %v3269_v60 = vld [vmem:[%s3634_s14 + $0xc8] ss:$16 sps:$4 sm:$0xff]   ;;  %v3270_v61 = vld [vmem:[%s3634_s14 + $0xe4] ss:$16 sps:$4 sm:$0xff]   ;;  %v3272_v62 = vld [vmem:[%s3634_s14 + $0xec] ss:$16 sps:$4 sm:$0xff]  }
  0x20   : > { %1243 = vmatpush1.bf16.msra.mxu1 %v3206_v11  ;;  %1532 = vmatpush1.bf16.msra.mxu0 %v3207_v12  ;;  %v3274_v63 = vld [vmem:[%s3634_s14 + $0xe0] ss:$16 sps:$4 sm:$0xff]   ;;  %v3275_v0 = vld [vmem:[%s3634_s14 + $0xe8] ss:$16 sps:$4 sm:$0xff]   ;;  %v3278_v2 = vld [vmem:[%s3634_s14 + $0x10c] ss:$16 sps:$4 sm:$0xff]  }
  0x21   : > { %1244 = vmatprep.subr.bf16.mxu1 %v3509_v1  ;;  %1533 = vmatprep.subr.bf16.mxu0 %v3509_v1  ;;  %v3280_v3 = vld [vmem:[%s3634_s14 + $0x100] ss:$16 sps:$4 sm:$0xff]   ;;  %v3281_v4 = vld [vmem:[%s3634_s14 + $0x108] ss:$16 sps:$4 sm:$0xff]   ;;  %v3282_v5 = vld [vmem:[%s3634_s14 + $0x124] ss:$16 sps:$4 sm:$0xff]  }
  0x22   : > { %v3284_v6 = vld [vmem:[%s3634_s14 + $0x12c] ss:$16 sps:$4 sm:$0xff]   ;;  %v3286_v7 = vld [vmem:[%s3634_s14 + $0x120] ss:$16 sps:$4 sm:$0xff]   ;;  %v3287_v8 = vld [vmem:[%s3634_s14 + $0x128] ss:$16 sps:$4 sm:$0xff]  }
  0x23   : > { %v3288_v9 = vld [vmem:[%s3634_s14 + $0x144] ss:$16 sps:$4 sm:$0xff]   ;;  %v3290_v10 = vld [vmem:[%s3634_s14 + $0x14c] ss:$16 sps:$4 sm:$0xff]   ;;  %v3292_v11 = vld [vmem:[%s3634_s14 + $0x140] ss:$16 sps:$4 sm:$0xff]  }
  0x24   : > { %1245 = vmatpush1.bf16.msra.mxu1 %v3208_v13  ;;  %1534 = vmatpush1.bf16.msra.mxu0 %v3209_v14  ;;  %v3293_v12 = vld [vmem:[%s3634_s14 + $0x148] ss:$16 sps:$4 sm:$0xff]   ;;  %v3294_v13 = vld [vmem:[%s3634_s14 + $0x164] ss:$16 sps:$4 sm:$0xff]   ;;  %v3296_v14 = vld [vmem:[%s3634_s14 + $0x16c] ss:$16 sps:$4 sm:$0xff]  }
  0x25   : > { %1246 = vmatprep.subr.bf16.mxu1 %v3509_v1  ;;  %1535 = vmatprep.subr.bf16.mxu0 %v3509_v1  ;;  %v3304_v19 = vld [vmem:[%s3634_s14 + $0x180] ss:$16 sps:$4 sm:$0xff]   ;;  %v3306_v21 = vld [vmem:[%s3634_s14 + $0x1a4] ss:$16 sps:$4 sm:$0xff]   ;;  %s3819_s12 = scalar_lea.vmem [#allocation2], %s2665_s7  }
  0x28   : > { %1247 = vmatpush1.bf16.msra.mxu1 %v3210_v15  ;;  %1536 = vmatpush1.bf16.msra.mxu0 %v3211_v16  ;;  %v3298_v15 = vld [vmem:[%s3634_s14 + $0x160] ss:$16 sps:$4 sm:$0xff]   ;;  %v3299_v16 = vld [vmem:[%s3634_s14 + $0x168] ss:$16 sps:$4 sm:$0xff]  }
  0x29   : > { %1248 = vmatprep.subr.bf16.mxu1 %v3509_v1  ;;  %1537 = vmatprep.subr.bf16.mxu0 %v3509_v1 }
  0x2c   : > { %1249 = vmatpush1.bf16.msra.mxu1 %v3212_v17  ;;  %1538 = vmatpush1.bf16.msra.mxu0 %v3213_v18  ;;  %v3300_v17 = vld [vmem:[%s3634_s14 + $0x184] ss:$16 sps:$4 sm:$0xff]   ;;  %v3302_v18 = vld [vmem:[%s3634_s14 + $0x18c] ss:$16 sps:$4 sm:$0xff]  }
  0x2d   : > { %1250 = vmatprep.subr.bf16.mxu1 %v3509_v1  ;;  %1539 = vmatprep.subr.bf16.mxu0 %v3509_v1 }
  0x30   : > { %1251 = vmatpush1.bf16.msra.mxu1 %v3214_v20  ;;  %1540 = vmatpush1.bf16.msra.mxu0 %v3215_v22  ;;  %v3305_v20 = vld [vmem:[%s3634_s14 + $0x188] ss:$16 sps:$4 sm:$0xff]   ;;  %v3308_v22 = vld [vmem:[%s3634_s14 + $0x1ac] ss:$16 sps:$4 sm:$0xff]  }
  0x31   : > { %1252 = vmatprep.subr.bf16.mxu1 %v3509_v1  ;;  %1541 = vmatprep.subr.bf16.mxu0 %v3509_v1 }
  0x34   : > { %1253 = vmatpush1.bf16.msra.mxu1 %v3216_v23  ;;  %1542 = vmatpush1.bf16.msra.mxu0 %v3217_v24  ;;  %v3310_v23 = vld [vmem:[%s3634_s14 + $0x1a0] ss:$16 sps:$4 sm:$0xff]   ;;  %v3311_v24 = vld [vmem:[%s3634_s14 + $0x1a8] ss:$16 sps:$4 sm:$0xff]  }
  0x35   : > { %1254 = vmatprep.subr.bf16.mxu1 %v3509_v1  ;;  %1543 = vmatprep.subr.bf16.mxu0 %v3509_v1 }
  0x38   : > { %1255 = vmatpush1.bf16.msra.mxu1 %v3218_v25  ;;  %1544 = vmatpush1.bf16.msra.mxu0 %v3219_v26  ;;  %v3312_v25 = vld [vmem:[%s3634_s14 + $0x1c4] ss:$16 sps:$4 sm:$0xff]   ;;  %v3314_v26 = vld [vmem:[%s3634_s14 + $0x1cc] ss:$16 sps:$4 sm:$0xff]  }
  0x39   : > { %1256 = vmatprep.subr.bf16.mxu1 %v3509_v1  ;;  %1545 = vmatprep.subr.bf16.mxu0 %v3509_v1 }
  0x3c   : > { %1257 = vmatpush1.bf16.msra.mxu1 %v3220_v27  ;;  %1546 = vmatpush1.bf16.msra.mxu0 %v3221_v28  ;;  %v3316_v27 = vld [vmem:[%s3634_s14 + $0x1c0] ss:$16 sps:$4 sm:$0xff]   ;;  %v3317_v28 = vld [vmem:[%s3634_s14 + $0x1c8] ss:$16 sps:$4 sm:$0xff]  }
  0x3d   : > { %1258 = vmatprep.subr.bf16.mxu1 %v3509_v1  ;;  %1547 = vmatprep.subr.bf16.mxu0 %v3509_v1 }
  0x40   : > { %1259 = vmatpush1.bf16.msra.mxu1 %v3222_v29  ;;  %1548 = vmatpush1.bf16.msra.mxu0 %v3223_v30  ;;  %v3318_v29 = vld [vmem:[%s3634_s14 + $0x1e4] ss:$16 sps:$4 sm:$0xff]   ;;  %v3320_v30 = vld [vmem:[%s3634_s14 + $0x1ec] ss:$16 sps:$4 sm:$0xff]  }
  0x41   : > { %1260 = vmatprep.subr.bf16.mxu1 %v3509_v1  ;;  %1549 = vmatprep.subr.bf16.mxu0 %v3509_v1 }
  0x44   : > { %1261 = vmatpush1.bf16.msra.mxu1 %v3224_v31  ;;  %1550 = vmatpush1.bf16.msra.mxu0 %v3225_v32  ;;  %v3322_v31 = vld [vmem:[%s3634_s14 + $0x1e0] ss:$16 sps:$4 sm:$0xff]   ;;  %v3323_v32 = vld [vmem:[%s3634_s14 + $0x1e8] ss:$16 sps:$4 sm:$0xff]  }
  0x45   : > { %1262 = vmatprep.subr.bf16.mxu1 %v3509_v1  ;;  %1551 = vmatprep.subr.bf16.mxu0 %v3509_v1  ;;  %v3276_v1 = vld [vmem:[%s3634_s14 + $0x104] ss:$16 sps:$4 sm:$0xff]  }
  0x48   : > { %1263 = vmatpush1.bf16.msra.mxu1 %v3226_v33  ;;  %1552 = vmatpush1.bf16.msra.mxu0 %v3227_v34  ;;  %v3324_v33 = vld [vmem:[%s3634_s14 + $0x204] ss:$16 sps:$4 sm:$0xff]   ;;  %v3326_v34 = vld [vmem:[%s3634_s14 + $0x20c] ss:$16 sps:$4 sm:$0xff]  }
  0x4b   : > { %1265 = vmatmul.mubr.bf16.vlgmr.msra.gmra.mrb[0].mxu1 %v3228_v35  ;;  %1554 = vmatmul.mubr.bf16.vlgmr.msra.gmra.mrb[0].mxu0 %v3231_v36  ;;  %v3328_v35 = vld [vmem:[%s3634_s14 + $0x200] ss:$16 sps:$4 sm:$0xff]   ;;  %v3329_v36 = vld [vmem:[%s3634_s14 + $0x208] ss:$16 sps:$4 sm:$0xff]  }
  0x4c   : > { %1272 = vmatprep.mubr.bf16.mxu1 %v3234_v37  ;;  %1561 = vmatprep.mubr.bf16.mxu0 %v3236_v38  ;;  %v3330_v37 = vld [vmem:[%s3634_s14 + $0x224] ss:$16 sps:$4 sm:$0xff]   ;;  %v3332_v38 = vld [vmem:[%s3634_s14 + $0x22c] ss:$16 sps:$4 sm:$0xff]  }
  0x53   : > { %1273 = vmatmul.mubr.bf16.gmra.mrb[4].mxu1 %v3238_v39  ;;  %1562 = vmatmul.mubr.bf16.gmra.mrb[4].mxu0 %v3239_v40  ;;  %v3334_v39 = vld [vmem:[%s3634_s14 + $0x220] ss:$16 sps:$4 sm:$0xff]   ;;  %v3335_v40 = vld [vmem:[%s3634_s14 + $0x228] ss:$16 sps:$4 sm:$0xff]  }
  0x54   : > { %1280 = vmatprep.mubr.bf16.mxu1 %v3240_v41  ;;  %1569 = vmatprep.mubr.bf16.mxu0 %v3242_v42  ;;  %v3336_v41 = vld [vmem:[%s3634_s14 + $0x244] ss:$16 sps:$4 sm:$0xff]   ;;  %v3338_v42 = vld [vmem:[%s3634_s14 + $0x24c] ss:$16 sps:$4 sm:$0xff]  }
  0x5b   : > { %1281 = vmatmul.mubr.bf16.gmra.mrb[8].mxu1 %v3244_v43  ;;  %1570 = vmatmul.mubr.bf16.gmra.mrb[8].mxu0 %v3245_v44  ;;  %v3340_v43 = vld [vmem:[%s3634_s14 + $0x240] ss:$16 sps:$4 sm:$0xff]   ;;  %v3341_v44 = vld [vmem:[%s3634_s14 + $0x248] ss:$16 sps:$4 sm:$0xff]  }
  0x5c   : > { %1288 = vmatprep.mubr.bf16.mxu1 %v3246_v45  ;;  %1577 = vmatprep.mubr.bf16.mxu0 %v3248_v46  ;;  %v3342_v45 = vld [vmem:[%s3634_s14 + $0x264] ss:$16 sps:$4 sm:$0xff]   ;;  %v3344_v46 = vld [vmem:[%s3634_s14 + $0x26c] ss:$16 sps:$4 sm:$0xff]  }
  0x63   : > { %1289 = vmatmul.mubr.bf16.gmra.mrb[12].mxu1 %v3250_v47  ;;  %1578 = vmatmul.mubr.bf16.gmra.mrb[12].mxu0 %v3251_v48  ;;  %v3346_v47 = vld [vmem:[%s3634_s14 + $0x260] ss:$16 sps:$4 sm:$0xff]   ;;  %v3347_v48 = vld [vmem:[%s3634_s14 + $0x268] ss:$16 sps:$4 sm:$0xff]  }
  0x64   : > { %1296 = vmatprep.mubr.bf16.mxu1 %v3252_v49  ;;  %1585 = vmatprep.mubr.bf16.mxu0 %v3254_v50  ;;  %v3348_v49 = vld [vmem:[%s3634_s14 + $0x284] ss:$16 sps:$4 sm:$0xff]   ;;  %v3350_v50 = vld [vmem:[%s3634_s14 + $0x28c] ss:$16 sps:$4 sm:$0xff]  }
  0x6b   : > { %1297 = vmatmul.mubr.bf16.gmra.mrb[16].mxu1 %v3256_v51  ;;  %1586 = vmatmul.mubr.bf16.gmra.mrb[16].mxu0 %v3257_v52  ;;  %v3352_v51 = vld [vmem:[%s3634_s14 + $0x280] ss:$16 sps:$4 sm:$0xff]   ;;  %v3353_v52 = vld [vmem:[%s3634_s14 + $0x288] ss:$16 sps:$4 sm:$0xff]  }
  0x6c   : > { %1304 = vmatprep.mubr.bf16.mxu1 %v3258_v53  ;;  %1593 = vmatprep.mubr.bf16.mxu0 %v3260_v54  ;;  %v3354_v53 = vld [vmem:[%s3634_s14 + $0x2a4] ss:$16 sps:$4 sm:$0xff]   ;;  %v3356_v54 = vld [vmem:[%s3634_s14 + $0x2ac] ss:$16 sps:$4 sm:$0xff]  }
  0x73   : > { %1305 = vmatmul.mubr.bf16.gmra.mrb[20].mxu1 %v3262_v55  ;;  %1594 = vmatmul.mubr.bf16.gmra.mrb[20].mxu0 %v3263_v56  ;;  %v3358_v55 = vld [vmem:[%s3634_s14 + $0x2a0] ss:$16 sps:$4 sm:$0xff]   ;;  %v3359_v56 = vld [vmem:[%s3634_s14 + $0x2a8] ss:$16 sps:$4 sm:$0xff]  }
  0x74   : > { %1312 = vmatprep.mubr.bf16.mxu1 %v3264_v57  ;;  %1601 = vmatprep.mubr.bf16.mxu0 %v3266_v58  ;;  %v3360_v57 = vld [vmem:[%s3634_s14 + $0x2c4] ss:$16 sps:$4 sm:$0xff]   ;;  %v3362_v58 = vld [vmem:[%s3634_s14 + $0x2cc] ss:$16 sps:$4 sm:$0xff]  }
  0x7b   : > { %1313 = vmatmul.mubr.bf16.gmra.mrb[24].mxu1 %v3268_v59  ;;  %1602 = vmatmul.mubr.bf16.gmra.mrb[24].mxu0 %v3269_v60  ;;  %v3364_v59 = vld [vmem:[%s3634_s14 + $0x2c0] ss:$16 sps:$4 sm:$0xff]   ;;  %v3365_v60 = vld [vmem:[%s3634_s14 + $0x2c8] ss:$16 sps:$4 sm:$0xff]  }
  0x7c   : > { %1320 = vmatprep.mubr.bf16.mxu1 %v3270_v61  ;;  %1609 = vmatprep.mubr.bf16.mxu0 %v3272_v62  ;;  %v3366_v61 = vld [vmem:[%s3634_s14 + $0x2e4] ss:$16 sps:$4 sm:$0xff]   ;;  %v3368_v62 = vld [vmem:[%s3634_s14 + $0x2ec] ss:$16 sps:$4 sm:$0xff]  }
  0x83   : > { %1321 = vmatmul.mubr.bf16.gmra.mrb[28].mxu1 %v3274_v63  ;;  %1610 = vmatmul.mubr.bf16.gmra.mrb[28].mxu0 %v3275_v0  ;;  %v3370_v63 = vld [vmem:[%s3634_s14 + $0x2e0] ss:$16 sps:$4 sm:$0xff]   ;;  %v3371_v0 = vld [vmem:[%s3634_s14 + $0x2e8] ss:$16 sps:$4 sm:$0xff]  }
  0x84   : > { %1328 = vmatprep.mubr.bf16.mxu1 %v3276_v1  ;;  %1617 = vmatprep.mubr.bf16.mxu0 %v3278_v2  ;;  %v3372_v1 = vld [vmem:[%s3634_s14 + $0x304] ss:$16 sps:$4 sm:$0xff]   ;;  %v3374_v2 = vld [vmem:[%s3634_s14 + $0x30c] ss:$16 sps:$4 sm:$0xff]  }
  0x8b   : > { %1329 = vmatmul.mubr.bf16.gmra.mrb[32].mxu1 %v3280_v3  ;;  %1618 = vmatmul.mubr.bf16.gmra.mrb[32].mxu0 %v3281_v4  ;;  %v3376_v3 = vld [vmem:[%s3634_s14 + $0x300] ss:$16 sps:$4 sm:$0xff]   ;;  %v3377_v4 = vld [vmem:[%s3634_s14 + $0x308] ss:$16 sps:$4 sm:$0xff]  }
  0x8c   : > { %1336 = vmatprep.mubr.bf16.mxu1 %v3282_v5  ;;  %1625 = vmatprep.mubr.bf16.mxu0 %v3284_v6  ;;  %v3378_v5 = vld [vmem:[%s3634_s14 + $0x324] ss:$16 sps:$4 sm:$0xff]   ;;  %v3380_v6 = vld [vmem:[%s3634_s14 + $0x32c] ss:$16 sps:$4 sm:$0xff]  }
  0x93   : > { %1337 = vmatmul.mubr.bf16.gmra.mrb[36].mxu1 %v3286_v7  ;;  %1626 = vmatmul.mubr.bf16.gmra.mrb[36].mxu0 %v3287_v8  ;;  %v3382_v7 = vld [vmem:[%s3634_s14 + $0x320] ss:$16 sps:$4 sm:$0xff]   ;;  %v3383_v8 = vld [vmem:[%s3634_s14 + $0x328] ss:$16 sps:$4 sm:$0xff]  }
  0x94   : > { %1344 = vmatprep.mubr.bf16.mxu1 %v3288_v9  ;;  %1633 = vmatprep.mubr.bf16.mxu0 %v3290_v10  ;;  %v3384_v9 = vld [vmem:[%s3634_s14 + $0x344] ss:$16 sps:$4 sm:$0xff]   ;;  %v3386_v10 = vld [vmem:[%s3634_s14 + $0x34c] ss:$16 sps:$4 sm:$0xff]  }
  0x9b   : > { %1345 = vmatmul.mubr.bf16.gmra.mrb[40].mxu1 %v3292_v11  ;;  %1634 = vmatmul.mubr.bf16.gmra.mrb[40].mxu0 %v3293_v12  ;;  %v3388_v11 = vld [vmem:[%s3634_s14 + $0x340] ss:$16 sps:$4 sm:$0xff]   ;;  %v3389_v12 = vld [vmem:[%s3634_s14 + $0x348] ss:$16 sps:$4 sm:$0xff]  }
  0x9c   : > { %1352 = vmatprep.mubr.bf16.mxu1 %v3294_v13  ;;  %1641 = vmatprep.mubr.bf16.mxu0 %v3296_v14  ;;  %v3390_v13 = vld [vmem:[%s3634_s14 + $0x364] ss:$16 sps:$4 sm:$0xff]   ;;  %v3392_v14 = vld [vmem:[%s3634_s14 + $0x36c] ss:$16 sps:$4 sm:$0xff]  }
  0xa3   : > { %1353 = vmatmul.mubr.bf16.gmra.mrb[44].mxu1 %v3298_v15  ;;  %1642 = vmatmul.mubr.bf16.gmra.mrb[44].mxu0 %v3299_v16  ;;  %v3810_v15 = vld [vmem:[%s4231_s2] ss:$0 sm:$0xff] }
  0xa4   : > { %1360 = vmatprep.mubr.bf16.mxu1 %v3300_v17  ;;  %1649 = vmatprep.mubr.bf16.mxu0 %v3302_v18 }
  0xab   : > { %1361 = vmatmul.mubr.bf16.gmra.mrb[48].mxu1 %v3304_v19  ;;  %1650 = vmatmul.mubr.bf16.gmra.mrb[48].mxu0 %v3305_v20  ;;  %v3394_v20 = vld [vmem:[%s3634_s14 + $0x360] ss:$16 sps:$4 sm:$0xff]  }
  0xac   : > { %1368 = vmatprep.mubr.bf16.mxu1 %v3306_v21  ;;  %1657 = vmatprep.mubr.bf16.mxu0 %v3308_v22 }
  0xb3   : > { %1369 = vmatmul.mubr.bf16.gmra.mrb[52].mxu1 %v3310_v23  ;;  %1658 = vmatmul.mubr.bf16.gmra.mrb[52].mxu0 %v3311_v24  ;;  %v3395_v23 = vld [vmem:[%s3634_s14 + $0x368] ss:$16 sps:$4 sm:$0xff]   ;;  %v3396_v24 = vld [vmem:[%s3634_s14 + $0x384] ss:$16 sps:$4 sm:$0xff]  }
  0xb4   : > { %1376 = vmatprep.mubr.bf16.mxu1 %v3312_v25  ;;  %1665 = vmatprep.mubr.bf16.mxu0 %v3314_v26 }
  0xbb   : > { %1377 = vmatmul.mubr.bf16.gmra.mrb[56].mxu1 %v3316_v27  ;;  %1666 = vmatmul.mubr.bf16.gmra.mrb[56].mxu0 %v3317_v28 }
  0xbc   : > { %1384 = vmatprep.mubr.bf16.mxu1 %v3318_v29  ;;  %1673 = vmatprep.mubr.bf16.mxu0 %v3320_v30  ;;  %v3398_v29 = vld [vmem:[%s3634_s14 + $0x38c] ss:$16 sps:$4 sm:$0xff]  }
  0xc3   : > { %1385 = vmatmul.mubr.bf16.gmra.mrb[60].mxu1 %v3322_v31  ;;  %1674 = vmatmul.mubr.bf16.gmra.mrb[60].mxu0 %v3323_v32 }
  0xc4   : > { %1392 = vmatprep.mubr.bf16.mxu1 %v3324_v33  ;;  %1681 = vmatprep.mubr.bf16.mxu0 %v3326_v34 }
  0xcb   : > { %1393 = vmatmul.mubr.bf16.gmra.mrb[64].mxu1 %v3328_v35  ;;  %1682 = vmatmul.mubr.bf16.gmra.mrb[64].mxu0 %v3329_v36 }
  0xcc   : > { %1400 = vmatprep.mubr.bf16.mxu1 %v3330_v37  ;;  %1689 = vmatprep.mubr.bf16.mxu0 %v3332_v38 }
  0xd3   : > { %1401 = vmatmul.mubr.bf16.gmra.mrb[68].mxu1 %v3334_v39  ;;  %1690 = vmatmul.mubr.bf16.gmra.mrb[68].mxu0 %v3335_v40  ;;  %v3400_v40 = vld [vmem:[%s3634_s14 + $0x380] ss:$16 sps:$4 sm:$0xff]  }
  0xd4   : > { %1408 = vmatprep.mubr.bf16.mxu1 %v3336_v41  ;;  %1697 = vmatprep.mubr.bf16.mxu0 %v3338_v42 }
  0xdb   : > { %1409 = vmatmul.mubr.bf16.gmra.mrb[72].mxu1 %v3340_v43  ;;  %1698 = vmatmul.mubr.bf16.gmra.mrb[72].mxu0 %v3341_v44  ;;  %v3401_v43 = vld [vmem:[%s3634_s14 + $0x388] ss:$16 sps:$4 sm:$0xff]   ;;  %v3402_v44 = vld [vmem:[%s3634_s14 + $0x3a4] ss:$16 sps:$4 sm:$0xff]  }
  0xdc   : > { %1416 = vmatprep.mubr.bf16.mxu1 %v3342_v45  ;;  %1705 = vmatprep.mubr.bf16.mxu0 %v3344_v46 }
  0xe3   : > { %1417 = vmatmul.mubr.bf16.gmra.mrb[76].mxu1 %v3346_v47  ;;  %1706 = vmatmul.mubr.bf16.gmra.mrb[76].mxu0 %v3347_v48 }
  0xe4   : > { %1424 = vmatprep.mubr.bf16.mxu1 %v3348_v49  ;;  %1713 = vmatprep.mubr.bf16.mxu0 %v3350_v50  ;;  %v3404_v49 = vld [vmem:[%s3634_s14 + $0x3ac] ss:$16 sps:$4 sm:$0xff]  }
  0xeb   : > { %1425 = vmatmul.mubr.bf16.gmra.mrb[80].mxu1 %v3352_v51  ;;  %1714 = vmatmul.mubr.bf16.gmra.mrb[80].mxu0 %v3353_v52 }
  0xec   : > { %1432 = vmatprep.mubr.bf16.mxu1 %v3354_v53  ;;  %1721 = vmatprep.mubr.bf16.mxu0 %v3356_v54 }
  0xf3   : > { %1433 = vmatmul.mubr.bf16.gmra.mrb[84].mxu1 %v3358_v55  ;;  %1722 = vmatmul.mubr.bf16.gmra.mrb[84].mxu0 %v3359_v56 }
  0xf4   : > { %1440 = vmatprep.mubr.bf16.mxu1 %v3360_v57  ;;  %1729 = vmatprep.mubr.bf16.mxu0 %v3362_v58 }
  0xfb   : > { %1441 = vmatmul.mubr.bf16.gmra.mrb[88].mxu1 %v3364_v59  ;;  %1730 = vmatmul.mubr.bf16.gmra.mrb[88].mxu0 %v3365_v60  ;;  %v3406_v60 = vld [vmem:[%s3634_s14 + $0x3a0] ss:$16 sps:$4 sm:$0xff]  }
  0xfc   : > { %1448 = vmatprep.mubr.bf16.mxu1 %v3366_v61  ;;  %1737 = vmatprep.mubr.bf16.mxu0 %v3368_v62 }
 0x103   : > { %1449 = vmatmul.mubr.bf16.gmra.mrb[92].mxu1 %v3370_v63  ;;  %1738 = vmatmul.mubr.bf16.gmra.mrb[92].mxu0 %v3371_v0  ;;  %v3407_v63 = vld [vmem:[%s3634_s14 + $0x3a8] ss:$16 sps:$4 sm:$0xff]   ;;  %v3408_v0 = vld [vmem:[%s3634_s14 + $0x3c4] ss:$16 sps:$4 sm:$0xff]  }
 0x104   : > { %1456 = vmatprep.mubr.bf16.mxu1 %v3372_v1  ;;  %1745 = vmatprep.mubr.bf16.mxu0 %v3374_v2 }
 0x10b   : > { %1457 = vmatmul.mubr.bf16.gmra.mrb[96].mxu1 %v3376_v3  ;;  %1746 = vmatmul.mubr.bf16.gmra.mrb[96].mxu0 %v3377_v4 }
 0x10c   : > { %1464 = vmatprep.mubr.bf16.mxu1 %v3378_v5  ;;  %1753 = vmatprep.mubr.bf16.mxu0 %v3380_v6  ;;  %v3410_v5 = vld [vmem:[%s3634_s14 + $0x3cc] ss:$16 sps:$4 sm:$0xff]  }
 0x113   : > { %1465 = vmatmul.mubr.bf16.gmra.mrb[100].mxu1 %v3382_v7  ;;  %1754 = vmatmul.mubr.bf16.gmra.mrb[100].mxu0 %v3383_v8 }
 0x114   : > { %1472 = vmatprep.mubr.bf16.mxu1 %v3384_v9  ;;  %1761 = vmatprep.mubr.bf16.mxu0 %v3386_v10 }
 0x11b   : > { %1473 = vmatmul.mubr.bf16.gmra.mrb[104].mxu1 %v3388_v11  ;;  %1762 = vmatmul.mubr.bf16.gmra.mrb[104].mxu0 %v3389_v12 }
 0x11c   : > { %1480 = vmatprep.mubr.bf16.mxu1 %v3390_v13  ;;  %1769 = vmatprep.mubr.bf16.mxu0 %v3392_v14 }
 0x11e   : > { %v1266_v16 = vpop.f32.mrb[0].mxu1  ;;  %v1555_v18 = vpop.f32.mrb[0].mxu0 }
 0x11f   : > { %v1267_v17 = vadd.f32 %v3810_v15, %v1266_v16  ;;  %v1268_v19 = vpop.f32.mrb[1].mxu1  ;;  %v1557_v21 = vpop.f32.mrb[1].mxu0 }
 0x120   : > { %v1269_v22 = vpop.f32.mrb[2].mxu1  ;;  %v1558_v27 = vpop.f32.mrb[2].mxu0  ;;  %v3414_v21 = vld [vmem:[%s3634_s14 + $0x3e4] ss:$16 sps:$4 sm:$0xff]  }
 0x121   : > { %v1556_v25 = vadd.f32 %v1555_v18, %v1267_v17  ;;  %v1270_v26 = vadd.f32 %v3810_v15, %v1269_v22  ;;  %v1271_v28 = vpop.f32.mrb[3].mxu1  ;;  %v1560_v30 = vpop.f32.mrb[3].mxu0  ;;  %v3412_v17 = vld [vmem:[%s3634_s14 + $0x3c0] ss:$16 sps:$4 sm:$0xff]  }
 0x123   : > { %v1810_v31 = vmax.f32 %v1556_v25, 0.0  ;;  %v1559_v32 = vadd.f32 %v1558_v27, %v1270_v26  ;;  %1481 = vmatmul.mubr.bf16.gmra.mrb[108].mxu1 %v3394_v20  ;;  %1770 = vmatmul.mubr.bf16.gmra.mrb[108].mxu0 %v3395_v23  ;;  %v3413_v20 = vld [vmem:[%s3634_s14 + $0x3c8] ss:$16 sps:$4 sm:$0xff]   ;;  %v3416_v26 = vld [vmem:[%s3634_s14 + $0x3ec] ss:$16 sps:$4 sm:$0xff]  }
 0x124   : > { %1488 = vmatprep.mubr.bf16.mxu1 %v3396_v24  ;;  %1777 = vmatprep.mubr.bf16.mxu0 %v3398_v29 }
 0x125   : > { %v2912_v33 = vpack.c.bf16 %v1810_v31, %v1810_v31  ;;  %v1811_v34 = vmax.f32 %v1559_v32, 0.0 }
 0x126   : > { %v1274_v35 = vpop.f32.mrb[4].mxu1  ;;  %v1563_v38 = vpop.f32.mrb[4].mxu0 }
 0x127   : > { %2131 = vst.msk [vmem:[%s3819_s12] sm:$0xf] %vm2130_vm0, %v2912_v33  ;;  %v2913_v36 = vpack.c.bf16 %v1811_v34, %v1811_v34  ;;  %v1275_v37 = vadd.f32 %v3810_v15, %v1274_v35  ;;  %v1276_v39 = vpop.f32.mrb[5].mxu1  ;;  %v1565_v41 = vpop.f32.mrb[5].mxu0 }
 0x128   : > { %v1277_v42 = vpop.f32.mrb[6].mxu1  ;;  %v1566_v47 = vpop.f32.mrb[6].mxu0 }
 0x129   : > { %2132 = vst.msk [vmem:[%s3819_s12 + $0x4] sm:$0xf] %vm2130_vm0, %v2913_v36  ;;  %v1564_v45 = vadd.f32 %v1563_v38, %v1275_v37  ;;  %v1278_v46 = vadd.f32 %v3810_v15, %v1277_v42  ;;  %v1279_v48 = vpop.f32.mrb[7].mxu1  ;;  %v1568_v50 = vpop.f32.mrb[7].mxu0  ;;  %v3418_v37 = vld [vmem:[%s3634_s14 + $0x3e0] ss:$16 sps:$4 sm:$0xff]  }
 0x12b   : > { %v1812_v51 = vmax.f32 %v1564_v45, 0.0  ;;  %v1567_v52 = vadd.f32 %v1566_v47, %v1278_v46  ;;  %1489 = vmatmul.mubr.bf16.gmra.mrb[112].mxu1 %v3400_v40  ;;  %1778 = vmatmul.mubr.bf16.gmra.mrb[112].mxu0 %v3401_v43  ;;  %v3419_v40 = vld [vmem:[%s3634_s14 + $0x3e8] ss:$16 sps:$4 sm:$0xff]  }
 0x12c   : > { %1496 = vmatprep.mubr.bf16.mxu1 %v3402_v44  ;;  %1785 = vmatprep.mubr.bf16.mxu0 %v3404_v49 }
 0x12d   : > { %v2914_v53 = vpack.c.bf16 %v1812_v51, %v1812_v51  ;;  %v1813_v54 = vmax.f32 %v1567_v52, 0.0 }
 0x12e   : > { %v1282_v55 = vpop.f32.mrb[8].mxu1  ;;  %v1571_v58 = vpop.f32.mrb[8].mxu0 }
 0x12f   : > { %2133 = vst.msk [vmem:[%s3819_s12 + $0x8] sm:$0xf] %vm2130_vm0, %v2914_v53  ;;  %v2915_v56 = vpack.c.bf16 %v1813_v54, %v1813_v54  ;;  %v1283_v57 = vadd.f32 %v3810_v15, %v1282_v55  ;;  %v1284_v59 = vpop.f32.mrb[9].mxu1  ;;  %v1573_v61 = vpop.f32.mrb[9].mxu0 }
 0x130   : > { %v1285_v62 = vpop.f32.mrb[10].mxu1  ;;  %v1574_v3 = vpop.f32.mrb[10].mxu0 }
 0x131   : > { %2134 = vst.msk [vmem:[%s3819_s12 + $0xc] sm:$0xf] %vm2130_vm0, %v2915_v56  ;;  %v1572_v1 = vadd.f32 %v1571_v58, %v1283_v57  ;;  %v1286_v2 = vadd.f32 %v3810_v15, %v1285_v62  ;;  %v1287_v4 = vpop.f32.mrb[11].mxu1  ;;  %v1576_v6 = vpop.f32.mrb[11].mxu0 }
 0x133   : > { %v1814_v7 = vmax.f32 %v1572_v1, 0.0  ;;  %v1575_v8 = vadd.f32 %v1574_v3, %v1286_v2  ;;  %1497 = vmatmul.mubr.bf16.gmra.mrb[116].mxu1 %v3406_v60  ;;  %1786 = vmatmul.mubr.bf16.gmra.mrb[116].mxu0 %v3407_v63 }
 0x134   : > { %1504 = vmatprep.mubr.bf16.mxu1 %v3408_v0  ;;  %1793 = vmatprep.mubr.bf16.mxu0 %v3410_v5 }
 0x135   : > { %v2916_v9 = vpack.c.bf16 %v1814_v7, %v1814_v7  ;;  %v1815_v10 = vmax.f32 %v1575_v8, 0.0 }
 0x136   : > { %v1290_v11 = vpop.f32.mrb[12].mxu1  ;;  %v1579_v14 = vpop.f32.mrb[12].mxu0 }
 0x137   : > { %2135 = vst.msk [vmem:[%s3819_s12 + $0x10] sm:$0xf] %vm2130_vm0, %v2916_v9  ;;  %v2917_v12 = vpack.c.bf16 %v1815_v10, %v1815_v10  ;;  %v1291_v13 = vadd.f32 %v3810_v15, %v1290_v11  ;;  %v1292_v16 = vpop.f32.mrb[13].mxu1  ;;  %v1581_v18 = vpop.f32.mrb[13].mxu0 }
 0x138   : > { %v1293_v19 = vpop.f32.mrb[14].mxu1  ;;  %v1582_v24 = vpop.f32.mrb[14].mxu0 }
 0x139   : > { %2136 = vst.msk [vmem:[%s3819_s12 + $0x14] sm:$0xf] %vm2130_vm0, %v2917_v12  ;;  %v1580_v22 = vadd.f32 %v1579_v14, %v1291_v13  ;;  %v1294_v23 = vadd.f32 %v3810_v15, %v1293_v19  ;;  %v1295_v25 = vpop.f32.mrb[15].mxu1  ;;  %v1584_v27 = vpop.f32.mrb[15].mxu0 }
 0x13b   : > { %v1816_v28 = vmax.f32 %v1580_v22, 0.0  ;;  %v1583_v29 = vadd.f32 %v1582_v24, %v1294_v23  ;;  %1505 = vmatmul.mubr.bf16.gmra.mrb[120].mxu1 %v3412_v17  ;;  %1794 = vmatmul.mubr.bf16.gmra.mrb[120].mxu0 %v3413_v20 }
 0x13c   : > { %1512 = vmatprep.mubr.bf16.mxu1 %v3414_v21  ;;  %1801 = vmatprep.mubr.bf16.mxu0 %v3416_v26 }
 0x13d   : > { %v2918_v30 = vpack.c.bf16 %v1816_v28, %v1816_v28  ;;  %v1817_v31 = vmax.f32 %v1583_v29, 0.0 }
 0x13e   : > { %v1298_v32 = vpop.f32.mrb[16].mxu1  ;;  %v1587_v35 = vpop.f32.mrb[16].mxu0 }
 0x13f   : > { %2137 = vst.msk [vmem:[%s3819_s12 + $0x18] sm:$0xf] %vm2130_vm0, %v2918_v30  ;;  %v2919_v33 = vpack.c.bf16 %v1817_v31, %v1817_v31  ;;  %v1299_v34 = vadd.f32 %v3810_v15, %v1298_v32  ;;  %v1300_v36 = vpop.f32.mrb[17].mxu1  ;;  %v1589_v38 = vpop.f32.mrb[17].mxu0 }
 0x140   : > { %v1301_v39 = vpop.f32.mrb[18].mxu1  ;;  %v1590_v43 = vpop.f32.mrb[18].mxu0 }
 0x141   : > { %2138 = vst.msk [vmem:[%s3819_s12 + $0x1c] sm:$0xf] %vm2130_vm0, %v2919_v33  ;;  %v1588_v41 = vadd.f32 %v1587_v35, %v1299_v34  ;;  %v1302_v42 = vadd.f32 %v3810_v15, %v1301_v39  ;;  %v1303_v44 = vpop.f32.mrb[19].mxu1  ;;  %v1592_v45 = vpop.f32.mrb[19].mxu0 }
 0x143   : > { %v1818_v46 = vmax.f32 %v1588_v41, 0.0  ;;  %v1591_v47 = vadd.f32 %v1590_v43, %v1302_v42  ;;  %1513 = vmatmul.mubr.bf16.gmra.mrb[124].mxu1 %v3418_v37  ;;  %1802 = vmatmul.mubr.bf16.gmra.mrb[124].mxu0 %v3419_v40 }
 0x145   : > { %v2920_v48 = vpack.c.bf16 %v1818_v46, %v1818_v46  ;;  %v1819_v49 = vmax.f32 %v1591_v47, 0.0 }
 0x146   : > { %v1306_v50 = vpop.f32.mrb[20].mxu1  ;;  %v1595_v53 = vpop.f32.mrb[20].mxu0 }
 0x147   : > { %2139 = vst.msk [vmem:[%s3819_s12 + $0x20] sm:$0xf] %vm2130_vm0, %v2920_v48  ;;  %v2921_v51 = vpack.c.bf16 %v1819_v49, %v1819_v49  ;;  %v1307_v52 = vadd.f32 %v3810_v15, %v1306_v50  ;;  %v1308_v54 = vpop.f32.mrb[21].mxu1  ;;  %v1597_v55 = vpop.f32.mrb[21].mxu0 }
 0x148   : > { %v1309_v56 = vpop.f32.mrb[22].mxu1  ;;  %v1598_v59 = vpop.f32.mrb[22].mxu0 }
 0x149   : > { %2140 = vst.msk [vmem:[%s3819_s12 + $0x24] sm:$0xf] %vm2130_vm0, %v2921_v51  ;;  %v1596_v57 = vadd.f32 %v1595_v53, %v1307_v52  ;;  %v1310_v58 = vadd.f32 %v3810_v15, %v1309_v56  ;;  %v1311_v60 = vpop.f32.mrb[23].mxu1  ;;  %v1600_v61 = vpop.f32.mrb[23].mxu0 }
 0x14b   : > { %v1820_v62 = vmax.f32 %v1596_v57, 0.0  ;;  %v1599_v63 = vadd.f32 %v1598_v59, %v1310_v58 }
 0x14d   : > { %v2922_v0 = vpack.c.bf16 %v1820_v62, %v1820_v62  ;;  %v1821_v1 = vmax.f32 %v1599_v63, 0.0 }
 0x14e   : > { %v1314_v2 = vpop.f32.mrb[24].mxu1  ;;  %v1603_v5 = vpop.f32.mrb[24].mxu0 }
 0x14f   : > { %2141 = vst.msk [vmem:[%s3819_s12 + $0x28] sm:$0xf] %vm2130_vm0, %v2922_v0  ;;  %v2923_v3 = vpack.c.bf16 %v1821_v1, %v1821_v1  ;;  %v1315_v4 = vadd.f32 %v3810_v15, %v1314_v2  ;;  %v1316_v6 = vpop.f32.mrb[25].mxu1  ;;  %v1605_v7 = vpop.f32.mrb[25].mxu0 }
 0x150   : > { %v1317_v8 = vpop.f32.mrb[26].mxu1  ;;  %v1606_v11 = vpop.f32.mrb[26].mxu0 }
 0x151   : > { %2142 = vst.msk [vmem:[%s3819_s12 + $0x2c] sm:$0xf] %vm2130_vm0, %v2923_v3  ;;  %v1604_v9 = vadd.f32 %v1603_v5, %v1315_v4  ;;  %v1318_v10 = vadd.f32 %v3810_v15, %v1317_v8  ;;  %v1319_v12 = vpop.f32.mrb[27].mxu1  ;;  %v1608_v13 = vpop.f32.mrb[27].mxu0 }
 0x153   : > { %v1822_v14 = vmax.f32 %v1604_v9, 0.0  ;;  %v1607_v16 = vadd.f32 %v1606_v11, %v1318_v10 }
 0x155   : > { %v2924_v17 = vpack.c.bf16 %v1822_v14, %v1822_v14  ;;  %v1823_v18 = vmax.f32 %v1607_v16, 0.0 }
 0x156   : > { %v1322_v19 = vpop.f32.mrb[28].mxu1  ;;  %v1611_v22 = vpop.f32.mrb[28].mxu0 }
 0x157   : > { %2143 = vst.msk [vmem:[%s3819_s12 + $0x30] sm:$0xf] %vm2130_vm0, %v2924_v17  ;;  %v2925_v20 = vpack.c.bf16 %v1823_v18, %v1823_v18  ;;  %v1323_v21 = vadd.f32 %v3810_v15, %v1322_v19  ;;  %v1324_v23 = vpop.f32.mrb[29].mxu1  ;;  %v1613_v24 = vpop.f32.mrb[29].mxu0 }
 0x158   : > { %v1325_v25 = vpop.f32.mrb[30].mxu1  ;;  %v1614_v28 = vpop.f32.mrb[30].mxu0 }
 0x159   : > { %2144 = vst.msk [vmem:[%s3819_s12 + $0x34] sm:$0xf] %vm2130_vm0, %v2925_v20  ;;  %v1612_v26 = vadd.f32 %v1611_v22, %v1323_v21  ;;  %v1326_v27 = vadd.f32 %v3810_v15, %v1325_v25  ;;  %v1327_v29 = vpop.f32.mrb[31].mxu1  ;;  %v1616_v30 = vpop.f32.mrb[31].mxu0 }
 0x15b   : > { %v1824_v31 = vmax.f32 %v1612_v26, 0.0  ;;  %v1615_v32 = vadd.f32 %v1614_v28, %v1326_v27 }
 0x15d   : > { %v2926_v33 = vpack.c.bf16 %v1824_v31, %v1824_v31  ;;  %v1825_v34 = vmax.f32 %v1615_v32, 0.0 }
 0x15e   : > { %v1330_v35 = vpop.f32.mrb[32].mxu1  ;;  %v1619_v38 = vpop.f32.mrb[32].mxu0 }
 0x15f   : > { %2145 = vst.msk [vmem:[%s3819_s12 + $0x38] sm:$0xf] %vm2130_vm0, %v2926_v33  ;;  %v2927_v36 = vpack.c.bf16 %v1825_v34, %v1825_v34  ;;  %v1331_v37 = vadd.f32 %v3810_v15, %v1330_v35  ;;  %v1332_v39 = vpop.f32.mrb[33].mxu1  ;;  %v1621_v40 = vpop.f32.mrb[33].mxu0 }
 0x160   : > { %v1333_v41 = vpop.f32.mrb[34].mxu1  ;;  %v1622_v44 = vpop.f32.mrb[34].mxu0 }
 0x161   : > { %2146 = vst.msk [vmem:[%s3819_s12 + $0x3c] sm:$0xf] %vm2130_vm0, %v2927_v36  ;;  %v1620_v42 = vadd.f32 %v1619_v38, %v1331_v37  ;;  %v1334_v43 = vadd.f32 %v3810_v15, %v1333_v41  ;;  %v1335_v45 = vpop.f32.mrb[35].mxu1  ;;  %v1624_v46 = vpop.f32.mrb[35].mxu0 }
 0x163   : > { %v1826_v47 = vmax.f32 %v1620_v42, 0.0  ;;  %v1623_v48 = vadd.f32 %v1622_v44, %v1334_v43 }
 0x165   : > { %v2928_v49 = vpack.c.bf16 %v1826_v47, %v1826_v47  ;;  %v1827_v50 = vmax.f32 %v1623_v48, 0.0 }
 0x166   : > { %v1338_v51 = vpop.f32.mrb[36].mxu1  ;;  %v1627_v54 = vpop.f32.mrb[36].mxu0 }
 0x167   : > { %2147 = vst.msk [vmem:[%s3819_s12 + $0x40] sm:$0xf] %vm2130_vm0, %v2928_v49  ;;  %v2929_v52 = vpack.c.bf16 %v1827_v50, %v1827_v50  ;;  %v1339_v53 = vadd.f32 %v3810_v15, %v1338_v51  ;;  %v1340_v55 = vpop.f32.mrb[37].mxu1  ;;  %v1629_v56 = vpop.f32.mrb[37].mxu0 }
 0x168   : > { %v1341_v57 = vpop.f32.mrb[38].mxu1  ;;  %v1630_v60 = vpop.f32.mrb[38].mxu0 }
 0x169   : > { %2148 = vst.msk [vmem:[%s3819_s12 + $0x44] sm:$0xf] %vm2130_vm0, %v2929_v52  ;;  %v1628_v58 = vadd.f32 %v1627_v54, %v1339_v53  ;;  %v1342_v59 = vadd.f32 %v3810_v15, %v1341_v57  ;;  %v1343_v61 = vpop.f32.mrb[39].mxu1  ;;  %v1632_v62 = vpop.f32.mrb[39].mxu0 }
 0x16b   : > { %v1828_v63 = vmax.f32 %v1628_v58, 0.0  ;;  %v1631_v0 = vadd.f32 %v1630_v60, %v1342_v59 }
 0x16d   : > { %v2930_v1 = vpack.c.bf16 %v1828_v63, %v1828_v63  ;;  %v1829_v2 = vmax.f32 %v1631_v0, 0.0 }
 0x16e   : > { %v1346_v3 = vpop.f32.mrb[40].mxu1  ;;  %v1635_v6 = vpop.f32.mrb[40].mxu0 }
 0x16f   : > { %2149 = vst.msk [vmem:[%s3819_s12 + $0x48] sm:$0xf] %vm2130_vm0, %v2930_v1  ;;  %v2931_v4 = vpack.c.bf16 %v1829_v2, %v1829_v2  ;;  %v1347_v5 = vadd.f32 %v3810_v15, %v1346_v3  ;;  %v1348_v7 = vpop.f32.mrb[41].mxu1  ;;  %v1637_v8 = vpop.f32.mrb[41].mxu0 }
 0x170   : > { %v1349_v9 = vpop.f32.mrb[42].mxu1  ;;  %v1638_v12 = vpop.f32.mrb[42].mxu0 }
 0x171   : > { %2150 = vst.msk [vmem:[%s3819_s12 + $0x4c] sm:$0xf] %vm2130_vm0, %v2931_v4  ;;  %v1636_v10 = vadd.f32 %v1635_v6, %v1347_v5  ;;  %v1350_v11 = vadd.f32 %v3810_v15, %v1349_v9  ;;  %v1351_v13 = vpop.f32.mrb[43].mxu1  ;;  %v1640_v14 = vpop.f32.mrb[43].mxu0 }
 0x173   : > { %v1830_v16 = vmax.f32 %v1636_v10, 0.0  ;;  %v1639_v17 = vadd.f32 %v1638_v12, %v1350_v11 }
 0x175   : > { %v2932_v18 = vpack.c.bf16 %v1830_v16, %v1830_v16  ;;  %v1831_v19 = vmax.f32 %v1639_v17, 0.0 }
 0x176   : > { %v1354_v20 = vpop.f32.mrb[44].mxu1  ;;  %v1643_v23 = vpop.f32.mrb[44].mxu0 }
 0x177   : > { %2151 = vst.msk [vmem:[%s3819_s12 + $0x50] sm:$0xf] %vm2130_vm0, %v2932_v18  ;;  %v2933_v21 = vpack.c.bf16 %v1831_v19, %v1831_v19  ;;  %v1355_v22 = vadd.f32 %v3810_v15, %v1354_v20  ;;  %v1356_v24 = vpop.f32.mrb[45].mxu1  ;;  %v1645_v25 = vpop.f32.mrb[45].mxu0 }
 0x178   : > { %v1357_v26 = vpop.f32.mrb[46].mxu1  ;;  %v1646_v29 = vpop.f32.mrb[46].mxu0 }
 0x179   : > { %2152 = vst.msk [vmem:[%s3819_s12 + $0x54] sm:$0xf] %vm2130_vm0, %v2933_v21  ;;  %v1644_v27 = vadd.f32 %v1643_v23, %v1355_v22  ;;  %v1358_v28 = vadd.f32 %v3810_v15, %v1357_v26  ;;  %v1359_v30 = vpop.f32.mrb[47].mxu1  ;;  %v1648_v31 = vpop.f32.mrb[47].mxu0 }
 0x17b   : > { %v1832_v32 = vmax.f32 %v1644_v27, 0.0  ;;  %v1647_v33 = vadd.f32 %v1646_v29, %v1358_v28 }
 0x17d   : > { %v2934_v34 = vpack.c.bf16 %v1832_v32, %v1832_v32  ;;  %v1833_v35 = vmax.f32 %v1647_v33, 0.0 }
 0x17e   : > { %v1362_v36 = vpop.f32.mrb[48].mxu1  ;;  %v1651_v39 = vpop.f32.mrb[48].mxu0 }
 0x17f   : > { %2153 = vst.msk [vmem:[%s3819_s12 + $0x58] sm:$0xf] %vm2130_vm0, %v2934_v34  ;;  %v2935_v37 = vpack.c.bf16 %v1833_v35, %v1833_v35  ;;  %v1363_v38 = vadd.f32 %v3810_v15, %v1362_v36  ;;  %v1364_v40 = vpop.f32.mrb[49].mxu1  ;;  %v1653_v41 = vpop.f32.mrb[49].mxu0 }
 0x180   : > { %v1365_v42 = vpop.f32.mrb[50].mxu1  ;;  %v1654_v45 = vpop.f32.mrb[50].mxu0 }
 0x181   : > { %2154 = vst.msk [vmem:[%s3819_s12 + $0x5c] sm:$0xf] %vm2130_vm0, %v2935_v37  ;;  %v1652_v43 = vadd.f32 %v1651_v39, %v1363_v38  ;;  %v1366_v44 = vadd.f32 %v3810_v15, %v1365_v42  ;;  %v1367_v46 = vpop.f32.mrb[51].mxu1  ;;  %v1656_v47 = vpop.f32.mrb[51].mxu0 }
 0x183   : > { %v1834_v48 = vmax.f32 %v1652_v43, 0.0  ;;  %v1655_v49 = vadd.f32 %v1654_v45, %v1366_v44 }
 0x185   : > { %v2936_v50 = vpack.c.bf16 %v1834_v48, %v1834_v48  ;;  %v1835_v51 = vmax.f32 %v1655_v49, 0.0 }
 0x186   : > { %v1370_v52 = vpop.f32.mrb[52].mxu1  ;;  %v1659_v55 = vpop.f32.mrb[52].mxu0 }
 0x187   : > { %2155 = vst.msk [vmem:[%s3819_s12 + $0x60] sm:$0xf] %vm2130_vm0, %v2936_v50  ;;  %v2937_v53 = vpack.c.bf16 %v1835_v51, %v1835_v51  ;;  %v1371_v54 = vadd.f32 %v3810_v15, %v1370_v52  ;;  %v1372_v56 = vpop.f32.mrb[53].mxu1  ;;  %v1661_v57 = vpop.f32.mrb[53].mxu0 }
 0x188   : > { %v1373_v58 = vpop.f32.mrb[54].mxu1  ;;  %v1662_v61 = vpop.f32.mrb[54].mxu0 }
 0x189   : > { %2156 = vst.msk [vmem:[%s3819_s12 + $0x64] sm:$0xf] %vm2130_vm0, %v2937_v53  ;;  %v1660_v59 = vadd.f32 %v1659_v55, %v1371_v54  ;;  %v1374_v60 = vadd.f32 %v3810_v15, %v1373_v58  ;;  %v1375_v62 = vpop.f32.mrb[55].mxu1  ;;  %v1664_v63 = vpop.f32.mrb[55].mxu0 }
 0x18b   : > { %v1836_v0 = vmax.f32 %v1660_v59, 0.0  ;;  %v1663_v1 = vadd.f32 %v1662_v61, %v1374_v60 }
 0x18d   : > { %v2938_v2 = vpack.c.bf16 %v1836_v0, %v1836_v0  ;;  %v1837_v3 = vmax.f32 %v1663_v1, 0.0 }
 0x18e   : > { %v1378_v4 = vpop.f32.mrb[56].mxu1  ;;  %v1667_v7 = vpop.f32.mrb[56].mxu0 }
 0x18f   : > { %2157 = vst.msk [vmem:[%s3819_s12 + $0x68] sm:$0xf] %vm2130_vm0, %v2938_v2  ;;  %v2939_v5 = vpack.c.bf16 %v1837_v3, %v1837_v3  ;;  %v1379_v6 = vadd.f32 %v3810_v15, %v1378_v4  ;;  %v1380_v8 = vpop.f32.mrb[57].mxu1  ;;  %v1669_v9 = vpop.f32.mrb[57].mxu0 }
 0x190   : > { %v1381_v10 = vpop.f32.mrb[58].mxu1  ;;  %v1670_v13 = vpop.f32.mrb[58].mxu0 }
 0x191   : > { %2158 = vst.msk [vmem:[%s3819_s12 + $0x6c] sm:$0xf] %vm2130_vm0, %v2939_v5  ;;  %v1668_v11 = vadd.f32 %v1667_v7, %v1379_v6  ;;  %v1382_v12 = vadd.f32 %v3810_v15, %v1381_v10  ;;  %v1383_v14 = vpop.f32.mrb[59].mxu1  ;;  %v1672_v16 = vpop.f32.mrb[59].mxu0 }
 0x193   : > { %v1838_v17 = vmax.f32 %v1668_v11, 0.0  ;;  %v1671_v18 = vadd.f32 %v1670_v13, %v1382_v12 }
 0x195   : > { %v2940_v19 = vpack.c.bf16 %v1838_v17, %v1838_v17  ;;  %v1839_v20 = vmax.f32 %v1671_v18, 0.0 }
 0x196   : > { %v1386_v21 = vpop.f32.mrb[60].mxu1  ;;  %v1675_v24 = vpop.f32.mrb[60].mxu0 }
 0x197   : > { %2159 = vst.msk [vmem:[%s3819_s12 + $0x70] sm:$0xf] %vm2130_vm0, %v2940_v19  ;;  %v2941_v22 = vpack.c.bf16 %v1839_v20, %v1839_v20  ;;  %v1387_v23 = vadd.f32 %v3810_v15, %v1386_v21  ;;  %v1388_v25 = vpop.f32.mrb[61].mxu1  ;;  %v1677_v26 = vpop.f32.mrb[61].mxu0 }
 0x198   : > { %v1389_v27 = vpop.f32.mrb[62].mxu1  ;;  %v1678_v30 = vpop.f32.mrb[62].mxu0 }
 0x199   : > { %2160 = vst.msk [vmem:[%s3819_s12 + $0x74] sm:$0xf] %vm2130_vm0, %v2941_v22  ;;  %v1676_v28 = vadd.f32 %v1675_v24, %v1387_v23  ;;  %v1390_v29 = vadd.f32 %v3810_v15, %v1389_v27  ;;  %v1391_v31 = vpop.f32.mrb[63].mxu1  ;;  %v1680_v32 = vpop.f32.mrb[63].mxu0 }
 0x19b   : > { %v1840_v33 = vmax.f32 %v1676_v28, 0.0  ;;  %v1679_v34 = vadd.f32 %v1678_v30, %v1390_v29 }
 0x19d   : > { %v2942_v35 = vpack.c.bf16 %v1840_v33, %v1840_v33  ;;  %v1841_v36 = vmax.f32 %v1679_v34, 0.0 }
 0x19e   : > { %v1394_v37 = vpop.f32.mrb[64].mxu1  ;;  %v1683_v40 = vpop.f32.mrb[64].mxu0 }
 0x19f   : > { %2161 = vst.msk [vmem:[%s3819_s12 + $0x78] sm:$0xf] %vm2130_vm0, %v2942_v35  ;;  %v2943_v38 = vpack.c.bf16 %v1841_v36, %v1841_v36  ;;  %v1395_v39 = vadd.f32 %v3810_v15, %v1394_v37  ;;  %v1396_v41 = vpop.f32.mrb[65].mxu1  ;;  %v1685_v42 = vpop.f32.mrb[65].mxu0 }
 0x1a0   : > { %v1397_v43 = vpop.f32.mrb[66].mxu1  ;;  %v1686_v46 = vpop.f32.mrb[66].mxu0 }
 0x1a1   : > { %2162 = vst.msk [vmem:[%s3819_s12 + $0x7c] sm:$0xf] %vm2130_vm0, %v2943_v38  ;;  %v1684_v44 = vadd.f32 %v1683_v40, %v1395_v39  ;;  %v1398_v45 = vadd.f32 %v3810_v15, %v1397_v43  ;;  %v1399_v47 = vpop.f32.mrb[67].mxu1  ;;  %v1688_v48 = vpop.f32.mrb[67].mxu0 }
 0x1a3   : > { %v1842_v49 = vmax.f32 %v1684_v44, 0.0  ;;  %v1687_v50 = vadd.f32 %v1686_v46, %v1398_v45 }
 0x1a5   : > { %v2944_v51 = vpack.c.bf16 %v1842_v49, %v1842_v49  ;;  %v1843_v52 = vmax.f32 %v1687_v50, 0.0 }
 0x1a6   : > { %v1402_v53 = vpop.f32.mrb[68].mxu1  ;;  %v1691_v56 = vpop.f32.mrb[68].mxu0 }
 0x1a7   : > { %2163 = vst.msk [vmem:[%s3819_s12 + $0x80] sm:$0xf] %vm2130_vm0, %v2944_v51  ;;  %v2945_v54 = vpack.c.bf16 %v1843_v52, %v1843_v52  ;;  %v1403_v55 = vadd.f32 %v3810_v15, %v1402_v53  ;;  %v1404_v57 = vpop.f32.mrb[69].mxu1  ;;  %v1693_v58 = vpop.f32.mrb[69].mxu0 }
 0x1a8   : > { %v1405_v59 = vpop.f32.mrb[70].mxu1  ;;  %v1694_v62 = vpop.f32.mrb[70].mxu0 }
 0x1a9   : > { %2164 = vst.msk [vmem:[%s3819_s12 + $0x84] sm:$0xf] %vm2130_vm0, %v2945_v54  ;;  %v1692_v60 = vadd.f32 %v1691_v56, %v1403_v55  ;;  %v1406_v61 = vadd.f32 %v3810_v15, %v1405_v59  ;;  %v1407_v63 = vpop.f32.mrb[71].mxu1  ;;  %v1696_v0 = vpop.f32.mrb[71].mxu0 }
 0x1ab   : > { %v1844_v1 = vmax.f32 %v1692_v60, 0.0  ;;  %v1695_v2 = vadd.f32 %v1694_v62, %v1406_v61 }
 0x1ad   : > { %v2946_v3 = vpack.c.bf16 %v1844_v1, %v1844_v1  ;;  %v1845_v4 = vmax.f32 %v1695_v2, 0.0 }
 0x1ae   : > { %v1410_v5 = vpop.f32.mrb[72].mxu1  ;;  %v1699_v8 = vpop.f32.mrb[72].mxu0 }
 0x1af   : > { %2165 = vst.msk [vmem:[%s3819_s12 + $0x88] sm:$0xf] %vm2130_vm0, %v2946_v3  ;;  %v2947_v6 = vpack.c.bf16 %v1845_v4, %v1845_v4  ;;  %v1411_v7 = vadd.f32 %v3810_v15, %v1410_v5  ;;  %v1412_v9 = vpop.f32.mrb[73].mxu1  ;;  %v1701_v10 = vpop.f32.mrb[73].mxu0 }
 0x1b0   : > { %v1413_v11 = vpop.f32.mrb[74].mxu1  ;;  %v1702_v14 = vpop.f32.mrb[74].mxu0 }
 0x1b1   : > { %2166 = vst.msk [vmem:[%s3819_s12 + $0x8c] sm:$0xf] %vm2130_vm0, %v2947_v6  ;;  %v1700_v12 = vadd.f32 %v1699_v8, %v1411_v7  ;;  %v1414_v13 = vadd.f32 %v3810_v15, %v1413_v11  ;;  %v1415_v16 = vpop.f32.mrb[75].mxu1  ;;  %v1704_v17 = vpop.f32.mrb[75].mxu0 }
 0x1b3   : > { %v1846_v18 = vmax.f32 %v1700_v12, 0.0  ;;  %v1703_v19 = vadd.f32 %v1702_v14, %v1414_v13 }
 0x1b5   : > { %v2948_v20 = vpack.c.bf16 %v1846_v18, %v1846_v18  ;;  %v1847_v21 = vmax.f32 %v1703_v19, 0.0 }
 0x1b6   : > { %v1418_v22 = vpop.f32.mrb[76].mxu1  ;;  %v1707_v25 = vpop.f32.mrb[76].mxu0 }
 0x1b7   : > { %2167 = vst.msk [vmem:[%s3819_s12 + $0x90] sm:$0xf] %vm2130_vm0, %v2948_v20  ;;  %v2949_v23 = vpack.c.bf16 %v1847_v21, %v1847_v21  ;;  %v1419_v24 = vadd.f32 %v3810_v15, %v1418_v22  ;;  %v1420_v26 = vpop.f32.mrb[77].mxu1  ;;  %v1709_v27 = vpop.f32.mrb[77].mxu0 }
 0x1b8   : > { %v1421_v28 = vpop.f32.mrb[78].mxu1  ;;  %v1710_v31 = vpop.f32.mrb[78].mxu0 }
 0x1b9   : > { %2168 = vst.msk [vmem:[%s3819_s12 + $0x94] sm:$0xf] %vm2130_vm0, %v2949_v23  ;;  %v1708_v29 = vadd.f32 %v1707_v25, %v1419_v24  ;;  %v1422_v30 = vadd.f32 %v3810_v15, %v1421_v28  ;;  %v1423_v32 = vpop.f32.mrb[79].mxu1  ;;  %v1712_v33 = vpop.f32.mrb[79].mxu0 }
 0x1bb   : > { %v1848_v34 = vmax.f32 %v1708_v29, 0.0  ;;  %v1711_v35 = vadd.f32 %v1710_v31, %v1422_v30 }
 0x1bd   : > { %v2950_v36 = vpack.c.bf16 %v1848_v34, %v1848_v34  ;;  %v1849_v37 = vmax.f32 %v1711_v35, 0.0 }
 0x1be   : > { %v1426_v38 = vpop.f32.mrb[80].mxu1  ;;  %v1715_v41 = vpop.f32.mrb[80].mxu0 }
 0x1bf   : > { %2169 = vst.msk [vmem:[%s3819_s12 + $0x98] sm:$0xf] %vm2130_vm0, %v2950_v36  ;;  %v2951_v39 = vpack.c.bf16 %v1849_v37, %v1849_v37  ;;  %v1427_v40 = vadd.f32 %v3810_v15, %v1426_v38  ;;  %v1428_v42 = vpop.f32.mrb[81].mxu1  ;;  %v1717_v43 = vpop.f32.mrb[81].mxu0 }
 0x1c0   : > { %v1429_v44 = vpop.f32.mrb[82].mxu1  ;;  %v1718_v47 = vpop.f32.mrb[82].mxu0 }
 0x1c1   : > { %2170 = vst.msk [vmem:[%s3819_s12 + $0x9c] sm:$0xf] %vm2130_vm0, %v2951_v39  ;;  %v1716_v45 = vadd.f32 %v1715_v41, %v1427_v40  ;;  %v1430_v46 = vadd.f32 %v3810_v15, %v1429_v44  ;;  %v1431_v48 = vpop.f32.mrb[83].mxu1  ;;  %v1720_v49 = vpop.f32.mrb[83].mxu0 }
 0x1c3   : > { %v1850_v50 = vmax.f32 %v1716_v45, 0.0  ;;  %v1719_v51 = vadd.f32 %v1718_v47, %v1430_v46 }
 0x1c5   : > { %v2952_v52 = vpack.c.bf16 %v1850_v50, %v1850_v50  ;;  %v1851_v53 = vmax.f32 %v1719_v51, 0.0 }
 0x1c6   : > { %v1434_v54 = vpop.f32.mrb[84].mxu1  ;;  %v1723_v57 = vpop.f32.mrb[84].mxu0 }
 0x1c7   : > { %2171 = vst.msk [vmem:[%s3819_s12 + $0xa0] sm:$0xf] %vm2130_vm0, %v2952_v52  ;;  %v2953_v55 = vpack.c.bf16 %v1851_v53, %v1851_v53  ;;  %v1435_v56 = vadd.f32 %v3810_v15, %v1434_v54  ;;  %v1436_v58 = vpop.f32.mrb[85].mxu1  ;;  %v1725_v59 = vpop.f32.mrb[85].mxu0 }
 0x1c8   : > { %v1437_v60 = vpop.f32.mrb[86].mxu1  ;;  %v1726_v63 = vpop.f32.mrb[86].mxu0 }
 0x1c9   : > { %2172 = vst.msk [vmem:[%s3819_s12 + $0xa4] sm:$0xf] %vm2130_vm0, %v2953_v55  ;;  %v1724_v61 = vadd.f32 %v1723_v57, %v1435_v56  ;;  %v1438_v62 = vadd.f32 %v3810_v15, %v1437_v60  ;;  %v1439_v0 = vpop.f32.mrb[87].mxu1  ;;  %v1728_v1 = vpop.f32.mrb[87].mxu0 }
 0x1cb   : > { %v1852_v2 = vmax.f32 %v1724_v61, 0.0  ;;  %v1727_v3 = vadd.f32 %v1726_v63, %v1438_v62 }
 0x1cd   : > { %v2954_v4 = vpack.c.bf16 %v1852_v2, %v1852_v2  ;;  %v1853_v5 = vmax.f32 %v1727_v3, 0.0 }
 0x1ce   : > { %v1442_v6 = vpop.f32.mrb[88].mxu1  ;;  %v1731_v9 = vpop.f32.mrb[88].mxu0 }
 0x1cf   : > { %2173 = vst.msk [vmem:[%s3819_s12 + $0xa8] sm:$0xf] %vm2130_vm0, %v2954_v4  ;;  %v2955_v7 = vpack.c.bf16 %v1853_v5, %v1853_v5  ;;  %v1443_v8 = vadd.f32 %v3810_v15, %v1442_v6  ;;  %v1444_v10 = vpop.f32.mrb[89].mxu1  ;;  %v1733_v11 = vpop.f32.mrb[89].mxu0 }
 0x1d0   : > { %v1445_v12 = vpop.f32.mrb[90].mxu1  ;;  %v1734_v16 = vpop.f32.mrb[90].mxu0 }
 0x1d1   : > { %2174 = vst.msk [vmem:[%s3819_s12 + $0xac] sm:$0xf] %vm2130_vm0, %v2955_v7  ;;  %v1732_v13 = vadd.f32 %v1731_v9, %v1443_v8  ;;  %v1446_v14 = vadd.f32 %v3810_v15, %v1445_v12  ;;  %v1447_v17 = vpop.f32.mrb[91].mxu1  ;;  %v1736_v18 = vpop.f32.mrb[91].mxu0 }
 0x1d3   : > { %v1854_v19 = vmax.f32 %v1732_v13, 0.0  ;;  %v1735_v20 = vadd.f32 %v1734_v16, %v1446_v14  ;;  %v3993_v16 = vld [vmem:[%s4231_s2] ss:$0 sm:$0xff] }
 0x1d5   : > { %v2956_v21 = vpack.c.bf16 %v1854_v19, %v1854_v19  ;;  %v1855_v22 = vmax.f32 %v1735_v20, 0.0 }
 0x1d6   : > { %v1450_v23 = vpop.f32.mrb[92].mxu1  ;;  %v1739_v26 = vpop.f32.mrb[92].mxu0 }
 0x1d7   : > { %2175 = vst.msk [vmem:[%s3819_s12 + $0xb0] sm:$0xf] %vm2130_vm0, %v2956_v21  ;;  %v2957_v24 = vpack.c.bf16 %v1855_v22, %v1855_v22  ;;  %v1451_v25 = vadd.f32 %v3810_v15, %v1450_v23  ;;  %v1452_v27 = vpop.f32.mrb[93].mxu1  ;;  %v1741_v28 = vpop.f32.mrb[93].mxu0 }
 0x1d8   : > { %v1453_v29 = vpop.f32.mrb[94].mxu1  ;;  %v1742_v32 = vpop.f32.mrb[94].mxu0 }
 0x1d9   : > { %2176 = vst.msk [vmem:[%s3819_s12 + $0xb4] sm:$0xf] %vm2130_vm0, %v2957_v24  ;;  %v1740_v30 = vadd.f32 %v1739_v26, %v1451_v25  ;;  %v1454_v31 = vadd.f32 %v3810_v15, %v1453_v29  ;;  %v1455_v33 = vpop.f32.mrb[95].mxu1  ;;  %v1744_v34 = vpop.f32.mrb[95].mxu0 }
 0x1db   : > { %v1856_v35 = vmax.f32 %v1740_v30, 0.0  ;;  %v1743_v36 = vadd.f32 %v1742_v32, %v1454_v31 }
 0x1dd   : > { %v2958_v37 = vpack.c.bf16 %v1856_v35, %v1856_v35  ;;  %v1857_v38 = vmax.f32 %v1743_v36, 0.0 }
 0x1de   : > { %v1458_v39 = vpop.f32.mrb[96].mxu1  ;;  %v1747_v42 = vpop.f32.mrb[96].mxu0 }
 0x1df   : > { %2177 = vst.msk [vmem:[%s3819_s12 + $0xb8] sm:$0xf] %vm2130_vm0, %v2958_v37  ;;  %v2959_v40 = vpack.c.bf16 %v1857_v38, %v1857_v38  ;;  %v1459_v41 = vadd.f32 %v3810_v15, %v1458_v39  ;;  %v1460_v43 = vpop.f32.mrb[97].mxu1  ;;  %v1749_v44 = vpop.f32.mrb[97].mxu0 }
 0x1e0   : > { %v1461_v45 = vpop.f32.mrb[98].mxu1  ;;  %v1750_v48 = vpop.f32.mrb[98].mxu0 }
 0x1e1   : > { %2178 = vst.msk [vmem:[%s3819_s12 + $0xbc] sm:$0xf] %vm2130_vm0, %v2959_v40  ;;  %v1748_v46 = vadd.f32 %v1747_v42, %v1459_v41  ;;  %v1462_v47 = vadd.f32 %v3810_v15, %v1461_v45  ;;  %v1463_v49 = vpop.f32.mrb[99].mxu1  ;;  %v1752_v50 = vpop.f32.mrb[99].mxu0 }
 0x1e3   : > { %v1858_v51 = vmax.f32 %v1748_v46, 0.0  ;;  %v1751_v52 = vadd.f32 %v1750_v48, %v1462_v47 }
 0x1e5   : > { %v2960_v53 = vpack.c.bf16 %v1858_v51, %v1858_v51  ;;  %v1859_v54 = vmax.f32 %v1751_v52, 0.0 }
 0x1e6   : > { %v1466_v55 = vpop.f32.mrb[100].mxu1  ;;  %v1755_v58 = vpop.f32.mrb[100].mxu0 }
 0x1e7   : > { %2179 = vst.msk [vmem:[%s3819_s12 + $0xc0] sm:$0xf] %vm2130_vm0, %v2960_v53  ;;  %v2961_v56 = vpack.c.bf16 %v1859_v54, %v1859_v54  ;;  %v1467_v57 = vadd.f32 %v3810_v15, %v1466_v55  ;;  %v1468_v59 = vpop.f32.mrb[101].mxu1  ;;  %v1757_v60 = vpop.f32.mrb[101].mxu0 }
 0x1e8   : > { %v1469_v61 = vpop.f32.mrb[102].mxu1  ;;  %v1758_v0 = vpop.f32.mrb[102].mxu0 }
 0x1e9   : > { %2180 = vst.msk [vmem:[%s3819_s12 + $0xc4] sm:$0xf] %vm2130_vm0, %v2961_v56  ;;  %v1756_v62 = vadd.f32 %v1755_v58, %v1467_v57  ;;  %v1470_v63 = vadd.f32 %v3810_v15, %v1469_v61  ;;  %v1471_v1 = vpop.f32.mrb[103].mxu1  ;;  %v1760_v2 = vpop.f32.mrb[103].mxu0 }
 0x1eb   : > { %v1860_v3 = vmax.f32 %v1756_v62, 0.0  ;;  %v1759_v4 = vadd.f32 %v1758_v0, %v1470_v63 }
 0x1ed   : > { %v2962_v5 = vpack.c.bf16 %v1860_v3, %v1860_v3  ;;  %v1861_v6 = vmax.f32 %v1759_v4, 0.0 }
 0x1ee   : > { %v1474_v7 = vpop.f32.mrb[104].mxu1  ;;  %v1763_v10 = vpop.f32.mrb[104].mxu0 }
 0x1ef   : > { %2181 = vst.msk [vmem:[%s3819_s12 + $0xc8] sm:$0xf] %vm2130_vm0, %v2962_v5  ;;  %v2963_v8 = vpack.c.bf16 %v1861_v6, %v1861_v6  ;;  %v1475_v9 = vadd.f32 %v3810_v15, %v1474_v7  ;;  %v1476_v11 = vpop.f32.mrb[105].mxu1  ;;  %v1765_v12 = vpop.f32.mrb[105].mxu0 }
 0x1f0   : > { %v1477_v13 = vpop.f32.mrb[106].mxu1  ;;  %v1766_v18 = vpop.f32.mrb[106].mxu0 }
 0x1f1   : > { %2182 = vst.msk [vmem:[%s3819_s12 + $0xcc] sm:$0xf] %vm2130_vm0, %v2963_v8  ;;  %v1764_v14 = vadd.f32 %v1763_v10, %v1475_v9  ;;  %v1478_v17 = vadd.f32 %v3993_v16, %v1477_v13  ;;  %v1479_v19 = vpop.f32.mrb[107].mxu1  ;;  %v1768_v20 = vpop.f32.mrb[107].mxu0 }
 0x1f3   : > { %v1862_v15 = vmax.f32 %v1764_v14, 0.0  ;;  %v1767_v21 = vadd.f32 %v1766_v18, %v1478_v17 }
 0x1f5   : > { %v2964_v22 = vpack.c.bf16 %v1862_v15, %v1862_v15  ;;  %v1863_v23 = vmax.f32 %v1767_v21, 0.0 }
 0x1f6   : > { %v1482_v24 = vpop.f32.mrb[108].mxu1  ;;  %v1771_v27 = vpop.f32.mrb[108].mxu0 }
 0x1f7   : > { %2183 = vst.msk [vmem:[%s3819_s12 + $0xd0] sm:$0xf] %vm2130_vm0, %v2964_v22  ;;  %v2965_v25 = vpack.c.bf16 %v1863_v23, %v1863_v23  ;;  %v1483_v26 = vadd.f32 %v3993_v16, %v1482_v24  ;;  %v1484_v28 = vpop.f32.mrb[109].mxu1  ;;  %v1773_v29 = vpop.f32.mrb[109].mxu0 }
 0x1f8   : > { %v1485_v30 = vpop.f32.mrb[110].mxu1  ;;  %v1774_v33 = vpop.f32.mrb[110].mxu0 }
 0x1f9   : > { %2184 = vst.msk [vmem:[%s3819_s12 + $0xd4] sm:$0xf] %vm2130_vm0, %v2965_v25  ;;  %v1772_v31 = vadd.f32 %v1771_v27, %v1483_v26  ;;  %v1486_v32 = vadd.f32 %v3993_v16, %v1485_v30  ;;  %v1487_v34 = vpop.f32.mrb[111].mxu1  ;;  %v1776_v35 = vpop.f32.mrb[111].mxu0 }
 0x1fb   : > { %v1864_v36 = vmax.f32 %v1772_v31, 0.0  ;;  %v1775_v37 = vadd.f32 %v1774_v33, %v1486_v32 }
 0x1fd   : > { %v2966_v38 = vpack.c.bf16 %v1864_v36, %v1864_v36  ;;  %v1865_v39 = vmax.f32 %v1775_v37, 0.0 }
 0x1fe   : > { %v1490_v40 = vpop.f32.mrb[112].mxu1  ;;  %v1779_v43 = vpop.f32.mrb[112].mxu0 }
 0x1ff   : > { %2185 = vst.msk [vmem:[%s3819_s12 + $0xd8] sm:$0xf] %vm2130_vm0, %v2966_v38  ;;  %v2967_v41 = vpack.c.bf16 %v1865_v39, %v1865_v39  ;;  %v1491_v42 = vadd.f32 %v3993_v16, %v1490_v40  ;;  %v1492_v44 = vpop.f32.mrb[113].mxu1  ;;  %v1781_v45 = vpop.f32.mrb[113].mxu0 }
 0x200   : > { %v1493_v46 = vpop.f32.mrb[114].mxu1  ;;  %v1782_v49 = vpop.f32.mrb[114].mxu0 }
 0x201   : > { %2186 = vst.msk [vmem:[%s3819_s12 + $0xdc] sm:$0xf] %vm2130_vm0, %v2967_v41  ;;  %v1780_v47 = vadd.f32 %v1779_v43, %v1491_v42  ;;  %v1494_v48 = vadd.f32 %v3993_v16, %v1493_v46  ;;  %v1495_v50 = vpop.f32.mrb[115].mxu1  ;;  %v1784_v51 = vpop.f32.mrb[115].mxu0 }
 0x203   : > { %v1866_v52 = vmax.f32 %v1780_v47, 0.0  ;;  %v1783_v53 = vadd.f32 %v1782_v49, %v1494_v48 }
 0x205   : > { %v2968_v54 = vpack.c.bf16 %v1866_v52, %v1866_v52  ;;  %v1867_v55 = vmax.f32 %v1783_v53, 0.0 }
 0x206   : > { %v1498_v56 = vpop.f32.mrb[116].mxu1  ;;  %v1787_v59 = vpop.f32.mrb[116].mxu0 }
 0x207   : > { %2187 = vst.msk [vmem:[%s3819_s12 + $0xe0] sm:$0xf] %vm2130_vm0, %v2968_v54  ;;  %v2969_v57 = vpack.c.bf16 %v1867_v55, %v1867_v55  ;;  %v1499_v58 = vadd.f32 %v3993_v16, %v1498_v56  ;;  %v1500_v60 = vpop.f32.mrb[117].mxu1  ;;  %v1789_v61 = vpop.f32.mrb[117].mxu0 }
 0x208   : > { %v1501_v62 = vpop.f32.mrb[118].mxu1  ;;  %v1790_v1 = vpop.f32.mrb[118].mxu0 }
 0x209   : > { %2188 = vst.msk [vmem:[%s3819_s12 + $0xe4] sm:$0xf] %vm2130_vm0, %v2969_v57  ;;  %v1788_v63 = vadd.f32 %v1787_v59, %v1499_v58  ;;  %v1502_v0 = vadd.f32 %v3993_v16, %v1501_v62  ;;  %v1503_v2 = vpop.f32.mrb[119].mxu1  ;;  %v1792_v3 = vpop.f32.mrb[119].mxu0 }
 0x20b   : > { %v1868_v4 = vmax.f32 %v1788_v63, 0.0  ;;  %v1791_v5 = vadd.f32 %v1790_v1, %v1502_v0 }
 0x20d   : > { %v2970_v6 = vpack.c.bf16 %v1868_v4, %v1868_v4  ;;  %v1869_v7 = vmax.f32 %v1791_v5, 0.0 }
 0x20e   : > { %v1506_v8 = vpop.f32.mrb[120].mxu1  ;;  %v1795_v11 = vpop.f32.mrb[120].mxu0 }
 0x20f   : > { %2189 = vst.msk [vmem:[%s3819_s12 + $0xe8] sm:$0xf] %vm2130_vm0, %v2970_v6  ;;  %v2971_v9 = vpack.c.bf16 %v1869_v7, %v1869_v7  ;;  %v1507_v10 = vadd.f32 %v3993_v16, %v1506_v8  ;;  %v1508_v12 = vpop.f32.mrb[121].mxu1  ;;  %v1797_v13 = vpop.f32.mrb[121].mxu0 }
 0x210   : > { %v1509_v14 = vpop.f32.mrb[122].mxu1  ;;  %v1798_v19 = vpop.f32.mrb[122].mxu0 }
 0x211   : > { %2190 = vst.msk [vmem:[%s3819_s12 + $0xec] sm:$0xf] %vm2130_vm0, %v2971_v9  ;;  %v1796_v17 = vadd.f32 %v1795_v11, %v1507_v10  ;;  %v1510_v18 = vadd.f32 %v3993_v16, %v1509_v14  ;;  %v1511_v20 = vpop.f32.mrb[123].mxu1  ;;  %v1800_v15 = vpop.f32.mrb[123].mxu0 }
 0x213   : > { %v1870_v21 = vmax.f32 %v1796_v17, 0.0  ;;  %v1799_v22 = vadd.f32 %v1798_v19, %v1510_v18 }
 0x215   : > { %v2972_v23 = vpack.c.bf16 %v1870_v21, %v1870_v21  ;;  %v1871_v24 = vmax.f32 %v1799_v22, 0.0 }
 0x216   : > { %v1514_v25 = vpop.f32.mrb[124].mxu1  ;;  %v1803_v28 = vpop.f32.mrb[124].mxu0 }
 0x217   : > { %2191 = vst.msk [vmem:[%s3819_s12 + $0xf0] sm:$0xf] %vm2130_vm0, %v2972_v23  ;;  %v2973_v26 = vpack.c.bf16 %v1871_v24, %v1871_v24  ;;  %v1515_v27 = vadd.f32 %v3993_v16, %v1514_v25  ;;  %v1516_v29 = vpop.f32.mrb[125].mxu1  ;;  %v1805_v30 = vpop.f32.mrb[125].mxu0 }
 0x218   : > { %v1517_v31 = vpop.f32.mrb[126].mxu1  ;;  %v1806_v34 = vpop.f32.mrb[126].mxu0 }
 0x219   : > { %2192 = vst.msk [vmem:[%s3819_s12 + $0xf4] sm:$0xf] %vm2130_vm0, %v2973_v26  ;;  %v1804_v32 = vadd.f32 %v1803_v28, %v1515_v27  ;;  %v1518_v33 = vadd.f32 %v3993_v16, %v1517_v31  ;;  %v1519_v35 = vpop.f32.mrb[127].mxu1  ;;  %v1808_v36 = vpop.f32.mrb[127].mxu0 }
 0x21b   : > { %v1872_v37 = vmax.f32 %v1804_v32, 0.0  ;;  %v1807_v38 = vadd.f32 %v1806_v34, %v1518_v33  ;;  %2201 = sbr.rel (!%p3555_p4) target bundleno = 637 (0x27d), region = 36 }
 0x21d   : > { %v2974_v39 = vpack.c.bf16 %v1872_v37, %v1872_v37  ;;  %v1873_v40 = vmax.f32 %v1807_v38, 0.0 }
 0x21f   : > { %2193 = vst.msk [vmem:[%s3819_s12 + $0xf8] sm:$0xf] %vm2130_vm0, %v2974_v39  ;;  %v2975_v41 = vpack.c.bf16 %v1873_v40, %v1873_v40 }
 0x221   : > { %2194 = vst.msk [vmem:[%s3819_s12 + $0xfc] sm:$0xf] %vm2130_vm0, %v2975_v41 }
 0x222   : > { %s4241_s9 = smov (!%p2204_p8, %s2203_s9), 64 }
 0x223   : > { %s2896_s22 = sshll.u32 %s4241_s9, 6 }
 0x224   : > { %p2899_p9 = scmp.eq.s32.totalorder %s2896_s22, 0 }
 0x225   : > { %s4043_s23 = sshrl.u32 (!%p2899_p9), %s4241_s9, 6 }
 0x226   : > { %2212 = sbr.rel (%p2899_p9) target bundleno = 637 (0x27d), region = 40  ;;  %p2900_p10 = scmp.le.s32.totalorder (!%p2899_p9), %s4043_s23, 0 }
 0x22d   : > { %2617 = sbr.rel (%p2900_p10) target bundleno = 616 (0x268), region = 112  ;;  %s4234_s15 = smov (!%p2900_p10), %s4037_s21 }
 0x22e   : > { %s4235_s20 = smov (!%p2900_p10), %s3819_s12  ;;  %s4052_s18 = smov (!%p2900_p10), 0  }
 0x22f   : > { %s4054_s24 = smov (!%p2900_p10), 0  }
 0x234 LB: >> { %v2228_v16 = vld [vmem:[%s3483_s20] sm:$0xf]  ;;  %v2230_v42 = vld [vmem:[%s3483_s20 + $0x4] sm:$0xf]  ;;  %v2232_v43 = vld [vmem:[%s3483_s20 + $0x8] sm:$0xf]  ;;  %s3491_s24 = sphi %s4054_s24, %s2222_s24   ;;  %s3487_s18 = sphi %s4052_s18, %s4236_s18   ;;  %s3483_s20 = sphi %s4235_s20, %s2361_s20   ;;  %s3479_s15 = sphi %s4234_s15, %s2362_s15  }
 0x235   : >> { %2229 = vst [vmem:[%s3479_s15] sm:$0xf] %v2228_v16  ;;  %2231 = vst [vmem:[%s3479_s15 + $0x4] sm:$0xf] %v2230_v42  ;;  %v2234_v44 = vld [vmem:[%s3483_s20 + $0xc] sm:$0xf]  ;;  %s2356_s25 = sadd.s32 1, %s3487_s18 }
 0x236   : >> { %2233 = vst [vmem:[%s3479_s15 + $0x8] sm:$0xf] %v2232_v43  ;;  %v2236_v45 = vld [vmem:[%s3483_s20 + $0x10] sm:$0xf]  ;;  %v2238_v46 = vld [vmem:[%s3483_s20 + $0x14] sm:$0xf]  ;;  %p2357_p11 = scmp.ge.s32.totalorder %s2356_s25, %s4043_s23 }
 0x237   : >> { %2235 = vst [vmem:[%s3479_s15 + $0xc] sm:$0xf] %v2234_v44  ;;  %2237 = vst [vmem:[%s3479_s15 + $0x10] sm:$0xf] %v2236_v45  ;;  %v2240_v47 = vld [vmem:[%s3483_s20 + $0x18] sm:$0xf] }
 0x238   : >> { %2239 = vst [vmem:[%s3479_s15 + $0x14] sm:$0xf] %v2238_v46  ;;  %v2242_v48 = vld [vmem:[%s3483_s20 + $0x1c] sm:$0xf]  ;;  %v2244_v49 = vld [vmem:[%s3483_s20 + $0x20] sm:$0xf] }
 0x239   : >> { %2241 = vst [vmem:[%s3479_s15 + $0x18] sm:$0xf] %v2240_v47  ;;  %2243 = vst [vmem:[%s3479_s15 + $0x1c] sm:$0xf] %v2242_v48  ;;  %v2246_v50 = vld [vmem:[%s3483_s20 + $0x24] sm:$0xf] }
 0x23a   : >> { %2245 = vst [vmem:[%s3479_s15 + $0x20] sm:$0xf] %v2244_v49  ;;  %v2248_v51 = vld [vmem:[%s3483_s20 + $0x28] sm:$0xf]  ;;  %v2250_v52 = vld [vmem:[%s3483_s20 + $0x2c] sm:$0xf] }
 0x23b   : >> { %2247 = vst [vmem:[%s3479_s15 + $0x24] sm:$0xf] %v2246_v50  ;;  %2249 = vst [vmem:[%s3479_s15 + $0x28] sm:$0xf] %v2248_v51  ;;  %v2252_v53 = vld [vmem:[%s3483_s20 + $0x30] sm:$0xf] }
 0x23c   : >> { %2251 = vst [vmem:[%s3479_s15 + $0x2c] sm:$0xf] %v2250_v52  ;;  %v2254_v54 = vld [vmem:[%s3483_s20 + $0x34] sm:$0xf]  ;;  %v2256_v55 = vld [vmem:[%s3483_s20 + $0x38] sm:$0xf] }
 0x23d   : >> { %2253 = vst [vmem:[%s3479_s15 + $0x30] sm:$0xf] %v2252_v53  ;;  %2255 = vst [vmem:[%s3479_s15 + $0x34] sm:$0xf] %v2254_v54  ;;  %v2258_v56 = vld [vmem:[%s3483_s20 + $0x3c] sm:$0xf] }
 0x23e   : >> { %2257 = vst [vmem:[%s3479_s15 + $0x38] sm:$0xf] %v2256_v55  ;;  %v2260_v57 = vld [vmem:[%s3483_s20 + $0x40] sm:$0xf]  ;;  %v2262_v58 = vld [vmem:[%s3483_s20 + $0x44] sm:$0xf] }
 0x23f   : >> { %2259 = vst [vmem:[%s3479_s15 + $0x3c] sm:$0xf] %v2258_v56  ;;  %2261 = vst [vmem:[%s3479_s15 + $0x40] sm:$0xf] %v2260_v57  ;;  %v2264_v59 = vld [vmem:[%s3483_s20 + $0x48] sm:$0xf] }
 0x240   : >> { %2263 = vst [vmem:[%s3479_s15 + $0x44] sm:$0xf] %v2262_v58  ;;  %v2266_v60 = vld [vmem:[%s3483_s20 + $0x4c] sm:$0xf]  ;;  %v2268_v61 = vld [vmem:[%s3483_s20 + $0x50] sm:$0xf] }
 0x241   : >> { %2265 = vst [vmem:[%s3479_s15 + $0x48] sm:$0xf] %v2264_v59  ;;  %2267 = vst [vmem:[%s3479_s15 + $0x4c] sm:$0xf] %v2266_v60  ;;  %v2270_v62 = vld [vmem:[%s3483_s20 + $0x54] sm:$0xf] }
 0x242   : >> { %2269 = vst [vmem:[%s3479_s15 + $0x50] sm:$0xf] %v2268_v61  ;;  %v2272_v63 = vld [vmem:[%s3483_s20 + $0x58] sm:$0xf]  ;;  %v2274_v0 = vld [vmem:[%s3483_s20 + $0x5c] sm:$0xf] }
 0x243   : >> { %2271 = vst [vmem:[%s3479_s15 + $0x54] sm:$0xf] %v2270_v62  ;;  %2273 = vst [vmem:[%s3479_s15 + $0x58] sm:$0xf] %v2272_v63  ;;  %v2276_v1 = vld [vmem:[%s3483_s20 + $0x60] sm:$0xf] }
 0x244   : >> { %2275 = vst [vmem:[%s3479_s15 + $0x5c] sm:$0xf] %v2274_v0  ;;  %v2278_v2 = vld [vmem:[%s3483_s20 + $0x64] sm:$0xf]  ;;  %v2280_v3 = vld [vmem:[%s3483_s20 + $0x68] sm:$0xf] }
 0x245   : >> { %2277 = vst [vmem:[%s3479_s15 + $0x60] sm:$0xf] %v2276_v1  ;;  %2279 = vst [vmem:[%s3479_s15 + $0x64] sm:$0xf] %v2278_v2  ;;  %v2282_v4 = vld [vmem:[%s3483_s20 + $0x6c] sm:$0xf] }
 0x246   : >> { %2281 = vst [vmem:[%s3479_s15 + $0x68] sm:$0xf] %v2280_v3  ;;  %v2284_v5 = vld [vmem:[%s3483_s20 + $0x70] sm:$0xf]  ;;  %v2286_v6 = vld [vmem:[%s3483_s20 + $0x74] sm:$0xf] }
 0x247   : >> { %2283 = vst [vmem:[%s3479_s15 + $0x6c] sm:$0xf] %v2282_v4  ;;  %2285 = vst [vmem:[%s3479_s15 + $0x70] sm:$0xf] %v2284_v5  ;;  %v2288_v7 = vld [vmem:[%s3483_s20 + $0x78] sm:$0xf] }
 0x248   : >> { %2287 = vst [vmem:[%s3479_s15 + $0x74] sm:$0xf] %v2286_v6  ;;  %v2290_v8 = vld [vmem:[%s3483_s20 + $0x7c] sm:$0xf]  ;;  %v2292_v9 = vld [vmem:[%s3483_s20 + $0x80] sm:$0xf] }
 0x249   : >> { %2289 = vst [vmem:[%s3479_s15 + $0x78] sm:$0xf] %v2288_v7  ;;  %2291 = vst [vmem:[%s3479_s15 + $0x7c] sm:$0xf] %v2290_v8  ;;  %v2294_v10 = vld [vmem:[%s3483_s20 + $0x84] sm:$0xf] }
 0x24a   : >> { %2293 = vst [vmem:[%s3479_s15 + $0x80] sm:$0xf] %v2292_v9  ;;  %v2296_v11 = vld [vmem:[%s3483_s20 + $0x88] sm:$0xf]  ;;  %v2298_v12 = vld [vmem:[%s3483_s20 + $0x8c] sm:$0xf] }
 0x24b   : >> { %2295 = vst [vmem:[%s3479_s15 + $0x84] sm:$0xf] %v2294_v10  ;;  %2297 = vst [vmem:[%s3479_s15 + $0x88] sm:$0xf] %v2296_v11  ;;  %v2300_v13 = vld [vmem:[%s3483_s20 + $0x90] sm:$0xf] }
 0x24c   : >> { %2299 = vst [vmem:[%s3479_s15 + $0x8c] sm:$0xf] %v2298_v12  ;;  %v2302_v14 = vld [vmem:[%s3483_s20 + $0x94] sm:$0xf]  ;;  %v2304_v17 = vld [vmem:[%s3483_s20 + $0x98] sm:$0xf] }
 0x24d   : >> { %2301 = vst [vmem:[%s3479_s15 + $0x90] sm:$0xf] %v2300_v13  ;;  %2303 = vst [vmem:[%s3479_s15 + $0x94] sm:$0xf] %v2302_v14  ;;  %v2306_v18 = vld [vmem:[%s3483_s20 + $0x9c] sm:$0xf] }
 0x24e   : >> { %2305 = vst [vmem:[%s3479_s15 + $0x98] sm:$0xf] %v2304_v17  ;;  %v2308_v19 = vld [vmem:[%s3483_s20 + $0xa0] sm:$0xf]  ;;  %v2310_v20 = vld [vmem:[%s3483_s20 + $0xa4] sm:$0xf] }
 0x24f   : >> { %2307 = vst [vmem:[%s3479_s15 + $0x9c] sm:$0xf] %v2306_v18  ;;  %2309 = vst [vmem:[%s3479_s15 + $0xa0] sm:$0xf] %v2308_v19  ;;  %v2312_v15 = vld [vmem:[%s3483_s20 + $0xa8] sm:$0xf] }
 0x250   : >> { %2311 = vst [vmem:[%s3479_s15 + $0xa4] sm:$0xf] %v2310_v20  ;;  %v2314_v21 = vld [vmem:[%s3483_s20 + $0xac] sm:$0xf]  ;;  %v2316_v22 = vld [vmem:[%s3483_s20 + $0xb0] sm:$0xf] }
 0x251   : >> { %2313 = vst [vmem:[%s3479_s15 + $0xa8] sm:$0xf] %v2312_v15  ;;  %2315 = vst [vmem:[%s3479_s15 + $0xac] sm:$0xf] %v2314_v21  ;;  %v2318_v23 = vld [vmem:[%s3483_s20 + $0xb4] sm:$0xf] }
 0x252   : >> { %2317 = vst [vmem:[%s3479_s15 + $0xb0] sm:$0xf] %v2316_v22  ;;  %v2320_v24 = vld [vmem:[%s3483_s20 + $0xb8] sm:$0xf]  ;;  %v2322_v25 = vld [vmem:[%s3483_s20 + $0xbc] sm:$0xf] }
 0x253   : >> { %2319 = vst [vmem:[%s3479_s15 + $0xb4] sm:$0xf] %v2318_v23  ;;  %2321 = vst [vmem:[%s3479_s15 + $0xb8] sm:$0xf] %v2320_v24  ;;  %v2324_v26 = vld [vmem:[%s3483_s20 + $0xc0] sm:$0xf] }
 0x254   : >> { %2323 = vst [vmem:[%s3479_s15 + $0xbc] sm:$0xf] %v2322_v25  ;;  %v2326_v27 = vld [vmem:[%s3483_s20 + $0xc4] sm:$0xf]  ;;  %v2328_v28 = vld [vmem:[%s3483_s20 + $0xc8] sm:$0xf] }
 0x255   : >> { %2325 = vst [vmem:[%s3479_s15 + $0xc0] sm:$0xf] %v2324_v26  ;;  %2327 = vst [vmem:[%s3479_s15 + $0xc4] sm:$0xf] %v2326_v27  ;;  %v2330_v29 = vld [vmem:[%s3483_s20 + $0xcc] sm:$0xf] }
 0x256   : >> { %2329 = vst [vmem:[%s3479_s15 + $0xc8] sm:$0xf] %v2328_v28  ;;  %v2332_v30 = vld [vmem:[%s3483_s20 + $0xd0] sm:$0xf]  ;;  %v2334_v31 = vld [vmem:[%s3483_s20 + $0xd4] sm:$0xf] }
 0x257   : >> { %2331 = vst [vmem:[%s3479_s15 + $0xcc] sm:$0xf] %v2330_v29  ;;  %2333 = vst [vmem:[%s3479_s15 + $0xd0] sm:$0xf] %v2332_v30  ;;  %v2336_v32 = vld [vmem:[%s3483_s20 + $0xd8] sm:$0xf] }
 0x258   : >> { %2335 = vst [vmem:[%s3479_s15 + $0xd4] sm:$0xf] %v2334_v31  ;;  %v2338_v33 = vld [vmem:[%s3483_s20 + $0xdc] sm:$0xf]  ;;  %v2340_v34 = vld [vmem:[%s3483_s20 + $0xe0] sm:$0xf] }
 0x259   : >> { %2337 = vst [vmem:[%s3479_s15 + $0xd8] sm:$0xf] %v2336_v32  ;;  %2339 = vst [vmem:[%s3479_s15 + $0xdc] sm:$0xf] %v2338_v33  ;;  %v2342_v35 = vld [vmem:[%s3483_s20 + $0xe4] sm:$0xf] }
 0x25a   : >> { %2341 = vst [vmem:[%s3479_s15 + $0xe0] sm:$0xf] %v2340_v34  ;;  %v2344_v36 = vld [vmem:[%s3483_s20 + $0xe8] sm:$0xf]  ;;  %v2346_v37 = vld [vmem:[%s3483_s20 + $0xec] sm:$0xf] }
 0x25b   : >> { %2343 = vst [vmem:[%s3479_s15 + $0xe4] sm:$0xf] %v2342_v35  ;;  %2345 = vst [vmem:[%s3479_s15 + $0xe8] sm:$0xf] %v2344_v36  ;;  %v2348_v38 = vld [vmem:[%s3483_s20 + $0xf0] sm:$0xf] }
 0x25c   : >> { %2347 = vst [vmem:[%s3479_s15 + $0xec] sm:$0xf] %v2346_v37  ;;  %v2350_v39 = vld [vmem:[%s3483_s20 + $0xf4] sm:$0xf]  ;;  %v2352_v40 = vld [vmem:[%s3483_s20 + $0xf8] sm:$0xf] }
 0x25d   : >> { %2349 = vst [vmem:[%s3479_s15 + $0xf0] sm:$0xf] %v2348_v38  ;;  %2351 = vst [vmem:[%s3479_s15 + $0xf4] sm:$0xf] %v2350_v39  ;;  %v2354_v41 = vld [vmem:[%s3483_s20 + $0xfc] sm:$0xf] }
 0x25e   : >> { %2353 = vst [vmem:[%s3479_s15 + $0xf8] sm:$0xf] %v2352_v40  ;;  %2355 = vst [vmem:[%s3479_s15 + $0xfc] sm:$0xf] %v2354_v41  ;;  %s4243_s25 = smov (%p2357_p11, %s2356_s25), 0  ;;  %s2222_s24 = sadd.s32 1, %s3491_s24  }
 0x25f   : >> { %s2901_s26 = sshll.u32 %s4243_s25, 8  ;;  %p2221_p12 = scmp.ge.s32.totalorder %s2222_s24, %s4043_s23 }
 0x260   : >> { %s2361_s20 = scalar_lea.vmem %s3819_s12, %s2901_s26 [#allocation2]   ;;  %s2362_s15 = scalar_lea.vmem %s4037_s21, %s2901_s26  }
 0x261   : >> { %s4236_s18 = smov %s4243_s25  ;;  %2224 = sbr.rel (!%p2221_p12) target bundleno = 564 (0x234), region = 118 }
 0x268 PF: > { %s4211_s27 = sand.u32 63, %s4241_s9   ;;  %s2977_s28 = sshll.u32 %s4043_s23, 8 }
 0x269   : > { %s2367_s29 = scalar_lea.vmem %s3819_s12, %s2977_s28 [#allocation2]   ;;  %s2369_s30 = scalar_lea.vmem %s4037_s21, %s2977_s28  }
 0x26a   : > { %p2906_p13 = scmp.le.s32.totalorder %s4211_s27, 0 }
 0x26b   : > { %s3493_s4 = smov (!%p2906_p13), %s2369_s30   ;;  %s3497_s5 = smov (!%p2906_p13), %s2367_s29  }
 0x26c   : > { %2631 = sbr.rel (%p2906_p13) target bundleno = 637 (0x27d), region = 123  ;;  %s3501_s6 = smov (!%p2906_p13), 0  }
 0x26d   : > { %s3505_s7 = smov (!%p2906_p13), 0  }
 0x273 LB: >> { %v2379_v16 = vld [vmem:[%s3499_s5] sm:$0xf]  ;;  %s2381_s14 = sadd.s32 1, %s3503_s6  ;;  %s2373_s7 = sadd.s32 1, %s3507_s7   ;;  %s3507_s7 = sphi %s3505_s7, %s2373_s7   ;;  %s3503_s6 = sphi %s3501_s6, %s3502_s6   ;;  %s3499_s5 = sphi %s3497_s5, %s2386_s5   ;;  %s3495_s4 = sphi %s3493_s4, %s2387_s4  }
 0x274   : >> { %2380 = vst [vmem:[%s3495_s4] sm:$0xf] %v2379_v16  ;;  %p2382_p0 = scmp.ge.s32.totalorder %s2381_s14, %s4211_s27  ;;  %p2372_p1 = scmp.ge.s32.totalorder %s2373_s7, %s4211_s27 }
 0x276   : >> { %s4245_s14 = smov (%p2382_p0, %s2381_s14), 0  ;;  %2375 = sbr.rel (!%p2372_p1) target bundleno = 627 (0x273), region = 129 }
 0x277   : >> { %s2907_s12 = sshll.u32 %s4245_s14, 2  ;;  %s3502_s6 = smov %s4245_s14  }
 0x278   : >> { %s2386_s5 = scalar_lea.vmem %s2367_s29, %s2907_s12 [#allocation2]   ;;  %s2387_s4 = scalar_lea.vmem %s2369_s30, %s2907_s12  }
 0x27d PF: > { %p10_p2 = scmp.ge.s32.totalorder %s3545_s16, 4   ;;  %s4237_s12 = smov %s3471_s13 }
 0x27e   : > { %s4238_s13 = smov %s3553_s19  ;;  %s4239_s14 = smov %s3545_s16 }
 0x27f   :  { %12 = sbr.rel (!%p10_p2) target bundleno = 2 (0x2), region = 140 }

// kernel: critic_forward.7
= control target key start
LH: loop header
LB: loop body
LE: loop exit
PB: predicated region body
PF: predicated region fallthrough
CT: control target
= control target key end

     0   :  { %v3610_v0 = vmov 0   ;;  %v3611_v39 = vmov 0.0   ;;  %vm3612_vm0 = vmmov 0   ;;  %vm1260_vm1 = vcmask 523264   ;;  %s4815_s1 = inlined_call_operand.vmem [shape: bf16[576,64], index: 1, kind: input, shape index: {}]   ;;  %s4816_s0 = inlined_call_operand.vmem [shape: bf16[486,576], index: 0, kind: input, shape index: {}]   ;;  %s4817_s2 = inlined_call_operand.vmem [shape: f32[1,64], index: 2, kind: input, shape index: {}]   ;;  %s4818_s3 = inlined_call_operand.vmem [shape: bf16[486,64], index: 3, kind: output, shape index: {}]  }
   0x1   :  { %1354 = vmatprep.subr.bf16.mxu1 %v3610_v0  ;;  %1634 = vmatprep.subr.bf16.mxu0 %v3610_v0  ;;  %v3359_v1 = vld [vmem:[%s4815_s1] sm:$0xff]   ;;  %v3361_v3 = vld [vmem:[%s4815_s1 + $0x8] sm:$0xff]   ;;  %v3363_v5 = vld [vmem:[%s4815_s1 + $0x10] sm:$0xff]   ;;  %vm2500_vm2 = vcmask 519168  }
   0x2   :  { %v3641_v2 = vld [vmem:[%s4815_s1 + $0x80] sm:$0xff]   ;;  %1355 = vmatpush1.bf16.msra.mxu1 %v3359_v1  ;;  %v3651_v4 = vld [vmem:[%s4815_s1 + $0x88] sm:$0xff]   ;;  %v3662_v6 = vld [vmem:[%s4815_s1 + $0x90] sm:$0xff]  }
   0x3   :  { %1635 = vmatpush1.bf16.msra.mxu0 %v3641_v2  ;;  %1356 = vmatprep.subr.bf16.mxu1 %v3610_v0  ;;  %v3365_v7 = vld [vmem:[%s4815_s1 + $0x18] sm:$0xff]   ;;  %v3367_v9 = vld [vmem:[%s4815_s1 + $0x20] sm:$0xff]   ;;  %v3369_v11 = vld [vmem:[%s4815_s1 + $0x28] sm:$0xff]  }
   0x4   :  { %1636 = vmatprep.subr.bf16.mxu0 %v3610_v0  ;;  %v3673_v8 = vld [vmem:[%s4815_s1 + $0x98] sm:$0xff]   ;;  %v3684_v10 = vld [vmem:[%s4815_s1 + $0xa0] sm:$0xff]   ;;  %v3695_v12 = vld [vmem:[%s4815_s1 + $0xa8] sm:$0xff]  }
   0x5   :  { %v3371_v13 = vld [vmem:[%s4815_s1 + $0x30] sm:$0xff]   ;;  %v3373_v15 = vld [vmem:[%s4815_s1 + $0x38] sm:$0xff]   ;;  %v3375_v17 = vld [vmem:[%s4815_s1 + $0x40] sm:$0xff]  }
   0x6   :  { %1357 = vmatpush1.bf16.msra.mxu1 %v3361_v3  ;;  %v3706_v14 = vld [vmem:[%s4815_s1 + $0xb0] sm:$0xff]   ;;  %v3717_v16 = vld [vmem:[%s4815_s1 + $0xb8] sm:$0xff]   ;;  %v3728_v18 = vld [vmem:[%s4815_s1 + $0xc0] sm:$0xff]  }
   0x7   :  { %1637 = vmatpush1.bf16.msra.mxu0 %v3651_v4  ;;  %1358 = vmatprep.subr.bf16.mxu1 %v3610_v0  ;;  %v3393_v19 = vld [vmem:[%s4816_s0 + $0x4] ss:$20 sps:$4 sm:$0xff]   ;;  %v3377_v20 = vld [vmem:[%s4815_s1 + $0x48] sm:$0xff]   ;;  %v3379_v23 = vld [vmem:[%s4815_s1 + $0x50] sm:$0xff]  }
   0x8   :  { %1638 = vmatprep.subr.bf16.mxu0 %v3610_v0  ;;  %v3396_v21 = vld [vmem:[%s4816_s0 + $0xc] ss:$20 sps:$4 sm:$0xff]   ;;  %1386 = vmatprep.mubr.bf16.mxu1 %v3393_v19  ;;  %v3756_v24 = vld [vmem:[%s4815_s1 + $0xd0] sm:$0xff]   ;;  %v3381_v25 = vld [vmem:[%s4815_s1 + $0x58] sm:$0xff]  }
   0x9   :  { %v3745_v22 = vld [vmem:[%s4815_s1 + $0xc8] sm:$0xff]   ;;  %1666 = vmatprep.mubr.bf16.mxu0 %v3396_v21  ;;  %v3767_v26 = vld [vmem:[%s4815_s1 + $0xd8] sm:$0xff]   ;;  %v3383_v27 = vld [vmem:[%s4815_s1 + $0x60] sm:$0xff]  }
   0xa   :  { %1359 = vmatpush1.bf16.msra.mxu1 %v3363_v5  ;;  %v3778_v28 = vld [vmem:[%s4815_s1 + $0xe0] sm:$0xff]   ;;  %v3385_v29 = vld [vmem:[%s4815_s1 + $0x68] sm:$0xff]   ;;  %v3387_v31 = vld [vmem:[%s4815_s1 + $0x70] sm:$0xff]  }
   0xb   :  { %1639 = vmatpush1.bf16.msra.mxu0 %v3662_v6  ;;  %1360 = vmatprep.subr.bf16.mxu1 %v3610_v0  ;;  %v3789_v30 = vld [vmem:[%s4815_s1 + $0xe8] sm:$0xff]   ;;  %v3800_v32 = vld [vmem:[%s4815_s1 + $0xf0] sm:$0xff]   ;;  %v3389_v33 = vld [vmem:[%s4815_s1 + $0x78] sm:$0xff]  }
   0xc   :  { %1640 = vmatprep.subr.bf16.mxu0 %v3610_v0  ;;  %v3811_v34 = vld [vmem:[%s4815_s1 + $0xf8] sm:$0xff]   ;;  %v3391_v35 = vld [vmem:[%s4816_s0] ss:$20 sps:$4 sm:$0xff]   ;;  %v3422_v41 = vld [vmem:[%s4815_s1 + $0x108] sm:$0xff]  }
   0xd   :  { %v3394_v36 = vld [vmem:[%s4816_s0 + $0x8] ss:$20 sps:$4 sm:$0xff]   ;;  %v3398_v37 = vld [vmem:[%s4816_s0 + $0x2c] ss:$20 sps:$4 sm:$0xff]   ;;  %v3403_v43 = vld [vmem:[%s4816_s0 + $0x30] ss:$20 sps:$4 sm:$0xff]  }
   0xe   :  { %1361 = vmatpush1.bf16.msra.mxu1 %v3365_v7  ;;  %v3397_v38 = vld [vmem:[%s4815_s1 + $0x100] sm:$0xff]   ;;  %v3400_v40 = vld [vmem:[%s4816_s0 + $0x34] ss:$20 sps:$4 sm:$0xff]   ;;  %v3406_v45 = vld [vmem:[%s4816_s0 + $0x5c] ss:$20 sps:$4 sm:$0xff]  }
   0xf   :  { %1641 = vmatpush1.bf16.msra.mxu0 %v3673_v8  ;;  %1362 = vmatprep.subr.bf16.mxu1 %v3610_v0  ;;  %v3402_v42 = vld [vmem:[%s4816_s0 + $0x28] ss:$20 sps:$4 sm:$0xff]   ;;  %v3447_v46 = vld [vmem:[%s4815_s1 + $0x110] sm:$0xff]   ;;  %v3409_v49 = vld [vmem:[%s4816_s0 + $0x58] ss:$20 sps:$4 sm:$0xff]  }
  0x10   :  { %1642 = vmatprep.subr.bf16.mxu0 %v3610_v0  ;;  %v3404_v44 = vld [vmem:[%s4816_s0 + $0x54] ss:$20 sps:$4 sm:$0xff]   ;;  %v3472_v47 = vld [vmem:[%s4815_s1 + $0x118] sm:$0xff]   ;;  %v3408_v48 = vld [vmem:[%s4816_s0 + $0x50] ss:$20 sps:$4 sm:$0xff]  }
  0x11   :  { %v3410_v50 = vld [vmem:[%s4816_s0 + $0x7c] ss:$20 sps:$4 sm:$0xff]   ;;  %v3412_v51 = vld [vmem:[%s4816_s0 + $0x84] ss:$20 sps:$4 sm:$0xff]   ;;  %v3415_v53 = vld [vmem:[%s4816_s0 + $0x80] ss:$20 sps:$4 sm:$0xff]  }
  0x12   :  { %1363 = vmatpush1.bf16.msra.mxu1 %v3367_v9  ;;  %v3414_v52 = vld [vmem:[%s4816_s0 + $0x78] ss:$20 sps:$4 sm:$0xff]   ;;  %v3420_v56 = vld [vmem:[%s4816_s0 + $0xa0] ss:$20 sps:$4 sm:$0xff]   ;;  %v3421_v57 = vld [vmem:[%s4816_s0 + $0xa8] ss:$20 sps:$4 sm:$0xff]  }
  0x13   :  { %1643 = vmatpush1.bf16.msra.mxu0 %v3684_v10  ;;  %1364 = vmatprep.subr.bf16.mxu1 %v3610_v0  ;;  %v3416_v54 = vld [vmem:[%s4816_s0 + $0xa4] ss:$20 sps:$4 sm:$0xff]   ;;  %v3418_v55 = vld [vmem:[%s4816_s0 + $0xac] ss:$20 sps:$4 sm:$0xff]   ;;  %v3425_v59 = vld [vmem:[%s4816_s0 + $0xd4] ss:$20 sps:$4 sm:$0xff]  }
  0x14   :  { %1644 = vmatprep.subr.bf16.mxu0 %v3610_v0  ;;  %v3423_v58 = vld [vmem:[%s4816_s0 + $0xcc] ss:$20 sps:$4 sm:$0xff]   ;;  %v3427_v60 = vld [vmem:[%s4816_s0 + $0xc8] ss:$20 sps:$4 sm:$0xff]   ;;  %v3428_v61 = vld [vmem:[%s4816_s0 + $0xd0] ss:$20 sps:$4 sm:$0xff]  }
  0x15   :  { %v3429_v62 = vld [vmem:[%s4816_s0 + $0xf4] ss:$20 sps:$4 sm:$0xff]   ;;  %v3431_v63 = vld [vmem:[%s4816_s0 + $0xfc] ss:$20 sps:$4 sm:$0xff]   ;;  %v3439_v5 = vld [vmem:[%s4816_s0 + $0x118] ss:$20 sps:$4 sm:$0xff]  }
  0x16   :  { %1365 = vmatpush1.bf16.msra.mxu1 %v3369_v11  ;;  %v3433_v1 = vld [vmem:[%s4816_s0 + $0xf0] ss:$20 sps:$4 sm:$0xff]   ;;  %v3445_v9 = vld [vmem:[%s4816_s0 + $0x140] ss:$20 sps:$4 sm:$0xff]  }
  0x17   :  { %1645 = vmatpush1.bf16.msra.mxu0 %v3695_v12  ;;  %1366 = vmatprep.subr.bf16.mxu1 %v3610_v0  ;;  %v3435_v3 = vld [vmem:[%s4816_s0 + $0x11c] ss:$20 sps:$4 sm:$0xff]   ;;  %v3441_v7 = vld [vmem:[%s4816_s0 + $0x144] ss:$20 sps:$4 sm:$0xff]   ;;  %v3448_v11 = vld [vmem:[%s4816_s0 + $0x16c] ss:$20 sps:$4 sm:$0xff]  }
  0x18   :  { %1646 = vmatprep.subr.bf16.mxu0 %v3610_v0  ;;  %v3462_v19 = vld [vmem:[%s4816_s0 + $0x1c4] ss:$20 sps:$4 sm:$0xff]   ;;  %v3465_v21 = vld [vmem:[%s4816_s0 + $0x1c0] ss:$20 sps:$4 sm:$0xff]  }
  0x1a   :  { %1367 = vmatpush1.bf16.msra.mxu1 %v3371_v13  ;;  %v3453_v13 = vld [vmem:[%s4816_s0 + $0x170] ss:$20 sps:$4 sm:$0xff]  }
  0x1b   :  { %1647 = vmatpush1.bf16.msra.mxu0 %v3706_v14  ;;  %1368 = vmatprep.subr.bf16.mxu1 %v3610_v0 }
  0x1c   :  { %1648 = vmatprep.subr.bf16.mxu0 %v3610_v0 }
  0x1e   :  { %1369 = vmatpush1.bf16.msra.mxu1 %v3373_v15  ;;  %v3456_v15 = vld [vmem:[%s4816_s0 + $0x19c] ss:$20 sps:$4 sm:$0xff]  }
  0x1f   :  { %1649 = vmatpush1.bf16.msra.mxu0 %v3717_v16  ;;  %1370 = vmatprep.subr.bf16.mxu1 %v3610_v0 }
  0x20   :  { %1650 = vmatprep.subr.bf16.mxu0 %v3610_v0 }
  0x22   :  { %1371 = vmatpush1.bf16.msra.mxu1 %v3375_v17  ;;  %v3459_v17 = vld [vmem:[%s4816_s0 + $0x198] ss:$20 sps:$4 sm:$0xff]  }
  0x23   :  { %1651 = vmatpush1.bf16.msra.mxu0 %v3728_v18  ;;  %1372 = vmatprep.subr.bf16.mxu1 %v3610_v0 }
  0x24   :  { %1652 = vmatprep.subr.bf16.mxu0 %v3610_v0 }
  0x26   :  { %1373 = vmatpush1.bf16.msra.mxu1 %v3377_v20  ;;  %v3464_v20 = vld [vmem:[%s4816_s0 + $0x1b8] ss:$20 sps:$4 sm:$0xff]  }
  0x27   :  { %1653 = vmatpush1.bf16.msra.mxu0 %v3745_v22  ;;  %1374 = vmatprep.subr.bf16.mxu1 %v3610_v0 }
  0x28   :  { %1654 = vmatprep.subr.bf16.mxu0 %v3610_v0 }
  0x2a   :  { %1375 = vmatpush1.bf16.msra.mxu1 %v3379_v23  ;;  %v3468_v23 = vld [vmem:[%s4816_s0 + $0x1ec] ss:$20 sps:$4 sm:$0xff]  }
  0x2b   :  { %1655 = vmatpush1.bf16.msra.mxu0 %v3756_v24  ;;  %1376 = vmatprep.subr.bf16.mxu1 %v3610_v0 }
  0x2c   :  { %1656 = vmatprep.subr.bf16.mxu0 %v3610_v0 }
  0x2e   :  { %1377 = vmatpush1.bf16.msra.mxu1 %v3381_v25  ;;  %v3471_v25 = vld [vmem:[%s4816_s0 + $0x1e8] ss:$20 sps:$4 sm:$0xff]  }
  0x2f   :  { %1657 = vmatpush1.bf16.msra.mxu0 %v3767_v26  ;;  %1378 = vmatprep.subr.bf16.mxu1 %v3610_v0 }
  0x30   :  { %1658 = vmatprep.subr.bf16.mxu0 %v3610_v0 }
  0x32   :  { %1379 = vmatpush1.bf16.msra.mxu1 %v3383_v27  ;;  %v3475_v27 = vld [vmem:[%s4816_s0 + $0x214] ss:$20 sps:$4 sm:$0xff]  }
  0x33   :  { %1659 = vmatpush1.bf16.msra.mxu0 %v3778_v28  ;;  %1380 = vmatprep.subr.bf16.mxu1 %v3610_v0 }
  0x34   :  { %1660 = vmatprep.subr.bf16.mxu0 %v3610_v0 }
  0x36   :  { %1381 = vmatpush1.bf16.msra.mxu1 %v3385_v29  ;;  %v3478_v29 = vld [vmem:[%s4816_s0 + $0x210] ss:$20 sps:$4 sm:$0xff]  }
  0x37   :  { %1661 = vmatpush1.bf16.msra.mxu0 %v3789_v30  ;;  %1382 = vmatprep.subr.bf16.mxu1 %v3610_v0 }
  0x38   :  { %1662 = vmatprep.subr.bf16.mxu0 %v3610_v0 }
  0x3a   :  { %1383 = vmatpush1.bf16.msra.mxu1 %v3387_v31  ;;  %v3481_v31 = vld [vmem:[%s4816_s0 + $0x23c] ss:$20 sps:$4 sm:$0xff]  }
  0x3b   :  { %1663 = vmatpush1.bf16.msra.mxu0 %v3800_v32  ;;  %1384 = vmatprep.subr.bf16.mxu1 %v3610_v0 }
  0x3c   :  { %1664 = vmatprep.subr.bf16.mxu0 %v3610_v0 }
  0x3e   :  { %1385 = vmatpush1.bf16.msra.mxu1 %v3389_v33  ;;  %v3484_v33 = vld [vmem:[%s4816_s0 + $0x238] ss:$20 sps:$4 sm:$0xff]  }
  0x3f   :  { %1665 = vmatpush1.bf16.msra.mxu0 %v3811_v34  ;;  %3078 = vmatprep.subr.bf16.mxu1 %v3610_v0 }
  0x40   :  { %2946 = vmatprep.subr.bf16.mxu0 %v3611_v39 }
  0x41   :  { %1387 = vmatmul.mubr.bf16.vlgmr.msra.gmra.mrb[0].mxu1 %v3391_v35  ;;  %v3487_v35 = vld [vmem:[%s4816_s0 + $0x264] ss:$20 sps:$4 sm:$0xff]  }
  0x42   :  { %1667 = vmatmul.mubr.bf16.vlgmr.msra.gmra.mrb[0].mxu0 %v3394_v36  ;;  %1394 = vmatprep.mubr.bf16.mxu1 %v3398_v37  ;;  %v3489_v36 = vld [vmem:[%s4816_s0 + $0x258] ss:$20 sps:$4 sm:$0xff]   ;;  %v3490_v37 = vld [vmem:[%s4816_s0 + $0x260] ss:$20 sps:$4 sm:$0xff]  }
  0x43   :  { %2947 = vmatpush3.bf16.msra.mxu0 %v3397_v38  ;;  %3094 = vmatpush1.bf16.msra.mxu1 %v3641_v2  ;;  %v3434_v2 = vld [vmem:[%s4816_s0 + $0xf8] ss:$20 sps:$4 sm:$0xff]  }
  0x44   :  { %1674 = vmatprep.mubr.bf16.mxu0 %v3400_v40  ;;  %3079 = vmatprep.subr.bf16.mxu1 %v3610_v0  ;;  %v3491_v38 = vld [vmem:[%s4816_s0 + $0x284] ss:$20 sps:$4 sm:$0xff]   ;;  %v3493_v40 = vld [vmem:[%s4816_s0 + $0x280] ss:$20 sps:$4 sm:$0xff]  }
  0x45   :  { %2948 = vmatprep.subr.bf16.mxu0 %v3611_v39 }
  0x47   :  { %3095 = vmatpush1.bf16.msra.mxu1 %v3651_v4  ;;  %2949 = vmatpush3.bf16.msra.mxu0 %v3422_v41  ;;  %v3437_v4 = vld [vmem:[%s4816_s0 + $0x124] ss:$20 sps:$4 sm:$0xff]  }
  0x48   :  { %3080 = vmatprep.subr.bf16.mxu1 %v3610_v0  ;;  %2950 = vmatprep.subr.bf16.mxu0 %v3611_v39  ;;  %v3494_v41 = vld [vmem:[%s4816_s0 + $0x10] ss:$20 sps:$4 sm:$0xff]  }
  0x49   :  { %1395 = vmatmul.mubr.bf16.gmra.mrb[4].mxu1 %v3402_v42  ;;  %v3495_v42 = vld [vmem:[%s4816_s0 + $0x2ac] ss:$20 sps:$4 sm:$0xff]  }
  0x4a   :  { %1675 = vmatmul.mubr.bf16.gmra.mrb[4].mxu0 %v3403_v43  ;;  %1402 = vmatprep.mubr.bf16.mxu1 %v3404_v44  ;;  %v3497_v43 = vld [vmem:[%s4816_s0 + $0x2a8] ss:$20 sps:$4 sm:$0xff]   ;;  %v3498_v44 = vld [vmem:[%s4816_s0 + $0x38] ss:$20 sps:$4 sm:$0xff]  }
  0x4b   :  { %1682 = vmatprep.mubr.bf16.mxu0 %v3406_v45  ;;  %3096 = vmatpush1.bf16.msra.mxu1 %v3662_v6  ;;  %v3440_v6 = vld [vmem:[%s4816_s0 + $0x120] ss:$20 sps:$4 sm:$0xff]  }
  0x4c   :  { %3081 = vmatprep.subr.bf16.mxu1 %v3610_v0  ;;  %2951 = vmatpush3.bf16.msra.mxu0 %v3447_v46  ;;  %v3499_v45 = vld [vmem:[%s4816_s0 + $0x2d4] ss:$20 sps:$4 sm:$0xff]   ;;  %v3501_v46 = vld [vmem:[%s4816_s0 + $0x2d0] ss:$20 sps:$4 sm:$0xff]  }
  0x4d   :  { %2952 = vmatprep.subr.bf16.mxu0 %v3611_v39 }
  0x4f   :  { %3097 = vmatpush1.bf16.msra.mxu1 %v3673_v8  ;;  %v3443_v8 = vld [vmem:[%s4816_s0 + $0x14c] ss:$20 sps:$4 sm:$0xff]  }
  0x50   :  { %3082 = vmatprep.subr.bf16.mxu1 %v3610_v0  ;;  %2953 = vmatpush3.bf16.msra.mxu0 %v3472_v47  ;;  %v3502_v47 = vld [vmem:[%s4816_s0 + $0x60] ss:$20 sps:$4 sm:$0xff]  }
  0x51   :  { %1403 = vmatmul.mubr.bf16.gmra.mrb[8].mxu1 %v3408_v48  ;;  %v3503_v48 = vld [vmem:[%s4816_s0 + $0x2fc] ss:$20 sps:$4 sm:$0xff]  }
  0x52   :  { %1683 = vmatmul.mubr.bf16.gmra.mrb[8].mxu0 %v3409_v49  ;;  %1410 = vmatprep.mubr.bf16.mxu1 %v3410_v50  ;;  %v3505_v49 = vld [vmem:[%s4816_s0 + $0x2f8] ss:$20 sps:$4 sm:$0xff]   ;;  %v3506_v50 = vld [vmem:[%s4816_s0 + $0x88] ss:$20 sps:$4 sm:$0xff]  }
  0x53   :  { %1690 = vmatprep.mubr.bf16.mxu0 %v3412_v51  ;;  %3098 = vmatpush1.bf16.msra.mxu1 %v3684_v10  ;;  %v3446_v10 = vld [vmem:[%s4816_s0 + $0x148] ss:$20 sps:$4 sm:$0xff]   ;;  %v3507_v51 = vld [vmem:[%s4816_s0 + $0x324] ss:$20 sps:$4 sm:$0xff]  }
  0x54   :  { %3083 = vmatprep.subr.bf16.mxu1 %v3610_v0 }
  0x57   :  { %3099 = vmatpush1.bf16.msra.mxu1 %v3695_v12  ;;  %v3450_v12 = vld [vmem:[%s4816_s0 + $0x174] ss:$20 sps:$4 sm:$0xff]  }
  0x58   :  { %3084 = vmatprep.subr.bf16.mxu1 %v3610_v0 }
  0x59   :  { %1411 = vmatmul.mubr.bf16.gmra.mrb[12].mxu1 %v3414_v52  ;;  %v3509_v52 = vld [vmem:[%s4816_s0 + $0x320] ss:$20 sps:$4 sm:$0xff]  }
  0x5a   :  { %1691 = vmatmul.mubr.bf16.gmra.mrb[12].mxu0 %v3415_v53  ;;  %1418 = vmatprep.mubr.bf16.mxu1 %v3416_v54  ;;  %v3510_v53 = vld [vmem:[%s4816_s0 + $0xb0] ss:$20 sps:$4 sm:$0xff]   ;;  %v3511_v54 = vld [vmem:[%s4816_s0 + $0x34c] ss:$20 sps:$4 sm:$0xff]  }
  0x5b   :  { %1698 = vmatprep.mubr.bf16.mxu0 %v3418_v55  ;;  %3100 = vmatpush1.bf16.msra.mxu1 %v3706_v14  ;;  %v3454_v14 = vld [vmem:[%s4816_s0 + $0x194] ss:$20 sps:$4 sm:$0xff]  }
  0x5c   :  { %3085 = vmatprep.subr.bf16.mxu1 %v3610_v0  ;;  %v3513_v55 = vld [vmem:[%s4816_s0 + $0x348] ss:$20 sps:$4 sm:$0xff]  }
  0x5f   :  { %3101 = vmatpush1.bf16.msra.mxu1 %v3717_v16  ;;  %v3458_v16 = vld [vmem:[%s4816_s0 + $0x190] ss:$20 sps:$4 sm:$0xff]  }
  0x60   :  { %3086 = vmatprep.subr.bf16.mxu1 %v3610_v0 }
  0x61   :  { %1419 = vmatmul.mubr.bf16.gmra.mrb[16].mxu1 %v3420_v56  ;;  %v3514_v56 = vld [vmem:[%s4816_s0 + $0xd8] ss:$20 sps:$4 sm:$0xff]  }
  0x62   :  { %1699 = vmatmul.mubr.bf16.gmra.mrb[16].mxu0 %v3421_v57  ;;  %1426 = vmatprep.mubr.bf16.mxu1 %v3423_v58  ;;  %v3515_v57 = vld [vmem:[%s4816_s0 + $0x374] ss:$20 sps:$4 sm:$0xff]   ;;  %v3517_v58 = vld [vmem:[%s4816_s0 + $0x370] ss:$20 sps:$4 sm:$0xff]  }
  0x63   :  { %1706 = vmatprep.mubr.bf16.mxu0 %v3425_v59  ;;  %3102 = vmatpush1.bf16.msra.mxu1 %v3728_v18  ;;  %v3460_v18 = vld [vmem:[%s4816_s0 + $0x1bc] ss:$20 sps:$4 sm:$0xff]   ;;  %v3518_v59 = vld [vmem:[%s4816_s0 + $0x100] ss:$20 sps:$4 sm:$0xff]  }
  0x64   :  { %3087 = vmatprep.subr.bf16.mxu1 %v3610_v0 }
  0x67   :  { %3103 = vmatpush1.bf16.msra.mxu1 %v3745_v22  ;;  %v3466_v22 = vld [vmem:[%s4816_s0 + $0x1e4] ss:$20 sps:$4 sm:$0xff]  }
  0x68   :  { %3088 = vmatprep.subr.bf16.mxu1 %v3610_v0 }
  0x69   :  { %1427 = vmatmul.mubr.bf16.gmra.mrb[20].mxu1 %v3427_v60  ;;  %v3519_v60 = vld [vmem:[%s4816_s0 + $0x39c] ss:$20 sps:$4 sm:$0xff]  }
  0x6a   :  { %1707 = vmatmul.mubr.bf16.gmra.mrb[20].mxu0 %v3428_v61  ;;  %1434 = vmatprep.mubr.bf16.mxu1 %v3429_v62  ;;  %v3521_v61 = vld [vmem:[%s4816_s0 + $0x398] ss:$20 sps:$4 sm:$0xff]   ;;  %v3522_v62 = vld [vmem:[%s4816_s0 + $0x128] ss:$20 sps:$4 sm:$0xff]  }
  0x6b   :  { %1714 = vmatprep.mubr.bf16.mxu0 %v3431_v63  ;;  %3104 = vmatpush1.bf16.msra.mxu1 %v3756_v24  ;;  %v3470_v24 = vld [vmem:[%s4816_s0 + $0x1e0] ss:$20 sps:$4 sm:$0xff]   ;;  %v3523_v63 = vld [vmem:[%s4816_s0 + $0x3c4] ss:$20 sps:$4 sm:$0xff]  }
  0x6c   :  { %3089 = vmatprep.subr.bf16.mxu1 %v3610_v0 }
  0x6f   :  { %3105 = vmatpush1.bf16.msra.mxu1 %v3767_v26  ;;  %v3473_v26 = vld [vmem:[%s4816_s0 + $0x20c] ss:$20 sps:$4 sm:$0xff]  }
  0x70   :  { %3090 = vmatprep.subr.bf16.mxu1 %v3610_v0 }
  0x71   :  { %1435 = vmatmul.mubr.bf16.gmra.mrb[24].mxu1 %v3433_v1  ;;  %v3525_v1 = vld [vmem:[%s4816_s0 + $0x3c0] ss:$20 sps:$4 sm:$0xff]  }
  0x72   :  { %1715 = vmatmul.mubr.bf16.gmra.mrb[24].mxu0 %v3434_v2  ;;  %1442 = vmatprep.mubr.bf16.mxu1 %v3435_v3  ;;  %v3526_v2 = vld [vmem:[%s4816_s0 + $0x150] ss:$20 sps:$4 sm:$0xff]   ;;  %v3527_v3 = vld [vmem:[%s4816_s0 + $0x3ec] ss:$20 sps:$4 sm:$0xff]  }
  0x73   :  { %1722 = vmatprep.mubr.bf16.mxu0 %v3437_v4  ;;  %3106 = vmatpush1.bf16.msra.mxu1 %v3778_v28  ;;  %v3477_v28 = vld [vmem:[%s4816_s0 + $0x208] ss:$20 sps:$4 sm:$0xff]  }
  0x74   :  { %3091 = vmatprep.subr.bf16.mxu1 %v3610_v0  ;;  %v3529_v4 = vld [vmem:[%s4816_s0 + $0x3e8] ss:$20 sps:$4 sm:$0xff]  }
  0x77   :  { %3107 = vmatpush1.bf16.msra.mxu1 %v3789_v30  ;;  %v3479_v30 = vld [vmem:[%s4816_s0 + $0x234] ss:$20 sps:$4 sm:$0xff]  }
  0x78   :  { %3092 = vmatprep.subr.bf16.mxu1 %v3610_v0 }
  0x79   :  { %1443 = vmatmul.mubr.bf16.gmra.mrb[28].mxu1 %v3439_v5  ;;  %v3530_v5 = vld [vmem:[%s4816_s0 + $0x178] ss:$20 sps:$4 sm:$0xff]  }
  0x7a   :  { %1723 = vmatmul.mubr.bf16.gmra.mrb[28].mxu0 %v3440_v6  ;;  %1450 = vmatprep.mubr.bf16.mxu1 %v3441_v7  ;;  %v3531_v6 = vld [vmem:[%s4816_s0 + $0x414] ss:$20 sps:$4 sm:$0xff]   ;;  %v3533_v7 = vld [vmem:[%s4816_s0 + $0x410] ss:$20 sps:$4 sm:$0xff]  }
  0x7b   :  { %1730 = vmatprep.mubr.bf16.mxu0 %v3443_v8  ;;  %3108 = vmatpush1.bf16.msra.mxu1 %v3800_v32  ;;  %v3483_v32 = vld [vmem:[%s4816_s0 + $0x230] ss:$20 sps:$4 sm:$0xff]   ;;  %v3534_v8 = vld [vmem:[%s4816_s0 + $0x1a0] ss:$20 sps:$4 sm:$0xff]  }
  0x7c   :  { %3093 = vmatprep.subr.bf16.mxu1 %v3610_v0  ;;  %v3452_v0 = vld [vmem:[%s4816_s0 + $0x168] ss:$20 sps:$4 sm:$0xff]  }
  0x7f   :  { %3109 = vmatpush1.bf16.msra.mxu1 %v3811_v34  ;;  %v3485_v34 = vld [vmem:[%s4816_s0 + $0x25c] ss:$20 sps:$4 sm:$0xff]  }
  0x81   :  { %1451 = vmatmul.mubr.bf16.gmra.mrb[32].mxu1 %v3445_v9  ;;  %v3535_v9 = vld [vmem:[%s4816_s0 + $0x43c] ss:$20 sps:$4 sm:$0xff]  }
  0x82   :  { %1731 = vmatmul.mubr.bf16.gmra.mrb[32].mxu0 %v3446_v10  ;;  %1458 = vmatprep.mubr.bf16.mxu1 %v3448_v11 }
  0x83   :  { %1738 = vmatprep.mubr.bf16.mxu0 %v3450_v12  ;;  %v3537_v12 = vld [vmem:[%s4816_s0 + $0x438] ss:$20 sps:$4 sm:$0xff]  }
  0x89   :  { %1459 = vmatmul.mubr.bf16.gmra.mrb[36].mxu1 %v3452_v0  ;;  %v3538_v0 = vld [vmem:[%s4816_s0 + $0x1c8] ss:$20 sps:$4 sm:$0xff]  }
  0x8a   :  { %1739 = vmatmul.mubr.bf16.gmra.mrb[36].mxu0 %v3453_v13  ;;  %1466 = vmatprep.mubr.bf16.mxu1 %v3454_v14  ;;  %v3539_v14 = vld [vmem:[%s4816_s0 + $0x464] ss:$20 sps:$4 sm:$0xff]  }
  0x8b   :  { %1746 = vmatprep.mubr.bf16.mxu0 %v3456_v15 }
  0x91   :  { %1467 = vmatmul.mubr.bf16.gmra.mrb[40].mxu1 %v3458_v16 }
  0x92   :  { %1747 = vmatmul.mubr.bf16.gmra.mrb[40].mxu0 %v3459_v17  ;;  %1474 = vmatprep.mubr.bf16.mxu1 %v3460_v18  ;;  %v3541_v18 = vld [vmem:[%s4816_s0 + $0x460] ss:$20 sps:$4 sm:$0xff]  }
  0x93   :  { %1754 = vmatprep.mubr.bf16.mxu0 %v3462_v19  ;;  %v3542_v19 = vld [vmem:[%s4816_s0 + $0x1f0] ss:$20 sps:$4 sm:$0xff]  }
  0x99   :  { %1475 = vmatmul.mubr.bf16.gmra.mrb[44].mxu1 %v3464_v20 }
  0x9a   :  { %1755 = vmatmul.mubr.bf16.gmra.mrb[44].mxu0 %v3465_v21  ;;  %1482 = vmatprep.mubr.bf16.mxu1 %v3466_v22  ;;  %v3543_v21 = vld [vmem:[%s4816_s0 + $0x48c] ss:$20 sps:$4 sm:$0xff]  }
  0x9b   :  { %1762 = vmatprep.mubr.bf16.mxu0 %v3468_v23  ;;  %v195_v23 = vld [vmem:[%s4816_s0 + $0x4b0] sm:$0xff] }
  0xa1   :  { %1483 = vmatmul.mubr.bf16.gmra.mrb[48].mxu1 %v3470_v24 }
  0xa2   :  { %1763 = vmatmul.mubr.bf16.gmra.mrb[48].mxu0 %v3471_v25  ;;  %1490 = vmatprep.mubr.bf16.mxu1 %v3473_v26  ;;  %v3545_v26 = vld [vmem:[%s4816_s0 + $0x488] ss:$20 sps:$4 sm:$0xff]  }
  0xa3   :  { %1770 = vmatprep.mubr.bf16.mxu0 %v3475_v27  ;;  %v3546_v27 = vld [vmem:[%s4816_s0 + $0x218] ss:$20 sps:$4 sm:$0xff]  }
  0xa9   :  { %1491 = vmatmul.mubr.bf16.gmra.mrb[52].mxu1 %v3477_v28 }
  0xaa   :  { %1771 = vmatmul.mubr.bf16.gmra.mrb[52].mxu0 %v3478_v29  ;;  %1498 = vmatprep.mubr.bf16.mxu1 %v3479_v30  ;;  %v2718_v29 = vcombine.high %v195_v23, %v195_v23 }
  0xab   :  { %1778 = vmatprep.mubr.bf16.mxu0 %v3481_v31 }
  0xb1   :  { %1499 = vmatmul.mubr.bf16.gmra.mrb[56].mxu1 %v3483_v32 }
  0xb2   :  { %1779 = vmatmul.mubr.bf16.gmra.mrb[56].mxu0 %v3484_v33  ;;  %1506 = vmatprep.mubr.bf16.mxu1 %v3485_v34  ;;  %v2717_v33 = vcombine.low %v195_v23, %v195_v23  ;;  %v3549_v34 = vld [vmem:[%s4816_s0 + $0x240] ss:$20 sps:$4 sm:$0xff]   ;;  %v3576_v23 = vld [vmem:[%s4816_s0 + $0x378] ss:$20 sps:$4 sm:$0xff]  }
  0xb3   :  { %1786 = vmatprep.mubr.bf16.mxu0 %v3487_v35 }
  0xb9   :  { %1507 = vmatmul.mubr.bf16.gmra.mrb[60].mxu1 %v3489_v36  ;;  %v3552_v36 = vld [vmem:[%s4816_s0 + $0x28c] ss:$20 sps:$4 sm:$0xff]  }
  0xba   :  { %1787 = vmatmul.mubr.bf16.gmra.mrb[60].mxu0 %v3490_v37  ;;  %1514 = vmatprep.mubr.bf16.mxu1 %v3491_v38 }
  0xbb   :  { %2954 = vmatprep.mubr.msk.bf16.mxu0 %vm3612_vm0, %v3611_v39 }
  0xc1   :  { %1515 = vmatmul.mubr.bf16.gmra.mrb[64].mxu1 %v3493_v40  ;;  %v3550_v40 = vld [vmem:[%s4816_s0 + $0x288] ss:$20 sps:$4 sm:$0xff]  }
  0xc2   :  { %2955 = vmatmul.mubr.msk.bf16.vlgmr.msra.gmra.mrb[0].mxu0 %vm1260_vm1, %v3494_v41  ;;  %1522 = vmatprep.mubr.bf16.mxu1 %v3495_v42  ;;  %v3553_v42 = vld [vmem:[%s4816_s0 + $0x268] ss:$20 sps:$4 sm:$0xff]  }
  0xc3   :  { %2958 = vmatprep.mubr.msk.bf16.mxu0 %vm3612_vm0, %v3611_v39 }
  0xc9   :  { %1523 = vmatmul.mubr.bf16.gmra.mrb[68].mxu1 %v3497_v43 }
  0xca   :  { %2959 = vmatmul.mubr.msk.bf16.gmra.mrb[4].mxu0 %vm1260_vm1, %v3498_v44  ;;  %1530 = vmatprep.mubr.bf16.mxu1 %v3499_v45  ;;  %v3554_v44 = vld [vmem:[%s4816_s0 + $0x2b4] ss:$20 sps:$4 sm:$0xff]  }
  0xcb   :  { %2962 = vmatprep.mubr.msk.bf16.mxu0 %vm3612_vm0, %v3611_v39 }
  0xd1   :  { %1531 = vmatmul.mubr.bf16.gmra.mrb[72].mxu1 %v3501_v46 }
  0xd2   :  { %2963 = vmatmul.mubr.msk.bf16.gmra.mrb[8].mxu0 %vm1260_vm1, %v3502_v47  ;;  %1538 = vmatprep.mubr.bf16.mxu1 %v3503_v48  ;;  %v3556_v48 = vld [vmem:[%s4816_s0 + $0x2b0] ss:$20 sps:$4 sm:$0xff]  }
  0xd3   :  { %2966 = vmatprep.mubr.msk.bf16.mxu0 %vm3612_vm0, %v3611_v39 }
  0xd9   :  { %1539 = vmatmul.mubr.bf16.gmra.mrb[76].mxu1 %v3505_v49  ;;  %v3557_v49 = vld [vmem:[%s4816_s0 + $0x290] ss:$20 sps:$4 sm:$0xff]  }
  0xda   :  { %2967 = vmatmul.mubr.msk.bf16.gmra.mrb[12].mxu0 %vm1260_vm1, %v3506_v50  ;;  %1546 = vmatprep.mubr.bf16.mxu1 %v3507_v51  ;;  %v3558_v51 = vld [vmem:[%s4816_s0 + $0x2dc] ss:$20 sps:$4 sm:$0xff]  }
  0xdb   :  { %2970 = vmatprep.mubr.msk.bf16.mxu0 %vm3612_vm0, %v3611_v39 }
  0xe1   :  { %1547 = vmatmul.mubr.bf16.gmra.mrb[80].mxu1 %v3509_v52 }
  0xe2   :  { %2971 = vmatmul.mubr.msk.bf16.gmra.mrb[16].mxu0 %vm1260_vm1, %v3510_v53  ;;  %1554 = vmatprep.mubr.bf16.mxu1 %v3511_v54 }
  0xe3   :  { %2974 = vmatprep.mubr.msk.bf16.mxu0 %vm3612_vm0, %v3611_v39 }
  0xe9   :  { %1555 = vmatmul.mubr.bf16.gmra.mrb[84].mxu1 %v3513_v55  ;;  %v3560_v55 = vld [vmem:[%s4816_s0 + $0x2d8] ss:$20 sps:$4 sm:$0xff]  }
  0xea   :  { %2975 = vmatmul.mubr.msk.bf16.gmra.mrb[20].mxu0 %vm1260_vm1, %v3514_v56  ;;  %1562 = vmatprep.mubr.bf16.mxu1 %v3515_v57  ;;  %v3561_v56 = vld [vmem:[%s4816_s0 + $0x2b8] ss:$20 sps:$4 sm:$0xff]  }
  0xeb   :  { %2978 = vmatprep.mubr.msk.bf16.mxu0 %vm3612_vm0, %v3611_v39 }
  0xf1   :  { %1563 = vmatmul.mubr.bf16.gmra.mrb[88].mxu1 %v3517_v58  ;;  %v3562_v58 = vld [vmem:[%s4816_s0 + $0x304] ss:$20 sps:$4 sm:$0xff]  }
  0xf2   :  { %2979 = vmatmul.mubr.msk.bf16.gmra.mrb[24].mxu0 %vm1260_vm1, %v3518_v59  ;;  %1570 = vmatprep.mubr.bf16.mxu1 %v3519_v60 }
  0xf3   :  { %2982 = vmatprep.mubr.msk.bf16.mxu0 %vm3612_vm0, %v3611_v39 }
  0xf9   :  { %1571 = vmatmul.mubr.bf16.gmra.mrb[92].mxu1 %v3521_v61 }
  0xfa   :  { %2983 = vmatmul.mubr.msk.bf16.gmra.mrb[28].mxu0 %vm1260_vm1, %v3522_v62  ;;  %1578 = vmatprep.mubr.bf16.mxu1 %v3523_v63  ;;  %v3564_v62 = vld [vmem:[%s4816_s0 + $0x300] ss:$20 sps:$4 sm:$0xff]  }
  0xfb   :  { %2986 = vmatprep.mubr.msk.bf16.mxu0 %vm3612_vm0, %v3611_v39  ;;  %v3565_v63 = vld [vmem:[%s4816_s0 + $0x2e0] ss:$20 sps:$4 sm:$0xff]  }
 0x101   :  { %1579 = vmatmul.mubr.bf16.gmra.mrb[96].mxu1 %v3525_v1 }
 0x102   :  { %2987 = vmatmul.mubr.msk.bf16.gmra.mrb[32].mxu0 %vm1260_vm1, %v3526_v2  ;;  %1586 = vmatprep.mubr.bf16.mxu1 %v3527_v3  ;;  %v3566_v2 = vld [vmem:[%s4816_s0 + $0x32c] ss:$20 sps:$4 sm:$0xff]  }
 0x103   :  { %2990 = vmatprep.mubr.msk.bf16.mxu0 %vm3612_vm0, %v3611_v39 }
 0x109   :  { %1587 = vmatmul.mubr.bf16.gmra.mrb[100].mxu1 %v3529_v4 }
 0x10a   :  { %2991 = vmatmul.mubr.msk.bf16.gmra.mrb[36].mxu0 %vm1260_vm1, %v3530_v5  ;;  %1594 = vmatprep.mubr.bf16.mxu1 %v3531_v6  ;;  %v3568_v6 = vld [vmem:[%s4816_s0 + $0x328] ss:$20 sps:$4 sm:$0xff]  }
 0x10b   :  { %2994 = vmatprep.mubr.msk.bf16.mxu0 %vm3612_vm0, %v3611_v39 }
 0x111   :  { %1595 = vmatmul.mubr.bf16.gmra.mrb[104].mxu1 %v3533_v7  ;;  %v3569_v7 = vld [vmem:[%s4816_s0 + $0x308] ss:$20 sps:$4 sm:$0xff]  }
 0x112   :  { %2995 = vmatmul.mubr.msk.bf16.gmra.mrb[40].mxu0 %vm1260_vm1, %v3534_v8  ;;  %1602 = vmatprep.mubr.bf16.mxu1 %v3535_v9  ;;  %v3570_v9 = vld [vmem:[%s4816_s0 + $0x354] ss:$20 sps:$4 sm:$0xff]  }
 0x113   :  { %2998 = vmatprep.mubr.msk.bf16.mxu0 %vm3612_vm0, %v3611_v39 }
 0x114   :  { %v4186_v10 = vpop.f32.mrb[0].mxu1 }
 0x115   :  { %v1390_v11 = vpop.f32.mrb[1].mxu1 }
 0x116   :  { %v4194_v13 = vpop.f32.mrb[2].mxu1 }
 0x117   :  { %v1393_v15 = vpop.f32.mrb[3].mxu1 }
 0x118   :  { %v3573_v15 = vld [vmem:[%s4816_s0 + $0x330] ss:$20 sps:$4 sm:$0xff]  }
 0x119   :  { %1603 = vmatmul.mubr.bf16.gmra.mrb[108].mxu1 %v3537_v12 }
 0x11a   :  { %2999 = vmatmul.mubr.msk.bf16.gmra.mrb[44].mxu0 %vm1260_vm1, %v3538_v0  ;;  %1610 = vmatprep.mubr.bf16.mxu1 %v3539_v14  ;;  %v3572_v14 = vld [vmem:[%s4816_s0 + $0x350] ss:$20 sps:$4 sm:$0xff]  }
 0x11b   :  { %3002 = vmatprep.mubr.msk.bf16.mxu0 %vm3612_vm0, %v3611_v39 }
 0x11c   :  { %v4202_v16 = vpop.f32.mrb[4].mxu1 }
 0x11d   :  { %v1398_v17 = vpop.f32.mrb[5].mxu1 }
 0x11e   :  { %v4210_v20 = vpop.f32.mrb[6].mxu1 }
 0x11f   :  { %v1401_v22 = vpop.f32.mrb[7].mxu1 }
 0x121   :  { %1611 = vmatmul.mubr.bf16.gmra.mrb[112].mxu1 %v3541_v18  ;;  %v3574_v18 = vld [vmem:[%s4816_s0 + $0x37c] ss:$20 sps:$4 sm:$0xff]  }
 0x122   :  { %3003 = vmatmul.mubr.msk.bf16.gmra.mrb[48].mxu0 %vm1260_vm1, %v3542_v19  ;;  %1618 = vmatprep.mubr.bf16.mxu1 %v3543_v21 }
 0x123   :  { %3006 = vmatprep.mubr.msk.bf16.mxu0 %vm3612_vm0, %v3611_v39 }
 0x124   :  { %v4221_v24 = vpop.f32.mrb[8].mxu1 }
 0x125   :  { %v1406_v25 = vpop.f32.mrb[9].mxu1 }
 0x126   :  { %v4229_v28 = vpop.f32.mrb[10].mxu1  ;;  %v3577_v25 = vld [vmem:[%s4816_s0 + $0x358] ss:$20 sps:$4 sm:$0xff]  }
 0x127   :  { %v1409_v30 = vpop.f32.mrb[11].mxu1 }
 0x129   :  { %1619 = vmatmul.mubr.bf16.gmra.mrb[116].mxu1 %v3545_v26 }
 0x12a   :  { %3007 = vmatmul.mubr.msk.bf16.gmra.mrb[52].mxu0 %vm1260_vm1, %v3546_v27  ;;  %1626 = vmatprep.mubr.bf16.mxu1 %v2718_v29  ;;  %v3578_v27 = vld [vmem:[%s4816_s0 + $0x3a4] ss:$20 sps:$4 sm:$0xff]  }
 0x12b   :  { %3010 = vmatprep.mubr.msk.bf16.mxu0 %vm3612_vm0, %v3611_v39 }
 0x12c   :  { %v4234_v31 = vpop.f32.mrb[12].mxu1 }
 0x12d   :  { %v1414_v32 = vpop.f32.mrb[13].mxu1 }
 0x12e   :  { %v4239_v35 = vpop.f32.mrb[14].mxu1 }
 0x12f   :  { %v1417_v37 = vpop.f32.mrb[15].mxu1 }
 0x130   :  { %v3582_v37 = vld [vmem:[%s4816_s0 + $0x3cc] ss:$20 sps:$4 sm:$0xff]  }
 0x131   :  { %1627 = vmatmul.mubr.bf16.gmra.mrb[120].mxu1 %v2717_v33  ;;  %v3580_v33 = vld [vmem:[%s4816_s0 + $0x3a0] ss:$20 sps:$4 sm:$0xff]  }
 0x132   :  { %3011 = vmatmul.mubr.msk.bf16.gmra.mrb[56].mxu0 %vm1260_vm1, %v3549_v34  ;;  %1794 = vmatprep.mubr.bf16.mxu1 %v3552_v36  ;;  %v3581_v34 = vld [vmem:[%s4816_s0 + $0x380] ss:$20 sps:$4 sm:$0xff]  }
 0x133   :  { %3014 = vmatprep.mubr.msk.bf16.mxu0 %vm3612_vm0, %v3611_v39 }
 0x134   :  { %v4247_v38 = vpop.f32.mrb[16].mxu1 }
 0x135   :  { %v1422_v41 = vpop.f32.mrb[17].mxu1 }
 0x136   :  { %v4255_v43 = vpop.f32.mrb[18].mxu1 }
 0x137   :  { %v1425_v45 = vpop.f32.mrb[19].mxu1 }
 0x138   :  { %v3585_v45 = vld [vmem:[%s4816_s0 + $0x3a8] ss:$20 sps:$4 sm:$0xff]  }
 0x139   :  { %1795 = vmatmul.mubr.bf16.vlgmr.msra.gmra.mrb[64].mxu1 %v3550_v40 }
 0x13a   :  { %3015 = vmatmul.mubr.msk.bf16.gmra.mrb[60].mxu0 %vm1260_vm1, %v3553_v42  ;;  %1802 = vmatprep.mubr.bf16.mxu1 %v3554_v44  ;;  %v3584_v44 = vld [vmem:[%s4816_s0 + $0x3c8] ss:$20 sps:$4 sm:$0xff]  }
 0x13b   :  { %3018 = vmatprep.mubr.msk.bf16.mxu0 %vm3612_vm0, %v3611_v39 }
 0x13c   :  { %v4263_v46 = vpop.f32.mrb[20].mxu1 }
 0x13d   :  { %v1430_v47 = vpop.f32.mrb[21].mxu1 }
 0x13e   :  { %v4271_v50 = vpop.f32.mrb[22].mxu1 }
 0x13f   :  { %v1433_v52 = vpop.f32.mrb[23].mxu1 }
 0x141   :  { %1803 = vmatmul.mubr.bf16.gmra.mrb[68].mxu1 %v3556_v48  ;;  %v3586_v48 = vld [vmem:[%s4816_s0 + $0x3f4] ss:$20 sps:$4 sm:$0xff]  }
 0x142   :  { %3019 = vmatmul.mubr.msk.bf16.gmra.mrb[64].mxu0 %vm1260_vm1, %v3557_v49  ;;  %1810 = vmatprep.mubr.bf16.mxu1 %v3558_v51 }
 0x143   :  { %3022 = vmatprep.mubr.msk.bf16.mxu0 %vm3612_vm0, %v3611_v39 }
 0x144   :  { %v4279_v53 = vpop.f32.mrb[24].mxu1 }
 0x145   :  { %v1438_v54 = vpop.f32.mrb[25].mxu1 }
 0x146   :  { %v4287_v57 = vpop.f32.mrb[26].mxu1  ;;  %v3588_v54 = vld [vmem:[%s4816_s0 + $0x3f0] ss:$20 sps:$4 sm:$0xff]  }
 0x147   :  { %v1441_v59 = vpop.f32.mrb[27].mxu1 }
 0x149   :  { %1811 = vmatmul.mubr.bf16.gmra.mrb[72].mxu1 %v3560_v55  ;;  %v3589_v55 = vld [vmem:[%s4816_s0 + $0x3d0] ss:$20 sps:$4 sm:$0xff]  }
 0x14a   :  { %3023 = vmatmul.mubr.msk.bf16.gmra.mrb[68].mxu0 %vm1260_vm1, %v3561_v56  ;;  %1818 = vmatprep.mubr.bf16.mxu1 %v3562_v58  ;;  %v3590_v58 = vld [vmem:[%s4816_s0 + $0x41c] ss:$20 sps:$4 sm:$0xff]  }
 0x14b   :  { %3026 = vmatprep.mubr.msk.bf16.mxu0 %vm3612_vm0, %v3611_v39 }
 0x14c   :  { %v4295_v60 = vpop.f32.mrb[28].mxu1 }
 0x14d   :  { %v1446_v61 = vpop.f32.mrb[29].mxu1 }
 0x14e   :  { %v4303_v1 = vpop.f32.mrb[30].mxu1 }
 0x14f   :  { %v1449_v3 = vpop.f32.mrb[31].mxu1 }
 0x151   :  { %1819 = vmatmul.mubr.bf16.gmra.mrb[76].mxu1 %v3564_v62 }
 0x152   :  { %3027 = vmatmul.mubr.msk.bf16.gmra.mrb[72].mxu0 %vm1260_vm1, %v3565_v63  ;;  %1826 = vmatprep.mubr.bf16.mxu1 %v3566_v2  ;;  %v3592_v63 = vld [vmem:[%s4816_s0 + $0x418] ss:$20 sps:$4 sm:$0xff]  }
 0x153   :  { %3030 = vmatprep.mubr.msk.bf16.mxu0 %vm3612_vm0, %v3611_v39  ;;  %v3593_v2 = vld [vmem:[%s4816_s0 + $0x3f8] ss:$20 sps:$4 sm:$0xff]  }
 0x154   :  { %v4311_v4 = vpop.f32.mrb[32].mxu1 }
 0x155   :  { %v1454_v5 = vpop.f32.mrb[33].mxu1 }
 0x156   :  { %v4319_v8 = vpop.f32.mrb[34].mxu1  ;;  %v3594_v5 = vld [vmem:[%s4816_s0 + $0x444] ss:$20 sps:$4 sm:$0xff]  }
 0x157   :  { %v1457_v11 = vpop.f32.mrb[35].mxu1 }
 0x158   :  { %v3596_v11 = vld [vmem:[%s4816_s0 + $0x440] ss:$20 sps:$4 sm:$0xff]  }
 0x159   :  { %1827 = vmatmul.mubr.bf16.gmra.mrb[80].mxu1 %v3568_v6 }
 0x15a   :  { %3031 = vmatmul.mubr.msk.bf16.gmra.mrb[76].mxu0 %vm1260_vm1, %v3569_v7  ;;  %1834 = vmatprep.mubr.bf16.mxu1 %v3570_v9 }
 0x15b   :  { %3034 = vmatprep.mubr.msk.bf16.mxu0 %vm3612_vm0, %v3611_v39 }
 0x15c   :  { %v4327_v12 = vpop.f32.mrb[36].mxu1 }
 0x15d   :  { %v1462_v0 = vpop.f32.mrb[37].mxu1 }
 0x15e   :  { %v4335_v17 = vpop.f32.mrb[38].mxu1  ;;  %v3597_v0 = vld [vmem:[%s4816_s0 + $0x420] ss:$20 sps:$4 sm:$0xff]  }
 0x15f   :  { %v1465_v19 = vpop.f32.mrb[39].mxu1 }
 0x160   :  { %v4439_v19 = vld [vmem:[%s4817_s2] ss:$0 sm:$0xff] }
 0x161   :  { %1835 = vmatmul.mubr.bf16.gmra.mrb[84].mxu1 %v3572_v14 }
 0x162   :  { %3035 = vmatmul.mubr.msk.bf16.gmra.mrb[80].mxu0 %vm1260_vm1, %v3573_v15  ;;  %1842 = vmatprep.mubr.bf16.mxu1 %v3574_v18  ;;  %v3598_v15 = vld [vmem:[%s4816_s0 + $0x46c] ss:$20 sps:$4 sm:$0xff]  }
 0x163   :  { %3038 = vmatprep.mubr.msk.bf16.mxu0 %vm3612_vm0, %v3611_v39 }
 0x164   :  { %v4343_v21 = vpop.f32.mrb[40].mxu1 }
 0x165   :  { %v1470_v22 = vpop.f32.mrb[41].mxu1 }
 0x166   :  { %v4351_v26 = vpop.f32.mrb[42].mxu1  ;;  %v1389_v22 = vadd.f32 %v4439_v19, %v4186_v10 }
 0x167   :  { %v1473_v29 = vpop.f32.mrb[43].mxu1 }
 0x169   :  { %1843 = vmatmul.mubr.bf16.gmra.mrb[88].mxu1 %v3576_v23 }
 0x16a   :  { %3039 = vmatmul.mubr.msk.bf16.gmra.mrb[84].mxu0 %vm1260_vm1, %v3577_v25  ;;  %1850 = vmatprep.mubr.bf16.mxu1 %v3578_v27  ;;  %v3600_v25 = vld [vmem:[%s4816_s0 + $0x468] ss:$20 sps:$4 sm:$0xff]   ;;  %v1392_v27 = vadd.f32 %v4439_v19, %v4194_v13 }
 0x16b   :  { %3042 = vmatprep.mubr.msk.bf16.mxu0 %vm3612_vm0, %v3611_v39  ;;  %v196_v13 = vld [vmem:[%s4816_s0 + $0x4b8] sm:$0xff] }
 0x16c   :  { %v4359_v30 = vpop.f32.mrb[44].mxu1 }
 0x16d   :  { %v1478_v32 = vpop.f32.mrb[45].mxu1 }
 0x16e   :  { %v4367_v36 = vpop.f32.mrb[46].mxu1 }
 0x16f   :  { %v1481_v40 = vpop.f32.mrb[47].mxu1 }
 0x171   :  { %1851 = vmatmul.mubr.bf16.gmra.mrb[92].mxu1 %v3580_v33  ;;  %v3601_v33 = vld [vmem:[%s4816_s0 + $0x448] ss:$20 sps:$4 sm:$0xff]  }
 0x172   :  { %3043 = vmatmul.mubr.msk.bf16.gmra.mrb[88].mxu0 %vm1260_vm1, %v3581_v34  ;;  %1858 = vmatprep.mubr.bf16.mxu1 %v3582_v37  ;;  %v3602_v34 = vld [vmem:[%s4816_s0 + $0x494] ss:$20 sps:$4 sm:$0xff]  }
 0x173   :  { %3046 = vmatprep.mubr.msk.bf16.mxu0 %vm3612_vm0, %v3611_v39 }
 0x174   :  { %v4375_v41 = vpop.f32.mrb[48].mxu1 }
 0x175   :  { %v1486_v42 = vpop.f32.mrb[49].mxu1 }
 0x176   :  { %v4383_v47 = vpop.f32.mrb[50].mxu1 }
 0x177   :  { %v1489_v49 = vpop.f32.mrb[51].mxu1 }
 0x179   :  { %1859 = vmatmul.mubr.bf16.gmra.mrb[96].mxu1 %v3584_v44 }
 0x17a   :  { %3047 = vmatmul.mubr.msk.bf16.gmra.mrb[92].mxu0 %vm1260_vm1, %v3585_v45  ;;  %1866 = vmatprep.mubr.bf16.mxu1 %v3586_v48  ;;  %v1397_v48 = vadd.f32 %v4439_v19, %v4202_v16 }
 0x17b   :  { %3050 = vmatprep.mubr.msk.bf16.mxu0 %vm3612_vm0, %v3611_v39 }
 0x17c   :  { %v4391_v51 = vpop.f32.mrb[52].mxu1 }
 0x17d   :  { %v1494_v52 = vpop.f32.mrb[53].mxu1 }
 0x17e   :  { %v4399_v56 = vpop.f32.mrb[54].mxu1 }
 0x17f   :  { %v1497_v59 = vpop.f32.mrb[55].mxu1 }
 0x180   :  { %v3605_v59 = vld [vmem:[%s4816_s0 + $0x470] ss:$20 sps:$4 sm:$0xff]  }
 0x181   :  { %1867 = vmatmul.mubr.bf16.gmra.mrb[100].mxu1 %v3588_v54  ;;  %v3604_v54 = vld [vmem:[%s4816_s0 + $0x490] ss:$20 sps:$4 sm:$0xff]  }
 0x182   :  { %3051 = vmatmul.mubr.msk.bf16.gmra.mrb[96].mxu0 %vm1260_vm1, %v3589_v55  ;;  %1874 = vmatprep.mubr.bf16.mxu1 %v3590_v58  ;;  %v1400_v55 = vadd.f32 %v4439_v19, %v4210_v20  ;;  %v1405_v20 = vadd.f32 %v4439_v19, %v4221_v24  ;;  %v3608_v24 = vld [vmem:[%s4816_s0 + $0x498] ss:$20 sps:$4 sm:$0xff]  }
 0x183   :  { %3054 = vmatprep.mubr.msk.bf16.mxu0 %vm3612_vm0, %v3611_v39 }
 0x184   :  { %v4407_v61 = vpop.f32.mrb[56].mxu1 }
 0x185   :  { %v1502_v62 = vpop.f32.mrb[57].mxu1 }
 0x186   :  { %v4415_v3 = vpop.f32.mrb[58].mxu1  ;;  %v2720_v62 = vcombine.high %v196_v13, %v196_v13 }
 0x187   :  { %v1505_v6 = vpop.f32.mrb[59].mxu1 }
 0x189   :  { %1875 = vmatmul.mubr.bf16.gmra.mrb[104].mxu1 %v3592_v63 }
 0x18a   :  { %3055 = vmatmul.mubr.msk.bf16.gmra.mrb[100].mxu0 %vm1260_vm1, %v3593_v2  ;;  %1882 = vmatprep.mubr.bf16.mxu1 %v3594_v5 }
 0x18b   :  { %3058 = vmatprep.mubr.msk.bf16.mxu0 %vm3612_vm0, %v3611_v39 }
 0x18c   :  { %v4423_v7 = vpop.f32.mrb[60].mxu1 }
 0x18d   :  { %v1510_v9 = vpop.f32.mrb[61].mxu1 }
 0x18e   :  { %v4431_v14 = vpop.f32.mrb[62].mxu1 }
 0x18f   :  { %v1513_v18 = vpop.f32.mrb[63].mxu1 }
 0x190   :  { %v2719_v18 = vcombine.low %v196_v13, %v196_v13 }
 0x191   :  { %1883 = vmatmul.mubr.bf16.gmra.mrb[108].mxu1 %v3596_v11 }
 0x192   :  { %3059 = vmatmul.mubr.msk.bf16.gmra.mrb[104].mxu0 %vm1260_vm1, %v3597_v0  ;;  %1890 = vmatprep.mubr.bf16.mxu1 %v3598_v15 }
 0x193   :  { %3062 = vmatprep.mubr.msk.bf16.mxu0 %vm3612_vm0, %v3611_v39 }
 0x195   :  { %v1948_v23 = vpop.f32.mrb[0].mxu0 }
 0x196   :  { %v3111_v29 = vadd.f32 %v1948_v23, %v1389_v22  ;;  %v2956_v32 = vpop.f32.mrb[1].mxu0  ;;  %v1408_v22 = vadd.f32 %v4439_v19, %v4229_v28  ;;  %v1413_v28 = vadd.f32 %v4439_v19, %v4234_v31  ;;  %v3609_v31 = vld [vmem:[%s4816_s0 + $0x4c0] ss:$0 sps:$4 sm:$0xff]  }
 0x197   :  { %v1951_v37 = vpop.f32.mrb[2].mxu0 }
 0x198   :  { %v2194_v10 = vmax.f32 %v3111_v29, 0.0  ;;  %v3113_v40 = vadd.f32 %v1951_v37, %v1392_v27  ;;  %v2957_v42 = vpop.f32.mrb[3].mxu0 }
 0x199   :  { %1891 = vmatmul.mubr.bf16.gmra.mrb[112].mxu1 %v3600_v25  ;;  %v1416_v42 = vadd.f32 %v4439_v19, %v4239_v35  ;;  %v1421_v35 = vadd.f32 %v4439_v19, %v4247_v38 }
 0x19a   :  { %v2850_v44 = vpack.c.bf16 %v2194_v10, %v2194_v10  ;;  %v2195_v45 = vmax.f32 %v3113_v40, 0.0  ;;  %3063 = vmatmul.mubr.msk.bf16.gmra.mrb[108].mxu0 %vm1260_vm1, %v3601_v33  ;;  %1898 = vmatprep.mubr.bf16.mxu1 %v3602_v34 }
 0x19b   :  { %3066 = vmatprep.mubr.msk.bf16.mxu0 %vm3612_vm0, %v3611_v39 }
 0x19c   :  { %2501 = vst.msk [vmem:[%s4818_s3] sm:$0xf] %vm2500_vm2, %v2850_v44  ;;  %v2851_v49 = vpack.c.bf16 %v2195_v45, %v2195_v45 }
 0x19d   :  { %v1956_v52 = vpop.f32.mrb[4].mxu0 }
 0x19e   :  { %2502 = vst.msk [vmem:[%s4818_s3 + $0x4] sm:$0xf] %vm2500_vm2, %v2851_v49  ;;  %v3115_v16 = vadd.f32 %v1956_v52, %v1397_v48  ;;  %v2960_v58 = vpop.f32.mrb[5].mxu0 }
 0x19f   :  { %v1959_v63 = vpop.f32.mrb[6].mxu0  ;;  %v1424_v58 = vadd.f32 %v4439_v19, %v4255_v43 }
 0x1a0   :  { %v2196_v2 = vmax.f32 %v3115_v16, 0.0  ;;  %v3117_v5 = vadd.f32 %v1959_v63, %v1400_v55  ;;  %v2961_v6 = vpop.f32.mrb[7].mxu0 }
 0x1a1   :  { %1899 = vmatmul.mubr.bf16.gmra.mrb[116].mxu1 %v3604_v54 }
 0x1a2   :  { %v2852_v9 = vpack.c.bf16 %v2196_v2, %v2196_v2  ;;  %v2197_v11 = vmax.f32 %v3117_v5, 0.0  ;;  %3067 = vmatmul.mubr.msk.bf16.gmra.mrb[112].mxu0 %vm1260_vm1, %v3605_v59  ;;  %1906 = vmatprep.mubr.bf16.mxu1 %v2720_v62 }
 0x1a3   :  { %3070 = vmatprep.mubr.msk.bf16.mxu0 %vm3612_vm0, %v3611_v39 }
 0x1a4   :  { %2503 = vst.msk [vmem:[%s4818_s3 + $0x8] sm:$0xf] %vm2500_vm2, %v2852_v9  ;;  %v2853_v0 = vpack.c.bf16 %v2197_v11, %v2197_v11  ;;  %v1429_v11 = vadd.f32 %v4439_v19, %v4263_v46 }
 0x1a5   :  { %v1964_v15 = vpop.f32.mrb[8].mxu0 }
 0x1a6   :  { %2504 = vst.msk [vmem:[%s4818_s3 + $0xc] sm:$0xf] %vm2500_vm2, %v2853_v0  ;;  %v3119_v23 = vadd.f32 %v1964_v15, %v1405_v20  ;;  %v2964_v25 = vpop.f32.mrb[9].mxu0  ;;  %v1432_v0 = vadd.f32 %v4439_v19, %v4271_v50 }
 0x1a7   :  { %v1967_v27 = vpop.f32.mrb[10].mxu0 }
 0x1a8   :  { %v2198_v29 = vmax.f32 %v3119_v23, 0.0  ;;  %v3121_v32 = vadd.f32 %v1967_v27, %v1408_v22  ;;  %v2965_v33 = vpop.f32.mrb[11].mxu0 }
 0x1a9   :  { %1907 = vmatmul.mubr.bf16.gmra.mrb[120].mxu1 %v2719_v18  ;;  %v1440_v33 = vadd.f32 %v4439_v19, %v4287_v57 }
 0x1aa   :  { %v2854_v34 = vpack.c.bf16 %v2198_v29, %v2198_v29  ;;  %v2199_v37 = vmax.f32 %v3121_v32, 0.0  ;;  %3071 = vmatmul.mubr.msk.bf16.gmra.mrb[116].mxu0 %vm1260_vm1, %v3608_v24  ;;  %v1437_v29 = vadd.f32 %v4439_v19, %v4279_v53 }
 0x1ab   :  { %3074 = vmatprep.mubr.msk.bf16.mxu0 %vm3612_vm0, %v3611_v39 }
 0x1ac   :  { %2505 = vst.msk [vmem:[%s4818_s3 + $0x10] sm:$0xf] %vm2500_vm2, %v2854_v34  ;;  %v2855_v10 = vpack.c.bf16 %v2199_v37, %v2199_v37 }
 0x1ad   :  { %v1972_v40 = vpop.f32.mrb[12].mxu0 }
 0x1ae   :  { %2506 = vst.msk [vmem:[%s4818_s3 + $0x14] sm:$0xf] %vm2500_vm2, %v2855_v10  ;;  %v3123_v44 = vadd.f32 %v1972_v40, %v1413_v28  ;;  %v2968_v39 = vpop.f32.mrb[13].mxu0 }
 0x1af   :  { %v1975_v45 = vpop.f32.mrb[14].mxu0  ;;  %v1445_v39 = vadd.f32 %v4439_v19, %v4295_v60 }
 0x1b0   :  { %v2200_v13 = vmax.f32 %v3123_v44, 0.0  ;;  %v3125_v48 = vadd.f32 %v1975_v45, %v1416_v42  ;;  %v2969_v49 = vpop.f32.mrb[15].mxu0  ;;  %v1448_v45 = vadd.f32 %v4439_v19, %v4303_v1 }
 0x1b2   :  { %v2856_v52 = vpack.c.bf16 %v2200_v13, %v2200_v13  ;;  %v2201_v54 = vmax.f32 %v3125_v48, 0.0  ;;  %3075 = vmatmul.mubr.msk.bf16.gmra.mrb[120].mxu0 %vm1260_vm1, %v3609_v31 }
 0x1b4   :  { %2507 = vst.msk [vmem:[%s4818_s3 + $0x18] sm:$0xf] %vm2500_vm2, %v2856_v52  ;;  %v2857_v55 = vpack.c.bf16 %v2201_v54, %v2201_v54 }
 0x1b5   :  { %v1980_v16 = vpop.f32.mrb[16].mxu0 }
 0x1b6   :  { %2508 = vst.msk [vmem:[%s4818_s3 + $0x1c] sm:$0xf] %vm2500_vm2, %v2857_v55  ;;  %v3127_v59 = vadd.f32 %v1980_v16, %v1421_v35  ;;  %v2972_v62 = vpop.f32.mrb[17].mxu0  ;;  %v1453_v16 = vadd.f32 %v4439_v19, %v4311_v4 }
 0x1b7   :  { %v1983_v63 = vpop.f32.mrb[18].mxu0 }
 0x1b8   :  { %v2202_v2 = vmax.f32 %v3127_v59, 0.0  ;;  %v3129_v38 = vadd.f32 %v1983_v63, %v1424_v58  ;;  %v2973_v5 = vpop.f32.mrb[19].mxu0  ;;  %v1456_v59 = vadd.f32 %v4439_v19, %v4319_v8 }
 0x1ba   :  { %v2858_v6 = vpack.c.bf16 %v2202_v2, %v2202_v2  ;;  %v2203_v9 = vmax.f32 %v3129_v38, 0.0 }
 0x1bc   :  { %2509 = vst.msk [vmem:[%s4818_s3 + $0x20] sm:$0xf] %vm2500_vm2, %v2858_v6  ;;  %v2859_v43 = vpack.c.bf16 %v2203_v9, %v2203_v9 }
 0x1bd   :  { %v1988_v20 = vpop.f32.mrb[20].mxu0 }
 0x1be   :  { %2510 = vst.msk [vmem:[%s4818_s3 + $0x24] sm:$0xf] %vm2500_vm2, %v2859_v43  ;;  %v3131_v15 = vadd.f32 %v1988_v20, %v1429_v11  ;;  %v2976_v18 = vpop.f32.mrb[21].mxu0  ;;  %v1461_v11 = vadd.f32 %v4439_v19, %v4327_v12  ;;  %v1464_v20 = vadd.f32 %v4439_v19, %v4335_v17 }
 0x1bf   :  { %v1991_v22 = vpop.f32.mrb[22].mxu0 }
 0x1c0   :  { %v2204_v23 = vmax.f32 %v3131_v15, 0.0  ;;  %v3133_v46 = vadd.f32 %v1991_v22, %v1432_v0  ;;  %v2977_v25 = vpop.f32.mrb[23].mxu0 }
 0x1c2   :  { %v2860_v24 = vpack.c.bf16 %v2204_v23, %v2204_v23  ;;  %v2205_v27 = vmax.f32 %v3133_v46, 0.0 }
 0x1c4   :  { %2511 = vst.msk [vmem:[%s4818_s3 + $0x28] sm:$0xf] %vm2500_vm2, %v2860_v24  ;;  %v2861_v50 = vpack.c.bf16 %v2205_v27, %v2205_v27  ;;  %v1469_v24 = vadd.f32 %v4439_v19, %v4343_v21 }
 0x1c5   :  { %v1996_v32 = vpop.f32.mrb[24].mxu0 }
 0x1c6   :  { %2512 = vst.msk [vmem:[%s4818_s3 + $0x2c] sm:$0xf] %vm2500_vm2, %v2861_v50  ;;  %v3135_v34 = vadd.f32 %v1996_v32, %v1437_v29  ;;  %v2980_v37 = vpop.f32.mrb[25].mxu0  ;;  %v1472_v29 = vadd.f32 %v4439_v19, %v4351_v26 }
 0x1c7   :  { %v1999_v28 = vpop.f32.mrb[26].mxu0 }
 0x1c8   :  { %v2206_v10 = vmax.f32 %v3135_v34, 0.0  ;;  %v3137_v53 = vadd.f32 %v1999_v28, %v1440_v33  ;;  %v2981_v40 = vpop.f32.mrb[27].mxu0 }
 0x1ca   :  { %v2862_v42 = vpack.c.bf16 %v2206_v10, %v2206_v10  ;;  %v2207_v44 = vmax.f32 %v3137_v53, 0.0  ;;  %v1477_v53 = vadd.f32 %v4439_v19, %v4359_v30 }
 0x1cc   :  { %2513 = vst.msk [vmem:[%s4818_s3 + $0x30] sm:$0xf] %vm2500_vm2, %v2862_v42  ;;  %v2863_v57 = vpack.c.bf16 %v2207_v44, %v2207_v44  ;;  %v1480_v42 = vadd.f32 %v4439_v19, %v4367_v36 }
 0x1cd   :  { %v2004_v31 = vpop.f32.mrb[28].mxu0 }
 0x1ce   :  { %2514 = vst.msk [vmem:[%s4818_s3 + $0x34] sm:$0xf] %vm2500_vm2, %v2863_v57  ;;  %v3139_v13 = vadd.f32 %v2004_v31, %v1445_v39  ;;  %v2984_v48 = vpop.f32.mrb[29].mxu0 }
 0x1cf   :  { %v2007_v49 = vpop.f32.mrb[30].mxu0 }
 0x1d0   :  { %v2208_v52 = vmax.f32 %v3139_v13, 0.0  ;;  %v3141_v60 = vadd.f32 %v2007_v49, %v1448_v45  ;;  %v2985_v54 = vpop.f32.mrb[31].mxu0  ;;  %v1485_v49 = vadd.f32 %v4439_v19, %v4375_v41 }
 0x1d2   :  { %v2864_v35 = vpack.c.bf16 %v2208_v52, %v2208_v52  ;;  %v2209_v55 = vmax.f32 %v3141_v60, 0.0  ;;  %v1488_v60 = vadd.f32 %v4439_v19, %v4383_v47 }
 0x1d4   :  { %2515 = vst.msk [vmem:[%s4818_s3 + $0x38] sm:$0xf] %vm2500_vm2, %v2864_v35  ;;  %v2865_v1 = vpack.c.bf16 %v2209_v55, %v2209_v55 }
 0x1d5   :  { %v2012_v58 = vpop.f32.mrb[32].mxu0 }
 0x1d6   :  { %2516 = vst.msk [vmem:[%s4818_s3 + $0x3c] sm:$0xf] %vm2500_vm2, %v2865_v1  ;;  %v3143_v62 = vadd.f32 %v2012_v58, %v1453_v16  ;;  %v2988_v63 = vpop.f32.mrb[33].mxu0 }
 0x1d7   :  { %v2015_v2 = vpop.f32.mrb[34].mxu0 }
 0x1d8   :  { %v2210_v38 = vmax.f32 %v3143_v62, 0.0  ;;  %v3145_v4 = vadd.f32 %v2015_v2, %v1456_v59  ;;  %v2989_v5 = vpop.f32.mrb[35].mxu0  ;;  %v1493_v62 = vadd.f32 %v4439_v19, %v4391_v51  ;;  %v1496_v2 = vadd.f32 %v4439_v19, %v4399_v56 }
 0x1da   :  { %v2866_v6 = vpack.c.bf16 %v2210_v38, %v2210_v38  ;;  %v2211_v9 = vmax.f32 %v3145_v4, 0.0 }
 0x1dc   :  { %2517 = vst.msk [vmem:[%s4818_s3 + $0x40] sm:$0xf] %vm2500_vm2, %v2866_v6  ;;  %v2867_v8 = vpack.c.bf16 %v2211_v9, %v2211_v9 }
 0x1dd   :  { %v2020_v43 = vpop.f32.mrb[36].mxu0 }
 0x1de   :  { %2518 = vst.msk [vmem:[%s4818_s3 + $0x44] sm:$0xf] %vm2500_vm2, %v2867_v8  ;;  %v3147_v0 = vadd.f32 %v2020_v43, %v1461_v11  ;;  %v2992_v15 = vpop.f32.mrb[37].mxu0  ;;  %v1501_v43 = vadd.f32 %v4439_v19, %v4407_v61 }
 0x1df   :  { %v2023_v18 = vpop.f32.mrb[38].mxu0 }
 0x1e0   :  { %v2212_v22 = vmax.f32 %v3147_v0, 0.0  ;;  %v3149_v12 = vadd.f32 %v2023_v18, %v1464_v20  ;;  %v2993_v23 = vpop.f32.mrb[39].mxu0  ;;  %v1504_v0 = vadd.f32 %v4439_v19, %v4415_v3 }
 0x1e2   :  { %v2868_v46 = vpack.c.bf16 %v2212_v22, %v2212_v22  ;;  %v2213_v25 = vmax.f32 %v3149_v12, 0.0 }
 0x1e4   :  { %2519 = vst.msk [vmem:[%s4818_s3 + $0x48] sm:$0xf] %vm2500_vm2, %v2868_v46  ;;  %v2869_v17 = vpack.c.bf16 %v2213_v25, %v2213_v25 }
 0x1e5   :  { %v2028_v27 = vpop.f32.mrb[40].mxu0 }
 0x1e6   :  { %2520 = vst.msk [vmem:[%s4818_s3 + $0x4c] sm:$0xf] %vm2500_vm2, %v2869_v17  ;;  %v3151_v50 = vadd.f32 %v2028_v27, %v1469_v24  ;;  %v2996_v32 = vpop.f32.mrb[41].mxu0  ;;  %v1509_v24 = vadd.f32 %v4439_v19, %v4423_v7 }
 0x1e7   :  { %v2031_v33 = vpop.f32.mrb[42].mxu0 }
 0x1e8   :  { %v2214_v34 = vmax.f32 %v3151_v50, 0.0  ;;  %v3153_v21 = vadd.f32 %v2031_v33, %v1472_v29  ;;  %v2997_v37 = vpop.f32.mrb[43].mxu0  ;;  %v1512_v50 = vadd.f32 %v4439_v19, %v4431_v14 }
 0x1ea   :  { %v2870_v28 = vpack.c.bf16 %v2214_v34, %v2214_v34  ;;  %v2215_v10 = vmax.f32 %v3153_v21, 0.0 }
 0x1ec   :  { %2521 = vst.msk [vmem:[%s4818_s3 + $0x50] sm:$0xf] %vm2500_vm2, %v2870_v28  ;;  %v2871_v26 = vpack.c.bf16 %v2215_v10, %v2215_v10 }
 0x1ed   :  { %v2036_v40 = vpop.f32.mrb[44].mxu0 }
 0x1ee   :  { %2522 = vst.msk [vmem:[%s4818_s3 + $0x54] sm:$0xf] %vm2500_vm2, %v2871_v26  ;;  %v3155_v44 = vadd.f32 %v2036_v40, %v1477_v53  ;;  %v3000_v39 = vpop.f32.mrb[45].mxu0 }
 0x1ef   :  { %v2039_v57 = vpop.f32.mrb[46].mxu0 }
 0x1f0   :  { %v2216_v31 = vmax.f32 %v3155_v44, 0.0  ;;  %v3157_v30 = vadd.f32 %v2039_v57, %v1480_v42  ;;  %v3001_v45 = vpop.f32.mrb[47].mxu0 }
 0x1f2   :  { %v2872_v13 = vpack.c.bf16 %v2216_v31, %v2216_v31  ;;  %v2217_v48 = vmax.f32 %v3157_v30, 0.0 }
 0x1f4   :  { %2523 = vst.msk [vmem:[%s4818_s3 + $0x58] sm:$0xf] %vm2500_vm2, %v2872_v13  ;;  %v2873_v36 = vpack.c.bf16 %v2217_v48, %v2217_v48 }
 0x1f5   :  { %v2044_v52 = vpop.f32.mrb[48].mxu0 }
 0x1f6   :  { %2524 = vst.msk [vmem:[%s4818_s3 + $0x5c] sm:$0xf] %vm2500_vm2, %v2873_v36  ;;  %v3159_v54 = vadd.f32 %v2044_v52, %v1485_v49  ;;  %v3004_v35 = vpop.f32.mrb[49].mxu0 }
 0x1f7   :  { %v2047_v55 = vpop.f32.mrb[50].mxu0 }
 0x1f8   :  { %v2218_v16 = vmax.f32 %v3159_v54, 0.0  ;;  %v3161_v41 = vadd.f32 %v2047_v55, %v1488_v60  ;;  %v3005_v1 = vpop.f32.mrb[51].mxu0 }
 0x1fa   :  { %v2874_v58 = vpack.c.bf16 %v2218_v16, %v2218_v16  ;;  %v2219_v59 = vmax.f32 %v3161_v41, 0.0 }
 0x1fc   :  { %2525 = vst.msk [vmem:[%s4818_s3 + $0x60] sm:$0xf] %vm2500_vm2, %v2874_v58  ;;  %v2875_v47 = vpack.c.bf16 %v2219_v59, %v2219_v59 }
 0x1fd   :  { %v2052_v63 = vpop.f32.mrb[52].mxu0 }
 0x1fe   :  { %2526 = vst.msk [vmem:[%s4818_s3 + $0x64] sm:$0xf] %vm2500_vm2, %v2875_v47  ;;  %v3163_v38 = vadd.f32 %v2052_v63, %v1493_v62  ;;  %v3008_v4 = vpop.f32.mrb[53].mxu0 }
 0x1ff   :  { %v2055_v5 = vpop.f32.mrb[54].mxu0 }
 0x200   :  { %v2220_v6 = vmax.f32 %v3163_v38, 0.0  ;;  %v3165_v51 = vadd.f32 %v2055_v5, %v1496_v2  ;;  %v3009_v9 = vpop.f32.mrb[55].mxu0 }
 0x202   :  { %v2876_v11 = vpack.c.bf16 %v2220_v6, %v2220_v6  ;;  %v2221_v8 = vmax.f32 %v3165_v51, 0.0 }
 0x204   :  { %2527 = vst.msk [vmem:[%s4818_s3 + $0x68] sm:$0xf] %vm2500_vm2, %v2876_v11  ;;  %v2877_v56 = vpack.c.bf16 %v2221_v8, %v2221_v8 }
 0x205   :  { %v2060_v20 = vpop.f32.mrb[56].mxu0 }
 0x206   :  { %2528 = vst.msk [vmem:[%s4818_s3 + $0x6c] sm:$0xf] %vm2500_vm2, %v2877_v56  ;;  %v3167_v15 = vadd.f32 %v2060_v20, %v1501_v43  ;;  %v3012_v18 = vpop.f32.mrb[57].mxu0 }
 0x207   :  { %v2063_v22 = vpop.f32.mrb[58].mxu0 }
 0x208   :  { %v2222_v12 = vmax.f32 %v3167_v15, 0.0  ;;  %v3169_v61 = vadd.f32 %v2063_v22, %v1504_v0  ;;  %v3013_v23 = vpop.f32.mrb[59].mxu0 }
 0x20a   :  { %v2878_v46 = vpack.c.bf16 %v2222_v12, %v2222_v12  ;;  %v2223_v25 = vmax.f32 %v3169_v61, 0.0 }
 0x20c   :  { %2529 = vst.msk [vmem:[%s4818_s3 + $0x70] sm:$0xf] %vm2500_vm2, %v2878_v46  ;;  %v2879_v3 = vpack.c.bf16 %v2223_v25, %v2223_v25  ;;  %v1796_v17 = vpop.f32.mrb[64].mxu1 }
 0x20d   :  { %v2068_v27 = vpop.f32.mrb[60].mxu0  ;;  %v1798_v29 = vpop.f32.mrb[65].mxu1  ;;  %v3174_v40 = vadd.f32 %v4439_v19, %v1796_v17 }
 0x20e   :  { %2530 = vst.msk [vmem:[%s4818_s3 + $0x74] sm:$0xf] %vm2500_vm2, %v2879_v3  ;;  %v3171_v32 = vadd.f32 %v2068_v27, %v1509_v24  ;;  %v3016_v33 = vpop.f32.mrb[61].mxu0  ;;  %v1799_v7 = vpop.f32.mrb[66].mxu1 }
 0x20f   :  { %v2071_v34 = vpop.f32.mrb[62].mxu0  ;;  %v1801_v21 = vpop.f32.mrb[67].mxu1  ;;  %v3176_v57 = vadd.f32 %v4439_v19, %v1799_v7 }
 0x210   :  { %v2224_v37 = vmax.f32 %v3171_v32, 0.0  ;;  %v3173_v28 = vadd.f32 %v2071_v34, %v1512_v50  ;;  %v3017_v10 = vpop.f32.mrb[63].mxu0 }
 0x212   :  { %v2880_v53 = vpack.c.bf16 %v2224_v37, %v2224_v37  ;;  %v2225_v26 = vmax.f32 %v3173_v28, 0.0 }
 0x214   :  { %2531 = vst.msk [vmem:[%s4818_s3 + $0x78] sm:$0xf] %vm2500_vm2, %v2880_v53  ;;  %v2881_v14 = vpack.c.bf16 %v2225_v26, %v2225_v26  ;;  %v1804_v42 = vpop.f32.mrb[68].mxu1 }
 0x215   :  { %v2076_v44 = vpop.f32.mrb[64].mxu0  ;;  %v1806_v39 = vpop.f32.mrb[69].mxu1  ;;  %v3178_v35 = vadd.f32 %v4439_v19, %v1804_v42 }
 0x216   :  { %2532 = vst.msk [vmem:[%s4818_s3 + $0x7c] sm:$0xf] %vm2500_vm2, %v2881_v14  ;;  %v3175_v31 = vadd.f32 %v3174_v40, %v2076_v44  ;;  %v3020_v30 = vpop.f32.mrb[65].mxu0  ;;  %v1807_v45 = vpop.f32.mrb[70].mxu1 }
 0x217   :  { %v2079_v13 = vpop.f32.mrb[66].mxu0  ;;  %v1809_v48 = vpop.f32.mrb[71].mxu1  ;;  %v3180_v58 = vadd.f32 %v4439_v19, %v1807_v45 }
 0x218   :  { %v2226_v49 = vmax.f32 %v3175_v31, 0.0  ;;  %v3177_v36 = vadd.f32 %v3176_v57, %v2079_v13  ;;  %v3021_v52 = vpop.f32.mrb[67].mxu0 }
 0x21a   :  { %v2882_v60 = vpack.c.bf16 %v2226_v49, %v2226_v49  ;;  %v2227_v54 = vmax.f32 %v3177_v36, 0.0 }
 0x21c   :  { %2533 = vst.msk [vmem:[%s4818_s3 + $0x80] sm:$0xf] %vm2500_vm2, %v2882_v60  ;;  %v2883_v55 = vpack.c.bf16 %v2227_v54, %v2227_v54  ;;  %v1812_v16 = vpop.f32.mrb[72].mxu1 }
 0x21d   :  { %v2084_v41 = vpop.f32.mrb[68].mxu0  ;;  %v1814_v1 = vpop.f32.mrb[73].mxu1  ;;  %v3182_v9 = vadd.f32 %v4439_v19, %v1812_v16 }
 0x21e   :  { %2534 = vst.msk [vmem:[%s4818_s3 + $0x84] sm:$0xf] %vm2500_vm2, %v2883_v55  ;;  %v3179_v59 = vadd.f32 %v3178_v35, %v2084_v41  ;;  %v3024_v62 = vpop.f32.mrb[69].mxu0  ;;  %v1815_v47 = vpop.f32.mrb[74].mxu1 }
 0x21f   :  { %v2087_v63 = vpop.f32.mrb[70].mxu0  ;;  %v1817_v2 = vpop.f32.mrb[75].mxu1  ;;  %v3184_v20 = vadd.f32 %v4439_v19, %v1815_v47 }
 0x220   :  { %v2228_v38 = vmax.f32 %v3179_v59, 0.0  ;;  %v3181_v4 = vadd.f32 %v3180_v58, %v2087_v63  ;;  %v3025_v5 = vpop.f32.mrb[71].mxu0 }
 0x222   :  { %v2884_v6 = vpack.c.bf16 %v2228_v38, %v2228_v38  ;;  %v2229_v51 = vmax.f32 %v3181_v4, 0.0 }
 0x224   :  { %2535 = vst.msk [vmem:[%s4818_s3 + $0x88] sm:$0xf] %vm2500_vm2, %v2884_v6  ;;  %v2885_v11 = vpack.c.bf16 %v2229_v51, %v2229_v51  ;;  %v1820_v8 = vpop.f32.mrb[76].mxu1 }
 0x225   :  { %v2092_v43 = vpop.f32.mrb[72].mxu0  ;;  %v1822_v56 = vpop.f32.mrb[77].mxu1  ;;  %v3186_v3 = vadd.f32 %v4439_v19, %v1820_v8 }
 0x226   :  { %2536 = vst.msk [vmem:[%s4818_s3 + $0x8c] sm:$0xf] %vm2500_vm2, %v2885_v11  ;;  %v3183_v0 = vadd.f32 %v3182_v9, %v2092_v43  ;;  %v3028_v15 = vpop.f32.mrb[73].mxu0  ;;  %v1823_v18 = vpop.f32.mrb[78].mxu1 }
 0x227   :  { %v2095_v22 = vpop.f32.mrb[74].mxu0  ;;  %v1825_v12 = vpop.f32.mrb[79].mxu1  ;;  %v3188_v32 = vadd.f32 %v4439_v19, %v1823_v18 }
 0x228   :  { %v2230_v61 = vmax.f32 %v3183_v0, 0.0  ;;  %v3185_v23 = vadd.f32 %v3184_v20, %v2095_v22  ;;  %v3029_v46 = vpop.f32.mrb[75].mxu0 }
 0x22a   :  { %v2886_v25 = vpack.c.bf16 %v2230_v61, %v2230_v61  ;;  %v2231_v24 = vmax.f32 %v3185_v23, 0.0 }
 0x22c   :  { %2537 = vst.msk [vmem:[%s4818_s3 + $0x90] sm:$0xf] %vm2500_vm2, %v2886_v25  ;;  %v2887_v17 = vpack.c.bf16 %v2231_v24, %v2231_v24  ;;  %v1828_v27 = vpop.f32.mrb[80].mxu1 }
 0x22d   :  { %v2100_v29 = vpop.f32.mrb[76].mxu0  ;;  %v1830_v50 = vpop.f32.mrb[81].mxu1  ;;  %v3190_v14 = vadd.f32 %v4439_v19, %v1828_v27 }
 0x22e   :  { %2538 = vst.msk [vmem:[%s4818_s3 + $0x94] sm:$0xf] %vm2500_vm2, %v2887_v17  ;;  %v3187_v33 = vadd.f32 %v3186_v3, %v2100_v29  ;;  %v3032_v7 = vpop.f32.mrb[77].mxu0  ;;  %v1831_v34 = vpop.f32.mrb[82].mxu1 }
 0x22f   :  { %v2103_v21 = vpop.f32.mrb[78].mxu0  ;;  %v1833_v37 = vpop.f32.mrb[83].mxu1  ;;  %v3192_v31 = vadd.f32 %v4439_v19, %v1831_v34 }
 0x230   :  { %v2232_v28 = vmax.f32 %v3187_v33, 0.0  ;;  %v3189_v10 = vadd.f32 %v3188_v32, %v2103_v21  ;;  %v3033_v53 = vpop.f32.mrb[79].mxu0 }
 0x232   :  { %v2888_v26 = vpack.c.bf16 %v2232_v28, %v2232_v28  ;;  %v2233_v40 = vmax.f32 %v3189_v10, 0.0 }
 0x234   :  { %2539 = vst.msk [vmem:[%s4818_s3 + $0x98] sm:$0xf] %vm2500_vm2, %v2888_v26  ;;  %v2889_v42 = vpack.c.bf16 %v2233_v40, %v2233_v40  ;;  %v1836_v44 = vpop.f32.mrb[84].mxu1 }
 0x235   :  { %v2108_v39 = vpop.f32.mrb[80].mxu0  ;;  %v1838_v57 = vpop.f32.mrb[85].mxu1  ;;  %v3194_v55 = vadd.f32 %v4439_v19, %v1836_v44 }
 0x236   :  { %2540 = vst.msk [vmem:[%s4818_s3 + $0x9c] sm:$0xf] %vm2500_vm2, %v2889_v42  ;;  %v3191_v30 = vadd.f32 %v3190_v14, %v2108_v39  ;;  %v3036_v45 = vpop.f32.mrb[81].mxu0  ;;  %v1839_v13 = vpop.f32.mrb[86].mxu1 }
 0x237   :  { %v2111_v48 = vpop.f32.mrb[82].mxu0  ;;  %v1841_v49 = vpop.f32.mrb[87].mxu1  ;;  %v3196_v59 = vadd.f32 %v4439_v19, %v1839_v13 }
 0x238   :  { %v2234_v36 = vmax.f32 %v3191_v30, 0.0  ;;  %v3193_v52 = vadd.f32 %v3192_v31, %v2111_v48  ;;  %v3037_v60 = vpop.f32.mrb[83].mxu0 }
 0x23a   :  { %v2890_v54 = vpack.c.bf16 %v2234_v36, %v2234_v36  ;;  %v2235_v35 = vmax.f32 %v3193_v52, 0.0 }
 0x23c   :  { %2541 = vst.msk [vmem:[%s4818_s3 + $0xa0] sm:$0xf] %vm2500_vm2, %v2890_v54  ;;  %v2891_v16 = vpack.c.bf16 %v2235_v35, %v2235_v35  ;;  %v1844_v41 = vpop.f32.mrb[88].mxu1 }
 0x23d   :  { %v2116_v1 = vpop.f32.mrb[84].mxu0  ;;  %v1846_v58 = vpop.f32.mrb[89].mxu1  ;;  %v3198_v11 = vadd.f32 %v4439_v19, %v1844_v41 }
 0x23e   :  { %2542 = vst.msk [vmem:[%s4818_s3 + $0xa4] sm:$0xf] %vm2500_vm2, %v2891_v16  ;;  %v3195_v62 = vadd.f32 %v3194_v55, %v2116_v1  ;;  %v3040_v47 = vpop.f32.mrb[85].mxu0  ;;  %v1847_v63 = vpop.f32.mrb[90].mxu1 }
 0x23f   :  { %v2119_v2 = vpop.f32.mrb[86].mxu0  ;;  %v1849_v38 = vpop.f32.mrb[91].mxu1  ;;  %v3200_v0 = vadd.f32 %v4439_v19, %v1847_v63 }
 0x240   :  { %v2236_v4 = vmax.f32 %v3195_v62, 0.0  ;;  %v3197_v5 = vadd.f32 %v3196_v59, %v2119_v2  ;;  %v3041_v6 = vpop.f32.mrb[87].mxu0 }
 0x242   :  { %v2892_v51 = vpack.c.bf16 %v2236_v4, %v2236_v4  ;;  %v2237_v9 = vmax.f32 %v3197_v5, 0.0 }
 0x244   :  { %2543 = vst.msk [vmem:[%s4818_s3 + $0xa8] sm:$0xf] %vm2500_vm2, %v2892_v51  ;;  %v2893_v8 = vpack.c.bf16 %v2237_v9, %v2237_v9  ;;  %v1852_v43 = vpop.f32.mrb[92].mxu1 }
 0x245   :  { %v2124_v56 = vpop.f32.mrb[88].mxu0  ;;  %v1854_v20 = vpop.f32.mrb[93].mxu1  ;;  %v3202_v17 = vadd.f32 %v4439_v19, %v1852_v43 }
 0x246   :  { %2544 = vst.msk [vmem:[%s4818_s3 + $0xac] sm:$0xf] %vm2500_vm2, %v2893_v8  ;;  %v3199_v15 = vadd.f32 %v3198_v11, %v2124_v56  ;;  %v3044_v18 = vpop.f32.mrb[89].mxu0  ;;  %v1855_v22 = vpop.f32.mrb[94].mxu1 }
 0x247   :  { %v2127_v12 = vpop.f32.mrb[90].mxu0  ;;  %v1857_v61 = vpop.f32.mrb[95].mxu1  ;;  %v3204_v33 = vadd.f32 %v4439_v19, %v1855_v22 }
 0x248   :  { %v2238_v23 = vmax.f32 %v3199_v15, 0.0  ;;  %v3201_v46 = vadd.f32 %v3200_v0, %v2127_v12  ;;  %v3045_v25 = vpop.f32.mrb[91].mxu0 }
 0x24a   :  { %v2894_v24 = vpack.c.bf16 %v2238_v23, %v2238_v23  ;;  %v2239_v3 = vmax.f32 %v3201_v46, 0.0 }
 0x24c   :  { %2545 = vst.msk [vmem:[%s4818_s3 + $0xb0] sm:$0xf] %vm2500_vm2, %v2894_v24  ;;  %v2895_v27 = vpack.c.bf16 %v2239_v3, %v2239_v3  ;;  %v1860_v29 = vpop.f32.mrb[96].mxu1 }
 0x24d   :  { %v2132_v50 = vpop.f32.mrb[92].mxu0  ;;  %v1862_v32 = vpop.f32.mrb[97].mxu1  ;;  %v3206_v42 = vadd.f32 %v4439_v19, %v1860_v29 }
 0x24e   :  { %2546 = vst.msk [vmem:[%s4818_s3 + $0xb4] sm:$0xf] %vm2500_vm2, %v2895_v27  ;;  %v3203_v7 = vadd.f32 %v3202_v17, %v2132_v50  ;;  %v3048_v34 = vpop.f32.mrb[93].mxu0  ;;  %v1863_v21 = vpop.f32.mrb[98].mxu1 }
 0x24f   :  { %v2135_v37 = vpop.f32.mrb[94].mxu0  ;;  %v1865_v28 = vpop.f32.mrb[99].mxu1  ;;  %v3208_v30 = vadd.f32 %v4439_v19, %v1863_v21 }
 0x250   :  { %v2240_v10 = vmax.f32 %v3203_v7, 0.0  ;;  %v3205_v53 = vadd.f32 %v3204_v33, %v2135_v37  ;;  %v3049_v26 = vpop.f32.mrb[95].mxu0 }
 0x252   :  { %v2896_v40 = vpack.c.bf16 %v2240_v10, %v2240_v10  ;;  %v2241_v14 = vmax.f32 %v3205_v53, 0.0 }
 0x254   :  { %2547 = vst.msk [vmem:[%s4818_s3 + $0xb8] sm:$0xf] %vm2500_vm2, %v2896_v40  ;;  %v2897_v44 = vpack.c.bf16 %v2241_v14, %v2241_v14  ;;  %v1868_v39 = vpop.f32.mrb[100].mxu1 }
 0x255   :  { %v2140_v57 = vpop.f32.mrb[96].mxu0  ;;  %v1870_v31 = vpop.f32.mrb[101].mxu1  ;;  %v3210_v16 = vadd.f32 %v4439_v19, %v1868_v39 }
 0x256   :  { %2548 = vst.msk [vmem:[%s4818_s3 + $0xbc] sm:$0xf] %vm2500_vm2, %v2897_v44  ;;  %v3207_v45 = vadd.f32 %v3206_v42, %v2140_v57  ;;  %v3052_v13 = vpop.f32.mrb[97].mxu0  ;;  %v1871_v48 = vpop.f32.mrb[102].mxu1 }
 0x257   :  { %v2143_v49 = vpop.f32.mrb[98].mxu0  ;;  %v1873_v36 = vpop.f32.mrb[103].mxu1  ;;  %v3212_v62 = vadd.f32 %v4439_v19, %v1871_v48 }
 0x258   :  { %v2242_v52 = vmax.f32 %v3207_v45, 0.0  ;;  %v3209_v60 = vadd.f32 %v3208_v30, %v2143_v49  ;;  %v3053_v54 = vpop.f32.mrb[99].mxu0 }
 0x25a   :  { %v2898_v35 = vpack.c.bf16 %v2242_v52, %v2242_v52  ;;  %v2243_v55 = vmax.f32 %v3209_v60, 0.0 }
 0x25c   :  { %2549 = vst.msk [vmem:[%s4818_s3 + $0xc0] sm:$0xf] %vm2500_vm2, %v2898_v35  ;;  %v2899_v41 = vpack.c.bf16 %v2243_v55, %v2243_v55  ;;  %v1876_v1 = vpop.f32.mrb[104].mxu1 }
 0x25d   :  { %v2148_v58 = vpop.f32.mrb[100].mxu0  ;;  %v1878_v59 = vpop.f32.mrb[105].mxu1  ;;  %v3214_v8 = vadd.f32 %v4439_v19, %v1876_v1 }
 0x25e   :  { %2550 = vst.msk [vmem:[%s4818_s3 + $0xc4] sm:$0xf] %vm2500_vm2, %v2899_v41  ;;  %v3211_v47 = vadd.f32 %v3210_v16, %v2148_v58  ;;  %v3056_v63 = vpop.f32.mrb[101].mxu0  ;;  %v1879_v2 = vpop.f32.mrb[106].mxu1 }
 0x25f   :  { %v2151_v38 = vpop.f32.mrb[102].mxu0  ;;  %v1881_v4 = vpop.f32.mrb[107].mxu1  ;;  %v3216_v15 = vadd.f32 %v4439_v19, %v1879_v2 }
 0x260   :  { %v2244_v5 = vmax.f32 %v3211_v47, 0.0  ;;  %v3213_v6 = vadd.f32 %v3212_v62, %v2151_v38  ;;  %v3057_v51 = vpop.f32.mrb[103].mxu0 }
 0x262   :  { %v2900_v9 = vpack.c.bf16 %v2244_v5, %v2244_v5  ;;  %v2245_v11 = vmax.f32 %v3213_v6, 0.0 }
 0x264   :  { %2551 = vst.msk [vmem:[%s4818_s3 + $0xc8] sm:$0xf] %vm2500_vm2, %v2900_v9  ;;  %v2901_v43 = vpack.c.bf16 %v2245_v11, %v2245_v11  ;;  %v1884_v56 = vpop.f32.mrb[108].mxu1 }
 0x265   :  { %v2156_v20 = vpop.f32.mrb[104].mxu0  ;;  %v1886_v0 = vpop.f32.mrb[109].mxu1  ;;  %v3218_v27 = vadd.f32 %v4439_v19, %v1884_v56 }
 0x266   :  { %2552 = vst.msk [vmem:[%s4818_s3 + $0xcc] sm:$0xf] %vm2500_vm2, %v2901_v43  ;;  %v3215_v18 = vadd.f32 %v3214_v8, %v2156_v20  ;;  %v3060_v22 = vpop.f32.mrb[105].mxu0  ;;  %v1887_v12 = vpop.f32.mrb[110].mxu1 }
 0x267   :  { %v2159_v61 = vpop.f32.mrb[106].mxu0  ;;  %v1889_v23 = vpop.f32.mrb[111].mxu1  ;;  %v3220_v7 = vadd.f32 %v4439_v19, %v1887_v12 }
 0x268   :  { %v2246_v46 = vmax.f32 %v3215_v18, 0.0  ;;  %v3217_v25 = vadd.f32 %v3216_v15, %v2159_v61  ;;  %v3061_v24 = vpop.f32.mrb[107].mxu0 }
 0x26a   :  { %v2902_v3 = vpack.c.bf16 %v2246_v46, %v2246_v46  ;;  %v2247_v17 = vmax.f32 %v3217_v25, 0.0 }
 0x26c   :  { %2553 = vst.msk [vmem:[%s4818_s3 + $0xd0] sm:$0xf] %vm2500_vm2, %v2902_v3  ;;  %v2903_v29 = vpack.c.bf16 %v2247_v17, %v2247_v17  ;;  %v1892_v50 = vpop.f32.mrb[112].mxu1 }
 0x26d   :  { %v2164_v32 = vpop.f32.mrb[108].mxu0  ;;  %v1894_v33 = vpop.f32.mrb[113].mxu1  ;;  %v3222_v44 = vadd.f32 %v4439_v19, %v1892_v50 }
 0x26e   :  { %2554 = vst.msk [vmem:[%s4818_s3 + $0xd4] sm:$0xf] %vm2500_vm2, %v2903_v29  ;;  %v3219_v34 = vadd.f32 %v3218_v27, %v2164_v32  ;;  %v3064_v21 = vpop.f32.mrb[109].mxu0  ;;  %v1895_v37 = vpop.f32.mrb[114].mxu1 }
 0x26f   :  { %v2167_v28 = vpop.f32.mrb[110].mxu0  ;;  %v1897_v10 = vpop.f32.mrb[115].mxu1  ;;  %v3224_v45 = vadd.f32 %v4439_v19, %v1895_v37 }
 0x270   :  { %v2248_v53 = vmax.f32 %v3219_v34, 0.0  ;;  %v3221_v26 = vadd.f32 %v3220_v7, %v2167_v28  ;;  %v3065_v40 = vpop.f32.mrb[111].mxu0 }
 0x272   :  { %v2904_v14 = vpack.c.bf16 %v2248_v53, %v2248_v53  ;;  %v2249_v42 = vmax.f32 %v3221_v26, 0.0 }
 0x274   :  { %2555 = vst.msk [vmem:[%s4818_s3 + $0xd8] sm:$0xf] %vm2500_vm2, %v2904_v14  ;;  %v2905_v39 = vpack.c.bf16 %v2249_v42, %v2249_v42  ;;  %v1900_v57 = vpop.f32.mrb[116].mxu1 }
 0x275   :  { %v2172_v31 = vpop.f32.mrb[112].mxu0  ;;  %v1902_v30 = vpop.f32.mrb[117].mxu1  ;;  %v3226_v41 = vadd.f32 %v4439_v19, %v1900_v57 }
 0x276   :  { %2556 = vst.msk [vmem:[%s4818_s3 + $0xdc] sm:$0xf] %vm2500_vm2, %v2905_v39  ;;  %v3223_v13 = vadd.f32 %v3222_v44, %v2172_v31  ;;  %v3068_v48 = vpop.f32.mrb[113].mxu0  ;;  %v1903_v49 = vpop.f32.mrb[118].mxu1 }
 0x277   :  { %v2175_v36 = vpop.f32.mrb[114].mxu0  ;;  %v1905_v52 = vpop.f32.mrb[119].mxu1  ;;  %v3228_v47 = vadd.f32 %v4439_v19, %v1903_v49 }
 0x278   :  { %v2250_v60 = vmax.f32 %v3223_v13, 0.0  ;;  %v3225_v54 = vadd.f32 %v3224_v45, %v2175_v36  ;;  %v3069_v35 = vpop.f32.mrb[115].mxu0 }
 0x27a   :  { %v2906_v55 = vpack.c.bf16 %v2250_v60, %v2250_v60  ;;  %v2251_v16 = vmax.f32 %v3225_v54, 0.0 }
 0x27c   :  { %2557 = vst.msk [vmem:[%s4818_s3 + $0xe0] sm:$0xf] %vm2500_vm2, %v2906_v55  ;;  %v2907_v1 = vpack.c.bf16 %v2251_v16, %v2251_v16  ;;  %v1908_v58 = vpop.f32.mrb[120].mxu1 }
 0x27d   :  { %v2180_v59 = vpop.f32.mrb[116].mxu0  ;;  %v1910_v62 = vpop.f32.mrb[121].mxu1  ;;  %v3230_v43 = vadd.f32 %v4439_v19, %v1908_v58 }
 0x27e   :  { %2558 = vst.msk [vmem:[%s4818_s3 + $0xe4] sm:$0xf] %vm2500_vm2, %v2907_v1  ;;  %v3227_v63 = vadd.f32 %v3226_v41, %v2180_v59  ;;  %v3072_v2 = vpop.f32.mrb[117].mxu0  ;;  %v1911_v38 = vpop.f32.mrb[122].mxu1 }
 0x27f   :  { %v2183_v4 = vpop.f32.mrb[118].mxu0  ;;  %v1912_v5 = vpop.f32.mrb[123].mxu1 }
 0x280   :  { %v2252_v6 = vmax.f32 %v3227_v63, 0.0  ;;  %v3229_v51 = vadd.f32 %v3228_v47, %v2183_v4  ;;  %v3073_v9 = vpop.f32.mrb[119].mxu0 }
 0x282   :  { %v2908_v11 = vpack.c.bf16 %v2252_v6, %v2252_v6  ;;  %v2253_v8 = vmax.f32 %v3229_v51, 0.0 }
 0x284   :  { %2559 = vst.msk [vmem:[%s4818_s3 + $0xe8] sm:$0xf] %vm2500_vm2, %v2908_v11  ;;  %v2909_v56 = vpack.c.bf16 %v2253_v8, %v2253_v8 }
 0x285   :  { %v2188_v20 = vpop.f32.mrb[120].mxu0 }
 0x286   :  { %2560 = vst.msk [vmem:[%s4818_s3 + $0xec] sm:$0xf] %vm2500_vm2, %v2909_v56  ;;  %v3231_v0 = vadd.f32 %v3230_v43, %v2188_v20  ;;  %v3076_v15 = vpop.f32.mrb[121].mxu0 }
 0x287   :  { %v2191_v18 = vpop.f32.mrb[122].mxu0 }
 0x288   :  { %v2254_v22 = vmax.f32 %v3231_v0, 0.0  ;;  %v3077_v12 = vpop.f32.mrb[123].mxu0 }
 0x28a   :  { %v2910_v61 = vpack.c.bf16 %v2254_v22, %v2254_v22 }
 0x28c   :  { %2561 = vst.msk [vmem:[%s4818_s3 + $0xf0] sm:$0xf] %vm2500_vm2, %v2910_v61 }

// kernel: critic_forward.8
= control target key start
LH: loop header
LB: loop body
LE: loop exit
PB: predicated region body
PF: predicated region fallthrough
CT: control target
= control target key end

     0   :  { %vm4820_vm0 = vmmov 0   ;;  %vm2778_vm1 = vcmask 523264   ;;  %s5888_s1 = inlined_call_operand.vmem [shape: bf16[5184,128], index: 1, kind: input, shape index: {}]   ;;  %s5889_s0 = inlined_call_operand.vmem [shape: bf16[6,5184], index: 0, kind: input, shape index: {}]   ;;  %s5890_s2 = inlined_call_operand.vmem [shape: f32[1,128], index: 2, kind: input, shape index: {}]   ;;  %s5891_s3 = inlined_call_operand.vmem [shape: f32[6,128], index: 3, kind: output, shape index: {}]  }
   0x1   :  { %v4454_v0 = vld [vmem:[%s5888_s1 + $0x40] sm:$0xff]   ;;  %v4458_v4 = vld [vmem:[%s5888_s1 + $0x48] sm:$0xff]   ;;  %v4462_v8 = vld [vmem:[%s5888_s1 + $0x50] sm:$0xff]  }
   0x2   :  { %v4455_v1 = vld [vmem:[%s5888_s1] sm:$0xff]   ;;  %3995 = vmatprep.subr.bf16.mxu0 %v4454_v0  ;;  %v4459_v5 = vld [vmem:[%s5888_s1 + $0x8] sm:$0xff]   ;;  %v4463_v9 = vld [vmem:[%s5888_s1 + $0x10] sm:$0xff]  }
   0x3   :  { %v4456_v2 = vld [vmem:[%s5888_s1 + $0xc0] sm:$0xff]   ;;  %3996 = vmatpush3.bf16.msra.mxu0 %v4455_v1  ;;  %v4460_v6 = vld [vmem:[%s5888_s1 + $0xc8] sm:$0xff]   ;;  %v4464_v10 = vld [vmem:[%s5888_s1 + $0xd0] sm:$0xff]  }
   0x4   :  { %v4457_v3 = vld [vmem:[%s5888_s1 + $0x80] sm:$0xff]   ;;  %4017 = vmatprep.subr.bf16.mxu1 %v4456_v2  ;;  %3997 = vmatprep.subr.bf16.mxu0 %v4458_v4  ;;  %v4461_v7 = vld [vmem:[%s5888_s1 + $0x88] sm:$0xff]   ;;  %v4465_v11 = vld [vmem:[%s5888_s1 + $0x90] sm:$0xff]  }
   0x5   :  { %4018 = vmatpush3.bf16.msra.mxu1 %v4457_v3  ;;  %v4466_v12 = vld [vmem:[%s5888_s1 + $0x58] sm:$0xff]   ;;  %v4470_v16 = vld [vmem:[%s5888_s1 + $0x60] sm:$0xff]   ;;  %v4474_v20 = vld [vmem:[%s5888_s1 + $0x68] sm:$0xff]  }
   0x6   :  { %4019 = vmatprep.subr.bf16.mxu1 %v4460_v6  ;;  %v4467_v13 = vld [vmem:[%s5888_s1 + $0x18] sm:$0xff]   ;;  %v4471_v17 = vld [vmem:[%s5888_s1 + $0x20] sm:$0xff]   ;;  %v4475_v21 = vld [vmem:[%s5888_s1 + $0x28] sm:$0xff]  }
   0x7   :  { %3998 = vmatpush3.bf16.msra.mxu0 %v4459_v5  ;;  %v4468_v14 = vld [vmem:[%s5888_s1 + $0xd8] sm:$0xff]   ;;  %v4472_v18 = vld [vmem:[%s5888_s1 + $0xe0] sm:$0xff]   ;;  %v4476_v22 = vld [vmem:[%s5888_s1 + $0xe8] sm:$0xff]  }
   0x8   :  { %3999 = vmatprep.subr.bf16.mxu0 %v4462_v8  ;;  %v4469_v15 = vld [vmem:[%s5888_s1 + $0x98] sm:$0xff]   ;;  %v4473_v19 = vld [vmem:[%s5888_s1 + $0xa0] sm:$0xff]   ;;  %v4477_v23 = vld [vmem:[%s5888_s1 + $0xa8] sm:$0xff]  }
   0x9   :  { %4020 = vmatpush3.bf16.msra.mxu1 %v4461_v7  ;;  %v4478_v24 = vld [vmem:[%s5888_s1 + $0x70] sm:$0xff]   ;;  %v4482_v28 = vld [vmem:[%s5888_s1 + $0x78] sm:$0xff]   ;;  %v15_v31 = vld [vmem:[%s5889_s0] sm:$0xff] }
   0xa   :  { %4021 = vmatprep.subr.bf16.mxu1 %v4464_v10  ;;  %v4479_v25 = vld [vmem:[%s5888_s1 + $0x30] sm:$0xff]   ;;  %v4483_v29 = vld [vmem:[%s5888_s1 + $0x38] sm:$0xff]   ;;  %v3629_v32 = vcombine.low %v15_v31, %v15_v31  ;;  %v3630_v33 = vcombine.high %v15_v31, %v15_v31  ;;  %v4488_v35 = vld [vmem:[%s5888_s1 + $0x140] sm:$0xff]  }
   0xb   :  { %4000 = vmatpush3.bf16.msra.mxu0 %v4463_v9  ;;  %v4480_v26 = vld [vmem:[%s5888_s1 + $0xf0] sm:$0xff]   ;;  %v4484_v30 = vld [vmem:[%s5888_s1 + $0xf8] sm:$0xff]   ;;  %v16_v36 = vld [vmem:[%s5889_s0 + $0x8] sm:$0xff] }
   0xc   :  { %4001 = vmatprep.subr.bf16.mxu0 %v4466_v12  ;;  %v4481_v27 = vld [vmem:[%s5888_s1 + $0xb0] sm:$0xff]   ;;  %v4487_v34 = vld [vmem:[%s5888_s1 + $0xb8] sm:$0xff]   ;;  %2814 = vmatprep.mubr.bf16.mxu0 %v3630_v33  ;;  %v3631_v37 = vcombine.low %v16_v36, %v16_v36  ;;  %v3632_v38 = vcombine.high %v16_v36, %v16_v36  ;;  %v4491_v39 = vld [vmem:[%s5888_s1 + $0x100] sm:$0xff]  }
   0xd   :  { %4022 = vmatpush3.bf16.msra.mxu1 %v4465_v11  ;;  %v4492_v40 = vld [vmem:[%s5888_s1 + $0x1c0] sm:$0xff]   ;;  %v4494_v42 = vld [vmem:[%s5888_s1 + $0x148] sm:$0xff]   ;;  %v4498_v46 = vld [vmem:[%s5888_s1 + $0x150] sm:$0xff]  }
   0xe   :  { %4023 = vmatprep.subr.bf16.mxu1 %v4468_v14  ;;  %2854 = vmatprep.mubr.bf16.mxu1 %v3632_v38  ;;  %v4493_v41 = vld [vmem:[%s5888_s1 + $0x180] sm:$0xff]   ;;  %v4495_v43 = vld [vmem:[%s5888_s1 + $0x108] sm:$0xff]   ;;  %v4499_v47 = vld [vmem:[%s5888_s1 + $0x110] sm:$0xff]  }
   0xf   :  { %4002 = vmatpush3.bf16.msra.mxu0 %v4467_v13  ;;  %v4496_v44 = vld [vmem:[%s5888_s1 + $0x1c8] sm:$0xff]   ;;  %v4500_v48 = vld [vmem:[%s5888_s1 + $0x1d0] sm:$0xff]   ;;  %v4502_v50 = vld [vmem:[%s5888_s1 + $0x158] sm:$0xff]  }
  0x10   :  { %4003 = vmatprep.subr.bf16.mxu0 %v4470_v16  ;;  %v4497_v45 = vld [vmem:[%s5888_s1 + $0x188] sm:$0xff]   ;;  %v4501_v49 = vld [vmem:[%s5888_s1 + $0x190] sm:$0xff]   ;;  %v4503_v51 = vld [vmem:[%s5888_s1 + $0x118] sm:$0xff]  }
  0x11   :  { %4024 = vmatpush3.bf16.msra.mxu1 %v4469_v15  ;;  %v4504_v52 = vld [vmem:[%s5888_s1 + $0x1d8] sm:$0xff]   ;;  %v4506_v54 = vld [vmem:[%s5888_s1 + $0x160] sm:$0xff]   ;;  %v4510_v58 = vld [vmem:[%s5888_s1 + $0x168] sm:$0xff]  }
  0x12   :  { %4025 = vmatprep.subr.bf16.mxu1 %v4472_v18  ;;  %v4505_v53 = vld [vmem:[%s5888_s1 + $0x198] sm:$0xff]   ;;  %v4507_v55 = vld [vmem:[%s5888_s1 + $0x120] sm:$0xff]   ;;  %v4511_v59 = vld [vmem:[%s5888_s1 + $0x128] sm:$0xff]  }
  0x13   :  { %4004 = vmatpush3.bf16.msra.mxu0 %v4471_v17  ;;  %v4508_v56 = vld [vmem:[%s5888_s1 + $0x1e0] sm:$0xff]   ;;  %v4512_v60 = vld [vmem:[%s5888_s1 + $0x1e8] sm:$0xff]   ;;  %v4514_v62 = vld [vmem:[%s5888_s1 + $0x170] sm:$0xff]  }
  0x14   :  { %4005 = vmatprep.subr.bf16.mxu0 %v4474_v20  ;;  %v4509_v57 = vld [vmem:[%s5888_s1 + $0x1a0] sm:$0xff]   ;;  %v4513_v61 = vld [vmem:[%s5888_s1 + $0x1a8] sm:$0xff]   ;;  %v4515_v63 = vld [vmem:[%s5888_s1 + $0x130] sm:$0xff]  }
  0x15   :  { %4026 = vmatpush3.bf16.msra.mxu1 %v4473_v19  ;;  %v4516_v0 = vld [vmem:[%s5888_s1 + $0x1f0] sm:$0xff]   ;;  %v4518_v2 = vld [vmem:[%s5888_s1 + $0x178] sm:$0xff]   ;;  %v4524_v9 = vld [vmem:[%s5888_s1 + $0x240] sm:$0xff]  }
  0x16   :  { %4027 = vmatprep.subr.bf16.mxu1 %v4476_v22  ;;  %v4517_v1 = vld [vmem:[%s5888_s1 + $0x1b0] sm:$0xff]   ;;  %v4519_v3 = vld [vmem:[%s5888_s1 + $0x138] sm:$0xff]   ;;  %v4527_v13 = vld [vmem:[%s5888_s1 + $0x200] sm:$0xff]  }
  0x17   :  { %4006 = vmatpush3.bf16.msra.mxu0 %v4475_v21  ;;  %v4520_v4 = vld [vmem:[%s5888_s1 + $0x1f8] sm:$0xff]   ;;  %v17_v5 = vld [vmem:[%s5889_s0 + $0x10] sm:$0xff]  ;;  %v4528_v14 = vld [vmem:[%s5888_s1 + $0x2c0] sm:$0xff]  }
  0x18   :  { %4007 = vmatprep.subr.bf16.mxu0 %v4478_v24  ;;  %v3633_v6 = vcombine.low %v17_v5, %v17_v5  ;;  %v3634_v7 = vcombine.high %v17_v5, %v17_v5  ;;  %v4523_v8 = vld [vmem:[%s5888_s1 + $0x1b8] sm:$0xff]   ;;  %v4529_v15 = vld [vmem:[%s5888_s1 + $0x280] sm:$0xff]   ;;  %v4530_v16 = vld [vmem:[%s5888_s1 + $0x248] sm:$0xff]  }
  0x19   :  { %4028 = vmatpush3.bf16.msra.mxu1 %v4477_v23  ;;  %v18_v10 = vld [vmem:[%s5889_s0 + $0x18] sm:$0xff]  ;;  %v4531_v17 = vld [vmem:[%s5888_s1 + $0x208] sm:$0xff]   ;;  %v4534_v20 = vld [vmem:[%s5888_s1 + $0x250] sm:$0xff]  }
  0x1a   :  { %4029 = vmatprep.subr.bf16.mxu1 %v4480_v26  ;;  %v3635_v11 = vcombine.low %v18_v10, %v18_v10  ;;  %v3636_v12 = vcombine.high %v18_v10, %v18_v10  ;;  %v4532_v18 = vld [vmem:[%s5888_s1 + $0x2c8] sm:$0xff]   ;;  %v4535_v21 = vld [vmem:[%s5888_s1 + $0x210] sm:$0xff]   ;;  %v4538_v24 = vld [vmem:[%s5888_s1 + $0x258] sm:$0xff]  }
  0x1b   :  { %4008 = vmatpush3.bf16.msra.mxu0 %v4479_v25  ;;  %v4533_v19 = vld [vmem:[%s5888_s1 + $0x288] sm:$0xff]   ;;  %v4536_v22 = vld [vmem:[%s5888_s1 + $0x2d0] sm:$0xff]   ;;  %v4539_v25 = vld [vmem:[%s5888_s1 + $0x218] sm:$0xff]  }
  0x1c   :  { %4009 = vmatprep.subr.bf16.mxu0 %v4482_v28  ;;  %v4537_v23 = vld [vmem:[%s5888_s1 + $0x290] sm:$0xff]   ;;  %v4540_v26 = vld [vmem:[%s5888_s1 + $0x2d8] sm:$0xff]   ;;  %v4542_v28 = vld [vmem:[%s5888_s1 + $0x260] sm:$0xff]  }
  0x1d   :  { %4030 = vmatpush3.bf16.msra.mxu1 %v4481_v27  ;;  %v4541_v27 = vld [vmem:[%s5888_s1 + $0x298] sm:$0xff]   ;;  %v4545_v31 = vld [vmem:[%s5888_s1 + $0x2a0] sm:$0xff]   ;;  %v4547_v33 = vld [vmem:[%s5888_s1 + $0x228] sm:$0xff]  }
  0x1e   :  { %4031 = vmatprep.subr.bf16.mxu1 %v4484_v30  ;;  %v4544_v30 = vld [vmem:[%s5888_s1 + $0x2e0] sm:$0xff]   ;;  %v4550_v36 = vld [vmem:[%s5888_s1 + $0x270] sm:$0xff]  }
  0x1f   :  { %4010 = vmatpush3.bf16.msra.mxu0 %v4483_v29  ;;  %v4543_v29 = vld [vmem:[%s5888_s1 + $0x220] sm:$0xff]   ;;  %v4552_v38 = vld [vmem:[%s5888_s1 + $0x2f0] sm:$0xff]  }
  0x20   :  { %4039 = vmatprep.subr.bf16.mxu0 %v4488_v35  ;;  %v4549_v35 = vld [vmem:[%s5888_s1 + $0x2a8] sm:$0xff]   ;;  %v4581_v5 = vld [vmem:[%s5888_s1 + $0x3a0] sm:$0xff]   ;;  %v4586_v10 = vld [vmem:[%s5888_s1 + $0x370] sm:$0xff]  }
  0x21   :  { %4032 = vmatpush3.bf16.msra.mxu1 %v4487_v34  ;;  %v4548_v34 = vld [vmem:[%s5888_s1 + $0x2e8] sm:$0xff]  }
  0x22   :  { %2815 = vmatmul.mubr.bf16.vlgmr.msra.gmra.mrb[0].mxu0 %v3629_v32  ;;  %4061 = vmatprep.subr.bf16.mxu1 %v4492_v40  ;;  %v4546_v32 = vld [vmem:[%s5888_s1 + $0x268] sm:$0xff]   ;;  %v4554_v40 = vld [vmem:[%s5888_s1 + $0x278] sm:$0xff]  }
  0x23   :  { %4040 = vmatpush3.bf16.msra.mxu0 %v4491_v39  ;;  %2894 = vmatprep.mubr.bf16.mxu0 %v3634_v7  ;;  %v4553_v39 = vld [vmem:[%s5888_s1 + $0x2b0] sm:$0xff]   ;;  %v4583_v7 = vld [vmem:[%s5888_s1 + $0x328] sm:$0xff]  }
  0x24   :  { %2855 = vmatmul.mubr.bf16.vlgmr.msra.gmra.mrb[0].mxu1 %v3631_v37  ;;  %4041 = vmatprep.subr.bf16.mxu0 %v4494_v42  ;;  %v4551_v37 = vld [vmem:[%s5888_s1 + $0x230] sm:$0xff]   ;;  %v4556_v42 = vld [vmem:[%s5888_s1 + $0x2f8] sm:$0xff]  }
  0x25   :  { %4062 = vmatpush3.bf16.msra.mxu1 %v4493_v41  ;;  %2934 = vmatprep.mubr.bf16.mxu1 %v3636_v12  ;;  %v4555_v41 = vld [vmem:[%s5888_s1 + $0x238] sm:$0xff]   ;;  %v4588_v12 = vld [vmem:[%s5888_s1 + $0x3f0] sm:$0xff]  }
  0x26   :  { %4063 = vmatprep.subr.bf16.mxu1 %v4496_v44 }
  0x27   :  { %4042 = vmatpush3.bf16.msra.mxu0 %v4495_v43  ;;  %v19_v43 = vld [vmem:[%s5889_s0 + $0x20] sm:$0xff] }
  0x28   :  { %4043 = vmatprep.subr.bf16.mxu0 %v4498_v46  ;;  %v3637_v44 = vcombine.low %v19_v43, %v19_v43  ;;  %v4559_v46 = vld [vmem:[%s5888_s1 + $0x2b8] sm:$0xff]  }
  0x29   :  { %4064 = vmatpush3.bf16.msra.mxu1 %v4497_v45  ;;  %v3638_v45 = vcombine.high %v19_v43, %v19_v43  ;;  %v4617_v43 = vld [vmem:[%s5888_s1 + $0x4a0] sm:$0xff]  }
  0x2a   :  { %4065 = vmatprep.subr.bf16.mxu1 %v4500_v48  ;;  %v20_v48 = vld [vmem:[%s5889_s0 + $0x28] sm:$0xff] }
  0x2b   :  { %4044 = vmatpush3.bf16.msra.mxu0 %v4499_v47  ;;  %v4560_v47 = vld [vmem:[%s5888_s1 + $0x340] sm:$0xff]  }
  0x2c   :  { %4045 = vmatprep.subr.bf16.mxu0 %v4502_v50  ;;  %v3640_v50 = vcombine.high %v20_v48, %v20_v48 }
  0x2d   :  { %4066 = vmatpush3.bf16.msra.mxu1 %v4501_v49  ;;  %v3639_v49 = vcombine.low %v20_v48, %v20_v48  ;;  %v4622_v48 = vld [vmem:[%s5888_s1 + $0x470] sm:$0xff]  }
  0x2e   :  { %4067 = vmatprep.subr.bf16.mxu1 %v4504_v52  ;;  %v4564_v52 = vld [vmem:[%s5888_s1 + $0x3c0] sm:$0xff]  }
  0x2f   :  { %4046 = vmatpush3.bf16.msra.mxu0 %v4503_v51  ;;  %v4563_v51 = vld [vmem:[%s5888_s1 + $0x300] sm:$0xff]  }
  0x30   :  { %4047 = vmatprep.subr.bf16.mxu0 %v4506_v54  ;;  %v4566_v54 = vld [vmem:[%s5888_s1 + $0x348] sm:$0xff]  }
  0x31   :  { %4068 = vmatpush3.bf16.msra.mxu1 %v4505_v53  ;;  %v4565_v53 = vld [vmem:[%s5888_s1 + $0x380] sm:$0xff]  }
  0x32   :  { %4069 = vmatprep.subr.bf16.mxu1 %v4508_v56  ;;  %v4568_v56 = vld [vmem:[%s5888_s1 + $0x3c8] sm:$0xff]  }
  0x33   :  { %4048 = vmatpush3.bf16.msra.mxu0 %v4507_v55  ;;  %v4567_v55 = vld [vmem:[%s5888_s1 + $0x308] sm:$0xff]  }
  0x34   :  { %4049 = vmatprep.subr.bf16.mxu0 %v4510_v58  ;;  %v4570_v58 = vld [vmem:[%s5888_s1 + $0x350] sm:$0xff]  }
  0x35   :  { %4070 = vmatpush3.bf16.msra.mxu1 %v4509_v57  ;;  %v4569_v57 = vld [vmem:[%s5888_s1 + $0x388] sm:$0xff]  }
  0x36   :  { %4071 = vmatprep.subr.bf16.mxu1 %v4512_v60  ;;  %v4572_v60 = vld [vmem:[%s5888_s1 + $0x3d0] sm:$0xff]  }
  0x37   :  { %4050 = vmatpush3.bf16.msra.mxu0 %v4511_v59  ;;  %v4571_v59 = vld [vmem:[%s5888_s1 + $0x310] sm:$0xff]  }
  0x38   :  { %4051 = vmatprep.subr.bf16.mxu0 %v4514_v62  ;;  %v4574_v62 = vld [vmem:[%s5888_s1 + $0x358] sm:$0xff]  }
  0x39   :  { %4072 = vmatpush3.bf16.msra.mxu1 %v4513_v61  ;;  %v4573_v61 = vld [vmem:[%s5888_s1 + $0x390] sm:$0xff]  }
  0x3a   :  { %4073 = vmatprep.subr.bf16.mxu1 %v4516_v0  ;;  %v4576_v0 = vld [vmem:[%s5888_s1 + $0x3d8] sm:$0xff]  }
  0x3b   :  { %4052 = vmatpush3.bf16.msra.mxu0 %v4515_v63  ;;  %v4575_v63 = vld [vmem:[%s5888_s1 + $0x318] sm:$0xff]  }
  0x3c   :  { %4053 = vmatprep.subr.bf16.mxu0 %v4518_v2  ;;  %v4578_v2 = vld [vmem:[%s5888_s1 + $0x360] sm:$0xff]  }
  0x3d   :  { %4074 = vmatpush3.bf16.msra.mxu1 %v4517_v1  ;;  %v4577_v1 = vld [vmem:[%s5888_s1 + $0x398] sm:$0xff]  }
  0x3e   :  { %4075 = vmatprep.subr.bf16.mxu1 %v4520_v4  ;;  %v4580_v4 = vld [vmem:[%s5888_s1 + $0x3e0] sm:$0xff]  }
  0x3f   :  { %4054 = vmatpush3.bf16.msra.mxu0 %v4519_v3  ;;  %v4579_v3 = vld [vmem:[%s5888_s1 + $0x320] sm:$0xff]  }
  0x40   :  { %4083 = vmatprep.subr.bf16.mxu0 %v4524_v9  ;;  %v4585_v9 = vld [vmem:[%s5888_s1 + $0x3a8] sm:$0xff]  }
  0x41   :  { %4076 = vmatpush3.bf16.msra.mxu1 %v4523_v8  ;;  %v4584_v8 = vld [vmem:[%s5888_s1 + $0x3e8] sm:$0xff]  }
  0x42   :  { %2895 = vmatmul.mubr.bf16.vlgmr.msra.gmra.mrb[4].mxu0 %v3633_v6  ;;  %4105 = vmatprep.subr.bf16.mxu1 %v4528_v14  ;;  %v4582_v6 = vld [vmem:[%s5888_s1 + $0x368] sm:$0xff]   ;;  %v4590_v14 = vld [vmem:[%s5888_s1 + $0x378] sm:$0xff]  }
  0x43   :  { %4084 = vmatpush3.bf16.msra.mxu0 %v4527_v13  ;;  %2974 = vmatprep.mubr.bf16.mxu0 %v3638_v45  ;;  %v4589_v13 = vld [vmem:[%s5888_s1 + $0x3b0] sm:$0xff]   ;;  %v4619_v45 = vld [vmem:[%s5888_s1 + $0x428] sm:$0xff]  }
  0x44   :  { %2935 = vmatmul.mubr.bf16.vlgmr.msra.gmra.mrb[4].mxu1 %v3635_v11  ;;  %4085 = vmatprep.subr.bf16.mxu0 %v4530_v16  ;;  %v4587_v11 = vld [vmem:[%s5888_s1 + $0x330] sm:$0xff]   ;;  %v4592_v16 = vld [vmem:[%s5888_s1 + $0x3f8] sm:$0xff]  }
  0x45   :  { %4106 = vmatpush3.bf16.msra.mxu1 %v4529_v15  ;;  %3014 = vmatprep.mubr.bf16.mxu1 %v3640_v50  ;;  %v4591_v15 = vld [vmem:[%s5888_s1 + $0x338] sm:$0xff]   ;;  %v4624_v50 = vld [vmem:[%s5888_s1 + $0x4f0] sm:$0xff]  }
  0x46   :  { %4107 = vmatprep.subr.bf16.mxu1 %v4532_v18 }
  0x47   :  { %4086 = vmatpush3.bf16.msra.mxu0 %v4531_v17  ;;  %v21_v17 = vld [vmem:[%s5889_s0 + $0x30] sm:$0xff] }
  0x48   :  { %4087 = vmatprep.subr.bf16.mxu0 %v4534_v20  ;;  %v3641_v18 = vcombine.low %v21_v17, %v21_v17  ;;  %v4595_v20 = vld [vmem:[%s5888_s1 + $0x3b8] sm:$0xff]  }
  0x49   :  { %4108 = vmatpush3.bf16.msra.mxu1 %v4533_v19  ;;  %v3642_v19 = vcombine.high %v21_v17, %v21_v17  ;;  %v4653_v17 = vld [vmem:[%s5888_s1 + $0x5a0] sm:$0xff]  }
  0x4a   :  { %4109 = vmatprep.subr.bf16.mxu1 %v4536_v22  ;;  %v22_v22 = vld [vmem:[%s5889_s0 + $0x38] sm:$0xff] }
  0x4b   :  { %4088 = vmatpush3.bf16.msra.mxu0 %v4535_v21  ;;  %v4596_v21 = vld [vmem:[%s5888_s1 + $0x440] sm:$0xff]  }
  0x4c   :  { %4089 = vmatprep.subr.bf16.mxu0 %v4538_v24  ;;  %v3644_v24 = vcombine.high %v22_v22, %v22_v22 }
  0x4d   :  { %4110 = vmatpush3.bf16.msra.mxu1 %v4537_v23  ;;  %v3643_v23 = vcombine.low %v22_v22, %v22_v22  ;;  %v4658_v22 = vld [vmem:[%s5888_s1 + $0x570] sm:$0xff]  }
  0x4e   :  { %4111 = vmatprep.subr.bf16.mxu1 %v4540_v26  ;;  %v4600_v26 = vld [vmem:[%s5888_s1 + $0x4c0] sm:$0xff]  }
  0x4f   :  { %4090 = vmatpush3.bf16.msra.mxu0 %v4539_v25  ;;  %v4599_v25 = vld [vmem:[%s5888_s1 + $0x400] sm:$0xff]  }
  0x50   :  { %4091 = vmatprep.subr.bf16.mxu0 %v4542_v28  ;;  %v4602_v28 = vld [vmem:[%s5888_s1 + $0x448] sm:$0xff]  }
  0x51   :  { %4112 = vmatpush3.bf16.msra.mxu1 %v4541_v27  ;;  %v4601_v27 = vld [vmem:[%s5888_s1 + $0x480] sm:$0xff]  }
  0x52   :  { %4113 = vmatprep.subr.bf16.mxu1 %v4544_v30  ;;  %v4604_v30 = vld [vmem:[%s5888_s1 + $0x4c8] sm:$0xff]  }
  0x53   :  { %4092 = vmatpush3.bf16.msra.mxu0 %v4543_v29  ;;  %v4603_v29 = vld [vmem:[%s5888_s1 + $0x408] sm:$0xff]  }
  0x54   :  { %4093 = vmatprep.subr.bf16.mxu0 %v4546_v32  ;;  %v4606_v32 = vld [vmem:[%s5888_s1 + $0x450] sm:$0xff]  }
  0x55   :  { %4114 = vmatpush3.bf16.msra.mxu1 %v4545_v31  ;;  %v4605_v31 = vld [vmem:[%s5888_s1 + $0x488] sm:$0xff]  }
  0x56   :  { %4115 = vmatprep.subr.bf16.mxu1 %v4548_v34  ;;  %v4608_v34 = vld [vmem:[%s5888_s1 + $0x4d0] sm:$0xff]  }
  0x57   :  { %4094 = vmatpush3.bf16.msra.mxu0 %v4547_v33  ;;  %v4607_v33 = vld [vmem:[%s5888_s1 + $0x410] sm:$0xff]  }
  0x58   :  { %4095 = vmatprep.subr.bf16.mxu0 %v4550_v36  ;;  %v4610_v36 = vld [vmem:[%s5888_s1 + $0x458] sm:$0xff]  }
  0x59   :  { %4116 = vmatpush3.bf16.msra.mxu1 %v4549_v35  ;;  %v4609_v35 = vld [vmem:[%s5888_s1 + $0x490] sm:$0xff]  }
  0x5a   :  { %4117 = vmatprep.subr.bf16.mxu1 %v4552_v38  ;;  %v4612_v38 = vld [vmem:[%s5888_s1 + $0x4d8] sm:$0xff]  }
  0x5b   :  { %4096 = vmatpush3.bf16.msra.mxu0 %v4551_v37  ;;  %v4611_v37 = vld [vmem:[%s5888_s1 + $0x418] sm:$0xff]  }
  0x5c   :  { %4097 = vmatprep.subr.bf16.mxu0 %v4554_v40  ;;  %v4614_v40 = vld [vmem:[%s5888_s1 + $0x460] sm:$0xff]  }
  0x5d   :  { %4118 = vmatpush3.bf16.msra.mxu1 %v4553_v39  ;;  %v4613_v39 = vld [vmem:[%s5888_s1 + $0x498] sm:$0xff]  }
  0x5e   :  { %4119 = vmatprep.subr.bf16.mxu1 %v4556_v42  ;;  %v4616_v42 = vld [vmem:[%s5888_s1 + $0x4e0] sm:$0xff]  }
  0x5f   :  { %4098 = vmatpush3.bf16.msra.mxu0 %v4555_v41  ;;  %v4615_v41 = vld [vmem:[%s5888_s1 + $0x420] sm:$0xff]  }
  0x60   :  { %4127 = vmatprep.subr.bf16.mxu0 %v4560_v47  ;;  %v4621_v47 = vld [vmem:[%s5888_s1 + $0x4a8] sm:$0xff]  }
  0x61   :  { %4120 = vmatpush3.bf16.msra.mxu1 %v4559_v46  ;;  %v4620_v46 = vld [vmem:[%s5888_s1 + $0x4e8] sm:$0xff]  }
  0x62   :  { %2975 = vmatmul.mubr.bf16.vlgmr.msra.gmra.mrb[8].mxu0 %v3637_v44  ;;  %4149 = vmatprep.subr.bf16.mxu1 %v4564_v52  ;;  %v4618_v44 = vld [vmem:[%s5888_s1 + $0x468] sm:$0xff]   ;;  %v4626_v52 = vld [vmem:[%s5888_s1 + $0x478] sm:$0xff]  }
  0x63   :  { %4128 = vmatpush3.bf16.msra.mxu0 %v4563_v51  ;;  %3054 = vmatprep.mubr.bf16.mxu0 %v3642_v19  ;;  %v4625_v51 = vld [vmem:[%s5888_s1 + $0x4b0] sm:$0xff]   ;;  %v4655_v19 = vld [vmem:[%s5888_s1 + $0x528] sm:$0xff]  }
  0x64   :  { %3015 = vmatmul.mubr.bf16.vlgmr.msra.gmra.mrb[8].mxu1 %v3639_v49  ;;  %4129 = vmatprep.subr.bf16.mxu0 %v4566_v54  ;;  %v4623_v49 = vld [vmem:[%s5888_s1 + $0x430] sm:$0xff]   ;;  %v4628_v54 = vld [vmem:[%s5888_s1 + $0x4f8] sm:$0xff]  }
  0x65   :  { %4150 = vmatpush3.bf16.msra.mxu1 %v4565_v53  ;;  %3094 = vmatprep.mubr.bf16.mxu1 %v3644_v24  ;;  %v4627_v53 = vld [vmem:[%s5888_s1 + $0x438] sm:$0xff]   ;;  %v4660_v24 = vld [vmem:[%s5888_s1 + $0x5f0] sm:$0xff]  }
  0x66   :  { %4151 = vmatprep.subr.bf16.mxu1 %v4568_v56 }
  0x67   :  { %4130 = vmatpush3.bf16.msra.mxu0 %v4567_v55  ;;  %v23_v55 = vld [vmem:[%s5889_s0 + $0x40] sm:$0xff] }
  0x68   :  { %4131 = vmatprep.subr.bf16.mxu0 %v4570_v58  ;;  %v3645_v56 = vcombine.low %v23_v55, %v23_v55  ;;  %v4631_v58 = vld [vmem:[%s5888_s1 + $0x4b8] sm:$0xff]  }
  0x69   :  { %4152 = vmatpush3.bf16.msra.mxu1 %v4569_v57  ;;  %v3646_v57 = vcombine.high %v23_v55, %v23_v55  ;;  %v4689_v55 = vld [vmem:[%s5888_s1 + $0x6a0] sm:$0xff]  }
  0x6a   :  { %4153 = vmatprep.subr.bf16.mxu1 %v4572_v60  ;;  %v24_v60 = vld [vmem:[%s5889_s0 + $0x48] sm:$0xff] }
  0x6b   :  { %4132 = vmatpush3.bf16.msra.mxu0 %v4571_v59  ;;  %v4632_v59 = vld [vmem:[%s5888_s1 + $0x540] sm:$0xff]  }
  0x6c   :  { %4133 = vmatprep.subr.bf16.mxu0 %v4574_v62  ;;  %v3648_v62 = vcombine.high %v24_v60, %v24_v60 }
  0x6d   :  { %4154 = vmatpush3.bf16.msra.mxu1 %v4573_v61  ;;  %v3647_v61 = vcombine.low %v24_v60, %v24_v60  ;;  %v4694_v60 = vld [vmem:[%s5888_s1 + $0x670] sm:$0xff]  }
  0x6e   :  { %4155 = vmatprep.subr.bf16.mxu1 %v4576_v0  ;;  %v4636_v0 = vld [vmem:[%s5888_s1 + $0x5c0] sm:$0xff]  }
  0x6f   :  { %4134 = vmatpush3.bf16.msra.mxu0 %v4575_v63  ;;  %v4635_v63 = vld [vmem:[%s5888_s1 + $0x500] sm:$0xff]  }
  0x70   :  { %4135 = vmatprep.subr.bf16.mxu0 %v4578_v2  ;;  %v4638_v2 = vld [vmem:[%s5888_s1 + $0x548] sm:$0xff]  }
  0x71   :  { %4156 = vmatpush3.bf16.msra.mxu1 %v4577_v1  ;;  %v4637_v1 = vld [vmem:[%s5888_s1 + $0x580] sm:$0xff]  }
  0x72   :  { %4157 = vmatprep.subr.bf16.mxu1 %v4580_v4  ;;  %v4640_v4 = vld [vmem:[%s5888_s1 + $0x5c8] sm:$0xff]  }
  0x73   :  { %4136 = vmatpush3.bf16.msra.mxu0 %v4579_v3  ;;  %v4639_v3 = vld [vmem:[%s5888_s1 + $0x508] sm:$0xff]  }
  0x74   :  { %4137 = vmatprep.subr.bf16.mxu0 %v4582_v6  ;;  %v4642_v6 = vld [vmem:[%s5888_s1 + $0x550] sm:$0xff]  }
  0x75   :  { %4158 = vmatpush3.bf16.msra.mxu1 %v4581_v5  ;;  %v4641_v5 = vld [vmem:[%s5888_s1 + $0x588] sm:$0xff]  }
  0x76   :  { %4159 = vmatprep.subr.bf16.mxu1 %v4584_v8  ;;  %v4644_v8 = vld [vmem:[%s5888_s1 + $0x5d0] sm:$0xff]  }
  0x77   :  { %4138 = vmatpush3.bf16.msra.mxu0 %v4583_v7  ;;  %v4643_v7 = vld [vmem:[%s5888_s1 + $0x510] sm:$0xff]  }
  0x78   :  { %4139 = vmatprep.subr.bf16.mxu0 %v4586_v10  ;;  %v4646_v10 = vld [vmem:[%s5888_s1 + $0x558] sm:$0xff]  }
  0x79   :  { %4160 = vmatpush3.bf16.msra.mxu1 %v4585_v9  ;;  %v4645_v9 = vld [vmem:[%s5888_s1 + $0x590] sm:$0xff]  }
  0x7a   :  { %4161 = vmatprep.subr.bf16.mxu1 %v4588_v12  ;;  %v4648_v12 = vld [vmem:[%s5888_s1 + $0x5d8] sm:$0xff]  }
  0x7b   :  { %4140 = vmatpush3.bf16.msra.mxu0 %v4587_v11  ;;  %v4647_v11 = vld [vmem:[%s5888_s1 + $0x518] sm:$0xff]  }
  0x7c   :  { %4141 = vmatprep.subr.bf16.mxu0 %v4590_v14  ;;  %v4650_v14 = vld [vmem:[%s5888_s1 + $0x560] sm:$0xff]  }
  0x7d   :  { %4162 = vmatpush3.bf16.msra.mxu1 %v4589_v13  ;;  %v4649_v13 = vld [vmem:[%s5888_s1 + $0x598] sm:$0xff]  }
  0x7e   :  { %4163 = vmatprep.subr.bf16.mxu1 %v4592_v16  ;;  %v4652_v16 = vld [vmem:[%s5888_s1 + $0x5e0] sm:$0xff]  }
  0x7f   :  { %4142 = vmatpush3.bf16.msra.mxu0 %v4591_v15  ;;  %v4651_v15 = vld [vmem:[%s5888_s1 + $0x520] sm:$0xff]  }
  0x80   :  { %4171 = vmatprep.subr.bf16.mxu0 %v4596_v21  ;;  %v4657_v21 = vld [vmem:[%s5888_s1 + $0x5a8] sm:$0xff]  }
  0x81   :  { %4164 = vmatpush3.bf16.msra.mxu1 %v4595_v20  ;;  %v4656_v20 = vld [vmem:[%s5888_s1 + $0x5e8] sm:$0xff]  }
  0x82   :  { %3055 = vmatmul.mubr.bf16.vlgmr.msra.gmra.mrb[12].mxu0 %v3641_v18  ;;  %4193 = vmatprep.subr.bf16.mxu1 %v4600_v26  ;;  %v4654_v18 = vld [vmem:[%s5888_s1 + $0x568] sm:$0xff]   ;;  %v4662_v26 = vld [vmem:[%s5888_s1 + $0x578] sm:$0xff]  }
  0x83   :  { %4172 = vmatpush3.bf16.msra.mxu0 %v4599_v25  ;;  %3134 = vmatprep.mubr.bf16.mxu0 %v3646_v57  ;;  %v4661_v25 = vld [vmem:[%s5888_s1 + $0x5b0] sm:$0xff]   ;;  %v4691_v57 = vld [vmem:[%s5888_s1 + $0x628] sm:$0xff]  }
  0x84   :  { %3095 = vmatmul.mubr.bf16.vlgmr.msra.gmra.mrb[12].mxu1 %v3643_v23  ;;  %4173 = vmatprep.subr.bf16.mxu0 %v4602_v28  ;;  %v4659_v23 = vld [vmem:[%s5888_s1 + $0x530] sm:$0xff]   ;;  %v4664_v28 = vld [vmem:[%s5888_s1 + $0x5f8] sm:$0xff]  }
  0x85   :  { %4194 = vmatpush3.bf16.msra.mxu1 %v4601_v27  ;;  %3174 = vmatprep.mubr.bf16.mxu1 %v3648_v62  ;;  %v4663_v27 = vld [vmem:[%s5888_s1 + $0x538] sm:$0xff]   ;;  %v4696_v62 = vld [vmem:[%s5888_s1 + $0x6f0] sm:$0xff]  }
  0x86   :  { %4195 = vmatprep.subr.bf16.mxu1 %v4604_v30 }
  0x87   :  { %4174 = vmatpush3.bf16.msra.mxu0 %v4603_v29  ;;  %v25_v29 = vld [vmem:[%s5889_s0 + $0x50] sm:$0xff] }
  0x88   :  { %4175 = vmatprep.subr.bf16.mxu0 %v4606_v32  ;;  %v3649_v30 = vcombine.low %v25_v29, %v25_v29  ;;  %v4667_v32 = vld [vmem:[%s5888_s1 + $0x5b8] sm:$0xff]  }
  0x89   :  { %4196 = vmatpush3.bf16.msra.mxu1 %v4605_v31  ;;  %v3650_v31 = vcombine.high %v25_v29, %v25_v29  ;;  %v4724_v29 = vld [vmem:[%s5888_s1 + $0x7e0] sm:$0xff]  }
  0x8a   :  { %4197 = vmatprep.subr.bf16.mxu1 %v4608_v34  ;;  %v26_v34 = vld [vmem:[%s5889_s0 + $0x58] sm:$0xff] }
  0x8b   :  { %4176 = vmatpush3.bf16.msra.mxu0 %v4607_v33  ;;  %v4668_v33 = vld [vmem:[%s5888_s1 + $0x640] sm:$0xff]  }
  0x8c   :  { %4177 = vmatprep.subr.bf16.mxu0 %v4610_v36  ;;  %v3652_v36 = vcombine.high %v26_v34, %v26_v34 }
  0x8d   :  { %4198 = vmatpush3.bf16.msra.mxu1 %v4609_v35  ;;  %v3651_v35 = vcombine.low %v26_v34, %v26_v34 }
  0x8e   :  { %4199 = vmatprep.subr.bf16.mxu1 %v4612_v38  ;;  %v4672_v38 = vld [vmem:[%s5888_s1 + $0x6c0] sm:$0xff]  }
  0x8f   :  { %4178 = vmatpush3.bf16.msra.mxu0 %v4611_v37  ;;  %v4671_v37 = vld [vmem:[%s5888_s1 + $0x600] sm:$0xff]  }
  0x90   :  { %4179 = vmatprep.subr.bf16.mxu0 %v4614_v40  ;;  %v4674_v40 = vld [vmem:[%s5888_s1 + $0x648] sm:$0xff]  }
  0x91   :  { %4200 = vmatpush3.bf16.msra.mxu1 %v4613_v39  ;;  %v4673_v39 = vld [vmem:[%s5888_s1 + $0x680] sm:$0xff]  }
  0x92   :  { %4201 = vmatprep.subr.bf16.mxu1 %v4616_v42  ;;  %v4676_v42 = vld [vmem:[%s5888_s1 + $0x6c8] sm:$0xff]  }
  0x93   :  { %4180 = vmatpush3.bf16.msra.mxu0 %v4615_v41  ;;  %v4675_v41 = vld [vmem:[%s5888_s1 + $0x608] sm:$0xff]  }
  0x94   :  { %4181 = vmatprep.subr.bf16.mxu0 %v4618_v44  ;;  %v4678_v44 = vld [vmem:[%s5888_s1 + $0x650] sm:$0xff]  }
  0x95   :  { %4202 = vmatpush3.bf16.msra.mxu1 %v4617_v43  ;;  %v4677_v43 = vld [vmem:[%s5888_s1 + $0x688] sm:$0xff]  }
  0x96   :  { %4203 = vmatprep.subr.bf16.mxu1 %v4620_v46  ;;  %v4680_v46 = vld [vmem:[%s5888_s1 + $0x6d0] sm:$0xff]  }
  0x97   :  { %4182 = vmatpush3.bf16.msra.mxu0 %v4619_v45  ;;  %v4679_v45 = vld [vmem:[%s5888_s1 + $0x610] sm:$0xff]  }
  0x98   :  { %4183 = vmatprep.subr.bf16.mxu0 %v4622_v48  ;;  %v4682_v48 = vld [vmem:[%s5888_s1 + $0x658] sm:$0xff]  }
  0x99   :  { %4204 = vmatpush3.bf16.msra.mxu1 %v4621_v47  ;;  %v4681_v47 = vld [vmem:[%s5888_s1 + $0x690] sm:$0xff]  }
  0x9a   :  { %4205 = vmatprep.subr.bf16.mxu1 %v4624_v50  ;;  %v4684_v50 = vld [vmem:[%s5888_s1 + $0x6d8] sm:$0xff]  }
  0x9b   :  { %4184 = vmatpush3.bf16.msra.mxu0 %v4623_v49  ;;  %v4683_v49 = vld [vmem:[%s5888_s1 + $0x618] sm:$0xff]  }
  0x9c   :  { %4185 = vmatprep.subr.bf16.mxu0 %v4626_v52  ;;  %v4686_v52 = vld [vmem:[%s5888_s1 + $0x660] sm:$0xff]  }
  0x9d   :  { %4206 = vmatpush3.bf16.msra.mxu1 %v4625_v51  ;;  %v4685_v51 = vld [vmem:[%s5888_s1 + $0x698] sm:$0xff]  }
  0x9e   :  { %4207 = vmatprep.subr.bf16.mxu1 %v4628_v54  ;;  %v4688_v54 = vld [vmem:[%s5888_s1 + $0x6e0] sm:$0xff]  }
  0x9f   :  { %4186 = vmatpush3.bf16.msra.mxu0 %v4627_v53  ;;  %v4687_v53 = vld [vmem:[%s5888_s1 + $0x620] sm:$0xff]  }
  0xa0   :  { %4215 = vmatprep.subr.bf16.mxu0 %v4632_v59  ;;  %v4693_v59 = vld [vmem:[%s5888_s1 + $0x6a8] sm:$0xff]  }
  0xa1   :  { %4208 = vmatpush3.bf16.msra.mxu1 %v4631_v58  ;;  %v4692_v58 = vld [vmem:[%s5888_s1 + $0x6e8] sm:$0xff]  }
  0xa2   :  { %3135 = vmatmul.mubr.bf16.vlgmr.msra.gmra.mrb[16].mxu0 %v3645_v56  ;;  %4237 = vmatprep.subr.bf16.mxu1 %v4636_v0  ;;  %v4690_v56 = vld [vmem:[%s5888_s1 + $0x668] sm:$0xff]   ;;  %v4698_v0 = vld [vmem:[%s5888_s1 + $0x678] sm:$0xff]  }
  0xa3   :  { %4216 = vmatpush3.bf16.msra.mxu0 %v4635_v63  ;;  %3214 = vmatprep.mubr.bf16.mxu0 %v3650_v31  ;;  %v4697_v63 = vld [vmem:[%s5888_s1 + $0x6b0] sm:$0xff]   ;;  %v4725_v31 = vld [vmem:[%s5888_s1 + $0x7a0] sm:$0xff]  }
  0xa4   :  { %3175 = vmatmul.mubr.bf16.vlgmr.msra.gmra.mrb[16].mxu1 %v3647_v61  ;;  %4217 = vmatprep.subr.bf16.mxu0 %v4638_v2  ;;  %v4695_v61 = vld [vmem:[%s5888_s1 + $0x630] sm:$0xff]   ;;  %v4700_v2 = vld [vmem:[%s5888_s1 + $0x6f8] sm:$0xff]  }
  0xa5   :  { %4238 = vmatpush3.bf16.msra.mxu1 %v4637_v1  ;;  %3254 = vmatprep.mubr.bf16.mxu1 %v3652_v36  ;;  %v4699_v1 = vld [vmem:[%s5888_s1 + $0x638] sm:$0xff]  }
  0xa6   :  { %4239 = vmatprep.subr.bf16.mxu1 %v4640_v4 }
  0xa7   :  { %4218 = vmatpush3.bf16.msra.mxu0 %v4639_v3  ;;  %v27_v3 = vld [vmem:[%s5889_s0 + $0x60] sm:$0xff] }
  0xa8   :  { %4219 = vmatprep.subr.bf16.mxu0 %v4642_v6  ;;  %v3653_v4 = vcombine.low %v27_v3, %v27_v3  ;;  %v4703_v6 = vld [vmem:[%s5888_s1 + $0x6b8] sm:$0xff]  }
  0xa9   :  { %4240 = vmatpush3.bf16.msra.mxu1 %v4641_v5  ;;  %v3654_v5 = vcombine.high %v27_v3, %v27_v3  ;;  %v4748_v3 = vld [vmem:[%s5888_s1 + $0x8c8] sm:$0xff]  }
  0xaa   :  { %4241 = vmatprep.subr.bf16.mxu1 %v4644_v8  ;;  %v28_v8 = vld [vmem:[%s5889_s0 + $0x68] sm:$0xff] }
  0xab   :  { %4220 = vmatpush3.bf16.msra.mxu0 %v4643_v7  ;;  %v4704_v7 = vld [vmem:[%s5888_s1 + $0x740] sm:$0xff]  }
  0xac   :  { %4221 = vmatprep.subr.bf16.mxu0 %v4646_v10  ;;  %v3656_v10 = vcombine.high %v28_v8, %v28_v8 }
  0xad   :  { %4242 = vmatpush3.bf16.msra.mxu1 %v4645_v9  ;;  %v3655_v9 = vcombine.low %v28_v8, %v28_v8  ;;  %v4753_v8 = vld [vmem:[%s5888_s1 + $0x890] sm:$0xff]  }
  0xae   :  { %4243 = vmatprep.subr.bf16.mxu1 %v4648_v12  ;;  %v4708_v12 = vld [vmem:[%s5888_s1 + $0x7c0] sm:$0xff]  }
  0xaf   :  { %4222 = vmatpush3.bf16.msra.mxu0 %v4647_v11  ;;  %v4707_v11 = vld [vmem:[%s5888_s1 + $0x700] sm:$0xff]  }
  0xb0   :  { %4223 = vmatprep.subr.bf16.mxu0 %v4650_v14  ;;  %v4710_v14 = vld [vmem:[%s5888_s1 + $0x748] sm:$0xff]  }
  0xb1   :  { %4244 = vmatpush3.bf16.msra.mxu1 %v4649_v13  ;;  %v4709_v13 = vld [vmem:[%s5888_s1 + $0x780] sm:$0xff]  }
  0xb2   :  { %4245 = vmatprep.subr.bf16.mxu1 %v4652_v16  ;;  %v4712_v16 = vld [vmem:[%s5888_s1 + $0x7c8] sm:$0xff]  }
  0xb3   :  { %4224 = vmatpush3.bf16.msra.mxu0 %v4651_v15  ;;  %v4711_v15 = vld [vmem:[%s5888_s1 + $0x708] sm:$0xff]  }
  0xb4   :  { %4225 = vmatprep.subr.bf16.mxu0 %v4654_v18  ;;  %v4714_v18 = vld [vmem:[%s5888_s1 + $0x750] sm:$0xff]  }
  0xb5   :  { %4246 = vmatpush3.bf16.msra.mxu1 %v4653_v17  ;;  %v4713_v17 = vld [vmem:[%s5888_s1 + $0x788] sm:$0xff]  }
  0xb6   :  { %4247 = vmatprep.subr.bf16.mxu1 %v4656_v20  ;;  %v4716_v20 = vld [vmem:[%s5888_s1 + $0x7d0] sm:$0xff]  }
  0xb7   :  { %4226 = vmatpush3.bf16.msra.mxu0 %v4655_v19  ;;  %v4715_v19 = vld [vmem:[%s5888_s1 + $0x710] sm:$0xff]  }
  0xb8   :  { %4227 = vmatprep.subr.bf16.mxu0 %v4658_v22  ;;  %v4718_v22 = vld [vmem:[%s5888_s1 + $0x758] sm:$0xff]  }
  0xb9   :  { %4248 = vmatpush3.bf16.msra.mxu1 %v4657_v21  ;;  %v4717_v21 = vld [vmem:[%s5888_s1 + $0x790] sm:$0xff]  }
  0xba   :  { %4249 = vmatprep.subr.bf16.mxu1 %v4660_v24  ;;  %v4720_v24 = vld [vmem:[%s5888_s1 + $0x7d8] sm:$0xff]  }
  0xbb   :  { %4228 = vmatpush3.bf16.msra.mxu0 %v4659_v23  ;;  %v4719_v23 = vld [vmem:[%s5888_s1 + $0x718] sm:$0xff]  }
  0xbc   :  { %4229 = vmatprep.subr.bf16.mxu0 %v4662_v26  ;;  %v4722_v26 = vld [vmem:[%s5888_s1 + $0x760] sm:$0xff]  }
  0xbd   :  { %4250 = vmatpush3.bf16.msra.mxu1 %v4661_v25  ;;  %v4721_v25 = vld [vmem:[%s5888_s1 + $0x798] sm:$0xff]  }
  0xbe   :  { %4251 = vmatprep.subr.bf16.mxu1 %v4664_v28 }
  0xbf   :  { %4230 = vmatpush3.bf16.msra.mxu0 %v4663_v27  ;;  %v4723_v27 = vld [vmem:[%s5888_s1 + $0x720] sm:$0xff]  }
  0xc0   :  { %4259 = vmatprep.subr.bf16.mxu0 %v4668_v33 }
  0xc1   :  { %4252 = vmatpush3.bf16.msra.mxu1 %v4667_v32  ;;  %v3628_v32 = vld [vmem:[%s5890_s2] ss:$0 sm:$0xff] }
  0xc2   :  { %3215 = vmatmul.mubr.bf16.vlgmr.msra.gmra.mrb[20].mxu0 %v3649_v30  ;;  %4281 = vmatprep.subr.bf16.mxu1 %v4672_v38  ;;  %v4727_v38 = vld [vmem:[%s5888_s1 + $0x728] sm:$0xff]  }
  0xc3   :  { %4260 = vmatpush3.bf16.msra.mxu0 %v4671_v37  ;;  %3294 = vmatprep.mubr.bf16.mxu0 %v3654_v5  ;;  %v4750_v5 = vld [vmem:[%s5888_s1 + $0x850] sm:$0xff]  }
  0xc4   :  { %3255 = vmatmul.mubr.bf16.vlgmr.msra.gmra.mrb[20].mxu1 %v3651_v35  ;;  %4261 = vmatprep.subr.bf16.mxu0 %v4674_v40  ;;  %v4726_v35 = vld [vmem:[%s5888_s1 + $0x768] sm:$0xff]  }
  0xc5   :  { %4282 = vmatpush3.bf16.msra.mxu1 %v4673_v39  ;;  %3334 = vmatprep.mubr.bf16.mxu1 %v3656_v10  ;;  %v4755_v10 = vld [vmem:[%s5888_s1 + $0x818] sm:$0xff]  }
  0xc6   :  { %4283 = vmatprep.subr.bf16.mxu1 %v4676_v42 }
  0xc7   :  { %4262 = vmatpush3.bf16.msra.mxu0 %v4675_v41  ;;  %v4728_v41 = vld [vmem:[%s5888_s1 + $0x7e8] sm:$0xff]  }
  0xc8   :  { %4263 = vmatprep.subr.bf16.mxu0 %v4678_v44 }
  0xc9   :  { %4284 = vmatpush3.bf16.msra.mxu1 %v4677_v43  ;;  %v4729_v43 = vld [vmem:[%s5888_s1 + $0x7a8] sm:$0xff]  }
  0xca   :  { %4285 = vmatprep.subr.bf16.mxu1 %v4680_v46 }
  0xcb   :  { %4264 = vmatpush3.bf16.msra.mxu0 %v4679_v45  ;;  %v4730_v45 = vld [vmem:[%s5888_s1 + $0x770] sm:$0xff]  }
  0xcc   :  { %4265 = vmatprep.subr.bf16.mxu0 %v4682_v48  ;;  %v4731_v48 = vld [vmem:[%s5888_s1 + $0x730] sm:$0xff]  }
  0xcd   :  { %4286 = vmatpush3.bf16.msra.mxu1 %v4681_v47 }
  0xce   :  { %4287 = vmatprep.subr.bf16.mxu1 %v4684_v50  ;;  %v4733_v50 = vld [vmem:[%s5888_s1 + $0x7b0] sm:$0xff]  }
  0xcf   :  { %4266 = vmatpush3.bf16.msra.mxu0 %v4683_v49  ;;  %v4732_v49 = vld [vmem:[%s5888_s1 + $0x7f0] sm:$0xff]  }
  0xd0   :  { %4267 = vmatprep.subr.bf16.mxu0 %v4686_v52  ;;  %v4735_v52 = vld [vmem:[%s5888_s1 + $0x738] sm:$0xff]  }
  0xd1   :  { %4288 = vmatpush3.bf16.msra.mxu1 %v4685_v51  ;;  %v4734_v51 = vld [vmem:[%s5888_s1 + $0x778] sm:$0xff]  }
  0xd2   :  { %4289 = vmatprep.subr.bf16.mxu1 %v4688_v54  ;;  %v29_v54 = vld [vmem:[%s5889_s0 + $0x70] sm:$0xff] }
  0xd3   :  { %4268 = vmatpush3.bf16.msra.mxu0 %v4687_v53  ;;  %v4736_v53 = vld [vmem:[%s5888_s1 + $0x7f8] sm:$0xff]  }
  0xd4   :  { %4269 = vmatprep.subr.bf16.mxu0 %v4690_v56  ;;  %v3658_v56 = vcombine.high %v29_v54, %v29_v54 }
  0xd5   :  { %4290 = vmatpush3.bf16.msra.mxu1 %v4689_v55  ;;  %v3657_v55 = vcombine.low %v29_v54, %v29_v54  ;;  %v4785_v54 = vld [vmem:[%s5888_s1 + $0x988] sm:$0xff]  }
  0xd6   :  { %4291 = vmatprep.subr.bf16.mxu1 %v4692_v58  ;;  %v4740_v58 = vld [vmem:[%s5888_s1 + $0x840] sm:$0xff]  }
  0xd7   :  { %4270 = vmatpush3.bf16.msra.mxu0 %v4691_v57  ;;  %v4739_v57 = vld [vmem:[%s5888_s1 + $0x7b8] sm:$0xff]  }
  0xd8   :  { %4271 = vmatprep.subr.bf16.mxu0 %v4694_v60 }
  0xd9   :  { %4292 = vmatpush3.bf16.msra.mxu1 %v4693_v59  ;;  %v30_v59 = vld [vmem:[%s5889_s0 + $0x78] sm:$0xff] }
  0xda   :  { %4293 = vmatprep.subr.bf16.mxu1 %v4696_v62  ;;  %v3659_v60 = vcombine.low %v30_v59, %v30_v59  ;;  %v4743_v62 = vld [vmem:[%s5888_s1 + $0x800] sm:$0xff]  }
  0xdb   :  { %4272 = vmatpush3.bf16.msra.mxu0 %v4695_v61  ;;  %v3660_v61 = vcombine.high %v30_v59, %v30_v59  ;;  %v4790_v59 = vld [vmem:[%s5888_s1 + $0x958] sm:$0xff]  }
  0xdc   :  { %4273 = vmatprep.subr.bf16.mxu0 %v4698_v0  ;;  %v4745_v0 = vld [vmem:[%s5888_s1 + $0x880] sm:$0xff]  }
  0xdd   :  { %4294 = vmatpush3.bf16.msra.mxu1 %v4697_v63  ;;  %v4744_v63 = vld [vmem:[%s5888_s1 + $0x8c0] sm:$0xff]  }
  0xde   :  { %4295 = vmatprep.subr.bf16.mxu1 %v4700_v2  ;;  %v4747_v2 = vld [vmem:[%s5888_s1 + $0x808] sm:$0xff]  }
  0xdf   :  { %4274 = vmatpush3.bf16.msra.mxu0 %v4699_v1  ;;  %v4746_v1 = vld [vmem:[%s5888_s1 + $0x848] sm:$0xff]  }
  0xe0   :  { %4303 = vmatprep.subr.bf16.mxu0 %v4704_v7  ;;  %v4752_v7 = vld [vmem:[%s5888_s1 + $0x8d0] sm:$0xff]  }
  0xe1   :  { %4296 = vmatpush3.bf16.msra.mxu1 %v4703_v6  ;;  %v4751_v6 = vld [vmem:[%s5888_s1 + $0x810] sm:$0xff]  }
  0xe2   :  { %3295 = vmatmul.mubr.bf16.vlgmr.msra.gmra.mrb[24].mxu0 %v3653_v4  ;;  %4325 = vmatprep.subr.bf16.mxu1 %v4708_v12  ;;  %v4749_v4 = vld [vmem:[%s5888_s1 + $0x888] sm:$0xff]   ;;  %v4757_v12 = vld [vmem:[%s5888_s1 + $0x898] sm:$0xff]  }
  0xe3   :  { %4304 = vmatpush3.bf16.msra.mxu0 %v4707_v11  ;;  %3374 = vmatprep.mubr.bf16.mxu0 %v3658_v56  ;;  %v4756_v11 = vld [vmem:[%s5888_s1 + $0x8d8] sm:$0xff]   ;;  %v4787_v56 = vld [vmem:[%s5888_s1 + $0x910] sm:$0xff]  }
  0xe4   :  { %3335 = vmatmul.mubr.bf16.vlgmr.msra.gmra.mrb[24].mxu1 %v3655_v9  ;;  %4305 = vmatprep.subr.bf16.mxu0 %v4710_v14  ;;  %v4754_v9 = vld [vmem:[%s5888_s1 + $0x858] sm:$0xff]  }
  0xe5   :  { %4326 = vmatpush3.bf16.msra.mxu1 %v4709_v13  ;;  %3414 = vmatprep.mubr.bf16.mxu1 %v3660_v61  ;;  %v4758_v13 = vld [vmem:[%s5888_s1 + $0x860] sm:$0xff]   ;;  %v4792_v61 = vld [vmem:[%s5888_s1 + $0x9d8] sm:$0xff]  }
  0xe6   :  { %4327 = vmatprep.subr.bf16.mxu1 %v4712_v16 }
  0xe7   :  { %4306 = vmatpush3.bf16.msra.mxu0 %v4711_v15  ;;  %v4759_v15 = vld [vmem:[%s5888_s1 + $0x820] sm:$0xff]  }
  0xe8   :  { %4307 = vmatprep.subr.bf16.mxu0 %v4714_v18 }
  0xe9   :  { %4328 = vmatpush3.bf16.msra.mxu1 %v4713_v17  ;;  %v4760_v17 = vld [vmem:[%s5888_s1 + $0x8e0] sm:$0xff]  }
  0xea   :  { %4329 = vmatprep.subr.bf16.mxu1 %v4716_v20  ;;  %v4761_v20 = vld [vmem:[%s5888_s1 + $0x8a0] sm:$0xff]  }
  0xeb   :  { %4308 = vmatpush3.bf16.msra.mxu0 %v4715_v19 }
  0xec   :  { %4309 = vmatprep.subr.bf16.mxu0 %v4718_v22 }
  0xed   :  { %4330 = vmatpush3.bf16.msra.mxu1 %v4717_v21 }
  0xee   :  { %4331 = vmatprep.subr.bf16.mxu1 %v4720_v24 }
  0xef   :  { %4310 = vmatpush3.bf16.msra.mxu0 %v4719_v23  ;;  %v4762_v23 = vld [vmem:[%s5888_s1 + $0x868] sm:$0xff]  }
  0xf0   :  { %4311 = vmatprep.subr.bf16.mxu0 %v4722_v26 }
  0xf1   :  { %4332 = vmatpush3.bf16.msra.mxu1 %v4721_v25  ;;  %v4763_v25 = vld [vmem:[%s5888_s1 + $0x828] sm:$0xff]  }
  0xf2   :  { %4333 = vmatprep.subr.bf16.mxu1 %v4724_v29 }
  0xf3   :  { %4312 = vmatpush3.bf16.msra.mxu0 %v4723_v27 }
  0xf4   :  { %4313 = vmatprep.subr.bf16.mxu0 %v4726_v35  ;;  %v4768_v35 = vld [vmem:[%s5888_s1 + $0x8f0] sm:$0xff]  }
  0xf5   :  { %v4011_v28 = vpop.f32.mrb[0].mxu0  ;;  %4334 = vmatpush3.bf16.msra.mxu1 %v4725_v31 }
  0xf6   :  { %v4012_v30 = vpop.f32.mrb[1].mxu0  ;;  %4335 = vmatprep.subr.bf16.mxu1 %v4728_v41 }
  0xf7   :  { %v4013_v33 = vadd.f32 %v4012_v30, %v4011_v28  ;;  %v4014_v34 = vpop.f32.mrb[2].mxu0  ;;  %v4033_v36 = vpop.f32.mrb[0].mxu1  ;;  %4314 = vmatpush3.bf16.msra.mxu0 %v4727_v38  ;;  %v4764_v28 = vld [vmem:[%s5888_s1 + $0x8e8] sm:$0xff]   ;;  %v4771_v38 = vld [vmem:[%s5888_s1 + $0x838] sm:$0xff]  }
  0xf8   :  { %v4015_v39 = vpop.f32.mrb[3].mxu0  ;;  %v4034_v40 = vpop.f32.mrb[1].mxu1  ;;  %4315 = vmatprep.subr.bf16.mxu0 %v4730_v45  ;;  %v4765_v30 = vld [vmem:[%s5888_s1 + $0x8a8] sm:$0xff]   ;;  %v4767_v34 = vld [vmem:[%s5888_s1 + $0x830] sm:$0xff]  }
  0xf9   :  { %v2817_v37 = vadd.f32 %v4013_v33, %v3628_v32  ;;  %v4035_v42 = vadd.f32 %v4034_v40, %v4033_v36  ;;  %v4036_v44 = vpop.f32.mrb[2].mxu1  ;;  %4336 = vmatpush3.bf16.msra.mxu1 %v4729_v43  ;;  %v4766_v33 = vld [vmem:[%s5888_s1 + $0x870] sm:$0xff]   ;;  %v4772_v39 = vld [vmem:[%s5888_s1 + $0x8f8] sm:$0xff]   ;;  %v31_v40 = vld [vmem:[%s5889_s0 + $0x80] sm:$0xff] }
  0xfa   :  { %v4037_v46 = vpop.f32.mrb[3].mxu1  ;;  %4337 = vmatprep.subr.bf16.mxu1 %v4732_v49  ;;  %v4769_v36 = vld [vmem:[%s5888_s1 + $0x8b0] sm:$0xff]   ;;  %v3661_v41 = vcombine.low %v31_v40, %v31_v40  ;;  %v4775_v43 = vld [vmem:[%s5888_s1 + $0x8b8] sm:$0xff]   ;;  %v4776_v44 = vld [vmem:[%s5888_s1 + $0x940] sm:$0xff]  }
  0xfb   :  { %v5633_v47 = vadd.f32 %v4035_v42, %v2817_v37  ;;  %4316 = vmatpush3.bf16.msra.mxu0 %v4731_v48  ;;  %v4770_v37 = vld [vmem:[%s5888_s1 + $0x878] sm:$0xff]   ;;  %v3662_v42 = vcombine.high %v31_v40, %v31_v40  ;;  %v32_v45 = vld [vmem:[%s5889_s0 + $0x88] sm:$0xff]  ;;  %v4779_v48 = vld [vmem:[%s5888_s1 + $0x900] sm:$0xff]  }
  0xfc   :  { %4317 = vmatprep.subr.bf16.mxu0 %v4734_v51  ;;  %v3663_v46 = vcombine.low %v32_v45, %v32_v45  ;;  %v4780_v49 = vld [vmem:[%s5888_s1 + $0x9c0] sm:$0xff]   ;;  %v4782_v51 = vld [vmem:[%s5888_s1 + $0x948] sm:$0xff]  }
  0xfd   :  { %4338 = vmatpush3.bf16.msra.mxu1 %v4733_v50  ;;  %v4781_v50 = vld [vmem:[%s5888_s1 + $0x980] sm:$0xff]  }
  0xfe   :  { %4339 = vmatprep.subr.bf16.mxu1 %v4736_v53  ;;  %v4784_v53 = vld [vmem:[%s5888_s1 + $0x9c8] sm:$0xff]  }
  0xff   :  { %4318 = vmatpush3.bf16.msra.mxu0 %v4735_v52  ;;  %v4783_v52 = vld [vmem:[%s5888_s1 + $0x908] sm:$0xff]  }
 0x100   :  { %4347 = vmatprep.subr.bf16.mxu0 %v4740_v58  ;;  %v4789_v58 = vld [vmem:[%s5888_s1 + $0x990] sm:$0xff]  }
 0x101   :  { %4340 = vmatpush3.bf16.msra.mxu1 %v4739_v57  ;;  %v4788_v57 = vld [vmem:[%s5888_s1 + $0x9d0] sm:$0xff]  }
 0x102   :  { %3375 = vmatmul.mubr.bf16.vlgmr.msra.gmra.mrb[28].mxu0 %v3657_v55  ;;  %4369 = vmatprep.subr.bf16.mxu1 %v4744_v63  ;;  %v4786_v55 = vld [vmem:[%s5888_s1 + $0x950] sm:$0xff]   ;;  %v4794_v63 = vld [vmem:[%s5888_s1 + $0x960] sm:$0xff]  }
 0x103   :  { %4348 = vmatpush3.bf16.msra.mxu0 %v4743_v62  ;;  %3454 = vmatprep.mubr.bf16.mxu0 %v3662_v42  ;;  %v4793_v62 = vld [vmem:[%s5888_s1 + $0x998] sm:$0xff]  }
 0x104   :  { %3415 = vmatmul.mubr.bf16.vlgmr.msra.gmra.mrb[28].mxu1 %v3659_v60  ;;  %4349 = vmatprep.subr.bf16.mxu0 %v4746_v1  ;;  %v4791_v60 = vld [vmem:[%s5888_s1 + $0x918] sm:$0xff]   ;;  %v4795_v1 = vld [vmem:[%s5888_s1 + $0x920] sm:$0xff]  }
 0x105   :  { %4370 = vmatpush3.bf16.msra.mxu1 %v4745_v0 }
 0x106   :  { %4371 = vmatprep.subr.bf16.mxu1 %v4748_v3  ;;  %v4796_v3 = vld [vmem:[%s5888_s1 + $0x9e0] sm:$0xff]  }
 0x107   :  { %4350 = vmatpush3.bf16.msra.mxu0 %v4747_v2 }
 0x108   :  { %4351 = vmatprep.subr.bf16.mxu0 %v4750_v5 }
 0x109   :  { %4372 = vmatpush3.bf16.msra.mxu1 %v4749_v4 }
 0x10a   :  { %4373 = vmatprep.subr.bf16.mxu1 %v4752_v7 }
 0x10b   :  { %4352 = vmatpush3.bf16.msra.mxu0 %v4751_v6  ;;  %v4797_v6 = vld [vmem:[%s5888_s1 + $0x9a0] sm:$0xff]  }
 0x10c   :  { %4353 = vmatprep.subr.bf16.mxu0 %v4754_v9  ;;  %v4798_v9 = vld [vmem:[%s5888_s1 + $0x968] sm:$0xff]  }
 0x10d   :  { %4374 = vmatpush3.bf16.msra.mxu1 %v4753_v8 }
 0x10e   :  { %4375 = vmatprep.subr.bf16.mxu1 %v4756_v11  ;;  %v4799_v11 = vld [vmem:[%s5888_s1 + $0x928] sm:$0xff]  }
 0x10f   :  { %4354 = vmatpush3.bf16.msra.mxu0 %v4755_v10 }
 0x110   :  { %4355 = vmatprep.subr.bf16.mxu0 %v4758_v13 }
 0x111   :  { %4376 = vmatpush3.bf16.msra.mxu1 %v4757_v12 }
 0x112   :  { %4377 = vmatprep.subr.bf16.mxu1 %v4760_v17 }
 0x113   :  { %4356 = vmatpush3.bf16.msra.mxu0 %v4759_v15 }
 0x114   :  { %4357 = vmatprep.subr.bf16.mxu0 %v4762_v23  ;;  %v4806_v23 = vld [vmem:[%s5888_s1 + $0x978] sm:$0xff]  }
 0x115   :  { %v4055_v14 = vpop.f32.mrb[4].mxu0  ;;  %4378 = vmatpush3.bf16.msra.mxu1 %v4761_v20  ;;  %v4803_v20 = vld [vmem:[%s5888_s1 + $0x930] sm:$0xff]  }
 0x116   :  { %v4056_v16 = vpop.f32.mrb[5].mxu0  ;;  %4379 = vmatprep.subr.bf16.mxu1 %v4764_v28 }
 0x117   :  { %v4057_v18 = vadd.f32 %v4056_v16, %v4055_v14  ;;  %v4058_v19 = vpop.f32.mrb[6].mxu0  ;;  %v4077_v21 = vpop.f32.mrb[4].mxu1  ;;  %4358 = vmatpush3.bf16.msra.mxu0 %v4763_v25  ;;  %v4800_v14 = vld [vmem:[%s5888_s1 + $0x9e8] sm:$0xff]   ;;  %v4808_v25 = vld [vmem:[%s5888_s1 + $0x9f8] sm:$0xff]  }
 0x118   :  { %v4059_v24 = vpop.f32.mrb[7].mxu0  ;;  %v4078_v26 = vpop.f32.mrb[5].mxu1  ;;  %4359 = vmatprep.subr.bf16.mxu0 %v4766_v33  ;;  %v4801_v16 = vld [vmem:[%s5888_s1 + $0x9a8] sm:$0xff]   ;;  %v4802_v19 = vld [vmem:[%s5888_s1 + $0x970] sm:$0xff]  }
 0x119   :  { %v2897_v22 = vadd.f32 %v4057_v18, %v5633_v47  ;;  %v4079_v27 = vadd.f32 %v4078_v26, %v4077_v21  ;;  %v4080_v29 = vpop.f32.mrb[6].mxu1  ;;  %4380 = vmatpush3.bf16.msra.mxu1 %v4765_v30  ;;  %v3664_v47 = vcombine.high %v32_v45, %v32_v45  ;;  %v4804_v21 = vld [vmem:[%s5888_s1 + $0x9f0] sm:$0xff]   ;;  %v4807_v24 = vld [vmem:[%s5888_s1 + $0x938] sm:$0xff]  }
 0x11a   :  { %v4081_v31 = vpop.f32.mrb[7].mxu1  ;;  %4381 = vmatprep.subr.bf16.mxu1 %v4768_v35  ;;  %v33_v26 = vld [vmem:[%s5889_s0 + $0x90] sm:$0xff]  ;;  %v4811_v29 = vld [vmem:[%s5888_s1 + $0x9b8] sm:$0xff]   ;;  %v4815_v35 = vld [vmem:[%s5888_s1 + $0xa08] sm:$0xff]  }
 0x11b   :  { %v5735_v32 = vadd.f32 %v4079_v27, %v2897_v22  ;;  %4360 = vmatpush3.bf16.msra.mxu0 %v4767_v34  ;;  %3494 = vmatprep.mubr.bf16.mxu1 %v3664_v47  ;;  %v4805_v22 = vld [vmem:[%s5888_s1 + $0x9b0] sm:$0xff]   ;;  %v3665_v27 = vcombine.low %v33_v26, %v33_v26  ;;  %v3666_v28 = vcombine.high %v33_v26, %v33_v26  ;;  %v34_v30 = vld [vmem:[%s5889_s0 + $0x98] sm:$0xff]  ;;  %v4819_v31 = vmov 0.0   ;;  %v4814_v34 = vld [vmem:[%s5888_s1 + $0xa00] sm:$0xff]  }
 0x11c   :  { %4361 = vmatprep.subr.bf16.mxu0 %v4770_v37  ;;  %v3668_v33 = vcombine.high %v34_v30, %v34_v30  ;;  %v4817_v37 = vld [vmem:[%s5888_s1 + $0xa18] sm:$0xff]  }
 0x11d   :  { %4382 = vmatpush3.bf16.msra.mxu1 %v4769_v36  ;;  %v4816_v36 = vld [vmem:[%s5888_s1 + $0xa10] sm:$0xff]  }
 0x11e   :  { %4383 = vmatprep.subr.bf16.mxu1 %v4772_v39 }
 0x11f   :  { %4362 = vmatpush3.bf16.msra.mxu0 %v4771_v38  ;;  %v4818_v38 = vld [vmem:[%s5889_s0 + $0xa0] ss:$0 sps:$4 sm:$0xff]  }
 0x120   :  { %4391 = vmatprep.subr.bf16.mxu0 %v4776_v44 }
 0x121   :  { %4384 = vmatpush3.bf16.msra.mxu1 %v4775_v43 }
 0x122   :  { %3455 = vmatmul.mubr.bf16.vlgmr.msra.gmra.mrb[32].mxu0 %v3661_v41  ;;  %4413 = vmatprep.subr.bf16.mxu1 %v4780_v49 }
 0x123   :  { %4392 = vmatpush3.bf16.msra.mxu0 %v4779_v48  ;;  %3534 = vmatprep.mubr.bf16.mxu0 %v3666_v28 }
 0x124   :  { %3495 = vmatmul.mubr.bf16.vlgmr.msra.gmra.mrb[32].mxu1 %v3663_v46  ;;  %4393 = vmatprep.subr.bf16.mxu0 %v4782_v51 }
 0x125   :  { %4414 = vmatpush3.bf16.msra.mxu1 %v4781_v50  ;;  %3574 = vmatprep.mubr.bf16.mxu1 %v3668_v33 }
 0x126   :  { %4415 = vmatprep.subr.bf16.mxu1 %v4784_v53 }
 0x127   :  { %4394 = vmatpush3.bf16.msra.mxu0 %v4783_v52 }
 0x128   :  { %4395 = vmatprep.subr.bf16.mxu0 %v4786_v55 }
 0x129   :  { %4416 = vmatpush3.bf16.msra.mxu1 %v4785_v54 }
 0x12a   :  { %4417 = vmatprep.subr.bf16.mxu1 %v4788_v57 }
 0x12b   :  { %4396 = vmatpush3.bf16.msra.mxu0 %v4787_v56 }
 0x12c   :  { %4397 = vmatprep.subr.bf16.mxu0 %v4790_v59 }
 0x12d   :  { %4418 = vmatpush3.bf16.msra.mxu1 %v4789_v58 }
 0x12e   :  { %4419 = vmatprep.subr.bf16.mxu1 %v4792_v61 }
 0x12f   :  { %4398 = vmatpush3.bf16.msra.mxu0 %v4791_v60 }
 0x130   :  { %4399 = vmatprep.subr.bf16.mxu0 %v4794_v63 }
 0x131   :  { %4420 = vmatpush3.bf16.msra.mxu1 %v4793_v62 }
 0x132   :  { %4421 = vmatprep.subr.bf16.mxu1 %v4796_v3 }
 0x133   :  { %4400 = vmatpush3.bf16.msra.mxu0 %v4795_v1 }
 0x134   :  { %4401 = vmatprep.subr.bf16.mxu0 %v4798_v9 }
 0x135   :  { %v4099_v0 = vpop.f32.mrb[8].mxu0  ;;  %4422 = vmatpush3.bf16.msra.mxu1 %v4797_v6 }
 0x136   :  { %v4100_v2 = vpop.f32.mrb[9].mxu0  ;;  %4423 = vmatprep.subr.bf16.mxu1 %v4800_v14 }
 0x137   :  { %v4101_v4 = vadd.f32 %v4100_v2, %v4099_v0  ;;  %v4102_v5 = vpop.f32.mrb[10].mxu0  ;;  %v4121_v7 = vpop.f32.mrb[8].mxu1  ;;  %4402 = vmatpush3.bf16.msra.mxu0 %v4799_v11 }
 0x138   :  { %v4103_v10 = vpop.f32.mrb[11].mxu0  ;;  %v4122_v12 = vpop.f32.mrb[9].mxu1  ;;  %4403 = vmatprep.subr.bf16.mxu0 %v4802_v19 }
 0x139   :  { %v2977_v8 = vadd.f32 %v4101_v4, %v5735_v32  ;;  %v4123_v13 = vadd.f32 %v4122_v12, %v4121_v7  ;;  %v4124_v15 = vpop.f32.mrb[10].mxu1  ;;  %4424 = vmatpush3.bf16.msra.mxu1 %v4801_v16  ;;  %v3667_v32 = vcombine.low %v34_v30, %v34_v30 }
 0x13a   :  { %v4125_v17 = vpop.f32.mrb[11].mxu1  ;;  %4425 = vmatprep.subr.bf16.mxu1 %v4804_v21 }
 0x13b   :  { %v3017_v18 = vadd.f32 %v4123_v13, %v2977_v8  ;;  %4404 = vmatpush3.bf16.msra.mxu0 %v4803_v20 }
 0x13c   :  { %4405 = vmatprep.subr.bf16.mxu0 %v4806_v23 }
 0x13d   :  { %4426 = vmatpush3.bf16.msra.mxu1 %v4805_v22 }
 0x13e   :  { %4427 = vmatprep.subr.bf16.mxu1 %v4808_v25 }
 0x13f   :  { %4406 = vmatpush3.bf16.msra.mxu0 %v4807_v24 }
 0x140   :  { %4440 = vmatprep.subr.bf16.mxu0 %v4819_v31 }
 0x141   :  { %4428 = vmatpush3.bf16.msra.mxu1 %v4811_v29 }
 0x142   :  { %3535 = vmatmul.mubr.bf16.vlgmr.msra.gmra.mrb[36].mxu0 %v3665_v27 }
 0x143   :  { %4441 = vmatpush3.bf16.msra.mxu0 %v4814_v34  ;;  %4448 = vmatprep.mubr.msk.bf16.mxu0 %vm4820_vm0, %v4819_v31 }
 0x144   :  { %3575 = vmatmul.mubr.bf16.vlgmr.msra.gmra.mrb[36].mxu1 %v3667_v32  ;;  %4442 = vmatprep.subr.bf16.mxu0 %v4819_v31 }
 0x147   :  { %4443 = vmatpush3.bf16.msra.mxu0 %v4815_v35 }
 0x148   :  { %4444 = vmatprep.subr.bf16.mxu0 %v4819_v31 }
 0x14b   :  { %4445 = vmatpush3.bf16.msra.mxu0 %v4816_v36 }
 0x14c   :  { %4446 = vmatprep.subr.bf16.mxu0 %v4819_v31 }
 0x14f   :  { %4447 = vmatpush3.bf16.msra.mxu0 %v4817_v37 }
 0x152   :  { %4449 = vmatmul.mubr.msk.bf16.vlgmr.msra.gmra.mrb[40].mxu0 %vm2778_vm1, %v4818_v38 }
 0x155   :  { %v4143_v39 = vpop.f32.mrb[12].mxu0 }
 0x156   :  { %v4144_v40 = vpop.f32.mrb[13].mxu0 }
 0x157   :  { %v4145_v41 = vadd.f32 %v4144_v40, %v4143_v39  ;;  %v4146_v42 = vpop.f32.mrb[14].mxu0  ;;  %v4165_v43 = vpop.f32.mrb[12].mxu1 }
 0x158   :  { %v4147_v44 = vpop.f32.mrb[15].mxu0  ;;  %v4166_v45 = vpop.f32.mrb[13].mxu1 }
 0x159   :  { %v3057_v46 = vadd.f32 %v4145_v41, %v3017_v18  ;;  %v4167_v47 = vadd.f32 %v4166_v45, %v4165_v43  ;;  %v4168_v48 = vpop.f32.mrb[14].mxu1 }
 0x15a   :  { %v4169_v49 = vpop.f32.mrb[15].mxu1 }
 0x15b   :  { %v3097_v50 = vadd.f32 %v4167_v47, %v3057_v46 }
 0x175   :  { %v4187_v51 = vpop.f32.mrb[16].mxu0 }
 0x176   :  { %v4188_v52 = vpop.f32.mrb[17].mxu0 }
 0x177   :  { %v4189_v53 = vadd.f32 %v4188_v52, %v4187_v51  ;;  %v4190_v54 = vpop.f32.mrb[18].mxu0  ;;  %v4209_v55 = vpop.f32.mrb[16].mxu1 }
 0x178   :  { %v4191_v56 = vpop.f32.mrb[19].mxu0  ;;  %v4210_v58 = vpop.f32.mrb[17].mxu1 }
 0x179   :  { %v3137_v57 = vadd.f32 %v4189_v53, %v3097_v50  ;;  %v4211_v59 = vadd.f32 %v4210_v58, %v4209_v55  ;;  %v4212_v60 = vpop.f32.mrb[18].mxu1 }
 0x17a   :  { %v4213_v61 = vpop.f32.mrb[19].mxu1 }
 0x17b   :  { %v3177_v62 = vadd.f32 %v4211_v59, %v3137_v57 }
 0x195   :  { %v4231_v63 = vpop.f32.mrb[20].mxu0 }
 0x196   :  { %v4232_v0 = vpop.f32.mrb[21].mxu0 }
 0x197   :  { %v4233_v1 = vadd.f32 %v4232_v0, %v4231_v63  ;;  %v4234_v2 = vpop.f32.mrb[22].mxu0  ;;  %v4253_v3 = vpop.f32.mrb[20].mxu1 }
 0x198   :  { %v4235_v4 = vpop.f32.mrb[23].mxu0  ;;  %v4254_v5 = vpop.f32.mrb[21].mxu1 }
 0x199   :  { %v3217_v6 = vadd.f32 %v4233_v1, %v3177_v62  ;;  %v4255_v7 = vadd.f32 %v4254_v5, %v4253_v3  ;;  %v4256_v8 = vpop.f32.mrb[22].mxu1 }
 0x19a   :  { %v4257_v9 = vpop.f32.mrb[23].mxu1 }
 0x19b   :  { %v3257_v10 = vadd.f32 %v4255_v7, %v3217_v6 }
 0x1b5   :  { %v4275_v11 = vpop.f32.mrb[24].mxu0 }
 0x1b6   :  { %v4276_v12 = vpop.f32.mrb[25].mxu0 }
 0x1b7   :  { %v4277_v13 = vadd.f32 %v4276_v12, %v4275_v11  ;;  %v4278_v14 = vpop.f32.mrb[26].mxu0  ;;  %v4297_v15 = vpop.f32.mrb[24].mxu1 }
 0x1b8   :  { %v4279_v16 = vpop.f32.mrb[27].mxu0  ;;  %v4298_v17 = vpop.f32.mrb[25].mxu1 }
 0x1b9   :  { %v3297_v18 = vadd.f32 %v4277_v13, %v3257_v10  ;;  %v4299_v19 = vadd.f32 %v4298_v17, %v4297_v15  ;;  %v4300_v20 = vpop.f32.mrb[26].mxu1 }
 0x1ba   :  { %v4301_v21 = vpop.f32.mrb[27].mxu1 }
 0x1bb   :  { %v3337_v22 = vadd.f32 %v4299_v19, %v3297_v18 }
 0x1d5   :  { %v4319_v23 = vpop.f32.mrb[28].mxu0 }
 0x1d6   :  { %v4320_v24 = vpop.f32.mrb[29].mxu0 }
 0x1d7   :  { %v4321_v25 = vadd.f32 %v4320_v24, %v4319_v23  ;;  %v4322_v26 = vpop.f32.mrb[30].mxu0  ;;  %v4341_v27 = vpop.f32.mrb[28].mxu1 }
 0x1d8   :  { %v4323_v28 = vpop.f32.mrb[31].mxu0  ;;  %v4342_v29 = vpop.f32.mrb[29].mxu1 }
 0x1d9   :  { %v3377_v30 = vadd.f32 %v4321_v25, %v3337_v22  ;;  %v4343_v31 = vadd.f32 %v4342_v29, %v4341_v27  ;;  %v4344_v32 = vpop.f32.mrb[30].mxu1 }
 0x1da   :  { %v4345_v33 = vpop.f32.mrb[31].mxu1 }
 0x1db   :  { %v3417_v34 = vadd.f32 %v4343_v31, %v3377_v30 }
 0x1f5   :  { %v4363_v35 = vpop.f32.mrb[32].mxu0 }
 0x1f6   :  { %v4364_v36 = vpop.f32.mrb[33].mxu0 }
 0x1f7   :  { %v4365_v37 = vadd.f32 %v4364_v36, %v4363_v35  ;;  %v4366_v38 = vpop.f32.mrb[34].mxu0  ;;  %v4385_v39 = vpop.f32.mrb[32].mxu1 }
 0x1f8   :  { %v4367_v40 = vpop.f32.mrb[35].mxu0  ;;  %v4386_v42 = vpop.f32.mrb[33].mxu1 }
 0x1f9   :  { %v3457_v41 = vadd.f32 %v4365_v37, %v3417_v34  ;;  %v4387_v43 = vadd.f32 %v4386_v42, %v4385_v39  ;;  %v4388_v44 = vpop.f32.mrb[34].mxu1 }
 0x1fa   :  { %v4389_v45 = vpop.f32.mrb[35].mxu1 }
 0x1fb   :  { %v3497_v46 = vadd.f32 %v4387_v43, %v3457_v41 }
 0x215   :  { %v4407_v47 = vpop.f32.mrb[36].mxu0 }
 0x216   :  { %v4408_v48 = vpop.f32.mrb[37].mxu0 }
 0x217   :  { %v4409_v49 = vadd.f32 %v4408_v48, %v4407_v47  ;;  %v4410_v50 = vpop.f32.mrb[38].mxu0  ;;  %v4429_v51 = vpop.f32.mrb[36].mxu1 }
 0x218   :  { %v4411_v52 = vpop.f32.mrb[39].mxu0  ;;  %v4430_v53 = vpop.f32.mrb[37].mxu1 }
 0x219   :  { %v3537_v54 = vadd.f32 %v4409_v49, %v3497_v46  ;;  %v4431_v55 = vadd.f32 %v4430_v53, %v4429_v51  ;;  %v4432_v56 = vpop.f32.mrb[38].mxu1 }
 0x21a   :  { %v4433_v57 = vpop.f32.mrb[39].mxu1 }
 0x21b   :  { %v3577_v58 = vadd.f32 %v4431_v55, %v3537_v54 }
 0x225   :  { %v3616_v59 = vpop.f32.mrb[40].mxu0 }
 0x226   :  { %v3617_v60 = vadd.f32 %v3616_v59, %v3577_v58  ;;  %v4450_v61 = vpop.f32.mrb[41].mxu0 }
 0x227   :  { %v3619_v62 = vpop.f32.mrb[42].mxu0 }
 0x228   :  { %v3622_v63 = vmax.f32 %v3617_v60, 0.0  ;;  %v4451_v0 = vpop.f32.mrb[43].mxu0 }
 0x22a   :  { %3623 = vst [vmem:[%s5891_s3] sm:$0xff] %v3622_v63 }

// kernel: critic_forward.9
= control target key start
LH: loop header
LB: loop body
LE: loop exit
PB: predicated region body
PF: predicated region fallthrough
CT: control target
= control target key end

     0   :  { %v373_v0 = vmov 0   ;;  %v374_v2 = vmov 2   ;;  %v375_v7 = vmov 0.0|0.0   ;;  %v376_v10 = vmov 1   ;;  %s491_s1 = inlined_call_operand.vmem [shape: f32[8,3], index: 1, kind: input, shape index: {}]   ;;  %s492_s5 = inlined_call_operand.vmem [shape: f32[64,32], index: 5, kind: input, shape index: {}]   ;;  %s493_s3 = inlined_call_operand.vmem [shape: f32[3,64], index: 3, kind: input, shape index: {}]   ;;  %s494_s4 = inlined_call_operand.vmem [shape: f32[1,64], index: 4, kind: input, shape index: {}]   ;;  %s495_s6 = inlined_call_operand.vmem [shape: f32[1,32], index: 6, kind: input, shape index: {}]   ;;  %s496_s2 = inlined_call_operand.vmem [shape: f32[2,8], index: 2, kind: input, shape index: {}]   ;;  %s497_s0 = inlined_call_operand.vmem [shape: f32[2,3,128], index: 0, kind: input, shape index: {}]   ;;  %s498_s7 = inlined_call_operand.vmem [shape: f32[1,128], index: 7, kind: input, shape index: {}]   ;;  %s499_s8 = inlined_call_operand.vmem [shape: f32[1,32], index: 8, kind: input, shape index: {}]   ;;  %s500_s9 = inlined_call_operand.<no memory space> [shape: f32[1,1], index: 9, kind: input, shape index: {}]   ;;  %s501_s10 = inlined_call_operand.vmem [shape: f32[2,1], index: 10, kind: output, shape index: {}]  }
   0x1   :  { %369 = vset.pattern.permute.xlu0 %v373_v0  ;;  %v57_v1 = vld [vmem:[%s491_s1] sm:$0xff]  ;;  %371 = vset.pattern.permute.xlu1 %v374_v2  ;;  %v99_v4 = vld [vmem:[%s492_s5 + $0x8] sm:$0xff]  ;;  %v100_v5 = vld [vmem:[%s492_s5 + $0x10] sm:$0xff]  ;;  %vm377_vm0 = vmmov 0   ;;  %v378_v17 = vmov 0.0   ;;  %v64_v18 = vlaneseq  ;;  %vm113_vm1 = vcmask 523264  }
   0x2   :  { %v98_v3 = vld [vmem:[%s492_s5] sm:$0xff]  ;;  %61 = vperm.xlu0 %369, %v57_v1   ;;  %80 = vperm.xlu1 %371, %v57_v1   ;;  %v101_v6 = vld [vmem:[%s492_s5 + $0x18] sm:$0xff]  ;;  %v103_v12 = vld [vmem:[%s492_s5 + $0x28] sm:$0xff]  ;;  %vm189_vm2 = vcmask 64512   ;;  %vm39_vm3 = vcmask 1042432   ;;  %vm275_vm4 = vcmask 1041409  }
   0x3   :  { %351 = vmatprep.subr.bf16.mxu0 %v375_v7  ;;  %v352_v8 = vpack.c.bf16 %v99_v4, %v98_v3  ;;  %v355_v9 = vpack.c.bf16 %v101_v6, %v100_v5  ;;  %v102_v11 = vld [vmem:[%s492_s5 + $0x20] sm:$0xff]  ;;  %v104_v14 = vld [vmem:[%s492_s5 + $0x30] sm:$0xff]  ;;  %v105_v15 = vld [vmem:[%s492_s5 + $0x38] sm:$0xff]  ;;  %343 = vmatprep.mubr.msk.f32.mxu0 %vm377_vm0, %v378_v17  ;;  %v65_v19 = vshrl.u32 %v64_v18, 7  ;;  %vm278_vm5 = vcmask 1041408  }
   0x4   :  { %v358_v13 = vpack.c.bf16 %v103_v12, %v102_v11  ;;  %v361_v16 = vpack.c.bf16 %v105_v15, %v104_v14  ;;  %346 = vmatprep.subr.mxu1 %v378_v17  ;;  %348 = vmatprep.mubr.msk.f32.mxu1 %vm377_vm0, %v378_v17  ;;  %v58_v23 = vld [vmem:[%s493_s3] sm:$0x7]  ;;  %v38_v44 = vld [vmem:[%s497_s0 + $0x4] sm:$0x7]  ;;  %vm290_vm6 = vcmask 254976   ;;  %vm303_vm7 = vcmask 1024  }
   0x5   :  { %353 = vmatpush3.bf16.msra.mxu0 %v352_v8  ;;  %v66_v20 = vsub.s32 0, %v65_v19  ;;  %v75_v21 = vsub.s32 1, %v65_v19  ;;  %v85_v22 = vsub.s32 2, %v65_v19  ;;  %v309_v34 = vld [vmem:[%s494_s4] ss:$0 sm:$0xff]  ;;  %v47_v45 = vsel %vm39_vm3, %v38_v44, 0.0 }
   0x6   :  { %370 = vset.pattern.permute.xlu0 %v376_v10  ;;  %354 = vmatprep.subr.bf16.mxu0 %v375_v7  ;;  %v310_v38 = vld [vmem:[%s495_s6] ss:$0 sm:$0xff]  ;;  %v48_v47 = vrot.slane %v47_v45, 4 }
   0x7   :  { %70 = vperm.xlu0 %370, %v57_v1   ;;  %v67_v25 = vrot.slane %v58_v23, %v66_v20  ;;  %v76_v26 = vrot.slane %v58_v23, %v75_v21  ;;  %v86_v27 = vrot.slane %v58_v23, %v85_v22  ;;  %v188_v43 = vld [vmem:[%s496_s2] sm:$0x3] }
   0x8   :  { %v37_v46 = vld [vmem:[%s497_s0] sm:$0x7]  ;;  %v49_v50 = vadd.f32 %v48_v47, %v47_v45 }
   0x9   :  { %356 = vmatpush3.bf16.msra.mxu0 %v355_v9  ;;  %v40_v48 = vsel %vm39_vm3, %v37_v46, 0.0  ;;  %v313_v61 = vld [vmem:[%s498_s7] ss:$0 sm:$0xff]  ;;  %v15_v9 = vstv %s500_s9 }
   0xa   :  { %357 = vmatprep.subr.bf16.mxu0 %v375_v7  ;;  %v41_v49 = vrot.slane %v40_v48, 4  ;;  %v50_v52 = vrot.slane %v49_v50, 2  ;;  %v314_v4 = vld [vmem:[%s499_s8] ss:$0 sm:$0xff]  ;;  %16 = vst [vmem:[#allocation2] sm:$0x1] %v15_v9 }
   0xb   :  { %372 = vset.pattern.permute.xlu0 %v374_v2 }
   0xc   :  { %v42_v51 = vadd.f32 %v41_v49, %v40_v48  ;;  %v51_v54 = vadd.f32 %v50_v52, %v49_v50 }
   0xd   :  { %359 = vmatpush3.bf16.msra.mxu0 %v358_v13 }
   0xe   :  { %360 = vmatprep.subr.bf16.mxu0 %v375_v7  ;;  %v43_v53 = vrot.slane %v42_v51, 2  ;;  %v52_v56 = vrot.slane %v51_v54, 1 }
  0x10   :  { %v44_v55 = vadd.f32 %v43_v53, %v42_v51  ;;  %v53_v58 = vadd.f32 %v52_v56, %v51_v54 }
  0x11   :  { %362 = vmatpush3.bf16.msra.mxu0 %v361_v16  ;;  %v315_v12 = vld [vmem:[#allocation2] ss:$0 sm:$0xff] }
  0x12   :  { %v45_v57 = vrot.slane %v44_v55, 1  ;;  %v56_v60 = vmul.f32 0.33333334, %v53_v58 }
  0x14   :  { %v46_v59 = vadd.f32 %v45_v57, %v44_v55  ;;  %v271_v63 = vmul.f32 %v313_v61, %v56_v60 }
  0x16   :  { %v55_v62 = vmul.f32 0.33333334, %v46_v59  ;;  %v274_v1 = vrot.slane %v271_v63, 7 }
  0x18   :  { %v270_v0 = vmul.f32 %v313_v61, %v55_v62 }
  0x1a   :  { %v276_v2 = vsel %vm275_vm4, %v274_v1, %v270_v0 }
  0x1b   :  { %v279_v3 = vsel %vm278_vm5, %v276_v2, 0.0 }
  0x26   :  { %280 = vadd.xlane.f32.xlu1 %v279_v3 }
  0x81   :  { %v62_v24 = vpop.permute.xlu0 %61  ;;  %v81_v28 = vpop.permute.xlu1 %80 }
  0x82   :  { %v68_v30 = vmul.f32 %v67_v25, %v62_v24  ;;  %v87_v32 = vmul.f32 %v86_v27, %v81_v28 }
  0x86   :  { %v71_v29 = vpop.permute.xlu0 %70 }
  0x87   :  { %v77_v31 = vmul.f32 %v76_v26, %v71_v29 }
  0x89   :  { %v78_v33 = vadd.f32 %v77_v31, %v68_v30 }
  0x8b   :  { %v88_v35 = vadd.f32 %v87_v32, %v78_v33 }
  0x8d   :  { %v96_v36 = vadd.f32 %v309_v34, %v88_v35 }
  0x8f   :  { %v97_v37 = vmax.f32 %v96_v36, 0.0 }
  0x91   :  { %344 = vmatmul.mubr.msk.f32.vlgmr.msra.gmra.mrb[0].mxu0 %vm113_vm1, %v97_v37 }
  0xb3   :  { %v281_v10 = vpop.xlane.xlu1 %280 }
 0x164   :  { %v183_v39 = vpop.f32.mrb[0].mxu0 }
 0x165   :  { %v184_v40 = vadd.f32 %v310_v38, %v183_v39  ;;  %v345_v41 = vpop.f32.mrb[1].mxu0 }
 0x167   :  { %v187_v42 = vmax.f32 %v184_v40, 0.0 }
 0x169   :  { %347 = vmatpush3.msra.mxu1 %v187_v42 }
 0x16a   :  { %349 = vmatmul.mubr.msk.f32.vlgmr.msra.gmra.mrb[0].mxu1 %vm189_vm2, %v188_v43 }
 0x23d   :  { %v259_v5 = vpop.f32.mrb[0].mxu1 }
 0x23e   :  { %v289_v6 = vmul.f32 %v314_v4, %v259_v5  ;;  %v350_v7 = vpop.f32.mrb[1].mxu1 }
 0x240   :  { %v291_v8 = vsel %vm290_vm6, %v289_v6, 0.0 }
 0x241   :  { %292 = vadd.xlane.f32.xlu0 %v291_v8 }
 0x2ce   :  { %v293_v11 = vpop.xlane.xlu0 %292 }
 0x2cf   :  { %v294_v13 = vadd.f32 %v293_v11, %v281_v10 }
 0x2d1   :  { %v302_v14 = vadd.f32 %v315_v12, %v294_v13 }
 0x2d3   :  { %304 = vst.msk [vmem:[%s501_s10] sm:$0x3] %vm303_vm7, %v302_v14 }

</bundles_post_ra>
